<compile_context>
chip_gen: v5e
topology: v5e:2x2
jax: 0.10.0
libtpu: 0.0.40
codegen_flags: <defaults>
</compile_context>

<pallas_src>
import math

import jax
import jax.numpy as jnp
from jax.experimental import pallas as pl
from jax.experimental.pallas import tpu as pltpu


_OUT_PAD = 128  # lane-aligned padded output width (true output width is 3)


def _round_up(n, m):
    return ((n + m - 1) // m) * m


# ----------------------------------------------------------------------------
# Pallas kernel: full fused MLP forward for one batch tile.
#   x_ref           : (TB, 64)   f32
#   wN_ref          : bf16 weights, (in, out)
#   bN_ref          : f32 biases,  (1, out)
#   w45_ref/b45_ref : folded layers 4+5, zero-padded to _OUT_PAD columns
#   o_ref           : (TB, _OUT_PAD) f32
# ----------------------------------------------------------------------------
def _mlp_kernel(x_ref,
                w1_ref, b1_ref,
                w2_ref, b2_ref,
                w3_ref, b3_ref,
                w45_ref, b45_ref,
                o_ref):
    h = x_ref[...].astype(jnp.bfloat16)                                # (TB, 64)

    h = jnp.dot(h, w1_ref[...], preferred_element_type=jnp.float32)   # (TB,128)
    h = jnp.maximum(h + b1_ref[...], 0.0).astype(jnp.bfloat16)        # ReLU

    h = jnp.dot(h, w2_ref[...], preferred_element_type=jnp.float32)   # (TB,256)
    h = jnp.maximum(h + b2_ref[...], 0.0).astype(jnp.bfloat16)        # ReLU

    h = jnp.dot(h, w3_ref[...], preferred_element_type=jnp.float32)   # (TB,512)
    h = jnp.maximum(h + b3_ref[...], 0.0).astype(jnp.bfloat16)        # ReLU

    # Folded layers 4+5 (no activation between them in the original module).
    h = jnp.dot(h, w45_ref[...], preferred_element_type=jnp.float32)  # (TB,128)
    h = h + b45_ref[...]

    o_ref[...] = jax.nn.sigmoid(h).astype(o_ref.dtype)                 # Sigmoid


# ----------------------------------------------------------------------------
# Wrapper: folds layers 4+5, pads batch/output, builds BlockSpecs, calls
# pallas_call.
# ----------------------------------------------------------------------------
def wavelet_seis_forward(x, params, *, tile_b=512):
    """x: (B, 64) float32.  params: list of 5 (W_in_out f32, b_1_out f32)."""
    B, D_in = x.shape
    assert D_in == 64

    (w1, b1), (w2, b2), (w3, b3), (w4, b4), (w5, b5) = params
    out_dim = w5.shape[1]  # 3

    # ---- Fold layers 4 and 5 (pure affine composition) and lane-pad to 128.
    w45 = w4 @ w5                      # (512, 3)
    b45 = b4 @ w5 + b5                 # (1, 3)
    w45p = jnp.zeros((w4.shape[0], _OUT_PAD), jnp.float32).at[:, :out_dim].set(w45)
    b45p = jnp.zeros((1, _OUT_PAD), jnp.float32).at[:, :out_dim].set(b45)

    # ---- bf16 weights (f32 accumulation in kernel); biases stay f32.
    w1b, w2b, w3b, w45b = (w.astype(jnp.bfloat16) for w in (w1, w2, w3, w45p))

    # ---- Pick the batch tile: large for MXU utilization, but keep >=2
    #      parallel grid steps when the batch allows (v7x has 2 TensorCores).
    tile = min(max(tile_b, 8), 1024)
    if B > 8:
        tile = min(tile, _round_up(pl.cdiv(B, 2), 8))
    tile = max(8, _round_up(tile, 8))

    # ---- Pad the batch to a multiple of the tile instead of asserting.
    B_pad = _round_up(B, tile)
    x_p = jnp.pad(x, ((0, B_pad - B), (0, 0))) if B_pad != B else x

    grid = (B_pad // tile,)

    x_spec = pl.BlockSpec((tile, D_in), lambda i: (i, 0))
    o_spec = pl.BlockSpec((tile, _OUT_PAD), lambda i: (i, 0))

    def whole(arr):
        return pl.BlockSpec(arr.shape, lambda i: (0, 0))

    in_specs = [x_spec,
                whole(w1b), whole(b1),
                whole(w2b), whole(b2),
                whole(w3b), whole(b3),
                whole(w45b), whole(b45p)]

    out_pad = pl.pallas_call(
        _mlp_kernel,
        out_shape=jax.ShapeDtypeStruct((B_pad, _OUT_PAD), jnp.float32),
        grid=grid,
        in_specs=in_specs,
        out_specs=o_spec,
        compiler_params=pltpu.CompilerParams(
            dimension_semantics=("parallel",),
            vmem_limit_bytes=32 * 1024 * 1024,
        ),
    )(x_p, w1b, b1, w2b, b2, w3b, b3, w45b, b45p)

    return out_pad[:B, :out_dim]


# ----------------------------------------------------------------------------
# Deterministic parameter init (matches PyTorch nn.Linear default:
# U(-1/sqrt(fan_in), 1/sqrt(fan_in)) for both weight and bias).
# Weights are stored as (in_features, out_features).
# ----------------------------------------------------------------------------
def init_params(key):
    dims = [(64, 128), (128, 256), (256, 512), (512, 64), (64, 3)]
    params = []
    for (fan_in, fan_out) in dims:
        key, kw, kb = jax.random.split(key, 3)
        bound = 1.0 / math.sqrt(fan_in)
        w = jax.random.uniform(kw, (fan_in, fan_out), jnp.float32,
                               minval=-bound, maxval=bound)
        b = jax.random.uniform(kb, (1, fan_out), jnp.float32,
                               minval=-bound, maxval=bound)
        params.append((w, b))
    return params


# Pure-JAX f32 reference (unfolded) for sanity checking.
def reference_forward(x, params):
    h = x
    for i, (w, b) in enumerate(params):
        h = h @ w + b
        if i < 3:                      # ReLU after the first three layers only
            h = jnp.maximum(h, 0.0)
    return jax.nn.sigmoid(h)


if __name__ == "__main__":
    key = jax.random.PRNGKey(0)
    kx, kp = jax.random.split(key)

    B = 8                                             # small batch example
    x = jax.random.normal(kx, (B, 64), jnp.float32)   # module input: (B, 64)
    params = init_params(kp)

    out = wavelet_seis_forward(x, params)
    out = jax.block_until_ready(out)

    ref = reference_forward(x, params)
    assert out.shape == (B, 3)
    # bf16 matmul inputs (f32 accumulation) -> loosened tolerance vs f32 ref.
    assert jnp.allclose(out, ref, atol=2e-2, rtol=2e-2), (
        float(jnp.max(jnp.abs(out - ref))))

    print("KERNEL_OK")
</pallas_src>

<mosaic_0001>
module attributes {stable_mosaic.version = 11 : i64} {
  func.func @_mlp_kernel(%arg0: i32, %arg1: memref<512x64xf32, #tpu.memory_space<vmem>>, %arg2: memref<64x128xbf16, #tpu.memory_space<vmem>>, %arg3: memref<1x128xf32, #tpu.memory_space<vmem>>, %arg4: memref<128x256xbf16, #tpu.memory_space<vmem>>, %arg5: memref<1x256xf32, #tpu.memory_space<vmem>>, %arg6: memref<256x512xbf16, #tpu.memory_space<vmem>>, %arg7: memref<1x512xf32, #tpu.memory_space<vmem>>, %arg8: memref<512x128xbf16, #tpu.memory_space<vmem>>, %arg9: memref<1x128xf32, #tpu.memory_space<vmem>>, %arg10: memref<512x128xf32, #tpu.memory_space<vmem>>) attributes {dimension_semantics = [#tpu.dimension_semantics<parallel>], iteration_bounds = array<i64: 1>, scalar_prefetch = 0 : i64, scratch_operands = 0 : i64, tpu.core_type = #tpu.core_type<tc>, window_params = [{transform_indices = @transform_0, window_bounds = array<i64: 512, 64>}, {pipeline_mode = #tpu.pipeline_mode<synchronous>, transform_indices = @transform_1, window_bounds = array<i64: 64, 128>}, {pipeline_mode = #tpu.pipeline_mode<synchronous>, transform_indices = @transform_2, window_bounds = array<i64: 1, 128>}, {pipeline_mode = #tpu.pipeline_mode<synchronous>, transform_indices = @transform_3, window_bounds = array<i64: 128, 256>}, {pipeline_mode = #tpu.pipeline_mode<synchronous>, transform_indices = @transform_4, window_bounds = array<i64: 1, 256>}, {pipeline_mode = #tpu.pipeline_mode<synchronous>, transform_indices = @transform_5, window_bounds = array<i64: 256, 512>}, {pipeline_mode = #tpu.pipeline_mode<synchronous>, transform_indices = @transform_6, window_bounds = array<i64: 1, 512>}, {pipeline_mode = #tpu.pipeline_mode<synchronous>, transform_indices = @transform_7, window_bounds = array<i64: 512, 128>}, {pipeline_mode = #tpu.pipeline_mode<synchronous>, transform_indices = @transform_8, window_bounds = array<i64: 1, 128>}, {transform_indices = @transform_9, window_bounds = array<i64: 512, 128>}]} {
    %c0 = arith.constant 0 : index
    %c0_0 = arith.constant 0 : index
    %0 = vector.load %arg1[%c0, %c0_0] : memref<512x64xf32, #tpu.memory_space<vmem>>, vector<512x64xf32>
    %1 = arith.truncf %0 : vector<512x64xf32> to vector<512x64xbf16>
    %c0_1 = arith.constant 0 : index
    %c0_2 = arith.constant 0 : index
    %2 = vector.load %arg2[%c0_1, %c0_2] : memref<64x128xbf16, #tpu.memory_space<vmem>>, vector<64x128xbf16>
    %cst = arith.constant dense<0.000000e+00> : vector<512x128xf32>
    %3 = tpu.matmul %1, %2, %cst {dimension_numbers = #tpu.dot_dimension_numbers<[1], [0], [0], [1], [0, 0, 1, 1], [], []>} : vector<512x64xbf16>, vector<64x128xbf16>, vector<512x128xf32> -> vector<512x128xf32>
    %c0_3 = arith.constant 0 : index
    %c0_4 = arith.constant 0 : index
    %4 = vector.load %arg3[%c0_3, %c0_4] : memref<1x128xf32, #tpu.memory_space<vmem>>, vector<1x128xf32>
    %5 = vector.broadcast %4 : vector<1x128xf32> to vector<512x128xf32>
    %6 = arith.addf %3, %5 : vector<512x128xf32>
    %cst_5 = arith.constant 0.000000e+00 : f32
    %7 = vector.broadcast %cst_5 : f32 to vector<512x128xf32>
    %8 = arith.maximumf %6, %7 : vector<512x128xf32>
    %9 = arith.truncf %8 : vector<512x128xf32> to vector<512x128xbf16>
    %c0_6 = arith.constant 0 : index
    %c0_7 = arith.constant 0 : index
    %10 = vector.load %arg4[%c0_6, %c0_7] : memref<128x256xbf16, #tpu.memory_space<vmem>>, vector<128x256xbf16>
    %cst_8 = arith.constant dense<0.000000e+00> : vector<512x256xf32>
    %11 = tpu.matmul %9, %10, %cst_8 {dimension_numbers = #tpu.dot_dimension_numbers<[1], [0], [0], [1], [0, 0, 1, 1], [], []>} : vector<512x128xbf16>, vector<128x256xbf16>, vector<512x256xf32> -> vector<512x256xf32>
    %c0_9 = arith.constant 0 : index
    %c0_10 = arith.constant 0 : index
    %12 = vector.load %arg5[%c0_9, %c0_10] : memref<1x256xf32, #tpu.memory_space<vmem>>, vector<1x256xf32>
    %13 = vector.broadcast %12 : vector<1x256xf32> to vector<512x256xf32>
    %14 = arith.addf %11, %13 : vector<512x256xf32>
    %cst_11 = arith.constant 0.000000e+00 : f32
    %15 = vector.broadcast %cst_11 : f32 to vector<512x256xf32>
    %16 = arith.maximumf %14, %15 : vector<512x256xf32>
    %17 = arith.truncf %16 : vector<512x256xf32> to vector<512x256xbf16>
    %c0_12 = arith.constant 0 : index
    %c0_13 = arith.constant 0 : index
    %18 = vector.load %arg6[%c0_12, %c0_13] : memref<256x512xbf16, #tpu.memory_space<vmem>>, vector<256x512xbf16>
    %cst_14 = arith.constant dense<0.000000e+00> : vector<512x512xf32>
    %19 = tpu.matmul %17, %18, %cst_14 {dimension_numbers = #tpu.dot_dimension_numbers<[1], [0], [0], [1], [0, 0, 1, 1], [], []>} : vector<512x256xbf16>, vector<256x512xbf16>, vector<512x512xf32> -> vector<512x512xf32>
    %c0_15 = arith.constant 0 : index
    %c0_16 = arith.constant 0 : index
    %20 = vector.load %arg7[%c0_15, %c0_16] : memref<1x512xf32, #tpu.memory_space<vmem>>, vector<1x512xf32>
    %21 = vector.broadcast %20 : vector<1x512xf32> to vector<512x512xf32>
    %22 = arith.addf %19, %21 : vector<512x512xf32>
    %cst_17 = arith.constant 0.000000e+00 : f32
    %23 = vector.broadcast %cst_17 : f32 to vector<512x512xf32>
    %24 = arith.maximumf %22, %23 : vector<512x512xf32>
    %25 = arith.truncf %24 : vector<512x512xf32> to vector<512x512xbf16>
    %c0_18 = arith.constant 0 : index
    %c0_19 = arith.constant 0 : index
    %26 = vector.load %arg8[%c0_18, %c0_19] : memref<512x128xbf16, #tpu.memory_space<vmem>>, vector<512x128xbf16>
    %cst_20 = arith.constant dense<0.000000e+00> : vector<512x128xf32>
    %27 = tpu.matmul %25, %26, %cst_20 {dimension_numbers = #tpu.dot_dimension_numbers<[1], [0], [0], [1], [0, 0, 1, 1], [], []>} : vector<512x512xbf16>, vector<512x128xbf16>, vector<512x128xf32> -> vector<512x128xf32>
    %c0_21 = arith.constant 0 : index
    %c0_22 = arith.constant 0 : index
    %28 = vector.load %arg9[%c0_21, %c0_22] : memref<1x128xf32, #tpu.memory_space<vmem>>, vector<1x128xf32>
    %29 = vector.broadcast %28 : vector<1x128xf32> to vector<512x128xf32>
    %30 = arith.addf %27, %29 : vector<512x128xf32>
    %31 = arith.negf %30 : vector<512x128xf32>
    %32 = math.exp %31 : vector<512x128xf32>
    %cst_23 = arith.constant 1.000000e+00 : f32
    %33 = vector.broadcast %cst_23 : f32 to vector<512x128xf32>
    %34 = arith.addf %33, %32 : vector<512x128xf32>
    %35 = arith.divf %33, %34 : vector<512x128xf32>
    %c0_24 = arith.constant 0 : index
    %c0_25 = arith.constant 0 : index
    %36 = vector.load %arg10[%c0_24, %c0_25] : memref<512x128xf32, #tpu.memory_space<vmem>>, vector<512x128xf32>
    tpu.vector_store %arg10[%c0_24, %c0_25], %35 {strides = array<i32>} : memref<512x128xf32, #tpu.memory_space<vmem>>, vector<512x128xf32>,
    return
  }
  func.func @transform_0(%arg0: i32) -> (i32, i32) {
    %c0_i32 = arith.constant 0 : i32
    %c0_i32_0 = arith.constant 0 : i32
    return %arg0, %c0_i32 : i32, i32
  }
  func.func @transform_1(%arg0: i32) -> (i32, i32) {
    %c0_i32 = arith.constant 0 : i32
    %c0_i32_0 = arith.constant 0 : i32
    %c0_i32_1 = arith.constant 0 : i32
    return %c0_i32, %c0_i32_0 : i32, i32
  }
  func.func @transform_2(%arg0: i32) -> (i32, i32) {
    %c0_i32 = arith.constant 0 : i32
    %c0_i32_0 = arith.constant 0 : i32
    %c0_i32_1 = arith.constant 0 : i32
    return %c0_i32, %c0_i32_0 : i32, i32
  }
  func.func @transform_3(%arg0: i32) -> (i32, i32) {
    %c0_i32 = arith.constant 0 : i32
    %c0_i32_0 = arith.constant 0 : i32
    %c0_i32_1 = arith.constant 0 : i32
    return %c0_i32, %c0_i32_0 : i32, i32
  }
  func.func @transform_4(%arg0: i32) -> (i32, i32) {
    %c0_i32 = arith.constant 0 : i32
    %c0_i32_0 = arith.constant 0 : i32
    %c0_i32_1 = arith.constant 0 : i32
    return %c0_i32, %c0_i32_0 : i32, i32
  }
  func.func @transform_5(%arg0: i32) -> (i32, i32) {
    %c0_i32 = arith.constant 0 : i32
    %c0_i32_0 = arith.constant 0 : i32
    %c0_i32_1 = arith.constant 0 : i32
    return %c0_i32, %c0_i32_0 : i32, i32
  }
  func.func @transform_6(%arg0: i32) -> (i32, i32) {
    %c0_i32 = arith.constant 0 : i32
    %c0_i32_0 = arith.constant 0 : i32
    %c0_i32_1 = arith.constant 0 : i32
    return %c0_i32, %c0_i32_0 : i32, i32
  }
  func.func @transform_7(%arg0: i32) -> (i32, i32) {
    %c0_i32 = arith.constant 0 : i32
    %c0_i32_0 = arith.constant 0 : i32
    %c0_i32_1 = arith.constant 0 : i32
    return %c0_i32, %c0_i32_0 : i32, i32
  }
  func.func @transform_8(%arg0: i32) -> (i32, i32) {
    %c0_i32 = arith.constant 0 : i32
    %c0_i32_0 = arith.constant 0 : i32
    %c0_i32_1 = arith.constant 0 : i32
    return %c0_i32, %c0_i32_0 : i32, i32
  }
  func.func @transform_9(%arg0: i32) -> (i32, i32) {
    %c0_i32 = arith.constant 0 : i32
    %c0_i32_0 = arith.constant 0 : i32
    return %arg0, %c0_i32 : i32, i32
  }
}

</mosaic_0001>

<bundles_post_ra>
// kernel: tpu_custom_call.1
= control target key start
LH: loop header
LB: loop body
LE: loop exit
PB: predicated region body
PF: predicated region fallthrough
CT: control target
= control target key end

     0   :  { %14 = vsyncpa [#allocation3], 0  ;;  %s9938_s0 = inlined_call_operand.vmem [shape: f32[512,64], index: 0, kind: input, shape index: {}]   ;;  %s9939_s1 = inlined_call_operand.hbm [shape: bf16[64,128], index: 1, kind: input, shape index: {}]   ;;  %s9940_s2 = inlined_call_operand.hbm [shape: f32[1,128], index: 2, kind: input, shape index: {}]   ;;  %s9941_s3 = inlined_call_operand.hbm [shape: bf16[128,256], index: 3, kind: input, shape index: {}]   ;;  %s9942_s4 = inlined_call_operand.hbm [shape: f32[1,256], index: 4, kind: input, shape index: {}]   ;;  %s9943_s5 = inlined_call_operand.vmem [shape: bf16[256,512], index: 5, kind: input, shape index: {}]   ;;  %s9944_s6 = inlined_call_operand.vmem [shape: f32[1,512], index: 6, kind: input, shape index: {}]   ;;  %s9945_s7 = inlined_call_operand.vmem [shape: bf16[512,128], index: 7, kind: input, shape index: {}]   ;;  %s9946_s8 = inlined_call_operand.hbm [shape: f32[1,128], index: 8, kind: input, shape index: {}]   ;;  %s9947_s9 = inlined_call_operand.hbm [shape: f32[512,128], index: 9, kind: output, shape index: {}]  }
   0x1   :  { %15 = vsyncpa [#allocation6], 0 }
   0x2   :  { %16 = vsyncpa [#allocation9], 0  ;;  %s38_s11 = sshll.u32 %s9940_s2, 4  ;;  %s39_s11 = int_to_ptr.hbm [resolvable:$true] %s38_s11 }
   0x3   :  { %17 = vsyncpa [#allocation4], 0  ;;  %s6721_s12 = smov [#allocation5]   ;;  %s62_s16 = sshll.u32 %s9942_s4, 4  ;;  %s63_s16 = int_to_ptr.hbm [resolvable:$true] %s62_s16 }
   0x4   :  { %s40_s13 = sshll.u32 %s6721_s12, 4  ;;  %s6722_s17 = smov [#allocation8]   ;;  %s41_s13 = int_to_ptr.vmem [resolvable:$true] %s40_s13 }
   0x5   :  { %43 = dma.hbm_to_vmem [thread:$0]  %s39_s11, 16, %s41_s13, [#allocation6]  }
   0x6   :  { %s64_s18 = sshll.u32 %s6722_s17, 4  ;;  %s24_s21 = sshll.u32 %s9939_s1, 4  ;;  %s65_s18 = int_to_ptr.vmem [resolvable:$true] %s64_s18  ;;  %s25_s21 = int_to_ptr.hbm [resolvable:$true] %s24_s21 }
   0x7   :  { %67 = dma.hbm_to_vmem [thread:$0]  %s63_s16, 32, %s65_s18, [#allocation9]  }
   0x8   :  { %s6723_s2 = smov [#allocation2]   ;;  %s48_s25 = sshll.u32 %s9941_s3, 4  ;;  %s49_s25 = int_to_ptr.hbm [resolvable:$true] %s48_s25 }
   0x9   :  { %s26_s22 = sshll.u32 %s6723_s2, 4  ;;  %s6724_s26 = smov 64   ;;  %s27_s22 = int_to_ptr.vmem [resolvable:$true] %s26_s22 }
   0xa   :  { %s6725_s4 = smov 4   ;;  %s6726_s27 = smov [#allocation7]  }
   0xb   :  { %32 = dma.hbm_to_vmem [thread:$0]  %s25_s21, 512, %s27_s22, [#allocation3], %s6724_s26, %s6724_s26, %s6725_s4  }
   0xc   :  { %s50_s28 = sshll.u32 %s6726_s27, 4  ;;  %s6727_s29 = smov 128   ;;  %s51_s28 = int_to_ptr.vmem [resolvable:$true] %s50_s28 }
   0xd   :  { %s6728_s30 = smov 8   ;;  %s79_s11 = sshll.u32 %s9946_s8, 4  ;;  %s80_s11 = int_to_ptr.hbm [resolvable:$true] %s79_s11 }
   0xe   :  { %56 = dma.hbm_to_vmem [thread:$0]  %s49_s25, 2048, %s51_s28, [#allocation6], %s6727_s29, %s6727_s29, %s6728_s30  }
   0xf   :  { %s6729_s12 = smov [#allocation10]  }
  0x10   :  { %s81_s3 = sshll.u32 %s6729_s12, 4  ;;  %s82_s3 = int_to_ptr.vmem [resolvable:$true] %s81_s3 }
  0x11   :  { %84 = dma.hbm_to_vmem [thread:$0]  %s80_s11, 16, %s82_s3, [#allocation9]  }
  0x12   :  { %6713 = dma.done.wait [#allocation3], 512  }
  0x13   :  { %6714 = vsyncadd [#allocation3], 4294966784 }
  0x14   :  { %6715 = dma.done.wait [#allocation6], 2064  }
  0x15   :  { %6716 = vsyncadd [#allocation6], 4294965232 }
  0x16   :  { %6717 = dma.done.wait [#allocation9], 48  }
  0x17   :  { %6718 = vsyncadd [#allocation9], 4294967248  ;;  %v6162_v0 = vld [vmem:[#allocation2 + $0x18] sm:$0xff]  ;;  %v6161_v1 = vld [vmem:[#allocation2 + $0x10] sm:$0xff]  ;;  %vm238_vm0 = vcmask 523264   ;;  %s5584_s20 = sshll.u32 %s9947_s9, 4  ;;  %s5585_s20 = int_to_ptr.hbm [resolvable:$true] %s5584_s20 }
  0x18   :  { %339 = vmatpush.bf16.msra.mxu0 %v6162_v0  ;;  %6275 = vmatpush.bf16.msra.mxu3 %v6162_v0  ;;  %v6160_v2 = vld [vmem:[#allocation2 + $0x8] sm:$0xff]  ;;  %v6159_v3 = vld [vmem:[#allocation2] sm:$0xff]  ;;  %v108_v7 = vld [vmem:[%s9938_s0 + $0x10] sm:$0xff] }
  0x19   :  { %v106_v4 = vld [vmem:[%s9938_s0] sm:$0xff]  ;;  %v107_v5 = vld [vmem:[%s9938_s0 + $0x8] sm:$0xff]  ;;  %v109_v8 = vld [vmem:[%s9938_s0 + $0x18] sm:$0xff] }
  0x1a   :  { %v170_v6 = vpack.c.bf16 %v107_v5, %v106_v4  ;;  %v171_v9 = vpack.c.bf16 %v109_v8, %v108_v7  ;;  %v110_v10 = vld [vmem:[%s9938_s0 + $0x20] sm:$0xff]  ;;  %v111_v11 = vld [vmem:[%s9938_s0 + $0x28] sm:$0xff]  ;;  %v112_v13 = vld [vmem:[%s9938_s0 + $0x30] sm:$0xff] }
  0x1b   :  { %v172_v12 = vpack.c.bf16 %v111_v11, %v110_v10  ;;  %v113_v14 = vld [vmem:[%s9938_s0 + $0x38] sm:$0xff]  ;;  %v114_v16 = vld [vmem:[%s9938_s0 + $0x40] sm:$0xff]  ;;  %v115_v17 = vld [vmem:[%s9938_s0 + $0x48] sm:$0xff] }
  0x1c   :  { %340 = vmatpush.bf16.msra.mxu0 %v6161_v1  ;;  %6276 = vmatpush.bf16.msra.mxu3 %v6161_v1  ;;  %v173_v15 = vpack.c.bf16 %v113_v14, %v112_v13  ;;  %v174_v18 = vpack.c.bf16 %v115_v17, %v114_v16  ;;  %v5705_v19 = vld [vmem:[#allocation7 + $0x70] sm:$0xf]  ;;  %v6178_v20 = vld [vmem:[#allocation7 + $0x74] sm:$0xf0]  ;;  %v6177_v21 = vld [vmem:[#allocation7 + $0x74] sm:$0xf] }
  0x1d   :  { %v5706_v22 = vor.u32 %v6178_v20, %v5705_v19  ;;  %v5707_v23 = vld [vmem:[#allocation7 + $0x78] sm:$0xf0]  ;;  %v116_v25 = vld [vmem:[%s9938_s0 + $0x50] sm:$0xff]  ;;  %v5697_v28 = vld [vmem:[#allocation7 + $0x60] sm:$0xf] }
  0x1e   :  { %v6834_v24 = vor.u32 %v6177_v21, %v5707_v23  ;;  %v117_v26 = vld [vmem:[%s9938_s0 + $0x58] sm:$0xff]  ;;  %v6176_v29 = vld [vmem:[#allocation7 + $0x64] sm:$0xf0]  ;;  %v6175_v30 = vld [vmem:[#allocation7 + $0x64] sm:$0xf] }
  0x1f   :  { %702 = vmatpush.bf16.msra.mxu1 %v5706_v22  ;;  %v175_v27 = vpack.c.bf16 %v117_v26, %v116_v25  ;;  %v5698_v31 = vor.u32 %v6176_v29, %v5697_v28  ;;  %v5699_v32 = vld [vmem:[#allocation7 + $0x68] sm:$0xf0]  ;;  %v5689_v34 = vld [vmem:[#allocation7 + $0x50] sm:$0xf]  ;;  %v6174_v35 = vld [vmem:[#allocation7 + $0x54] sm:$0xf0] }
  0x20   :  { %341 = vmatpush.bf16.msra.mxu0 %v6160_v2  ;;  %6277 = vmatpush.bf16.msra.mxu3 %v6160_v2  ;;  %v6844_v33 = vor.u32 %v6175_v30, %v5699_v32  ;;  %v6173_v36 = vld [vmem:[#allocation7 + $0x54] sm:$0xf]  ;;  %v5690_v37 = vor.u32 %v6174_v35, %v5689_v34  ;;  %v5691_v38 = vld [vmem:[#allocation7 + $0x58] sm:$0xf0]  ;;  %v5681_v40 = vld [vmem:[#allocation7 + $0x40] sm:$0xf] }
  0x21   :  { %871 = vmatpush.bf16.msra.mxu2 %v6834_v24  ;;  %v6847_v39 = vor.u32 %v6173_v36, %v5691_v38  ;;  %v6172_v41 = vld [vmem:[#allocation7 + $0x44] sm:$0xf0]  ;;  %v6171_v42 = vld [vmem:[#allocation7 + $0x44] sm:$0xf]  ;;  %v5683_v43 = vld [vmem:[#allocation7 + $0x48] sm:$0xf0] }
  0x22   :  { %v5682_v44 = vor.u32 %v6172_v41, %v5681_v40  ;;  %v6850_v45 = vor.u32 %v6171_v42, %v5683_v43  ;;  %v118_v46 = vld [vmem:[%s9938_s0 + $0x60] sm:$0xff]  ;;  %v119_v47 = vld [vmem:[%s9938_s0 + $0x68] sm:$0xff]  ;;  %v5673_v48 = vld [vmem:[#allocation7 + $0x30] sm:$0xf] }
  0x23   :  { %703 = vmatpush.bf16.msra.mxu1 %v5698_v31  ;;  %v6170_v49 = vld [vmem:[#allocation7 + $0x34] sm:$0xf0]  ;;  %v6169_v50 = vld [vmem:[#allocation7 + $0x34] sm:$0xf]  ;;  %v5675_v52 = vld [vmem:[#allocation7 + $0x38] sm:$0xf0]  ;;  %v176_v53 = vpack.c.bf16 %v119_v47, %v118_v46 }
  0x24   :  { %342 = vmatpush.bf16.msra.mxu0 %v6159_v3  ;;  %6278 = vmatpush.bf16.msra.mxu3 %v6159_v3  ;;  %v5674_v51 = vor.u32 %v6170_v49, %v5673_v48  ;;  %v6859_v54 = vor.u32 %v6169_v50, %v5675_v52  ;;  %v5665_v55 = vld [vmem:[#allocation7 + $0x20] sm:$0xf]  ;;  %v6168_v56 = vld [vmem:[#allocation7 + $0x24] sm:$0xf0]  ;;  %v6167_v57 = vld [vmem:[#allocation7 + $0x24] sm:$0xf] }
  0x25   :  { %872 = vmatpush.bf16.msra.mxu2 %v6844_v33  ;;  %v5666_v58 = vor.u32 %v6168_v56, %v5665_v55  ;;  %v5667_v59 = vld [vmem:[#allocation7 + $0x28] sm:$0xf0]  ;;  %v5657_v61 = vld [vmem:[#allocation7 + $0x10] sm:$0xf]  ;;  %v6166_v62 = vld [vmem:[#allocation7 + $0x14] sm:$0xf0] }
  0x26   :  { %v6863_v60 = vor.u32 %v6167_v57, %v5667_v59  ;;  %v6165_v63 = vld [vmem:[#allocation7 + $0x14] sm:$0xf]  ;;  %v5658_v0 = vor.u32 %v6166_v62, %v5657_v61  ;;  %v5659_v1 = vld [vmem:[#allocation7 + $0x18] sm:$0xf0]  ;;  %v5649_v3 = vld [vmem:[#allocation7] sm:$0xf] }
  0x27   :  { %5615 = vmatmul.msk.bf16.vlgmr.msra.gmra.mxu0 %vm238_vm0, %v170_v6  ;;  %704 = vmatpush.bf16.msra.mxu1 %v5690_v37  ;;  %v6866_v2 = vor.u32 %v6165_v63, %v5659_v1  ;;  %v6164_v4 = vld [vmem:[#allocation7 + $0x4] sm:$0xf0]  ;;  %v6163_v5 = vld [vmem:[#allocation7 + $0x4] sm:$0xf]  ;;  %v5651_v7 = vld [vmem:[#allocation7 + $0x8] sm:$0xf0] }
  0x28   :  { %6279 = vmatpush.bf16.msrb.mxu3 %v5706_v22  ;;  %v5650_v6 = vor.u32 %v6164_v4, %v5649_v3  ;;  %v6869_v8 = vor.u32 %v6163_v5, %v5651_v7  ;;  %v121_v10 = vld [vmem:[%s9938_s0 + $0x78] sm:$0xff]  ;;  %v123_v13 = vld [vmem:[%s9938_s0 + $0x88] sm:$0xff]  ;;  %v6885_v16 = vld [vmem:[#allocation5] ss:$0 sm:$0xff] }
  0x29   :  { %873 = vmatpush.bf16.msra.mxu2 %v6847_v39  ;;  %v124_v22 = vld [vmem:[%s9938_s0 + $0x90] sm:$0xff]  ;;  %v125_v23 = vld [vmem:[%s9938_s0 + $0x98] sm:$0xff]  ;;  %v126_v34 = vld [vmem:[%s9938_s0 + $0xa0] sm:$0xff] }
  0x2a   :  { %v179_v26 = vpack.c.bf16 %v125_v23, %v124_v22  ;;  %v127_v35 = vld [vmem:[%s9938_s0 + $0xa8] sm:$0xff]  ;;  %v128_v46 = vld [vmem:[%s9938_s0 + $0xb0] sm:$0xff]  ;;  %v129_v47 = vld [vmem:[%s9938_s0 + $0xb8] sm:$0xff] }
  0x2b   :  { %705 = vmatpush.bf16.msra.mxu1 %v5682_v44  ;;  %v181_v49 = vpack.c.bf16 %v129_v47, %v128_v46  ;;  %v130_v57 = vld [vmem:[%s9938_s0 + $0xc0] sm:$0xff]  ;;  %v132_v5 = vld [vmem:[%s9938_s0 + $0xd0] sm:$0xff] }
  0x2c   :  { %6280 = vmatpush.bf16.msrb.mxu3 %v5698_v31 }
  0x2d   :  { %874 = vmatpush.bf16.msra.mxu2 %v6850_v45 }
  0x2f   :  { %706 = vmatpush.bf16.msra.mxu1 %v5674_v51 }
  0x30   :  { %6281 = vmatpush.bf16.msrb.mxu3 %v5690_v37  ;;  %v180_v37 = vpack.c.bf16 %v127_v35, %v126_v34 }
  0x31   :  { %875 = vmatpush.bf16.msra.mxu2 %v6859_v54 }
  0x33   :  { %707 = vmatpush.bf16.msra.mxu1 %v5666_v58 }
  0x34   :  { %6282 = vmatpush.bf16.msrb.mxu3 %v5682_v44 }
  0x35   :  { %876 = vmatpush.bf16.msra.mxu2 %v6863_v60 }
  0x37   :  { %5616 = vmatmul.msk.bf16.gmra.mxu0 %vm238_vm0, %v171_v9  ;;  %708 = vmatpush.bf16.msra.mxu1 %v5658_v0  ;;  %v120_v9 = vld [vmem:[%s9938_s0 + $0x70] sm:$0xff] }
  0x38   :  { %6283 = vmatpush.bf16.msrb.mxu3 %v5674_v51  ;;  %v177_v11 = vpack.c.bf16 %v121_v10, %v120_v9 }
  0x39   :  { %877 = vmatpush.bf16.msra.mxu2 %v6866_v2 }
  0x3b   :  { %709 = vmatpush.bf16.msra.mxu1 %v5650_v6 }
  0x3c   :  { %6284 = vmatpush.bf16.msrb.mxu3 %v5666_v58  ;;  %v131_v58 = vld [vmem:[%s9938_s0 + $0xc8] sm:$0xff] }
  0x3d   :  { %878 = vmatpush.bf16.msra.mxu2 %v6869_v8  ;;  %v182_v61 = vpack.c.bf16 %v131_v58, %v130_v57 }
  0x40   :  { %6285 = vmatpush.bf16.msrb.mxu3 %v5658_v0 }
  0x44   :  { %6286 = vmatpush.bf16.msrb.mxu3 %v5650_v6  ;;  %v133_v6 = vld [vmem:[%s9938_s0 + $0xd8] sm:$0xff] }
  0x45   :  { %v183_v9 = vpack.c.bf16 %v133_v6, %v132_v5 }
  0x47   :  { %5617 = vmatmul.msk.bf16.gmra.mxu0 %vm238_vm0, %v172_v12  ;;  %v122_v12 = vld [vmem:[%s9938_s0 + $0x80] sm:$0xff] }
  0x48   :  { %v178_v14 = vpack.c.bf16 %v123_v13, %v122_v12 }
  0x57   :  { %5618 = vmatmul.msk.bf16.gmra.mxu0 %vm238_vm0, %v173_v15 }
  0x67   :  { %5619 = vmatmul.msk.bf16.gmra.mxu0 %vm238_vm0, %v174_v18 }
  0x77   :  { %5620 = vmatmul.msk.bf16.gmra.mxu0 %vm238_vm0, %v175_v27 }
  0x87   :  { %5621 = vmatmul.msk.bf16.gmra.mxu0 %vm238_vm0, %v176_v53 }
  0x97   :  { %5622 = vmatmul.msk.bf16.gmra.mxu0 %vm238_vm0, %v177_v11 }
  0xa4   :  { %v344_v15 = vpop.f32.mrf.mxu0 }
  0xa5   :  { %v345_v17 = vadd.f32 %v6885_v16, %v344_v15 }
  0xa7   :  { %5623 = vmatmul.msk.bf16.gmra.mxu0 %vm238_vm0, %v178_v14  ;;  %v504_v20 = vmax.f32 %v345_v17, 0.0  ;;  %v134_v17 = vld [vmem:[%s9938_s0 + $0xe0] sm:$0xff] }
  0xac   :  { %v346_v18 = vpop.f32.mrf.mxu0 }
  0xad   :  { %v347_v19 = vadd.f32 %v6885_v16, %v346_v18  ;;  %v135_v18 = vld [vmem:[%s9938_s0 + $0xe8] sm:$0xff] }
  0xaf   :  { %v505_v21 = vmax.f32 %v347_v19, 0.0 }
  0xb1   :  { %v568_v25 = vpack.c.bf16 %v505_v21, %v504_v20  ;;  %v184_v20 = vpack.c.bf16 %v135_v18, %v134_v17 }
  0xb3   :  { %710 = vmatmul.bf16.vlgmr.msra.gmra.mxu1 %v568_v25  ;;  %879 = vmatmul.bf16.vlgmr.msra.gmra.mxu2 %v568_v25 }
  0xb4   :  { %v349_v27 = vpop.f32.mrf.mxu0 }
  0xb5   :  { %v350_v28 = vadd.f32 %v6885_v16, %v349_v27 }
  0xb7   :  { %5624 = vmatmul.msk.bf16.gmra.mxu0 %vm238_vm0, %v179_v26  ;;  %v506_v31 = vmax.f32 %v350_v28, 0.0  ;;  %v136_v28 = vld [vmem:[%s9938_s0 + $0xf0] sm:$0xff] }
  0xbc   :  { %v351_v29 = vpop.f32.mrf.mxu0 }
  0xbd   :  { %v352_v30 = vadd.f32 %v6885_v16, %v351_v29  ;;  %v137_v29 = vld [vmem:[%s9938_s0 + $0xf8] sm:$0xff] }
  0xbf   :  { %v507_v32 = vmax.f32 %v352_v30, 0.0 }
  0xc1   :  { %v569_v36 = vpack.c.bf16 %v507_v32, %v506_v31  ;;  %v185_v31 = vpack.c.bf16 %v137_v29, %v136_v28 }
  0xc3   :  { %715 = vmatmul.bf16.gmra.mxu1 %v569_v36  ;;  %884 = vmatmul.bf16.gmra.mxu2 %v569_v36 }
  0xc4   :  { %v354_v38 = vpop.f32.mrf.mxu0 }
  0xc5   :  { %v355_v40 = vadd.f32 %v6885_v16, %v354_v38 }
  0xc7   :  { %5625 = vmatmul.msk.bf16.gmra.mxu0 %vm238_vm0, %v180_v37  ;;  %v508_v43 = vmax.f32 %v355_v40, 0.0  ;;  %v138_v40 = vld [vmem:[%s9938_s0 + $0x100] sm:$0xff] }
  0xcc   :  { %v356_v41 = vpop.f32.mrf.mxu0 }
  0xcd   :  { %v357_v42 = vadd.f32 %v6885_v16, %v356_v41  ;;  %v139_v41 = vld [vmem:[%s9938_s0 + $0x108] sm:$0xff] }
  0xcf   :  { %v509_v44 = vmax.f32 %v357_v42, 0.0 }
  0xd1   :  { %v570_v48 = vpack.c.bf16 %v509_v44, %v508_v43  ;;  %v186_v43 = vpack.c.bf16 %v139_v41, %v138_v40 }
  0xd3   :  { %720 = vmatmul.bf16.gmra.mxu1 %v570_v48  ;;  %889 = vmatmul.bf16.gmra.mxu2 %v570_v48 }
  0xd4   :  { %v359_v50 = vpop.f32.mrf.mxu0 }
  0xd5   :  { %v360_v51 = vadd.f32 %v6885_v16, %v359_v50 }
  0xd7   :  { %5626 = vmatmul.msk.bf16.gmra.mxu0 %vm238_vm0, %v181_v49  ;;  %v510_v55 = vmax.f32 %v360_v51, 0.0  ;;  %v6962_v51 = vld [vmem:[#allocation8] sm:$0x3] }
  0xd8   :  { %v6971_v57 = vperm.slane %v6962_v51, 0 }
  0xdc   :  { %v361_v52 = vpop.f32.mrf.mxu0 }
  0xdd   :  { %v362_v53 = vadd.f32 %v6885_v16, %v361_v52 }
  0xdf   :  { %v511_v56 = vmax.f32 %v362_v53, 0.0  ;;  %v140_v53 = vld [vmem:[%s9938_s0 + $0x110] sm:$0xff] }
  0xe1   :  { %v571_v59 = vpack.c.bf16 %v511_v56, %v510_v55  ;;  %v141_v55 = vld [vmem:[%s9938_s0 + $0x118] sm:$0xff] }
  0xe2   :  { %v187_v58 = vpack.c.bf16 %v141_v55, %v140_v53 }
  0xe3   :  { %725 = vmatmul.bf16.gmra.mxu1 %v571_v59  ;;  %894 = vmatmul.bf16.gmra.mxu2 %v571_v59 }
  0xe4   :  { %v364_v62 = vpop.f32.mrf.mxu0 }
  0xe5   :  { %v365_v63 = vadd.f32 %v6885_v16, %v364_v62 }
  0xe7   :  { %5627 = vmatmul.msk.bf16.gmra.mxu0 %vm238_vm0, %v182_v61  ;;  %v512_v3 = vmax.f32 %v365_v63, 0.0 }
  0xec   :  { %v366_v0 = vpop.f32.mrf.mxu0 }
  0xed   :  { %v367_v1 = vadd.f32 %v6885_v16, %v366_v0 }
  0xef   :  { %v513_v4 = vmax.f32 %v367_v1, 0.0 }
  0xf1   :  { %v572_v7 = vpack.c.bf16 %v513_v4, %v512_v3 }
  0xf3   :  { %730 = vmatmul.bf16.gmra.mxu1 %v572_v7  ;;  %899 = vmatmul.bf16.gmra.mxu2 %v572_v7 }
  0xf4   :  { %v369_v10 = vpop.f32.mrf.mxu0 }
  0xf5   :  { %v370_v11 = vadd.f32 %v6885_v16, %v369_v10 }
  0xf7   :  { %5628 = vmatmul.msk.bf16.gmra.mxu0 %vm238_vm0, %v183_v9  ;;  %v514_v14 = vmax.f32 %v370_v11, 0.0 }
  0xfc   :  { %v371_v12 = vpop.f32.mrf.mxu0 }
  0xfd   :  { %v372_v13 = vadd.f32 %v6885_v16, %v371_v12 }
  0xff   :  { %v515_v15 = vmax.f32 %v372_v13, 0.0  ;;  %v142_v13 = vld [vmem:[%s9938_s0 + $0x120] sm:$0xff] }
 0x101   :  { %v573_v19 = vpack.c.bf16 %v515_v15, %v514_v14  ;;  %v143_v14 = vld [vmem:[%s9938_s0 + $0x128] sm:$0xff] }
 0x102   :  { %v188_v17 = vpack.c.bf16 %v143_v14, %v142_v13 }
 0x103   :  { %735 = vmatmul.bf16.gmra.mxu1 %v573_v19  ;;  %904 = vmatmul.bf16.gmra.mxu2 %v573_v19 }
 0x104   :  { %v374_v21 = vpop.f32.mrf.mxu0 }
 0x105   :  { %v375_v22 = vadd.f32 %v6885_v16, %v374_v21 }
 0x107   :  { %5629 = vmatmul.msk.bf16.gmra.mxu0 %vm238_vm0, %v184_v20  ;;  %v516_v26 = vmax.f32 %v375_v22, 0.0 }
 0x10c   :  { %v376_v23 = vpop.f32.mrf.mxu0 }
 0x10d   :  { %v377_v25 = vadd.f32 %v6885_v16, %v376_v23 }
 0x10f   :  { %v517_v27 = vmax.f32 %v377_v25, 0.0 }
 0x111   :  { %v574_v30 = vpack.c.bf16 %v517_v27, %v516_v26 }
 0x113   :  { %740 = vmatmul.bf16.gmra.mxu1 %v574_v30  ;;  %909 = vmatmul.bf16.gmra.mxu2 %v574_v30 }
 0x114   :  { %v379_v32 = vpop.f32.mrf.mxu0 }
 0x115   :  { %v380_v34 = vadd.f32 %v6885_v16, %v379_v32 }
 0x117   :  { %5630 = vmatmul.msk.bf16.gmra.mxu0 %vm238_vm0, %v185_v31  ;;  %v518_v37 = vmax.f32 %v380_v34, 0.0 }
 0x11c   :  { %v381_v35 = vpop.f32.mrf.mxu0 }
 0x11d   :  { %v382_v36 = vadd.f32 %v6885_v16, %v381_v35  ;;  %v144_v35 = vld [vmem:[%s9938_s0 + $0x130] sm:$0xff] }
 0x11f   :  { %v519_v38 = vmax.f32 %v382_v36, 0.0  ;;  %v145_v36 = vld [vmem:[%s9938_s0 + $0x138] sm:$0xff] }
 0x121   :  { %v575_v42 = vpack.c.bf16 %v519_v38, %v518_v37  ;;  %v189_v38 = vpack.c.bf16 %v145_v36, %v144_v35 }
 0x123   :  { %745 = vmatmul.bf16.gmra.mxu1 %v575_v42  ;;  %914 = vmatmul.bf16.gmra.mxu2 %v575_v42 }
 0x124   :  { %v384_v44 = vpop.f32.mrf.mxu0 }
 0x125   :  { %v385_v46 = vadd.f32 %v6885_v16, %v384_v44 }
 0x127   :  { %5631 = vmatmul.msk.bf16.gmra.mxu0 %vm238_vm0, %v186_v43  ;;  %v520_v49 = vmax.f32 %v385_v46, 0.0 }
 0x12c   :  { %v386_v47 = vpop.f32.mrf.mxu0 }
 0x12d   :  { %v387_v48 = vadd.f32 %v6885_v16, %v386_v47 }
 0x12f   :  { %v521_v50 = vmax.f32 %v387_v48, 0.0 }
 0x130   :  { %v711_v52 = vpop.f32.mrf.mxu1 }
 0x131   :  { %v576_v56 = vpack.c.bf16 %v521_v50, %v520_v49  ;;  %v712_v62 = vadd.f32 %v711_v52, %v6971_v57 }
 0x133   :  { %750 = vmatmul.bf16.gmra.mxu1 %v576_v56  ;;  %919 = vmatmul.bf16.gmra.mxu2 %v576_v56  ;;  %v1040_v1 = vmax.f32 %v712_v62, 0.0  ;;  %v147_v62 = vld [vmem:[%s9938_s0 + $0x148] sm:$0xff] }
 0x134   :  { %v389_v59 = vpop.f32.mrf.mxu0 }
 0x135   :  { %v390_v3 = vadd.f32 %v6885_v16, %v389_v59  ;;  %v146_v59 = vld [vmem:[%s9938_s0 + $0x140] sm:$0xff] }
 0x136   :  { %v6973_v61 = vpop.f32.mrf.mxu2 }
 0x137   :  { %5632 = vmatmul.msk.bf16.gmra.mxu0 %vm238_vm0, %v187_v58  ;;  %v522_v10 = vmax.f32 %v390_v3, 0.0 }
 0x138   :  { %v713_v63 = vpop.f32.mrf.mxu1 }
 0x139   :  { %v714_v0 = vadd.f32 %v713_v63, %v6971_v57 }
 0x13b   :  { %v1042_v4 = vmax.f32 %v714_v0, 0.0  ;;  %v190_v0 = vpack.c.bf16 %v147_v62, %v146_v59 }
 0x13c   :  { %v391_v5 = vpop.f32.mrf.mxu0 }
 0x13d   :  { %v6979_v6 = vpack.c.bf16 %v1042_v4, %v1040_v1  ;;  %v392_v7 = vadd.f32 %v6885_v16, %v391_v5 }
 0x13e   :  { %v6982_v9 = vpop.f32.mrf.mxu2 }
 0x13f   :  { %v523_v11 = vmax.f32 %v392_v7, 0.0 }
 0x140   :  { %v716_v12 = vpop.f32.mrf.mxu1 }
 0x141   :  { %v577_v15 = vpack.c.bf16 %v523_v11, %v522_v10  ;;  %v717_v20 = vadd.f32 %v716_v12, %v6971_v57 }
 0x143   :  { %755 = vmatmul.bf16.gmra.mxu1 %v577_v15  ;;  %924 = vmatmul.bf16.gmra.mxu2 %v577_v15  ;;  %v1044_v23 = vmax.f32 %v717_v20, 0.0 }
 0x144   :  { %v394_v18 = vpop.f32.mrf.mxu0 }
 0x145   :  { %v395_v25 = vadd.f32 %v6885_v16, %v394_v18 }
 0x146   :  { %v6990_v19 = vpop.f32.mrf.mxu2 }
 0x147   :  { %5633 = vmatmul.msk.bf16.gmra.mxu0 %vm238_vm0, %v188_v17  ;;  %v524_v31 = vmax.f32 %v395_v25, 0.0 }
 0x148   :  { %v718_v21 = vpop.f32.mrf.mxu1 }
 0x149   :  { %v719_v22 = vadd.f32 %v718_v21, %v6971_v57 }
 0x14b   :  { %v1046_v26 = vmax.f32 %v719_v22, 0.0  ;;  %v148_v22 = vld [vmem:[%s9938_s0 + $0x150] sm:$0xff] }
 0x14c   :  { %v396_v27 = vpop.f32.mrf.mxu0 }
 0x14d   :  { %v6996_v28 = vpack.c.bf16 %v1046_v26, %v1044_v23  ;;  %v397_v29 = vadd.f32 %v6885_v16, %v396_v27  ;;  %v149_v23 = vld [vmem:[%s9938_s0 + $0x158] sm:$0xff] }
 0x14e   :  { %v6999_v30 = vpop.f32.mrf.mxu2  ;;  %v191_v26 = vpack.c.bf16 %v149_v23, %v148_v22  ;;  %v157_v22 = vld [vmem:[%s9938_s0 + $0x198] sm:$0xff] }
 0x14f   :  { %v525_v32 = vmax.f32 %v397_v29, 0.0  ;;  %v5953_v29 = vld [vmem:[%s9943_s5 + $0x1e0] sm:$0xf] }
 0x150   :  { %v721_v34 = vpop.f32.mrf.mxu1 }
 0x151   :  { %v578_v37 = vpack.c.bf16 %v525_v32, %v524_v31  ;;  %v722_v42 = vadd.f32 %v721_v34, %v6971_v57  ;;  %v6241_v31 = vld [vmem:[%s9943_s5 + $0x1ec] sm:$0xf0] }
 0x152   :  { %v5954_v34 = vor.u32 %v6241_v31, %v5953_v29  ;;  %v5873_v29 = vld [vmem:[%s9943_s5 + $0x140] sm:$0xf]  ;;  %v6221_v31 = vld [vmem:[%s9943_s5 + $0x14c] sm:$0xf0] }
 0x153   :  { %760 = vmatmul.bf16.gmra.mxu1 %v578_v37  ;;  %929 = vmatmul.bf16.gmra.mxu2 %v578_v37  ;;  %v1048_v46 = vmax.f32 %v722_v42, 0.0 }
 0x154   :  { %v399_v40 = vpop.f32.mrf.mxu0  ;;  %1795 = vmatpush.bf16.msrb.mxu0 %v5954_v34  ;;  %v5874_v34 = vor.u32 %v6221_v31, %v5873_v29  ;;  %v6207_v31 = vld [vmem:[%s9943_s5 + $0xe4] sm:$0xf] }
 0x155   :  { %v400_v47 = vadd.f32 %v6885_v16, %v399_v40  ;;  %v6237_v40 = vld [vmem:[%s9943_s5 + $0x1cc] sm:$0xf0] }
 0x156   :  { %v7007_v41 = vpop.f32.mrf.mxu2 }
 0x157   :  { %5634 = vmatmul.msk.bf16.gmra.mxu0 %vm238_vm0, %v189_v38  ;;  %v526_v55 = vmax.f32 %v400_v47, 0.0  ;;  %v5937_v38 = vld [vmem:[%s9943_s5 + $0x1c0] sm:$0xf] }
 0x158   :  { %v723_v43 = vpop.f32.mrf.mxu1  ;;  %v5938_v42 = vor.u32 %v6237_v40, %v5937_v38 }
 0x159   :  { %v724_v44 = vadd.f32 %v723_v43, %v6971_v57 }
 0x15a   :  { %1796 = vmatpush.bf16.msrb.mxu0 %v5938_v42 }
 0x15b   :  { %v1050_v48 = vmax.f32 %v724_v44, 0.0 }
 0x15c   :  { %v401_v49 = vpop.f32.mrf.mxu0 }
 0x15d   :  { %v7013_v50 = vpack.c.bf16 %v1050_v48, %v1048_v46  ;;  %v402_v52 = vadd.f32 %v6885_v16, %v401_v49 }
 0x15e   :  { %v7016_v53 = vpop.f32.mrf.mxu2 }
 0x15f   :  { %10040 = vst [vmem:[#allocation16_spill] sm:$0xff] %v7013_v50  ;;  %v527_v56 = vmax.f32 %v402_v52, 0.0  ;;  %v5921_v52 = vld [vmem:[%s9943_s5 + $0x1a0] sm:$0xf] }
 0x160   :  { %v726_v58 = vpop.f32.mrf.mxu1 }
 0x161   :  { %v579_v63 = vpack.c.bf16 %v527_v56, %v526_v55  ;;  %v727_v4 = vadd.f32 %v726_v58, %v6971_v57  ;;  %v6233_v55 = vld [vmem:[%s9943_s5 + $0x1ac] sm:$0xf0] }
 0x162   :  { %v5922_v58 = vor.u32 %v6233_v55, %v5921_v52  ;;  %v152_v55 = vld [vmem:[%s9938_s0 + $0x170] sm:$0xff] }
 0x163   :  { %765 = vmatmul.bf16.gmra.mxu1 %v579_v63  ;;  %934 = vmatmul.bf16.gmra.mxu2 %v579_v63  ;;  %v1052_v10 = vmax.f32 %v727_v4, 0.0 }
 0x164   :  { %v404_v1 = vpop.f32.mrf.mxu0  ;;  %1797 = vmatpush.bf16.msrb.mxu0 %v5922_v58  ;;  %v153_v58 = vld [vmem:[%s9938_s0 + $0x178] sm:$0xff] }
 0x165   :  { %v405_v11 = vadd.f32 %v6885_v16, %v404_v1  ;;  %v151_v1 = vld [vmem:[%s9938_s0 + $0x168] sm:$0xff] }
 0x166   :  { %v7024_v3 = vpop.f32.mrf.mxu2 }
 0x167   :  { %5635 = vmatmul.msk.bf16.gmra.mxu0 %vm238_vm0, %v190_v0  ;;  %v528_v18 = vmax.f32 %v405_v11, 0.0  ;;  %v150_v0 = vld [vmem:[%s9938_s0 + $0x160] sm:$0xff] }
 0x168   :  { %v728_v5 = vpop.f32.mrf.mxu1  ;;  %v192_v11 = vpack.c.bf16 %v151_v1, %v150_v0  ;;  %v193_v0 = vpack.c.bf16 %v153_v58, %v152_v55  ;;  %v7187_v58 = vperm.slane %v6962_v51, 1 }
 0x169   :  { %v729_v7 = vadd.f32 %v728_v5, %v6971_v57  ;;  %v5905_v5 = vld [vmem:[%s9943_s5 + $0x180] sm:$0xf] }
 0x16b   :  { %v1054_v12 = vmax.f32 %v729_v7, 0.0  ;;  %v6229_v7 = vld [vmem:[%s9943_s5 + $0x18c] sm:$0xf0] }
 0x16c   :  { %v406_v13 = vpop.f32.mrf.mxu0 }
 0x16d   :  { %v7030_v14 = vpack.c.bf16 %v1054_v12, %v1052_v10  ;;  %v407_v15 = vadd.f32 %v6885_v16, %v406_v13  ;;  %v5906_v10 = vor.u32 %v6229_v7, %v5905_v5  ;;  %v5889_v13 = vld [vmem:[%s9943_s5 + $0x160] sm:$0xf]  ;;  %v159_v7 = vld [vmem:[%s9938_s0 + $0x1a8] sm:$0xff] }
 0x16e   :  { %v7033_v17 = vpop.f32.mrf.mxu2  ;;  %v158_v5 = vld [vmem:[%s9938_s0 + $0x1a0] sm:$0xff] }
 0x16f   :  { %10041 = vst [vmem:[#allocation17_spill] sm:$0xff] %v7030_v14  ;;  %v529_v20 = vmax.f32 %v407_v15, 0.0  ;;  %1798 = vmatpush.bf16.msrb.mxu0 %v5906_v10  ;;  %v6225_v15 = vld [vmem:[%s9943_s5 + $0x16c] sm:$0xf0] }
 0x170   :  { %v731_v21 = vpop.f32.mrf.mxu1 }
 0x171   :  { %v580_v25 = vpack.c.bf16 %v529_v20, %v528_v18  ;;  %v732_v35 = vadd.f32 %v731_v21, %v6971_v57  ;;  %v5890_v20 = vor.u32 %v6225_v15, %v5889_v13  ;;  %v156_v21 = vld [vmem:[%s9938_s0 + $0x190] sm:$0xff] }
 0x173   :  { %770 = vmatmul.bf16.gmra.mxu1 %v580_v25  ;;  %939 = vmatmul.bf16.gmra.mxu2 %v580_v25  ;;  %v1056_v43 = vmax.f32 %v732_v35, 0.0  ;;  %v195_v25 = vpack.c.bf16 %v157_v22, %v156_v21 }
 0x174   :  { %v409_v27 = vpop.f32.mrf.mxu0  ;;  %1799 = vmatpush.bf16.msrb.mxu0 %v5890_v20 }
 0x175   :  { %v410_v44 = vadd.f32 %v6885_v16, %v409_v27  ;;  %5640 = vmatmul.msk.bf16.vlgmr.msra.gmra.mxu3 %vm238_vm0, %v195_v25  ;;  %v5955_v25 = vld [vmem:[%s9943_s5 + $0x1f0] sm:$0xf0] }
 0x176   :  { %v7047_v32 = vpop.f32.mrf.mxu2  ;;  %6287 = vmatpush.bf16.msra.mxu3 %v6834_v24 }
 0x177   :  { %5636 = vmatmul.msk.bf16.gmra.mxu0 %vm238_vm0, %v191_v26  ;;  %v530_v59 = vmax.f32 %v410_v44, 0.0  ;;  %v6217_v44 = vld [vmem:[%s9943_s5 + $0x12c] sm:$0xf0] }
 0x178   :  { %v733_v36 = vpop.f32.mrf.mxu1  ;;  %1800 = vmatpush.bf16.msrb.mxu0 %v5874_v34  ;;  %v5827_v34 = vld [vmem:[%s9943_s5 + $0xf0] sm:$0xf0] }
 0x179   :  { %v734_v37 = vadd.f32 %v733_v36, %v6971_v57 }
 0x17a   :  { %6288 = vmatpush.bf16.msra.mxu3 %v6844_v33  ;;  %v6213_v33 = vld [vmem:[%s9943_s5 + $0x10c] sm:$0xf0] }
 0x17b   :  { %v1058_v46 = vmax.f32 %v734_v37, 0.0 }
 0x17c   :  { %v411_v47 = vpop.f32.mrf.mxu0 }
 0x17d   :  { %v7059_v48 = vpack.c.bf16 %v1058_v46, %v1056_v43  ;;  %v412_v49 = vadd.f32 %v6885_v16, %v411_v47  ;;  %v5857_v43 = vld [vmem:[%s9943_s5 + $0x120] sm:$0xf] }
 0x17e   :  { %v7068_v56 = vpop.f32.mrf.mxu2  ;;  %v5858_v24 = vor.u32 %v6217_v44, %v5857_v43  ;;  %6289 = vmatpush.bf16.msra.mxu3 %v6847_v39  ;;  %v196_v39 = vpack.c.bf16 %v159_v7, %v158_v5  ;;  %v881_v7 = vadd.f32 %v6973_v61, %v7187_v58  ;;  %v163_v61 = vld [vmem:[%s9938_s0 + $0x1c8] sm:$0xff] }
 0x17f   :  { %10042 = vst [vmem:[#allocation18_spill] sm:$0xff] %v7059_v48  ;;  %v531_v62 = vmax.f32 %v412_v49, 0.0 }
 0x180   :  { %v736_v63 = vpop.f32.mrf.mxu1  ;;  %1801 = vmatpush.bf16.msrb.mxu0 %v5858_v24  ;;  %v160_v24 = vld [vmem:[%s9938_s0 + $0x1b0] sm:$0xff] }
 0x181   :  { %v581_v4 = vpack.c.bf16 %v531_v62, %v530_v59  ;;  %v737_v23 = vadd.f32 %v736_v63, %v6971_v57  ;;  %v5841_v62 = vld [vmem:[%s9943_s5 + $0x100] sm:$0xf] }
 0x182   :  { %v5842_v63 = vor.u32 %v6213_v33, %v5841_v62  ;;  %6290 = vmatpush.bf16.msra.mxu3 %v6850_v45 }
 0x183   :  { %775 = vmatmul.bf16.gmra.mxu1 %v581_v4  ;;  %944 = vmatmul.bf16.gmra.mxu2 %v581_v4  ;;  %v1060_v35 = vmax.f32 %v737_v23, 0.0  ;;  %v6239_v23 = vld [vmem:[%s9943_s5 + $0x1e4] sm:$0xf] }
 0x184   :  { %v414_v12 = vpop.f32.mrf.mxu0  ;;  %1802 = vmatpush.bf16.msrb.mxu0 %v5842_v63 }
 0x185   :  { %v415_v36 = vadd.f32 %v6885_v16, %v414_v12  ;;  %5641 = vmatmul.msk.bf16.gmra.mxu3 %vm238_vm0, %v196_v39 }
 0x186   :  { %v7088_v18 = vpop.f32.mrf.mxu2  ;;  %6291 = vmatpush.bf16.msra.mxu3 %v6859_v54  ;;  %v5958_v54 = vor.u32 %v6239_v23, %v5955_v25 }
 0x187   :  { %5637 = vmatmul.msk.bf16.gmra.mxu0 %vm238_vm0, %v192_v11  ;;  %v532_v47 = vmax.f32 %v415_v36, 0.0  ;;  %v154_v36 = vld [vmem:[%s9938_s0 + $0x180] sm:$0xff] }
 0x188   :  { %v738_v26 = vpop.f32.mrf.mxu1  ;;  %2133 = vmatpush.bf16.msrb.mxu2 %v5958_v54 }
 0x189   :  { %v739_v27 = vadd.f32 %v738_v26, %v6971_v57 }
 0x18a   :  { %6292 = vmatpush.bf16.msra.mxu3 %v6863_v60  ;;  %v5830_v60 = vor.u32 %v6207_v31, %v5827_v34 }
 0x18b   :  { %v1062_v37 = vmax.f32 %v739_v27, 0.0 }
 0x18c   :  { %v416_v38 = vpop.f32.mrf.mxu0  ;;  %1964 = vmatpush.bf16.msrb.mxu1 %v5830_v60 }
 0x18d   :  { %v7108_v40 = vpack.c.bf16 %v1062_v37, %v1060_v35  ;;  %v417_v42 = vadd.f32 %v6885_v16, %v416_v38  ;;  %v155_v37 = vld [vmem:[%s9938_s0 + $0x188] sm:$0xff] }
 0x18e   :  { %v7117_v46 = vpop.f32.mrf.mxu2  ;;  %6293 = vmatpush.bf16.msra.mxu3 %v6866_v2 }
 0x18f   :  { %10043 = vst [vmem:[#allocation19_spill] sm:$0xff] %v7108_v40  ;;  %v533_v49 = vmax.f32 %v417_v42, 0.0  ;;  %v194_v42 = vpack.c.bf16 %v155_v37, %v154_v36 }
 0x190   :  { %v741_v52 = vpop.f32.mrf.mxu1 }
 0x191   :  { %v582_v59 = vpack.c.bf16 %v533_v49, %v532_v47  ;;  %v742_v10 = vadd.f32 %v741_v52, %v6971_v57  ;;  %v161_v47 = vld [vmem:[%s9938_s0 + $0x1b8] sm:$0xff] }
 0x192   :  { %6294 = vmatpush.bf16.msra.mxu3 %v6869_v8  ;;  %v197_v2 = vpack.c.bf16 %v161_v47, %v160_v24  ;;  %v883_v8 = vadd.f32 %v6982_v9, %v7187_v58 }
 0x193   :  { %780 = vmatmul.bf16.gmra.mxu1 %v582_v59  ;;  %949 = vmatmul.bf16.gmra.mxu2 %v582_v59  ;;  %v1064_v13 = vmax.f32 %v742_v10, 0.0 }
 0x194   :  { %v419_v1 = vpop.f32.mrf.mxu0 }
 0x195   :  { %v420_v15 = vadd.f32 %v6885_v16, %v419_v1  ;;  %5642 = vmatmul.msk.bf16.gmra.mxu3 %vm238_vm0, %v197_v2 }
 0x196   :  { %v7133_v4 = vpop.f32.mrf.mxu2 }
 0x197   :  { %5638 = vmatmul.msk.bf16.gmra.mxu0 %vm238_vm0, %v193_v0  ;;  %v534_v27 = vmax.f32 %v420_v15, 0.0 }
 0x198   :  { %v743_v11 = vpop.f32.mrf.mxu1 }
 0x199   :  { %v744_v12 = vadd.f32 %v743_v11, %v6971_v57  ;;  %v1043_v11 = vmax.f32 %v883_v8, 0.0 }
 0x19b   :  { %v1066_v20 = vmax.f32 %v744_v12, 0.0 }
 0x19c   :  { %v421_v21 = vpop.f32.mrf.mxu0 }
 0x19d   :  { %v7148_v22 = vpack.c.bf16 %v1066_v20, %v1064_v13  ;;  %v422_v45 = vadd.f32 %v6885_v16, %v421_v21  ;;  %v1041_v13 = vmax.f32 %v881_v7, 0.0  ;;  %v162_v21 = vld [vmem:[%s9938_s0 + $0x1c0] sm:$0xff] }
 0x19e   :  { %v7157_v26 = vpop.f32.mrf.mxu2  ;;  %v198_v23 = vpack.c.bf16 %v163_v61, %v162_v21 }
 0x19f   :  { %10044 = vst [vmem:[#allocation20_spill] sm:$0xff] %v7148_v22  ;;  %v535_v29 = vmax.f32 %v422_v45, 0.0  ;;  %v7199_v20 = vpack.c.bf16 %v1043_v11, %v1041_v13  ;;  %v6235_v13 = vld [vmem:[%s9943_s5 + $0x1c4] sm:$0xf] }
 0x1a0   :  { %v746_v35 = vpop.f32.mrf.mxu1 }
 0x1a1   :  { %v583_v38 = vpack.c.bf16 %v535_v29, %v534_v27  ;;  %v747_v49 = vadd.f32 %v746_v35, %v6971_v57  ;;  %10046 = vst [vmem:[#allocation22_spill] sm:$0xff] %v7199_v20  ;;  %v888_v35 = vadd.f32 %v6999_v30, %v7187_v58 }
 0x1a3   :  { %785 = vmatmul.bf16.gmra.mxu1 %v583_v38  ;;  %954 = vmatmul.bf16.gmra.mxu2 %v583_v38  ;;  %v1068_v59 = vmax.f32 %v747_v49, 0.0  ;;  %v886_v38 = vadd.f32 %v6990_v19, %v7187_v58  ;;  %v1047_v47 = vmax.f32 %v888_v35, 0.0  ;;  %v165_v19 = vld [vmem:[%s9938_s0 + $0x1d8] sm:$0xff] }
 0x1a4   :  { %v424_v43 = vpop.f32.mrf.mxu0 }
 0x1a5   :  { %v425_v62 = vadd.f32 %v6885_v16, %v424_v43  ;;  %5643 = vmatmul.msk.bf16.gmra.mxu3 %vm238_vm0, %v198_v23  ;;  %v1045_v2 = vmax.f32 %v886_v38, 0.0 }
 0x1a6   :  { %v7173_v44 = vpop.f32.mrf.mxu2 }
 0x1a7   :  { %5639 = vmatmul.msk.bf16.gmra.mxu0 %vm238_vm0, %v194_v42  ;;  %v536_v10 = vmax.f32 %v425_v62, 0.0 }
 0x1a8   :  { %v748_v52 = vpop.f32.mrf.mxu1 }
 0x1a9   :  { %v749_v55 = vadd.f32 %v748_v52, %v6971_v57 }
 0x1ab   :  { %v1070_v33 = vmax.f32 %v749_v55, 0.0  ;;  %v7223_v55 = vpack.c.bf16 %v1047_v47, %v1045_v2 }
 0x1ac   :  { %v426_v63 = vpop.f32.mrf.mxu0 }
 0x1ad   :  { %v7192_v0 = vpack.c.bf16 %v1070_v33, %v1068_v59  ;;  %v427_v1 = vadd.f32 %v6885_v16, %v426_v63  ;;  %10048 = vst [vmem:[#allocation24_spill] sm:$0xff] %v7223_v55  ;;  %v164_v59 = vld [vmem:[%s9938_s0 + $0x1d0] sm:$0xff] }
 0x1ae   :  { %v7195_v5 = vpop.f32.mrf.mxu2  ;;  %v199_v33 = vpack.c.bf16 %v165_v19, %v164_v59 }
 0x1af   :  { %10045 = vst [vmem:[#allocation21_spill] sm:$0xff] %v7192_v0  ;;  %v537_v51 = vmax.f32 %v427_v1, 0.0 }
 0x1b0   :  { %v751_v39 = vpop.f32.mrf.mxu1 }
 0x1b1   :  { %v584_v12 = vpack.c.bf16 %v537_v51, %v536_v10  ;;  %v752_v45 = vadd.f32 %v751_v39, %v6971_v57  ;;  %v893_v39 = vadd.f32 %v7016_v53, %v7187_v58 }
 0x1b3   :  { %790 = vmatmul.bf16.gmra.mxu1 %v584_v12  ;;  %959 = vmatmul.bf16.gmra.mxu2 %v584_v12  ;;  %v1072_v27 = vmax.f32 %v752_v45, 0.0  ;;  %v891_v45 = vadd.f32 %v7007_v41, %v7187_v58 }
 0x1b4   :  { %v429_v15 = vpop.f32.mrf.mxu0 }
 0x1b5   :  { %v430_v29 = vadd.f32 %v6885_v16, %v429_v15  ;;  %5644 = vmatmul.msk.bf16.gmra.mxu3 %vm238_vm0, %v199_v33  ;;  %v5939_v15 = vld [vmem:[%s9943_s5 + $0x1d0] sm:$0xf0]  ;;  %v1049_v35 = vmax.f32 %v891_v45, 0.0  ;;  %v898_v33 = vadd.f32 %v7033_v17, %v7187_v58 }
 0x1b6   :  { %v7201_v9 = vpop.f32.mrf.mxu2  ;;  %v5942_v61 = vor.u32 %v6235_v13, %v5939_v15 }
 0x1b7   :  { %1803 = vmatmul.bf16.vlgmr.msrb.gmra.mxu0 %v7199_v20  ;;  %v538_v42 = vmax.f32 %v430_v29, 0.0 }
 0x1b8   :  { %v753_v25 = vpop.f32.mrf.mxu1  ;;  %2134 = vmatpush.bf16.msrb.mxu2 %v5942_v61 }
 0x1b9   :  { %v754_v54 = vadd.f32 %v753_v25, %v6971_v57  ;;  %v6203_v25 = vld [vmem:[%s9943_s5 + $0xc4] sm:$0xf] }
 0x1bb   :  { %v1074_v31 = vmax.f32 %v754_v54, 0.0  ;;  %v5811_v54 = vld [vmem:[%s9943_s5 + $0xd0] sm:$0xf0] }
 0x1bc   :  { %v431_v34 = vpop.f32.mrf.mxu0  ;;  %v5814_v29 = vor.u32 %v6203_v25, %v5811_v54 }
 0x1bd   :  { %v7216_v36 = vpack.c.bf16 %v1074_v31, %v1072_v27  ;;  %v432_v37 = vadd.f32 %v6885_v16, %v431_v34  ;;  %v1051_v31 = vmax.f32 %v893_v39, 0.0 }
 0x1be   :  { %v7219_v60 = vpop.f32.mrf.mxu2  ;;  %1965 = vmatpush.bf16.msrb.mxu1 %v5814_v29 }
 0x1bf   :  { %10047 = vst [vmem:[#allocation23_spill] sm:$0xff] %v7216_v36  ;;  %v539_v43 = vmax.f32 %v432_v37, 0.0  ;;  %v7259_v37 = vpack.c.bf16 %v1051_v31, %v1049_v35 }
 0x1c0   :  { %v756_v24 = vpop.f32.mrf.mxu1 }
 0x1c1   :  { %v585_v49 = vpack.c.bf16 %v539_v43, %v538_v42  ;;  %v757_v62 = vadd.f32 %v756_v24, %v6971_v57  ;;  %10049 = vst [vmem:[#allocation25_spill] sm:$0xff] %v7259_v37  ;;  %v166_v42 = vld [vmem:[%s9938_s0 + $0x1e0] sm:$0xff]  ;;  %v167_v43 = vld [vmem:[%s9938_s0 + $0x1e8] sm:$0xff] }
 0x1c2   :  { %v200_v47 = vpack.c.bf16 %v167_v43, %v166_v42 }
 0x1c3   :  { %795 = vmatmul.bf16.gmra.mxu1 %v585_v49  ;;  %964 = vmatmul.bf16.gmra.mxu2 %v585_v49  ;;  %v1076_v1 = vmax.f32 %v757_v62, 0.0 }
 0x1c4   :  { %v434_v52 = vpop.f32.mrf.mxu0 }
 0x1c5   :  { %v435_v7 = vadd.f32 %v6885_v16, %v434_v52  ;;  %5645 = vmatmul.msk.bf16.gmra.mxu3 %vm238_vm0, %v200_v47  ;;  %v901_v47 = vadd.f32 %v7047_v32, %v7187_v58 }
 0x1c6   :  { %v7225_v30 = vpop.f32.mrf.mxu2 }
 0x1c7   :  { %1808 = vmatmul.bf16.gmra.mxu0 %v7223_v55  ;;  %v540_v23 = vmax.f32 %v435_v7, 0.0  ;;  %v896_v7 = vadd.f32 %v7024_v3, %v7187_v58  ;;  %v169_v3 = vld [vmem:[%s9938_s0 + $0x1f8] sm:$0xff] }
 0x1c8   :  { %v758_v63 = vpop.f32.mrf.mxu1 }
 0x1c9   :  { %v759_v8 = vadd.f32 %v758_v63, %v6971_v57  ;;  %v1053_v15 = vmax.f32 %v896_v7, 0.0 }
 0x1cb   :  { %v1078_v10 = vmax.f32 %v759_v8, 0.0 }
 0x1cc   :  { %v436_v51 = vpop.f32.mrf.mxu0 }
 0x1cd   :  { %v7240_v11 = vpack.c.bf16 %v1078_v10, %v1076_v1  ;;  %v437_v12 = vadd.f32 %v6885_v16, %v436_v51 }
 0x1ce   :  { %v7249_v21 = vpop.f32.mrf.mxu2 }
 0x1cf   :  { %v541_v53 = vmax.f32 %v437_v12, 0.0  ;;  %v1055_v12 = vmax.f32 %v898_v33, 0.0 }
 0x1d0   :  { %v761_v27 = vpop.f32.mrf.mxu1 }
 0x1d1   :  { %v586_v34 = vpack.c.bf16 %v541_v53, %v540_v23  ;;  %v762_v24 = vadd.f32 %v761_v27, %v6971_v57  ;;  %v7283_v45 = vpack.c.bf16 %v1055_v12, %v1053_v15  ;;  %v168_v23 = vld [vmem:[%s9938_s0 + $0x1f0] sm:$0xff] }
 0x1d2   :  { %v201_v25 = vpack.c.bf16 %v169_v3, %v168_v23  ;;  %v5795_v15 = vld [vmem:[%s9943_s5 + $0xb0] sm:$0xf0] }
 0x1d3   :  { %800 = vmatmul.bf16.gmra.mxu1 %v586_v34  ;;  %969 = vmatmul.bf16.gmra.mxu2 %v586_v34  ;;  %v1080_v52 = vmax.f32 %v762_v24, 0.0  ;;  %10051 = vst [vmem:[#allocation27_spill] sm:$0xff] %v7283_v45 }
 0x1d4   :  { %v439_v41 = vpop.f32.mrf.mxu0 }
 0x1d5   :  { %v440_v59 = vadd.f32 %v6885_v16, %v439_v41  ;;  %5646 = vmatmul.msk.bf16.gmra.mxu3 %vm238_vm0, %v201_v25  ;;  %v903_v41 = vadd.f32 %v7068_v56, %v7187_v58 }
 0x1d6   :  { %v7261_v38 = vpop.f32.mrf.mxu2 }
 0x1d7   :  { %1813 = vmatmul.bf16.gmra.mxu0 %v7259_v37  ;;  %v542_v10 = vmax.f32 %v440_v59, 0.0  ;;  %v1059_v59 = vmax.f32 %v903_v41, 0.0 }
 0x1d8   :  { %v763_v49 = vpop.f32.mrf.mxu1 }
 0x1d9   :  { %v764_v2 = vadd.f32 %v763_v49, %v6971_v57 }
 0x1db   :  { %v1082_v19 = vmax.f32 %v764_v2, 0.0 }
 0x1dc   :  { %v441_v62 = vpop.f32.mrf.mxu0 }
 0x1dd   :  { %v7276_v63 = vpack.c.bf16 %v1082_v19, %v1080_v52  ;;  %v442_v8 = vadd.f32 %v6885_v16, %v441_v62  ;;  %v1057_v62 = vmax.f32 %v901_v47, 0.0 }
 0x1de   :  { %v7279_v1 = vpop.f32.mrf.mxu2 }
 0x1df   :  { %10050 = vst [vmem:[#allocation26_spill] sm:$0xff] %v7276_v63  ;;  %v543_v51 = vmax.f32 %v442_v8, 0.0  ;;  %v7307_v8 = vpack.c.bf16 %v1059_v59, %v1057_v62  ;;  %v6191_v62 = vld [vmem:[%s9943_s5 + $0x64] sm:$0xf] }
 0x1e0   :  { %v766_v39 = vpop.f32.mrf.mxu1 }
 0x1e1   :  { %v587_v13 = vpack.c.bf16 %v543_v51, %v542_v10  ;;  %v767_v53 = vadd.f32 %v766_v39, %v6971_v57  ;;  %10052 = vst [vmem:[#allocation28_spill] sm:$0xff] %v7307_v8  ;;  %v6231_v51 = vld [vmem:[%s9943_s5 + $0x1a4] sm:$0xf]  ;;  %v5923_v39 = vld [vmem:[%s9943_s5 + $0x1b0] sm:$0xf0] }
 0x1e2   :  { %v5926_v12 = vor.u32 %v6231_v51, %v5923_v39 }
 0x1e3   :  { %805 = vmatmul.bf16.gmra.mxu1 %v587_v13  ;;  %974 = vmatmul.bf16.gmra.mxu2 %v587_v13  ;;  %v1084_v29 = vmax.f32 %v767_v53, 0.0  ;;  %v6199_v13 = vld [vmem:[%s9943_s5 + $0xa4] sm:$0xf] }
 0x1e4   :  { %v444_v61 = vpop.f32.mrf.mxu0  ;;  %v5798_v53 = vor.u32 %v6199_v13, %v5795_v15  ;;  %2135 = vmatpush.bf16.msrb.mxu2 %v5926_v12  ;;  %v6187_v13 = vld [vmem:[%s9943_s5 + $0x44] sm:$0xf]  ;;  %v5747_v15 = vld [vmem:[%s9943_s5 + $0x50] sm:$0xf0] }
 0x1e5   :  { %v445_v31 = vadd.f32 %v6885_v16, %v444_v61 }
 0x1e6   :  { %v7285_v17 = vpop.f32.mrf.mxu2  ;;  %1966 = vmatpush.bf16.msrb.mxu1 %v5798_v53  ;;  %v5875_v53 = vld [vmem:[%s9943_s5 + $0x150] sm:$0xf0] }
 0x1e7   :  { %1818 = vmatmul.bf16.gmra.mxu0 %v7283_v45  ;;  %v544_v49 = vmax.f32 %v445_v31, 0.0  ;;  %v6195_v31 = vld [vmem:[%s9943_s5 + $0x84] sm:$0xf] }
 0x1e8   :  { %v768_v54 = vpop.f32.mrf.mxu1 }
 0x1e9   :  { %v769_v27 = vadd.f32 %v768_v54, %v6971_v57  ;;  %v908_v54 = vadd.f32 %v7117_v46, %v7187_v58 }
 0x1eb   :  { %v1086_v34 = vmax.f32 %v769_v27, 0.0  ;;  %v1063_v59 = vmax.f32 %v908_v54, 0.0 }
 0x1ec   :  { %v446_v35 = vpop.f32.mrf.mxu0 }
 0x1ed   :  { %v7300_v42 = vpack.c.bf16 %v1086_v34, %v1084_v29  ;;  %v447_v43 = vadd.f32 %v6885_v16, %v446_v35  ;;  %v5779_v34 = vld [vmem:[%s9943_s5 + $0x90] sm:$0xf0]  ;;  %v6227_v35 = vld [vmem:[%s9943_s5 + $0x184] sm:$0xf] }
 0x1ee   :  { %v7303_v24 = vpop.f32.mrf.mxu2  ;;  %v5782_v46 = vor.u32 %v6195_v31, %v5779_v34  ;;  %v6183_v34 = vld [vmem:[%s9943_s5 + $0x24] sm:$0xf] }
 0x1ef   :  { %v545_v2 = vmax.f32 %v447_v43, 0.0  ;;  %v906_v43 = vadd.f32 %v7088_v18, %v7187_v58  ;;  %v6223_v18 = vld [vmem:[%s9943_s5 + $0x164] sm:$0xf] }
 0x1f0   :  { %v771_v52 = vpop.f32.mrf.mxu1  ;;  %1967 = vmatpush.bf16.msrb.mxu1 %v5782_v46 }
 0x1f1   :  { %v588_v19 = vpack.c.bf16 %v545_v2, %v544_v49  ;;  %v772_v7 = vadd.f32 %v771_v52, %v6971_v57 }
 0x1f3   :  { %810 = vmatmul.bf16.gmra.mxu1 %v588_v19  ;;  %979 = vmatmul.bf16.gmra.mxu2 %v588_v19  ;;  %v1088_v61 = vmax.f32 %v772_v7, 0.0 }
 0x1f4   :  { %v449_v33 = vpop.f32.mrf.mxu0 }
 0x1f5   :  { %v450_v23 = vadd.f32 %v6885_v16, %v449_v33  ;;  %v5763_v33 = vld [vmem:[%s9943_s5 + $0x70] sm:$0xf0] }
 0x1f6   :  { %v7309_v56 = vpop.f32.mrf.mxu2  ;;  %v5766_v7 = vor.u32 %v6191_v62, %v5763_v33  ;;  %v913_v62 = vadd.f32 %v7157_v26, %v7187_v58 }
 0x1f7   :  { %1823 = vmatmul.bf16.gmra.mxu0 %v7307_v8  ;;  %v546_v47 = vmax.f32 %v450_v23, 0.0 }
 0x1f8   :  { %v773_v10 = vpop.f32.mrf.mxu1  ;;  %1968 = vmatpush.bf16.msrb.mxu1 %v5766_v7 }
 0x1f9   :  { %v774_v32 = vadd.f32 %v773_v10, %v6971_v57  ;;  %v5891_v10 = vld [vmem:[%s9943_s5 + $0x170] sm:$0xf0] }
 0x1fa   :  { %v5894_v51 = vor.u32 %v6223_v18, %v5891_v10  ;;  %v6179_v18 = vld [vmem:[%s9943_s5 + $0x4] sm:$0xf]  ;;  %v5715_v10 = vld [vmem:[%s9943_s5 + $0x10] sm:$0xf0] }
 0x1fb   :  { %v1090_v3 = vmax.f32 %v774_v32, 0.0  ;;  %v1061_v32 = vmax.f32 %v906_v43, 0.0  ;;  %v5859_v43 = vld [vmem:[%s9943_s5 + $0x130] sm:$0xf0]  ;;  %v5718_v26 = vor.u32 %v6179_v18, %v5715_v10 }
 0x1fc   :  { %v451_v25 = vpop.f32.mrf.mxu0 }
 0x1fd   :  { %v7329_v27 = vpack.c.bf16 %v1090_v3, %v1088_v61  ;;  %v452_v29 = vadd.f32 %v6885_v16, %v451_v25  ;;  %v5907_v16 = vld [vmem:[%s9943_s5 + $0x190] sm:$0xf0]  ;;  %v7360_v12 = vpack.c.bf16 %v1063_v59, %v1061_v32  ;;  %v6219_v61 = vld [vmem:[%s9943_s5 + $0x144] sm:$0xf]  ;;  %v5750_v3 = vor.u32 %v6187_v13, %v5747_v15 }
 0x1fe   :  { %v7341_v41 = vpop.f32.mrf.mxu2  ;;  %v5910_v2 = vor.u32 %v6227_v35, %v5907_v16  ;;  %v5878_v54 = vor.u32 %v6219_v61, %v5875_v53  ;;  %v5731_v35 = vld [vmem:[%s9943_s5 + $0x30] sm:$0xf0]  ;;  %v6215_v16 = vld [vmem:[%s9943_s5 + $0x124] sm:$0xf]  ;;  %v911_v13 = vadd.f32 %v7133_v4, %v7187_v58 }
 0x1ff   :  { %v547_v49 = vmax.f32 %v452_v29, 0.0  ;;  %10053 = vst [vmem:[#allocation29_spill] sm:$0xff] %v7360_v12  ;;  %1969 = vmatpush.bf16.msrb.mxu1 %v5750_v3  ;;  %v5734_v46 = vor.u32 %v6183_v34, %v5731_v35  ;;  %v5862_v59 = vor.u32 %v6215_v16, %v5859_v43  ;;  %v6211_v32 = vld [vmem:[%s9943_s5 + $0x104] sm:$0xf]  ;;  %v469_v34 = vpop.f32.mrf.mxu3 }
 0x200   :  { %v776_v52 = vpop.f32.mrf.mxu1  ;;  %2136 = vmatpush.bf16.msrb.mxu2 %v5910_v2 }
 0x201   :  { %v589_v19 = vpack.c.bf16 %v547_v49, %v546_v47  ;;  %v777_v25 = vadd.f32 %v776_v52, %v6971_v57  ;;  %v7391_v49 = vld [vmem:[#allocation5] ss:$0 sm:$0xff] }
 0x203   :  { %815 = vmatmul.bf16.gmra.mxu1 %v589_v19  ;;  %984 = vmatmul.bf16.gmra.mxu2 %v589_v19  ;;  %v1092_v47 = vmax.f32 %v777_v25, 0.0  ;;  %v1067_v25 = vmax.f32 %v913_v62, 0.0 }
 0x204   :  { %v454_v39 = vpop.f32.mrf.mxu0  ;;  %2137 = vmatpush.bf16.msrb.mxu2 %v5894_v51  ;;  %1970 = vmatpush.bf16.msrb.mxu1 %v5734_v46 }
 0x205   :  { %v455_v2 = vadd.f32 %v7391_v49, %v454_v39  ;;  %v5843_v39 = vld [vmem:[%s9943_s5 + $0x110] sm:$0xf0] }
 0x206   :  { %v7371_v23 = vpop.f32.mrf.mxu2  ;;  %v5846_v3 = vor.u32 %v6211_v32, %v5843_v39  ;;  %v916_v32 = vadd.f32 %v7173_v44, %v7187_v58 }
 0x207   :  { %1828 = vmatmul.bf16.gmra.mxu0 %v7360_v12  ;;  %v548_v15 = vmax.f32 %v455_v2, 0.0  ;;  %v471_v10 = vpop.f32.mrf.mxu3 }
 0x208   :  { %v778_v29 = vpop.f32.mrf.mxu1  ;;  %2138 = vmatpush.bf16.msrb.mxu2 %v5878_v54  ;;  %1971 = vmatpush.bf16.msrb.mxu1 %v5718_v26 }
 0x209   :  { %v779_v31 = vadd.f32 %v778_v29, %v6971_v57  ;;  %v1065_v29 = vmax.f32 %v911_v13, 0.0 }
 0x20b   :  { %v1094_v52 = vmax.f32 %v779_v31, 0.0  ;;  %v7415_v35 = vpack.c.bf16 %v1067_v25, %v1065_v29 }
 0x20c   :  { %v456_v19 = vpop.f32.mrf.mxu0  ;;  %2139 = vmatpush.bf16.msrb.mxu2 %v5862_v59 }
 0x20d   :  { %v7396_v33 = vpack.c.bf16 %v1094_v52, %v1092_v47  ;;  %v457_v7 = vadd.f32 %v7391_v49, %v456_v19  ;;  %10054 = vst [vmem:[#allocation30_spill] sm:$0xff] %v7415_v35  ;;  %v918_v19 = vadd.f32 %v7195_v5, %v7187_v58 }
 0x20e   :  { %v7408_v51 = vpop.f32.mrf.mxu2 }
 0x20f   :  { %v549_v61 = vmax.f32 %v457_v7, 0.0 }
 0x210   :  { %v781_v53 = vpop.f32.mrf.mxu1  ;;  %2140 = vmatpush.bf16.msrb.mxu2 %v5846_v3  ;;  %v1069_v3 = vmax.f32 %v916_v32, 0.0 }
 0x211   :  { %v590_v54 = vpack.c.bf16 %v549_v61, %v548_v15  ;;  %v782_v16 = vadd.f32 %v781_v53, %v6971_v57  ;;  %v1071_v15 = vmax.f32 %v918_v19, 0.0 }
 0x213   :  { %820 = vmatmul.bf16.gmra.mxu1 %v590_v54  ;;  %989 = vmatmul.bf16.gmra.mxu2 %v590_v54  ;;  %v1096_v47 = vmax.f32 %v782_v16, 0.0  ;;  %v7432_v5 = vpack.c.bf16 %v1071_v15, %v1069_v3 }
 0x214   :  { %v459_v31 = vpop.f32.mrf.mxu0 }
 0x215   :  { %v460_v2 = vadd.f32 %v7391_v49, %v459_v31  ;;  %10055 = vst [vmem:[#allocation31_spill] sm:$0xff] %v7432_v5  ;;  %v474_v31 = vpop.f32.mrf.mxu3 }
 0x216   :  { %v7417_v46 = vpop.f32.mrf.mxu2 }
 0x217   :  { %1833 = vmatmul.bf16.gmra.mxu0 %v7415_v35  ;;  %v550_v26 = vmax.f32 %v460_v2, 0.0  ;;  %v923_v2 = vadd.f32 %v7219_v60, %v7187_v58 }
 0x218   :  { %v783_v4 = vpop.f32.mrf.mxu1 }
 0x219   :  { %v784_v43 = vadd.f32 %v783_v4, %v6971_v57 }
 0x21b   :  { %v1098_v52 = vmax.f32 %v784_v43, 0.0 }
 0x21c   :  { %v461_v59 = vpop.f32.mrf.mxu0 }
 0x21d   :  { %v7425_v62 = vpack.c.bf16 %v1098_v52, %v1096_v47  ;;  %v462_v7 = vadd.f32 %v7391_v49, %v461_v59 }
 0x21e   :  { %v7428_v18 = vpop.f32.mrf.mxu2 }
 0x21f   :  { %v551_v39 = vmax.f32 %v462_v7, 0.0  ;;  %v921_v7 = vadd.f32 %v7201_v9, %v7187_v58 }
 0x220   :  { %v786_v13 = vpop.f32.mrf.mxu1 }
 0x221   :  { %v591_v61 = vpack.c.bf16 %v551_v39, %v550_v26  ;;  %v787_v54 = vadd.f32 %v786_v13, %v6971_v57  ;;  %v1075_v13 = vmax.f32 %v923_v2, 0.0  ;;  %v1073_v3 = vmax.f32 %v921_v7, 0.0 }
 0x222   :  { %v928_v7 = vadd.f32 %v7249_v21, %v7187_v58 }
 0x223   :  { %825 = vmatmul.bf16.gmra.mxu1 %v591_v61  ;;  %994 = vmatmul.bf16.gmra.mxu2 %v591_v61  ;;  %v1100_v16 = vmax.f32 %v787_v54, 0.0  ;;  %v476_v61 = vpop.f32.mrf.mxu3 }
 0x224   :  { %v464_v53 = vpop.f32.mrf.mxu0 }
 0x225   :  { %v465_v4 = vadd.f32 %v7391_v49, %v464_v53  ;;  %v7456_v53 = vpack.c.bf16 %v1075_v13, %v1073_v3  ;;  %v1079_v3 = vmax.f32 %v928_v7, 0.0  ;;  %v477_v7 = vadd.f32 %v7391_v49, %v476_v61 }
 0x226   :  { %v7434_v25 = vpop.f32.mrf.mxu2 }
 0x227   :  { %1838 = vmatmul.bf16.gmra.mxu0 %v7432_v5  ;;  %v552_v32 = vmax.f32 %v465_v4, 0.0  ;;  %10057 = vst [vmem:[#allocation33_spill] sm:$0xff] %v7456_v53 }
 0x228   :  { %v788_v29 = vpop.f32.mrf.mxu1 }
 0x229   :  { %v789_v44 = vadd.f32 %v788_v29, %v6971_v57 }
 0x22b   :  { %v1102_v43 = vmax.f32 %v789_v44, 0.0  ;;  %v470_v44 = vadd.f32 %v7391_v49, %v469_v34  ;;  %v926_v34 = vadd.f32 %v7225_v30, %v7187_v58 }
 0x22c   :  { %v466_v47 = vpop.f32.mrf.mxu0 }
 0x22d   :  { %v7442_v52 = vpack.c.bf16 %v1102_v43, %v1100_v16  ;;  %v467_v59 = vadd.f32 %v7391_v49, %v466_v47  ;;  %v472_v16 = vadd.f32 %v7391_v49, %v471_v10 }
 0x22e   :  { %v7445_v19 = vpop.f32.mrf.mxu2 }
 0x22f   :  { %v553_v26 = vmax.f32 %v467_v59, 0.0  ;;  %v479_v59 = vpop.f32.mrf.mxu3 }
 0x230   :  { %v791_v39 = vpop.f32.mrf.mxu1 }
 0x231   :  { %v7449_v15 = vpack.c.bf16 %v553_v26, %v552_v32  ;;  %v792_v9 = vadd.f32 %v791_v39, %v6971_v57  ;;  %v554_v32 = vmax.f32 %v470_v44, 0.0  ;;  %v555_v26 = vmax.f32 %v472_v16, 0.0 }
 0x233   :  { %830 = vmatmul.bf16.vlgmr.msrb.gmra.mxu3 %v7449_v15  ;;  %1972 = vmatmul.bf16.vlgmr.msrb.gmra.mxu1 %v6979_v6  ;;  %v1104_v43 = vmax.f32 %v792_v9, 0.0  ;;  %v1077_v9 = vmax.f32 %v926_v34, 0.0 }
 0x234   :  { %2141 = vmatmul.bf16.vlgmr.msrb.gmra.mxu2 %v7199_v20  ;;  %v7454_v60 = vpop.f32.mrf.mxu0 }
 0x235   :  { %10056 = vst [vmem:[#allocation32_spill] sm:$0xff] %v7454_v60  ;;  %v7482_v44 = vpack.c.bf16 %v1079_v3, %v1077_v9  ;;  %v933_v3 = vadd.f32 %v7279_v1, %v7187_v58 }
 0x236   :  { %v7458_v54 = vpop.f32.mrf.mxu2 }
 0x237   :  { %1843 = vmatmul.bf16.gmra.mxu0 %v7456_v53  ;;  %10060 = vst [vmem:[#allocation36_spill] sm:$0xff] %v7482_v44  ;;  %v1083_v60 = vmax.f32 %v933_v3, 0.0 }
 0x238   :  { %v793_v29 = vpop.f32.mrf.mxu1 }
 0x239   :  { %v794_v4 = vadd.f32 %v793_v29, %v6971_v57  ;;  %v7475_v29 = vpack.c.bf16 %v555_v26, %v554_v32 }
 0x23b   :  { %v1106_v47 = vmax.f32 %v794_v4, 0.0  ;;  %v481_v4 = vpop.f32.mrf.mxu3 }
 0x23c   :  { %v7465_v2 = vpop.f32.mrf.mxu0 }
 0x23d   :  { %10058 = vst [vmem:[#allocation34_spill] sm:$0xff] %v7465_v2  ;;  %v7469_v39 = vpack.c.bf16 %v1106_v47, %v1104_v43  ;;  %v475_v47 = vadd.f32 %v7391_v49, %v474_v31  ;;  %v931_v31 = vadd.f32 %v7261_v38, %v7187_v58 }
 0x23e   :  { %v7471_v13 = vpop.f32.mrf.mxu2 }
 0x23f   :  { %v556_v9 = vmax.f32 %v475_v47, 0.0 }
 0x240   :  { %v796_v10 = vpop.f32.mrf.mxu1 }
 0x241   :  { %v797_v30 = vadd.f32 %v796_v10, %v6971_v57 }
 0x243   :  { %835 = vmatmul.bf16.gmra.mxu3 %v7475_v29  ;;  %1977 = vmatmul.bf16.gmra.mxu1 %v6996_v28  ;;  %v1108_v26 = vmax.f32 %v797_v30, 0.0  ;;  %v484_v61 = vpop.f32.mrf.mxu3  ;;  %v1081_v30 = vmax.f32 %v931_v31, 0.0 }
 0x244   :  { %2146 = vmatmul.bf16.gmra.mxu2 %v7223_v55  ;;  %v7480_v21 = vpop.f32.mrf.mxu0 }
 0x245   :  { %10059 = vst [vmem:[#allocation35_spill] sm:$0xff] %v7480_v21  ;;  %v557_v21 = vmax.f32 %v477_v7, 0.0  ;;  %v7508_v47 = vpack.c.bf16 %v1083_v60, %v1081_v30  ;;  %v938_v60 = vadd.f32 %v7303_v24, %v7187_v58 }
 0x246   :  { %v7484_v16 = vpop.f32.mrf.mxu2 }
 0x247   :  { %1848 = vmatmul.bf16.gmra.mxu0 %v7482_v44  ;;  %10063 = vst [vmem:[#allocation39_spill] sm:$0xff] %v7508_v47 }
 0x248   :  { %v798_v43 = vpop.f32.mrf.mxu1 }
 0x249   :  { %v799_v32 = vadd.f32 %v798_v43, %v6971_v57  ;;  %v7501_v43 = vpack.c.bf16 %v557_v21, %v556_v9  ;;  %v480_v21 = vadd.f32 %v7391_v49, %v479_v59  ;;  %v936_v59 = vadd.f32 %v7285_v17, %v7187_v58 }
 0x24b   :  { %v1110_v34 = vmax.f32 %v799_v32, 0.0  ;;  %v486_v3 = vpop.f32.mrf.mxu3  ;;  %v558_v30 = vmax.f32 %v480_v21, 0.0 }
 0x24c   :  { %v7491_v55 = vpop.f32.mrf.mxu0 }
 0x24d   :  { %10061 = vst [vmem:[#allocation37_spill] sm:$0xff] %v7491_v55  ;;  %v7495_v20 = vpack.c.bf16 %v1110_v34, %v1108_v26  ;;  %v482_v26 = vadd.f32 %v7391_v49, %v481_v4 }
 0x24e   :  { %v7497_v10 = vpop.f32.mrf.mxu2 }
 0x250   :  { %v801_v2 = vpop.f32.mrf.mxu1 }
 0x251   :  { %v802_v38 = vadd.f32 %v801_v2, %v6971_v57 }
 0x253   :  { %840 = vmatmul.bf16.gmra.mxu3 %v7501_v43  ;;  %1982 = vmatmul.bf16.gmra.mxu1 %v7013_v50  ;;  %v1112_v9 = vmax.f32 %v802_v38, 0.0  ;;  %v1087_v50 = vmax.f32 %v938_v60, 0.0  ;;  %v1085_v38 = vmax.f32 %v936_v59, 0.0  ;;  %v489_v21 = vpop.f32.mrf.mxu3 }
 0x254   :  { %2151 = vmatmul.bf16.gmra.mxu2 %v7259_v37  ;;  %v7506_v1 = vpop.f32.mrf.mxu0 }
 0x255   :  { %10062 = vst [vmem:[#allocation38_spill] sm:$0xff] %v7506_v1  ;;  %v559_v1 = vmax.f32 %v482_v26, 0.0  ;;  %v7534_v26 = vpack.c.bf16 %v1087_v50, %v1085_v38  ;;  %v943_v50 = vadd.f32 %v7341_v41, %v7187_v58 }
 0x256   :  { %v7510_v7 = vpop.f32.mrf.mxu2 }
 0x257   :  { %1853 = vmatmul.bf16.gmra.mxu0 %v7508_v47  ;;  %10067 = vst [vmem:[#allocation43_spill] sm:$0xff] %v7534_v26 }
 0x258   :  { %v803_v32 = vpop.f32.mrf.mxu1 }
 0x259   :  { %v804_v34 = vadd.f32 %v803_v32, %v6971_v57  ;;  %v7527_v32 = vpack.c.bf16 %v559_v1, %v558_v30 }
 0x25b   :  { %v1114_v31 = vmax.f32 %v804_v34, 0.0 }
 0x25c   :  { %v7517_v37 = vpop.f32.mrf.mxu0 }
 0x25d   :  { %10064 = vst [vmem:[#allocation40_spill] sm:$0xff] %v7517_v37  ;;  %v7521_v2 = vpack.c.bf16 %v1114_v31, %v1112_v9  ;;  %v485_v9 = vadd.f32 %v7391_v49, %v484_v61  ;;  %v487_v31 = vadd.f32 %v7391_v49, %v486_v3  ;;  %v941_v61 = vadd.f32 %v7309_v56, %v7187_v58 }
 0x25e   :  { %v7523_v55 = vpop.f32.mrf.mxu2 }
 0x25f   :  { %10065 = vst [vmem:[#allocation41_spill] sm:$0xff] %v7521_v2  ;;  %v560_v38 = vmax.f32 %v485_v9, 0.0  ;;  %v1091_v2 = vmax.f32 %v943_v50, 0.0 }
 0x260   :  { %v806_v4 = vpop.f32.mrf.mxu1 }
 0x261   :  { %v807_v17 = vadd.f32 %v806_v4, %v6971_v57 }
 0x263   :  { %845 = vmatmul.bf16.gmra.mxu3 %v7527_v32  ;;  %1987 = vmatmul.bf16.gmra.mxu1 %v7030_v14  ;;  %v1116_v30 = vmax.f32 %v807_v17, 0.0  ;;  %v491_v14 = vpop.f32.mrf.mxu3  ;;  %v1089_v17 = vmax.f32 %v941_v61, 0.0 }
 0x264   :  { %2156 = vmatmul.bf16.gmra.mxu2 %v7283_v45  ;;  %v7532_v24 = vpop.f32.mrf.mxu0 }
 0x265   :  { %10066 = vst [vmem:[#allocation42_spill] sm:$0xff] %v7532_v24  ;;  %v561_v24 = vmax.f32 %v487_v31, 0.0  ;;  %v7560_v9 = vpack.c.bf16 %v1091_v2, %v1089_v17  ;;  %v948_v2 = vadd.f32 %v7408_v51, %v7187_v58 }
 0x266   :  { %v7536_v34 = vpop.f32.mrf.mxu2 }
 0x267   :  { %1858 = vmatmul.bf16.gmra.mxu0 %v7534_v26  ;;  %10071 = vst [vmem:[#allocation47_spill] sm:$0xff] %v7560_v9 }
 0x268   :  { %v808_v1 = vpop.f32.mrf.mxu1 }
 0x269   :  { %v809_v60 = vadd.f32 %v808_v1, %v6971_v57  ;;  %v7553_v1 = vpack.c.bf16 %v561_v24, %v560_v38 }
 0x26b   :  { %v1118_v59 = vmax.f32 %v809_v60, 0.0  ;;  %v494_v24 = vpop.f32.mrf.mxu3 }
 0x26c   :  { %v7543_v45 = vpop.f32.mrf.mxu0 }
 0x26d   :  { %10068 = vst [vmem:[#allocation44_spill] sm:$0xff] %v7543_v45  ;;  %v7547_v37 = vpack.c.bf16 %v1118_v59, %v1116_v30  ;;  %v490_v30 = vadd.f32 %v7391_v49, %v489_v21  ;;  %v492_v59 = vadd.f32 %v7391_v49, %v491_v14  ;;  %v946_v21 = vadd.f32 %v7371_v23, %v7187_v58 }
 0x26e   :  { %v7549_v4 = vpop.f32.mrf.mxu2  ;;  %v1095_v14 = vmax.f32 %v948_v2, 0.0 }
 0x26f   :  { %10069 = vst [vmem:[#allocation45_spill] sm:$0xff] %v7547_v37  ;;  %v562_v17 = vmax.f32 %v490_v30, 0.0 }
 0x270   :  { %v811_v3 = vpop.f32.mrf.mxu1 }
 0x271   :  { %v812_v60 = vadd.f32 %v811_v3, %v6971_v57 }
 0x273   :  { %850 = vmatmul.bf16.gmra.mxu3 %v7553_v1  ;;  %1992 = vmatmul.bf16.gmra.mxu1 %v7059_v48  ;;  %v1120_v38 = vmax.f32 %v812_v60, 0.0  ;;  %v496_v60 = vpop.f32.mrf.mxu3 }
 0x274   :  { %2161 = vmatmul.bf16.gmra.mxu2 %v7307_v8  ;;  %v7558_v41 = vpop.f32.mrf.mxu0 }
 0x275   :  { %10070 = vst [vmem:[#allocation46_spill] sm:$0xff] %v7558_v41  ;;  %v563_v41 = vmax.f32 %v492_v59, 0.0 }
 0x276   :  { %v7562_v31 = vpop.f32.mrf.mxu2 }
 0x277   :  { %1863 = vmatmul.bf16.gmra.mxu0 %v7560_v9  ;;  %v7579_v37 = vpack.c.bf16 %v563_v41, %v562_v17 }
 0x278   :  { %v813_v56 = vpop.f32.mrf.mxu1 }
 0x279   :  { %v814_v50 = vadd.f32 %v813_v56, %v6971_v57  ;;  %v1093_v56 = vmax.f32 %v946_v21, 0.0 }
 0x27b   :  { %v1122_v61 = vmax.f32 %v814_v50, 0.0  ;;  %v7586_v30 = vpack.c.bf16 %v1095_v14, %v1093_v56  ;;  %v495_v50 = vadd.f32 %v7391_v49, %v494_v24  ;;  %v499_v21 = vpop.f32.mrf.mxu3  ;;  %v953_v14 = vadd.f32 %v7428_v18, %v7187_v58  ;;  %v5825_v18 = vld [vmem:[%s9943_s5 + $0xe0] sm:$0xf] }
 0x27c   :  { %v7569_v8 = vpop.f32.mrf.mxu0  ;;  %v951_v24 = vadd.f32 %v7417_v46, %v7187_v58 }
 0x27d   :  { %10072 = vst [vmem:[#allocation48_spill] sm:$0xff] %v7569_v8  ;;  %v7573_v3 = vpack.c.bf16 %v1122_v61, %v1120_v38  ;;  %v497_v38 = vadd.f32 %v7391_v49, %v496_v60  ;;  %v564_v56 = vmax.f32 %v495_v50, 0.0  ;;  %v6209_v50 = vld [vmem:[%s9943_s5 + $0xec] sm:$0xf0] }
 0x27e   :  { %v7575_v45 = vpop.f32.mrf.mxu2  ;;  %10074 = vst [vmem:[#allocation50_spill] sm:$0xff] %v7586_v30 }
 0x280   :  { %v816_v48 = vpop.f32.mrf.mxu1 }
 0x281   :  { %v817_v23 = vadd.f32 %v816_v48, %v6971_v57 }
 0x283   :  { %855 = vmatmul.bf16.gmra.mxu3 %v7579_v37  ;;  %1997 = vmatmul.bf16.gmra.mxu1 %v7108_v40  ;;  %v1124_v2 = vmax.f32 %v817_v23, 0.0  ;;  %v1099_v40 = vmax.f32 %v953_v14, 0.0  ;;  %v1097_v23 = vmax.f32 %v951_v24, 0.0 }
 0x284   :  { %2166 = vmatmul.bf16.gmra.mxu2 %v7360_v12  ;;  %v7584_v51 = vpop.f32.mrf.mxu0 }
 0x285   :  { %10073 = vst [vmem:[#allocation49_spill] sm:$0xff] %v7584_v51  ;;  %v565_v51 = vmax.f32 %v497_v38, 0.0  ;;  %v5826_v38 = vor.u32 %v6209_v50, %v5825_v18 }
 0x286   :  { %v7588_v59 = vpop.f32.mrf.mxu2 }
 0x287   :  { %1868 = vmatmul.bf16.gmra.mxu0 %v7586_v30  ;;  %1626 = vmatpush.bf16.msrb.mxu3 %v5826_v38 }
 0x288   :  { %v818_v41 = vpop.f32.mrf.mxu1 }
 0x289   :  { %v819_v61 = vadd.f32 %v818_v41, %v6971_v57  ;;  %v7605_v41 = vpack.c.bf16 %v565_v51, %v564_v56  ;;  %v7618_v51 = vpack.c.bf16 %v1099_v40, %v1097_v23  ;;  %v500_v56 = vadd.f32 %v7391_v49, %v499_v21 }
 0x28a   :  { %v958_v40 = vadd.f32 %v7445_v19, %v7187_v58  ;;  %v956_v21 = vadd.f32 %v7434_v25, %v7187_v58  ;;  %v6205_v25 = vld [vmem:[%s9943_s5 + $0xcc] sm:$0xf0] }
 0x28b   :  { %v1126_v17 = vmax.f32 %v819_v61, 0.0  ;;  %10077 = vst [vmem:[#allocation53_spill] sm:$0xff] %v7618_v51  ;;  %v501_v61 = vpop.f32.mrf.mxu3  ;;  %v566_v23 = vmax.f32 %v500_v56, 0.0 }
 0x28c   :  { %v7595_v12 = vpop.f32.mrf.mxu0  ;;  %v502_v24 = vadd.f32 %v7391_v49, %v501_v61  ;;  %v1103_v49 = vmax.f32 %v958_v40, 0.0 }
 0x28d   :  { %10075 = vst [vmem:[#allocation51_spill] sm:$0xff] %v7595_v12  ;;  %v7599_v48 = vpack.c.bf16 %v1126_v17, %v1124_v2 }
 0x28e   :  { %v7601_v8 = vpop.f32.mrf.mxu2  ;;  %v567_v50 = vmax.f32 %v502_v24, 0.0 }
 0x290   :  { %v821_v60 = vpop.f32.mrf.mxu1  ;;  %v7637_v61 = vpack.c.bf16 %v567_v50, %v566_v23 }
 0x291   :  { %v822_v17 = vadd.f32 %v821_v60, %v6971_v57 }
 0x293   :  { %860 = vmatmul.bf16.gmra.mxu3 %v7605_v41  ;;  %2002 = vmatmul.bf16.gmra.mxu1 %v7148_v22  ;;  %v1128_v12 = vmax.f32 %v822_v17, 0.0  ;;  %v1101_v17 = vmax.f32 %v956_v21, 0.0 }
 0x294   :  { %2171 = vmatmul.bf16.gmra.mxu2 %v7415_v35  ;;  %v7616_v46 = vpop.f32.mrf.mxu0 }
 0x295   :  { %10076 = vst [vmem:[#allocation52_spill] sm:$0xff] %v7616_v46  ;;  %v7650_v19 = vpack.c.bf16 %v1103_v49, %v1101_v17 }
 0x296   :  { %v7620_v2 = vpop.f32.mrf.mxu2 }
 0x297   :  { %1873 = vmatmul.bf16.gmra.mxu0 %v7618_v51  ;;  %10081 = vst [vmem:[#allocation57_spill] sm:$0xff] %v7650_v19 }
 0x298   :  { %v823_v14 = vpop.f32.mrf.mxu1 }
 0x299   :  { %v824_v35 = vadd.f32 %v823_v14, %v6971_v57 }
 0x29b   :  { %v1130_v46 = vmax.f32 %v824_v35, 0.0 }
 0x29c   :  { %v7627_v18 = vpop.f32.mrf.mxu0 }
 0x29d   :  { %10078 = vst [vmem:[#allocation54_spill] sm:$0xff] %v7627_v18  ;;  %v7631_v38 = vpack.c.bf16 %v1130_v46, %v1128_v12  ;;  %v5809_v12 = vld [vmem:[%s9943_s5 + $0xc0] sm:$0xf]  ;;  %v968_v18 = vadd.f32 %v7497_v10, %v7187_v58 }
 0x29e   :  { %v7633_v60 = vpop.f32.mrf.mxu2  ;;  %v5810_v46 = vor.u32 %v6205_v25, %v5809_v12  ;;  %v1296_v12 = vld [vmem:[%s9944_s6] sm:$0xf] }
 0x29f   :  { %10079 = vst [vmem:[#allocation55_spill] sm:$0xff] %v7631_v38 }
 0x2a0   :  { %v826_v22 = vpop.f32.mrf.mxu1  ;;  %1627 = vmatpush.bf16.msrb.mxu3 %v5810_v46 }
 0x2a1   :  { %v827_v56 = vadd.f32 %v826_v22, %v6971_v57  ;;  %v961_v22 = vadd.f32 %v7458_v54, %v7187_v58  ;;  %v6201_v54 = vld [vmem:[%s9943_s5 + $0xac] sm:$0xf0] }
 0x2a3   :  { %865 = vmatmul.bf16.gmra.mxu3 %v7637_v61  ;;  %2007 = vmatmul.bf16.gmra.mxu1 %v7192_v0  ;;  %v1132_v23 = vmax.f32 %v827_v56, 0.0  ;;  %v7670_v56 = vperm.slane %v1296_v12, 1 }
 0x2a4   :  { %2176 = vmatmul.bf16.gmra.mxu2 %v7432_v5  ;;  %v7642_v35 = vpop.f32.mrf.mxu0  ;;  %v963_v5 = vadd.f32 %v7471_v13, %v7187_v58  ;;  %v5793_v13 = vld [vmem:[%s9943_s5 + $0xa0] sm:$0xf] }
 0x2a5   :  { %10080 = vst [vmem:[#allocation56_spill] sm:$0xff] %v7642_v35 }
 0x2a6   :  { %v7652_v14 = vpop.f32.mrf.mxu2  ;;  %v1107_v46 = vmax.f32 %v963_v5, 0.0  ;;  %v5794_v5 = vor.u32 %v6201_v54, %v5793_v13 }
 0x2a7   :  { %1878 = vmatmul.bf16.gmra.mxu0 %v7650_v19 }
 0x2a8   :  { %v828_v24 = vpop.f32.mrf.mxu1  ;;  %1628 = vmatpush.bf16.msrb.mxu3 %v5794_v5 }
 0x2a9   :  { %v829_v40 = vadd.f32 %v828_v24, %v6971_v57  ;;  %v1105_v24 = vmax.f32 %v961_v22, 0.0 }
 0x2ab   :  { %v1134_v50 = vmax.f32 %v829_v40, 0.0 }
 0x2ac   :  { %v7657_v21 = vpop.f32.mrf.mxu0 }
 0x2ad   :  { %10082 = vst [vmem:[#allocation58_spill] sm:$0xff] %v7657_v21  ;;  %v7661_v49 = vpack.c.bf16 %v1134_v50, %v1132_v23  ;;  %v7683_v23 = vpack.c.bf16 %v1107_v46, %v1105_v24 }
 0x2ae   :  { %v7663_v17 = vpop.f32.mrf.mxu2 }
 0x2af   :  { %10083 = vst [vmem:[#allocation59_spill] sm:$0xff] %v7661_v49 }
 0x2b0   :  { %v1973_v25 = vpop.f32.mrf.mxu1  ;;  %10085 = vst [vmem:[#allocation61_spill] sm:$0xff] %v7683_v23 }
 0x2b1   :  { %v1974_v50 = vadd.f32 %v1973_v25, %v7670_v56  ;;  %v966_v25 = vadd.f32 %v7484_v16, %v7187_v58  ;;  %v5777_v16 = vld [vmem:[%s9943_s5 + $0x80] sm:$0xf] }
 0x2b3   :  { %999 = vmatmul.bf16.vlgmr.msra.gmra.mxu3 %v7449_v15  ;;  %2012 = vmatmul.bf16.gmra.mxu1 %v7216_v36  ;;  %v1109_v0 = vmax.f32 %v966_v25, 0.0 }
 0x2b4   :  { %2181 = vmatmul.bf16.gmra.mxu2 %v7456_v53  ;;  %v7681_v40 = vpop.f32.mrf.mxu0 }
 0x2b5   :  { %10084 = vst [vmem:[#allocation60_spill] sm:$0xff] %v7681_v40 }
 0x2b6   :  { %v831_v15 = vpop.f32.mrf.mxu3 }
 0x2b7   :  { %v2142_v22 = vpop.f32.mrf.mxu2  ;;  %1883 = vmatmul.bf16.gmra.mxu0 %v7683_v23  ;;  %v832_v53 = vadd.f32 %v831_v15, %v6971_v57 }
 0x2b8   :  { %v2143_v12 = vadd.f32 %v2142_v22, %v1974_v50  ;;  %v1975_v21 = vpop.f32.mrf.mxu1  ;;  %v1111_v50 = vmax.f32 %v968_v18, 0.0 }
 0x2b9   :  { %v1976_v13 = vadd.f32 %v1975_v21, %v7670_v56  ;;  %v1136_v22 = vmax.f32 %v832_v53, 0.0  ;;  %v6197_v21 = vld [vmem:[%s9943_s5 + $0x8c] sm:$0xf0] }
 0x2ba   :  { %v7711_v15 = vpack.c.bf16 %v1111_v50, %v1109_v0 }
 0x2bc   :  { %v7687_v35 = vpop.f32.mrf.mxu0  ;;  %10089 = vst [vmem:[#allocation65_spill] sm:$0xff] %v7711_v15 }
 0x2bd   :  { %10086 = vst [vmem:[#allocation62_spill] sm:$0xff] %v7687_v35  ;;  %v2979_v35 = vmax.f32 %v2143_v12, 0.0 }
 0x2be   :  { %v833_v46 = vpop.f32.mrf.mxu3 }
 0x2bf   :  { %v834_v24 = vadd.f32 %v833_v46, %v6971_v57  ;;  %v2144_v54 = vpop.f32.mrf.mxu2 }
 0x2c0   :  { %v2145_v5 = vadd.f32 %v2144_v54, %v1976_v13  ;;  %v1978_v40 = vpop.f32.mrf.mxu1 }
 0x2c1   :  { %v1138_v36 = vmax.f32 %v834_v24, 0.0 }
 0x2c2   :  { %v2983_v49 = vmax.f32 %v2145_v5, 0.0 }
 0x2c3   :  { %v7696_v10 = vpack.c.bf16 %v1138_v36, %v1136_v22  ;;  %1004 = vmatmul.bf16.gmra.mxu3 %v7475_v29  ;;  %2017 = vmatmul.bf16.gmra.mxu1 %v7240_v11  ;;  %v5778_v36 = vor.u32 %v6197_v21, %v5777_v16  ;;  %v1979_v29 = vadd.f32 %v1978_v40, %v7670_v56 }
 0x2c4   :  { %v7706_v18 = vpack.c.bf16 %v2983_v49, %v2979_v35  ;;  %2186 = vmatmul.bf16.gmra.mxu2 %v7482_v44  ;;  %v7709_v53 = vpop.f32.mrf.mxu0  ;;  %v973_v35 = vadd.f32 %v7523_v55, %v7187_v58  ;;  %v971_v40 = vadd.f32 %v7510_v7, %v7187_v58  ;;  %v5761_v7 = vld [vmem:[%s9943_s5 + $0x60] sm:$0xf] }
 0x2c5   :  { %10087 = vst [vmem:[#allocation63_spill] sm:$0xff] %v7696_v10  ;;  %1629 = vmatpush.bf16.msrb.mxu3 %v5778_v36 }
 0x2c6   :  { %10088 = vst [vmem:[#allocation64_spill] sm:$0xff] %v7706_v18  ;;  %v836_v12 = vpop.f32.mrf.mxu3  ;;  %v1115_v21 = vmax.f32 %v973_v35, 0.0  ;;  %v1113_v44 = vmax.f32 %v971_v40, 0.0 }
 0x2c7   :  { %v2147_v13 = vpop.f32.mrf.mxu2  ;;  %1888 = vmatmul.bf16.gmra.mxu0 %v7711_v15  ;;  %v837_v49 = vadd.f32 %v836_v12, %v6971_v57  ;;  %v6193_v12 = vld [vmem:[%s9943_s5 + $0x6c] sm:$0xf0] }
 0x2c8   :  { %v2148_v46 = vadd.f32 %v2147_v13, %v1979_v29  ;;  %v1980_v25 = vpop.f32.mrf.mxu1 }
 0x2c9   :  { %v1981_v54 = vadd.f32 %v1980_v25, %v7670_v56  ;;  %v1140_v36 = vmax.f32 %v837_v49, 0.0  ;;  %v7739_v49 = vpack.c.bf16 %v1115_v21, %v1113_v44 }
 0x2ca   :  { %v2987_v13 = vmax.f32 %v2148_v46, 0.0  ;;  %v5762_v46 = vor.u32 %v6193_v12, %v5761_v7 }
 0x2cb   :  { %10091 = vst [vmem:[#allocation67_spill] sm:$0xff] %v7739_v49 }
 0x2cc   :  { %v7715_v24 = vpop.f32.mrf.mxu0  ;;  %1630 = vmatpush.bf16.msrb.mxu3 %v5762_v46 }
 0x2ce   :  { %v838_v0 = vpop.f32.mrf.mxu3 }
 0x2cf   :  { %v839_v5 = vadd.f32 %v838_v0, %v6971_v57  ;;  %v2149_v50 = vpop.f32.mrf.mxu2 }
 0x2d0   :  { %v2150_v22 = vadd.f32 %v2149_v50, %v1981_v54  ;;  %v1983_v16 = vpop.f32.mrf.mxu1 }
 0x2d1   :  { %v1142_v29 = vmax.f32 %v839_v5, 0.0 }
 0x2d2   :  { %v2991_v18 = vmax.f32 %v2150_v22, 0.0  ;;  %v978_v22 = vadd.f32 %v7549_v4, %v7187_v58 }
 0x2d3   :  { %v7724_v55 = vpack.c.bf16 %v1142_v29, %v1140_v36  ;;  %1009 = vmatmul.bf16.gmra.mxu3 %v7501_v43  ;;  %2022 = vmatmul.bf16.gmra.mxu1 %v7276_v63  ;;  %v1984_v43 = vadd.f32 %v1983_v16, %v7670_v56  ;;  %v976_v16 = vadd.f32 %v7536_v34, %v7187_v58  ;;  %v5745_v34 = vld [vmem:[%s9943_s5 + $0x40] sm:$0xf] }
 0x2d4   :  { %2191 = vmatmul.bf16.gmra.mxu2 %v7508_v47  ;;  %v7735_v25 = vpop.f32.mrf.mxu0  ;;  %v7737_v35 = vpack.c.bf16 %v2991_v18, %v2987_v13  ;;  %v1119_v12 = vmax.f32 %v978_v22, 0.0 }
 0x2d5   :  { %v1117_v47 = vmax.f32 %v976_v16, 0.0 }
 0x2d6   :  { %10090 = vst [vmem:[#allocation66_spill] sm:$0xff] %v7737_v35  ;;  %v841_v54 = vpop.f32.mrf.mxu3 }
 0x2d7   :  { %v2152_v0 = vpop.f32.mrf.mxu2  ;;  %1893 = vmatmul.bf16.gmra.mxu0 %v7739_v49  ;;  %v842_v36 = vadd.f32 %v841_v54, %v6971_v57  ;;  %v6189_v54 = vld [vmem:[%s9943_s5 + $0x4c] sm:$0xf0] }
 0x2d8   :  { %v2153_v40 = vadd.f32 %v2152_v0, %v1984_v43  ;;  %v1985_v5 = vpop.f32.mrf.mxu1 }
 0x2d9   :  { %v1986_v18 = vadd.f32 %v1985_v5, %v7670_v56  ;;  %v1144_v46 = vmax.f32 %v842_v36, 0.0  ;;  %v7767_v36 = vpack.c.bf16 %v1119_v12, %v1117_v47 }
 0x2da   :  { %v2995_v0 = vmax.f32 %v2153_v40, 0.0  ;;  %v5746_v40 = vor.u32 %v6189_v54, %v5745_v34 }
 0x2db   :  { %10094 = vst [vmem:[#allocation70_spill] sm:$0xff] %v7767_v36 }
 0x2dc   :  { %v7743_v50 = vpop.f32.mrf.mxu0  ;;  %1631 = vmatpush.bf16.msrb.mxu3 %v5746_v40 }
 0x2de   :  { %v843_v44 = vpop.f32.mrf.mxu3 }
 0x2df   :  { %v844_v21 = vadd.f32 %v843_v44, %v6971_v57  ;;  %v2154_v29 = vpop.f32.mrf.mxu2 }
 0x2e0   :  { %v2155_v13 = vadd.f32 %v2154_v29, %v1986_v18  ;;  %v1988_v7 = vpop.f32.mrf.mxu1 }
 0x2e1   :  { %v1146_v43 = vmax.f32 %v844_v21, 0.0 }
 0x2e2   :  { %v2999_v35 = vmax.f32 %v2155_v13, 0.0  ;;  %v983_v13 = vadd.f32 %v7575_v45, %v7187_v58 }
 0x2e3   :  { %v7752_v4 = vpack.c.bf16 %v1146_v43, %v1144_v46  ;;  %1014 = vmatmul.bf16.gmra.mxu3 %v7527_v32  ;;  %2027 = vmatmul.bf16.gmra.mxu1 %v7300_v42  ;;  %v1989_v32 = vadd.f32 %v1988_v7, %v7670_v56  ;;  %v981_v7 = vadd.f32 %v7562_v31, %v7187_v58  ;;  %v5729_v31 = vld [vmem:[%s9943_s5 + $0x20] sm:$0xf] }
 0x2e4   :  { %2196 = vmatmul.bf16.gmra.mxu2 %v7534_v26  ;;  %v7763_v5 = vpop.f32.mrf.mxu0  ;;  %v7765_v22 = vpack.c.bf16 %v2999_v35, %v2995_v0  ;;  %v1123_v54 = vmax.f32 %v983_v13, 0.0 }
 0x2e5   :  { %10092 = vst [vmem:[#allocation68_spill] sm:$0xff] %v7752_v4  ;;  %v1121_v26 = vmax.f32 %v981_v7, 0.0 }
 0x2e6   :  { %10093 = vst [vmem:[#allocation69_spill] sm:$0xff] %v7765_v22  ;;  %v846_v18 = vpop.f32.mrf.mxu3 }
 0x2e7   :  { %v2157_v44 = vpop.f32.mrf.mxu2  ;;  %1898 = vmatmul.bf16.gmra.mxu0 %v7767_v36  ;;  %v847_v46 = vadd.f32 %v846_v18, %v6971_v57  ;;  %v6185_v18 = vld [vmem:[%s9943_s5 + $0x2c] sm:$0xf0] }
 0x2e8   :  { %v2158_v16 = vadd.f32 %v2157_v44, %v1989_v32  ;;  %v1990_v21 = vpop.f32.mrf.mxu1 }
 0x2e9   :  { %v1991_v35 = vadd.f32 %v1990_v21, %v7670_v56  ;;  %v1148_v40 = vmax.f32 %v847_v46, 0.0  ;;  %v7795_v46 = vpack.c.bf16 %v1123_v54, %v1121_v26 }
 0x2ea   :  { %v3003_v44 = vmax.f32 %v2158_v16, 0.0  ;;  %v5730_v16 = vor.u32 %v6185_v18, %v5729_v31 }
 0x2eb   :  { %10096 = vst [vmem:[#allocation72_spill] sm:$0xff] %v7795_v46 }
 0x2ec   :  { %v7771_v29 = vpop.f32.mrf.mxu0  ;;  %1632 = vmatpush.bf16.msrb.mxu3 %v5730_v16 }
 0x2ee   :  { %v848_v47 = vpop.f32.mrf.mxu3 }
 0x2ef   :  { %v849_v12 = vadd.f32 %v848_v47, %v6971_v57  ;;  %v2159_v43 = vpop.f32.mrf.mxu2 }
 0x2f0   :  { %v2160_v0 = vadd.f32 %v2159_v43, %v1991_v35  ;;  %v1993_v34 = vpop.f32.mrf.mxu1 }
 0x2f1   :  { %v1150_v32 = vmax.f32 %v849_v12, 0.0 }
 0x2f2   :  { %v3007_v22 = vmax.f32 %v2160_v0, 0.0  ;;  %v988_v0 = vadd.f32 %v7601_v8, %v7187_v58 }
 0x2f3   :  { %v7780_v45 = vpack.c.bf16 %v1150_v32, %v1148_v40  ;;  %1019 = vmatmul.bf16.gmra.mxu3 %v7553_v1  ;;  %2032 = vmatmul.bf16.gmra.mxu1 %v7329_v27  ;;  %v1994_v1 = vadd.f32 %v1993_v34, %v7670_v56  ;;  %v986_v34 = vadd.f32 %v7588_v59, %v7187_v58  ;;  %v5713_v59 = vld [vmem:[%s9943_s5] sm:$0xf] }
 0x2f4   :  { %2201 = vmatmul.bf16.gmra.mxu2 %v7560_v9  ;;  %v7791_v21 = vpop.f32.mrf.mxu0  ;;  %v7793_v13 = vpack.c.bf16 %v3007_v22, %v3003_v44  ;;  %v1127_v18 = vmax.f32 %v988_v0, 0.0 }
 0x2f5   :  { %v1125_v9 = vmax.f32 %v986_v34, 0.0 }
 0x2f6   :  { %10095 = vst [vmem:[#allocation71_spill] sm:$0xff] %v7793_v13  ;;  %v851_v35 = vpop.f32.mrf.mxu3 }
 0x2f7   :  { %v2162_v47 = vpop.f32.mrf.mxu2  ;;  %1903 = vmatmul.bf16.gmra.mxu0 %v7795_v46  ;;  %v852_v40 = vadd.f32 %v851_v35, %v6971_v57  ;;  %v6181_v35 = vld [vmem:[%s9943_s5 + $0xc] sm:$0xf0] }
 0x2f8   :  { %v2163_v7 = vadd.f32 %v2162_v47, %v1994_v1  ;;  %v1995_v12 = vpop.f32.mrf.mxu1 }
 0x2f9   :  { %v1996_v22 = vadd.f32 %v1995_v12, %v7670_v56  ;;  %v1152_v16 = vmax.f32 %v852_v40, 0.0  ;;  %v7823_v40 = vpack.c.bf16 %v1127_v18, %v1125_v9 }
 0x2fa   :  { %v3011_v47 = vmax.f32 %v2163_v7, 0.0  ;;  %v5714_v7 = vor.u32 %v6181_v35, %v5713_v59 }
 0x2fb   :  { %10098 = vst [vmem:[#allocation74_spill] sm:$0xff] %v7823_v40 }
 0x2fc   :  { %v7799_v43 = vpop.f32.mrf.mxu0  ;;  %1633 = vmatpush.bf16.msrb.mxu3 %v5714_v7 }
 0x2fe   :  { %v853_v26 = vpop.f32.mrf.mxu3 }
 0x2ff   :  { %v854_v54 = vadd.f32 %v853_v26, %v6971_v57  ;;  %v2164_v32 = vpop.f32.mrf.mxu2 }
 0x300   :  { %v2165_v44 = vadd.f32 %v2164_v32, %v1996_v22  ;;  %v1998_v31 = vpop.f32.mrf.mxu1 }
 0x301   :  { %v1154_v1 = vmax.f32 %v854_v54, 0.0 }
 0x302   :  { %v3015_v13 = vmax.f32 %v2165_v44, 0.0  ;;  %v993_v44 = vadd.f32 %v7633_v60, %v7187_v58 }
 0x303   :  { %v7808_v8 = vpack.c.bf16 %v1154_v1, %v1152_v16  ;;  %1024 = vmatmul.bf16.gmra.mxu3 %v7579_v37  ;;  %2037 = vmatmul.bf16.gmra.mxu1 %v7396_v33  ;;  %v1999_v37 = vadd.f32 %v1998_v31, %v7670_v56  ;;  %v991_v31 = vadd.f32 %v7620_v2, %v7187_v58 }
 0x304   :  { %2206 = vmatmul.bf16.gmra.mxu2 %v7586_v30  ;;  %v7819_v12 = vpop.f32.mrf.mxu0  ;;  %v7821_v0 = vpack.c.bf16 %v3015_v13, %v3011_v47  ;;  %v1131_v35 = vmax.f32 %v993_v44, 0.0 }
 0x305   :  { %v1129_v30 = vmax.f32 %v991_v31, 0.0 }
 0x306   :  { %10097 = vst [vmem:[#allocation73_spill] sm:$0xff] %v7821_v0  ;;  %v856_v22 = vpop.f32.mrf.mxu3 }
 0x307   :  { %v2167_v26 = vpop.f32.mrf.mxu2  ;;  %1908 = vmatmul.bf16.gmra.mxu0 %v7823_v40  ;;  %v857_v16 = vadd.f32 %v856_v22, %v6971_v57  ;;  %v5833_v22 = vld [vmem:[%s9943_s5 + $0xe8] sm:$0xf]  ;;  %v7851_v44 = vpack.c.bf16 %v1131_v35, %v1129_v30 }
 0x308   :  { %v2168_v34 = vadd.f32 %v2167_v26, %v1999_v37  ;;  %v2000_v54 = vpop.f32.mrf.mxu1 }
 0x309   :  { %v2001_v13 = vadd.f32 %v2000_v54, %v7670_v56  ;;  %v1156_v7 = vmax.f32 %v857_v16, 0.0  ;;  %10101 = vst [vmem:[#allocation77_spill] sm:$0xff] %v7851_v44 }
 0x30a   :  { %v3019_v26 = vmax.f32 %v2168_v34, 0.0  ;;  %v6210_v34 = vld [vmem:[%s9943_s5 + $0xf4] sm:$0xf0] }
 0x30b   :  { %v5834_v16 = vor.u32 %v6210_v34, %v5833_v22  ;;  %v998_v22 = vadd.f32 %v7663_v17, %v7187_v58 }
 0x30c   :  { %v7827_v32 = vpop.f32.mrf.mxu0 }
 0x30d   :  { %2302 = vmatpush.bf16.msra.mxu3 %v5834_v16 }
 0x30e   :  { %v858_v9 = vpop.f32.mrf.mxu3 }
 0x30f   :  { %v859_v18 = vadd.f32 %v858_v9, %v6971_v57  ;;  %v2169_v1 = vpop.f32.mrf.mxu2 }
 0x310   :  { %v2170_v47 = vadd.f32 %v2169_v1, %v2001_v13  ;;  %v2003_v59 = vpop.f32.mrf.mxu1  ;;  %v6240_v1 = vld [vmem:[%s9943_s5 + $0x1ec] sm:$0xf] }
 0x311   :  { %v1158_v37 = vmax.f32 %v859_v18, 0.0 }
 0x312   :  { %v3023_v0 = vmax.f32 %v2170_v47, 0.0  ;;  %v5961_v47 = vld [vmem:[%s9943_s5 + $0x1e8] sm:$0xf] }
 0x313   :  { %v7836_v60 = vpack.c.bf16 %v1158_v37, %v1156_v7  ;;  %1029 = vmatmul.bf16.gmra.mxu3 %v7605_v41  ;;  %2042 = vmatmul.bf16.gmra.mxu1 %v7425_v62  ;;  %v2004_v41 = vadd.f32 %v2003_v59, %v7670_v56  ;;  %v6242_v59 = vld [vmem:[%s9943_s5 + $0x1f4] sm:$0xf0]  ;;  %v6208_v37 = vld [vmem:[%s9943_s5 + $0xec] sm:$0xf] }
 0x314   :  { %2211 = vmatmul.bf16.gmra.mxu2 %v7618_v51  ;;  %v7841_v2 = vpop.f32.mrf.mxu0  ;;  %v7849_v54 = vpack.c.bf16 %v3023_v0, %v3019_v26  ;;  %v5963_v0 = vld [vmem:[%s9943_s5 + $0x1f8] sm:$0xf0]  ;;  %v5962_v7 = vor.u32 %v6242_v59, %v5961_v47  ;;  %v1135_v51 = vmax.f32 %v998_v22, 0.0 }
 0x315   :  { %10099 = vst [vmem:[#allocation75_spill] sm:$0xff] %v7841_v2  ;;  %v5966_v30 = vor.u32 %v6240_v1, %v5963_v0  ;;  %v5835_v26 = vld [vmem:[%s9943_s5 + $0xf8] sm:$0xf0]  ;;  %v996_v1 = vadd.f32 %v7652_v14, %v7187_v58 }
 0x316   :  { %10100 = vst [vmem:[#allocation76_spill] sm:$0xff] %v7849_v54  ;;  %v861_v13 = vpop.f32.mrf.mxu3  ;;  %v5838_v16 = vor.u32 %v6208_v37, %v5835_v26  ;;  %2471 = vmatpush.bf16.msra.mxu0 %v5962_v7 }
 0x317   :  { %v2172_v9 = vpop.f32.mrf.mxu2  ;;  %1913 = vmatmul.bf16.gmra.mxu0 %v7851_v44  ;;  %v862_v34 = vadd.f32 %v861_v13, %v6971_v57  ;;  %2809 = vmatpush.bf16.msra.mxu2 %v5966_v30  ;;  %v1133_v30 = vmax.f32 %v996_v1, 0.0 }
 0x318   :  { %v2173_v31 = vadd.f32 %v2172_v9, %v2004_v41  ;;  %v2005_v18 = vpop.f32.mrf.mxu1  ;;  %2640 = vmatpush.bf16.msra.mxu1 %v5838_v16 }
 0x319   :  { %v2006_v41 = vadd.f32 %v2005_v18, %v7670_v56  ;;  %v7891_v7 = vpack.c.bf16 %v1135_v51, %v1133_v30 }
 0x31a   :  { %v3027_v2 = vmax.f32 %v2173_v31, 0.0 }
 0x31b   :  { %10106 = vst [vmem:[#allocation82_spill] sm:$0xff] %v7891_v7 }
 0x31c   :  { %v7867_v35 = vpop.f32.mrf.mxu0 }
 0x31d   :  { %10102 = vst [vmem:[#allocation78_spill] sm:$0xff] %v7867_v35  ;;  %v1160_v35 = vmax.f32 %v862_v34, 0.0 }
 0x31e   :  { %v863_v9 = vpop.f32.mrf.mxu3 }
 0x31f   :  { %v864_v0 = vadd.f32 %v863_v9, %v6971_v57  ;;  %v2174_v47 = vpop.f32.mrf.mxu2 }
 0x320   :  { %v2175_v59 = vadd.f32 %v2174_v47, %v2006_v41  ;;  %v2008_v54 = vpop.f32.mrf.mxu1 }
 0x321   :  { %v1162_v17 = vmax.f32 %v864_v0, 0.0  ;;  %v2009_v26 = vadd.f32 %v2008_v54, %v7670_v56 }
 0x322   :  { %v3031_v13 = vmax.f32 %v2175_v59, 0.0 }
 0x323   :  { %v7882_v37 = vpack.c.bf16 %v1162_v17, %v1160_v35  ;;  %1034 = vmatmul.bf16.gmra.mxu3 %v7637_v61  ;;  %2047 = vmatmul.bf16.gmra.mxu1 %v7442_v52 }
 0x324   :  { %2216 = vmatmul.bf16.gmra.mxu2 %v7650_v19  ;;  %v7887_v14 = vpop.f32.mrf.mxu0  ;;  %v7889_v18 = vpack.c.bf16 %v3031_v13, %v3027_v2 }
 0x325   :  { %10103 = vst [vmem:[#allocation79_spill] sm:$0xff] %v7882_v37 }
 0x326   :  { %10104 = vst [vmem:[#allocation80_spill] sm:$0xff] %v7887_v14  ;;  %v866_v22 = vpop.f32.mrf.mxu3  ;;  %v10122_v14 = vld [vmem:[#allocation17_spill] sm:$0xff] }
 0x327   :  { %10105 = vst [vmem:[#allocation81_spill] sm:$0xff] %v7889_v18  ;;  %v2177_v31 = vpop.f32.mrf.mxu2  ;;  %1918 = vmatmul.bf16.gmra.mxu0 %v7891_v7  ;;  %v867_v61 = vadd.f32 %v866_v22, %v6971_v57 }
 0x328   :  { %v2178_v35 = vadd.f32 %v2177_v31, %v2009_v26  ;;  %v2010_v34 = vpop.f32.mrf.mxu1 }
 0x329   :  { %v2011_v41 = vadd.f32 %v2010_v34, %v7670_v56  ;;  %v1164_v47 = vmax.f32 %v867_v61, 0.0 }
 0x32a   :  { %v3035_v59 = vmax.f32 %v2178_v35, 0.0 }
 0x32c   :  { %v7895_v16 = vpop.f32.mrf.mxu0 }
 0x32d   :  { %10107 = vst [vmem:[#allocation83_spill] sm:$0xff] %v7895_v16 }
 0x32e   :  { %v868_v9 = vpop.f32.mrf.mxu3 }
 0x32f   :  { %v869_v2 = vadd.f32 %v868_v9, %v6971_v57  ;;  %v2179_v1 = vpop.f32.mrf.mxu2 }
 0x330   :  { %v2180_v51 = vadd.f32 %v2179_v1, %v2011_v41  ;;  %v2013_v0 = vpop.f32.mrf.mxu1 }
 0x331   :  { %v1166_v54 = vmax.f32 %v869_v2, 0.0  ;;  %v2014_v57 = vadd.f32 %v2013_v0, %v7670_v56 }
 0x332   :  { %v3039_v17 = vmax.f32 %v2180_v51, 0.0 }
 0x333   :  { %v7900_v13 = vpack.c.bf16 %v1166_v54, %v1164_v47  ;;  %1634 = vmatmul.bf16.vlgmr.msrb.gmra.mxu3 %v6979_v6  ;;  %2052 = vmatmul.bf16.gmra.mxu1 %v7469_v39 }
 0x334   :  { %2221 = vmatmul.bf16.gmra.mxu2 %v7683_v23  ;;  %v7905_v30 = vpop.f32.mrf.mxu0  ;;  %v7907_v26 = vpack.c.bf16 %v3039_v17, %v3035_v59 }
 0x335   :  { %10108 = vst [vmem:[#allocation84_spill] sm:$0xff] %v7905_v30 }
 0x336   :  { %10109 = vst [vmem:[#allocation85_spill] sm:$0xff] %v7907_v26  ;;  %v1000_v22 = vpop.f32.mrf.mxu3 }
 0x337   :  { %v2182_v31 = vpop.f32.mrf.mxu2  ;;  %v1001_v41 = vadd.f32 %v1000_v22, %v7187_v58 }
 0x338   :  { %v2183_v34 = vadd.f32 %v2182_v31, %v2014_v57  ;;  %v2015_v61 = vpop.f32.mrf.mxu1 }
 0x339   :  { %v2016_v9 = vadd.f32 %v2015_v61, %v7670_v56  ;;  %v1137_v59 = vmax.f32 %v1001_v41, 0.0 }
 0x33a   :  { %v3043_v26 = vmax.f32 %v2183_v34, 0.0 }
 0x33c   :  { %v7910_v35 = vpop.f32.mrf.mxu0 }
 0x33d   :  { %10110 = vst [vmem:[#allocation86_spill] sm:$0xff] %v7910_v35 }
 0x33e   :  { %v1002_v2 = vpop.f32.mrf.mxu3 }
 0x33f   :  { %v1003_v1 = vadd.f32 %v1002_v2, %v7187_v58  ;;  %v2184_v51 = vpop.f32.mrf.mxu2 }
 0x340   :  { %v2185_v47 = vadd.f32 %v2184_v51, %v2016_v9  ;;  %v2018_v54 = vpop.f32.mrf.mxu1 }
 0x341   :  { %v1139_v17 = vmax.f32 %v1003_v1, 0.0  ;;  %v2019_v31 = vadd.f32 %v2018_v54, %v7670_v56 }
 0x342   :  { %v3047_v0 = vmax.f32 %v2185_v47, 0.0 }
 0x343   :  { %v7915_v18 = vpack.c.bf16 %v1139_v17, %v1137_v59  ;;  %1639 = vmatmul.bf16.gmra.mxu3 %v6996_v28  ;;  %2057 = vmatmul.bf16.gmra.mxu1 %v7495_v20 }
 0x344   :  { %2226 = vmatmul.bf16.gmra.mxu2 %v7711_v15  ;;  %v7920_v57 = vpop.f32.mrf.mxu0  ;;  %v7922_v22 = vpack.c.bf16 %v3047_v0, %v3043_v26 }
 0x345   :  { %10111 = vst [vmem:[#allocation87_spill] sm:$0xff] %v7915_v18  ;;  %1923 = vmatmul.bf16.gmra.mxu0 %v7915_v18 }
 0x346   :  { %10112 = vst [vmem:[#allocation88_spill] sm:$0xff] %v7920_v57  ;;  %v1005_v61 = vpop.f32.mrf.mxu3 }
 0x347   :  { %10113 = vst [vmem:[#allocation89_spill] sm:$0xff] %v7922_v22  ;;  %v2187_v41 = vpop.f32.mrf.mxu2  ;;  %v1006_v1 = vadd.f32 %v1005_v61, %v7187_v58 }
 0x348   :  { %v2188_v34 = vadd.f32 %v2187_v41, %v2019_v31  ;;  %v2020_v9 = vpop.f32.mrf.mxu1  ;;  %v10116_v31 = vld [vmem:[#allocation16_spill] sm:$0xff]  ;;  %v10117_v41 = vld [vmem:[#allocation41_spill] sm:$0xff] }
 0x349   :  { %v2021_v51 = vadd.f32 %v2020_v9, %v7670_v56  ;;  %v1141_v22 = vmax.f32 %v1006_v1, 0.0  ;;  %v5817_v9 = vld [vmem:[%s9943_s5 + $0xc8] sm:$0xf]  ;;  %v6206_v1 = vld [vmem:[%s9943_s5 + $0xd4] sm:$0xf0] }
 0x34a   :  { %v3051_v57 = vmax.f32 %v2188_v34, 0.0 }
 0x34c   :  { %v7926_v2 = vpop.f32.mrf.mxu0 }
 0x34d   :  { %10114 = vst [vmem:[#allocation90_spill] sm:$0xff] %v7926_v2 }
 0x34e   :  { %v1007_v47 = vpop.f32.mrf.mxu3 }
 0x34f   :  { %v1008_v59 = vadd.f32 %v1007_v47, %v7187_v58  ;;  %v2189_v17 = vpop.f32.mrf.mxu2 }
 0x350   :  { %v2190_v26 = vadd.f32 %v2189_v17, %v2021_v51  ;;  %v2023_v0 = vpop.f32.mrf.mxu1 }
 0x351   :  { %v1143_v15 = vmax.f32 %v1008_v59, 0.0 }
 0x352   :  { %v3055_v54 = vmax.f32 %v2190_v26, 0.0  ;;  %v6236_v26 = vld [vmem:[%s9943_s5 + $0x1cc] sm:$0xf] }
 0x353   :  { %v7931_v23 = vpack.c.bf16 %v1143_v15, %v1141_v22  ;;  %1644 = vmatmul.bf16.gmra.mxu3 %v10116_v31  ;;  %2062 = vmatmul.bf16.gmra.mxu1 %v10117_v41  ;;  %v5818_v15 = vor.u32 %v6206_v1, %v5817_v9  ;;  %v2024_v22 = vadd.f32 %v2023_v0, %v7670_v56  ;;  %v6238_v0 = vld [vmem:[%s9943_s5 + $0x1d4] sm:$0xf0] }
 0x354   :  { %2231 = vmatmul.bf16.gmra.mxu2 %v7739_v49  ;;  %v7936_v61 = vpop.f32.mrf.mxu0  ;;  %v7944_v34 = vpack.c.bf16 %v3055_v54, %v3051_v57  ;;  %v5947_v49 = vld [vmem:[%s9943_s5 + $0x1d8] sm:$0xf0]  ;;  %v5945_v54 = vld [vmem:[%s9943_s5 + $0x1c8] sm:$0xf] }
 0x355   :  { %10115 = vst [vmem:[#allocation91_spill] sm:$0xff] %v7931_v23  ;;  %1928 = vmatmul.bf16.gmra.mxu0 %v7931_v23  ;;  %2303 = vmatpush.bf16.msra.mxu3 %v5818_v15  ;;  %v5950_v57 = vor.u32 %v6236_v26, %v5947_v49  ;;  %v5946_v1 = vor.u32 %v6238_v0, %v5945_v54  ;;  %v6204_v15 = vld [vmem:[%s9943_s5 + $0xcc] sm:$0xf] }
 0x356   :  { %10118 = vst [vmem:[#allocation16_spill] sm:$0xff] %v7936_v61  ;;  %v1010_v51 = vpop.f32.mrf.mxu3 }
 0x357   :  { %10119 = vst [vmem:[#allocation41_spill] sm:$0xff] %v7944_v34  ;;  %v2192_v47 = vpop.f32.mrf.mxu2  ;;  %v1011_v49 = vadd.f32 %v1010_v51, %v7187_v58  ;;  %2810 = vmatpush.bf16.msra.mxu2 %v5950_v57  ;;  %2472 = vmatpush.bf16.msra.mxu0 %v5946_v1  ;;  %v10123_v51 = vld [vmem:[#allocation45_spill] sm:$0xff] }
 0x358   :  { %v2193_v59 = vadd.f32 %v2192_v47, %v2024_v22  ;;  %v2025_v17 = vpop.f32.mrf.mxu1  ;;  %v5819_v22 = vld [vmem:[%s9943_s5 + $0xd8] sm:$0xf0] }
 0x359   :  { %v5822_v47 = vor.u32 %v6204_v15, %v5819_v22  ;;  %v2026_v26 = vadd.f32 %v2025_v17, %v7670_v56  ;;  %v1145_v2 = vmax.f32 %v1011_v49, 0.0 }
 0x35a   :  { %v3059_v30 = vmax.f32 %v2193_v59, 0.0 }
 0x35b   :  { %2641 = vmatpush.bf16.msra.mxu1 %v5822_v47 }
 0x35c   :  { %v7960_v9 = vpop.f32.mrf.mxu0 }
 0x35d   :  { %10120 = vst [vmem:[#allocation92_spill] sm:$0xff] %v7960_v9 }
 0x35e   :  { %v1012_v34 = vpop.f32.mrf.mxu3 }
 0x35f   :  { %v1013_v61 = vadd.f32 %v1012_v34, %v7187_v58  ;;  %v2194_v9 = vpop.f32.mrf.mxu2 }
 0x360   :  { %v2195_v54 = vadd.f32 %v2194_v9, %v2026_v26  ;;  %v2028_v0 = vpop.f32.mrf.mxu1 }
 0x361   :  { %v1147_v35 = vmax.f32 %v1013_v61, 0.0  ;;  %v2029_v34 = vadd.f32 %v2028_v0, %v7670_v56 }
 0x362   :  { %v3063_v19 = vmax.f32 %v2195_v54, 0.0 }
 0x363   :  { %v7971_v16 = vpack.c.bf16 %v1147_v35, %v1145_v2  ;;  %1649 = vmatmul.bf16.gmra.mxu3 %v10122_v14  ;;  %2067 = vmatmul.bf16.gmra.mxu1 %v10123_v51 }
 0x364   :  { %2236 = vmatmul.bf16.gmra.mxu2 %v7767_v36  ;;  %v7976_v17 = vpop.f32.mrf.mxu0  ;;  %v7978_v57 = vpack.c.bf16 %v3063_v19, %v3059_v30 }
 0x365   :  { %10121 = vst [vmem:[#allocation93_spill] sm:$0xff] %v7971_v16  ;;  %1933 = vmatmul.bf16.gmra.mxu0 %v7971_v16 }
 0x366   :  { %10124 = vst [vmem:[#allocation17_spill] sm:$0xff] %v7976_v17  ;;  %v1015_v9 = vpop.f32.mrf.mxu3 }
 0x367   :  { %10125 = vst [vmem:[#allocation45_spill] sm:$0xff] %v7978_v57  ;;  %v2197_v61 = vpop.f32.mrf.mxu2  ;;  %v1016_v2 = vadd.f32 %v1015_v9, %v7187_v58 }
 0x368   :  { %v2198_v59 = vadd.f32 %v2197_v61, %v2029_v34  ;;  %v2030_v1 = vpop.f32.mrf.mxu1  ;;  %v10128_v34 = vld [vmem:[#allocation18_spill] sm:$0xff] }
 0x369   :  { %v2031_v15 = vadd.f32 %v2030_v1, %v7670_v56  ;;  %v1149_v26 = vmax.f32 %v1016_v2, 0.0 }
 0x36a   :  { %v3067_v57 = vmax.f32 %v2198_v59, 0.0 }
 0x36c   :  { %v7982_v35 = vpop.f32.mrf.mxu0 }
 0x36d   :  { %10126 = vst [vmem:[#allocation94_spill] sm:$0xff] %v7982_v35 }
 0x36e   :  { %v1017_v22 = vpop.f32.mrf.mxu3 }
 0x36f   :  { %v1018_v49 = vadd.f32 %v1017_v22, %v7187_v58  ;;  %v2199_v47 = vpop.f32.mrf.mxu2 }
 0x370   :  { %v2200_v19 = vadd.f32 %v2199_v47, %v2031_v15  ;;  %v2033_v30 = vpop.f32.mrf.mxu1 }
 0x371   :  { %v1151_v54 = vmax.f32 %v1018_v49, 0.0  ;;  %v2034_v1 = vadd.f32 %v2033_v30, %v7670_v56 }
 0x372   :  { %v3071_v0 = vmax.f32 %v2200_v19, 0.0 }
 0x373   :  { %v7987_v36 = vpack.c.bf16 %v1151_v54, %v1149_v26  ;;  %1654 = vmatmul.bf16.gmra.mxu3 %v10128_v34  ;;  %2072 = vmatmul.bf16.gmra.mxu1 %v7573_v3 }
 0x374   :  { %2241 = vmatmul.bf16.gmra.mxu2 %v7795_v46  ;;  %v7992_v9 = vpop.f32.mrf.mxu0  ;;  %v7994_v61 = vpack.c.bf16 %v3071_v0, %v3067_v57 }
 0x375   :  { %10127 = vst [vmem:[#allocation95_spill] sm:$0xff] %v7987_v36  ;;  %1938 = vmatmul.bf16.gmra.mxu0 %v7987_v36 }
 0x376   :  { %10129 = vst [vmem:[#allocation18_spill] sm:$0xff] %v7992_v9  ;;  %v1020_v2 = vpop.f32.mrf.mxu3 }
 0x377   :  { %10130 = vst [vmem:[#allocation96_spill] sm:$0xff] %v7994_v61  ;;  %v2202_v15 = vpop.f32.mrf.mxu2  ;;  %v1021_v49 = vadd.f32 %v1020_v2, %v7187_v58 }
 0x378   :  { %v2203_v59 = vadd.f32 %v2202_v15, %v2034_v1  ;;  %v2035_v22 = vpop.f32.mrf.mxu1  ;;  %v10133_v1 = vld [vmem:[#allocation19_spill] sm:$0xff] }
 0x379   :  { %v2036_v47 = vadd.f32 %v2035_v22, %v7670_v56  ;;  %v1153_v61 = vmax.f32 %v1021_v49, 0.0 }
 0x37a   :  { %v3075_v35 = vmax.f32 %v2203_v59, 0.0 }
 0x37c   :  { %v8000_v19 = vpop.f32.mrf.mxu0 }
 0x37d   :  { %10131 = vst [vmem:[#allocation97_spill] sm:$0xff] %v8000_v19 }
 0x37e   :  { %v1022_v26 = vpop.f32.mrf.mxu3 }
 0x37f   :  { %v1023_v54 = vadd.f32 %v1022_v26, %v7187_v58  ;;  %v2204_v46 = vpop.f32.mrf.mxu2 }
 0x380   :  { %v2205_v57 = vadd.f32 %v2204_v46, %v2036_v47  ;;  %v2038_v0 = vpop.f32.mrf.mxu1 }
 0x381   :  { %v1155_v9 = vmax.f32 %v1023_v54, 0.0  ;;  %v2039_v15 = vadd.f32 %v2038_v0, %v7670_v56 }
 0x382   :  { %v3079_v30 = vmax.f32 %v2205_v57, 0.0 }
 0x383   :  { %v8003_v17 = vpack.c.bf16 %v1155_v9, %v1153_v61  ;;  %1659 = vmatmul.bf16.gmra.mxu3 %v10133_v1  ;;  %2077 = vmatmul.bf16.gmra.mxu1 %v7599_v48  ;;  %v5929_v9 = vld [vmem:[%s9943_s5 + $0x1a8] sm:$0xf]  ;;  %v6234_v61 = vld [vmem:[%s9943_s5 + $0x1b4] sm:$0xf0] }
 0x384   :  { %2246 = vmatmul.bf16.gmra.mxu2 %v7823_v40  ;;  %v8008_v2 = vpack.c.bf16 %v3079_v30, %v3075_v35  ;;  %v8012_v49 = vpop.f32.mrf.mxu0  ;;  %v5930_v26 = vor.u32 %v6234_v61, %v5929_v9  ;;  %v6230_v40 = vld [vmem:[%s9943_s5 + $0x194] sm:$0xf0] }
 0x385   :  { %10132 = vst [vmem:[#allocation98_spill] sm:$0xff] %v8003_v17  ;;  %1943 = vmatmul.bf16.gmra.mxu0 %v8003_v17 }
 0x386   :  { %10134 = vst [vmem:[#allocation19_spill] sm:$0xff] %v8008_v2  ;;  %v1025_v46 = vpop.f32.mrf.mxu3  ;;  %2473 = vmatpush.bf16.msra.mxu0 %v5930_v26  ;;  %v5913_v2 = vld [vmem:[%s9943_s5 + $0x188] sm:$0xf] }
 0x387   :  { %v2207_v22 = vpop.f32.mrf.mxu2  ;;  %10135 = vst [vmem:[#allocation99_spill] sm:$0xff] %v8012_v49  ;;  %v1026_v35 = vadd.f32 %v1025_v46, %v7187_v58  ;;  %v5914_v9 = vor.u32 %v6230_v40, %v5913_v2  ;;  %v10138_v26 = vld [vmem:[#allocation20_spill] sm:$0xff]  ;;  %v6202_v40 = vld [vmem:[%s9943_s5 + $0xb4] sm:$0xf0] }
 0x388   :  { %v2208_v59 = vadd.f32 %v2207_v22, %v2039_v15  ;;  %v2040_v47 = vpop.f32.mrf.mxu1  ;;  %v5897_v2 = vld [vmem:[%s9943_s5 + $0x168] sm:$0xf] }
 0x389   :  { %v2041_v54 = vadd.f32 %v2040_v47, %v7670_v56  ;;  %v1157_v49 = vmax.f32 %v1026_v35, 0.0  ;;  %v6226_v35 = vld [vmem:[%s9943_s5 + $0x174] sm:$0xf0] }
 0x38a   :  { %v3083_v61 = vmax.f32 %v2208_v59, 0.0  ;;  %2474 = vmatpush.bf16.msra.mxu0 %v5914_v9 }
 0x38c   :  { %v8029_v47 = vpop.f32.mrf.mxu0 }
 0x38d   :  { %10136 = vst [vmem:[#allocation100_spill] sm:$0xff] %v8029_v47 }
 0x38e   :  { %v1027_v57 = vpop.f32.mrf.mxu3 }
 0x38f   :  { %v1028_v0 = vadd.f32 %v1027_v57, %v7187_v58  ;;  %v2209_v30 = vpop.f32.mrf.mxu2 }
 0x390   :  { %v2210_v15 = vadd.f32 %v2209_v30, %v2041_v54  ;;  %v2043_v22 = vpop.f32.mrf.mxu1  ;;  %v5801_v54 = vld [vmem:[%s9943_s5 + $0xa8] sm:$0xf] }
 0x391   :  { %v1159_v46 = vmax.f32 %v1028_v0, 0.0  ;;  %v5802_v59 = vor.u32 %v6202_v40, %v5801_v54  ;;  %v2044_v0 = vadd.f32 %v2043_v22, %v7670_v56  ;;  %v6232_v22 = vld [vmem:[%s9943_s5 + $0x1ac] sm:$0xf]  ;;  %v5931_v40 = vld [vmem:[%s9943_s5 + $0x1b8] sm:$0xf0] }
 0x392   :  { %v3087_v19 = vmax.f32 %v2210_v15, 0.0  ;;  %v5898_v15 = vor.u32 %v6226_v35, %v5897_v2  ;;  %v6200_v2 = vld [vmem:[%s9943_s5 + $0xac] sm:$0xf]  ;;  %v5934_v35 = vor.u32 %v6232_v22, %v5931_v40 }
 0x393   :  { %v8031_v57 = vpack.c.bf16 %v1159_v46, %v1157_v49  ;;  %1664 = vmatmul.bf16.gmra.mxu3 %v10138_v26  ;;  %2082 = vmatmul.bf16.gmra.mxu1 %v7631_v38  ;;  %v5849_v38 = vld [vmem:[%s9943_s5 + $0x108] sm:$0xf] }
 0x394   :  { %2251 = vmatmul.bf16.gmra.mxu2 %v7851_v44  ;;  %v8045_v49 = vpack.c.bf16 %v3087_v19, %v3083_v61  ;;  %2304 = vmatpush.bf16.msra.mxu3 %v5802_v59  ;;  %v5881_v19 = vld [vmem:[%s9943_s5 + $0x148] sm:$0xf]  ;;  %v6222_v61 = vld [vmem:[%s9943_s5 + $0x154] sm:$0xf0]  ;;  %v8067_v59 = vpop.f32.mrf.mxu0 }
 0x395   :  { %10137 = vst [vmem:[#allocation101_spill] sm:$0xff] %v8031_v57  ;;  %1948 = vmatmul.bf16.gmra.mxu0 %v8031_v57  ;;  %v5882_v54 = vor.u32 %v6222_v61, %v5881_v19  ;;  %2811 = vmatpush.bf16.msra.mxu2 %v5934_v35 }
 0x396   :  { %10139 = vst [vmem:[#allocation102_spill] sm:$0xff] %v8045_v49  ;;  %v1030_v30 = vpop.f32.mrf.mxu3  ;;  %2475 = vmatpush.bf16.msra.mxu0 %v5898_v15  ;;  %v5865_v15 = vld [vmem:[%s9943_s5 + $0x128] sm:$0xf] }
 0x397   :  { %v2212_v46 = vpop.f32.mrf.mxu2  ;;  %10140 = vst [vmem:[#allocation103_spill] sm:$0xff] %v8067_v59  ;;  %v1031_v19 = vadd.f32 %v1030_v30, %v7187_v58  ;;  %v6214_v30 = vld [vmem:[%s9943_s5 + $0x114] sm:$0xf0] }
 0x398   :  { %v2213_v9 = vadd.f32 %v2212_v46, %v2044_v0  ;;  %v2045_v44 = vpop.f32.mrf.mxu1  ;;  %v5803_v0 = vld [vmem:[%s9943_s5 + $0xb8] sm:$0xf0]  ;;  %v6218_v46 = vld [vmem:[%s9943_s5 + $0x134] sm:$0xf0] }
 0x399   :  { %v5806_v61 = vor.u32 %v6200_v2, %v5803_v0  ;;  %v5866_v49 = vor.u32 %v6218_v46, %v5865_v15  ;;  %v2046_v59 = vadd.f32 %v2045_v44, %v7670_v56  ;;  %v1161_v2 = vmax.f32 %v1031_v19, 0.0 }
 0x39a   :  { %2476 = vmatpush.bf16.msra.mxu0 %v5882_v54  ;;  %v5850_v44 = vor.u32 %v6214_v30, %v5849_v38  ;;  %v3091_v15 = vmax.f32 %v2213_v9, 0.0 }
 0x39b   :  { %2642 = vmatpush.bf16.msra.mxu1 %v5806_v61 }
 0x39c   :  { %v8095_v61 = vpop.f32.mrf.mxu0 }
 0x39d   :  { %10145 = vst [vmem:[#allocation106_spill] sm:$0xff] %v8095_v61 }
 0x39e   :  { %v1032_v22 = vpop.f32.mrf.mxu3  ;;  %2477 = vmatpush.bf16.msra.mxu0 %v5866_v49 }
 0x39f   :  { %v1033_v54 = vadd.f32 %v1032_v22, %v7187_v58  ;;  %v2214_v40 = vpop.f32.mrf.mxu2  ;;  %v10142_v22 = vld [vmem:[#allocation21_spill] sm:$0xff] }
 0x3a0   :  { %v2215_v47 = vadd.f32 %v2214_v40, %v2046_v59  ;;  %v2048_v26 = vpop.f32.mrf.mxu1  ;;  %v10143_v59 = vld [vmem:[#allocation59_spill] sm:$0xff] }
 0x3a1   :  { %v1163_v0 = vmax.f32 %v1033_v54, 0.0  ;;  %v2049_v19 = vadd.f32 %v2048_v26, %v7670_v56 }
 0x3a2   :  { %v3095_v35 = vmax.f32 %v2215_v47, 0.0  ;;  %2478 = vmatpush.bf16.msra.mxu0 %v5850_v44 }
 0x3a3   :  { %v8087_v46 = vpack.c.bf16 %v1163_v0, %v1161_v2  ;;  %1669 = vmatmul.bf16.gmra.mxu3 %v10142_v22  ;;  %2087 = vmatmul.bf16.gmra.mxu1 %v10143_v59 }
 0x3a4   :  { %2256 = vmatmul.bf16.gmra.mxu2 %v7891_v7  ;;  %v8092_v49 = vpack.c.bf16 %v3095_v35, %v3091_v15  ;;  %v8101_v15 = vpop.f32.mrf.mxu0 }
 0x3a5   :  { %10141 = vst [vmem:[#allocation104_spill] sm:$0xff] %v8087_v46  ;;  %1953 = vmatmul.bf16.gmra.mxu0 %v8087_v46 }
 0x3a6   :  { %10144 = vst [vmem:[#allocation105_spill] sm:$0xff] %v8092_v49  ;;  %v1035_v38 = vpop.f32.mrf.mxu3 }
 0x3a7   :  { %v2217_v9 = vpop.f32.mrf.mxu2  ;;  %v1036_v40 = vadd.f32 %v1035_v38, %v7187_v58  ;;  %10146 = vst [vmem:[#allocation107_spill] sm:$0xff] %v8101_v15  ;;  %v10153_v15 = vld [vmem:[#allocation34_spill] sm:$0xff] }
 0x3a8   :  { %v2218_v47 = vadd.f32 %v2217_v9, %v2049_v19  ;;  %v2050_v54 = vpop.f32.mrf.mxu1  ;;  %v10148_v19 = vld [vmem:[#allocation23_spill] sm:$0xff] }
 0x3a9   :  { %v2051_v30 = vadd.f32 %v2050_v54, %v7670_v56  ;;  %v1165_v7 = vmax.f32 %v1036_v40, 0.0 }
 0x3aa   :  { %v3099_v22 = vmax.f32 %v2218_v47, 0.0  ;;  %v8115_v47 = vld [vmem:[%s9944_s6] sm:$0xf] }
 0x3ab   :  { %10150 = vst [vmem:[#allocation110_spill] sm:$0xff] %v8115_v47 }
 0x3ae   :  { %v1037_v2 = vpop.f32.mrf.mxu3 }
 0x3af   :  { %v1038_v0 = vadd.f32 %v1037_v2, %v7187_v58  ;;  %v2219_v44 = vpop.f32.mrf.mxu2 }
 0x3b0   :  { %v2220_v35 = vadd.f32 %v2219_v44, %v2051_v30  ;;  %v2053_v49 = vpop.f32.mrf.mxu1  ;;  %v8120_v30 = vpop.f32.mrf.mxu0 }
 0x3b1   :  { %v1167_v61 = vmax.f32 %v1038_v0, 0.0  ;;  %v2054_v58 = vadd.f32 %v2053_v49, %v7670_v56  ;;  %10151 = vst [vmem:[#allocation111_spill] sm:$0xff] %v8120_v30  ;;  %v10152_v49 = vld [vmem:[#allocation32_spill] sm:$0xff] }
 0x3b2   :  { %v3103_v26 = vmax.f32 %v2220_v35, 0.0 }
 0x3b3   :  { %v8103_v59 = vpack.c.bf16 %v1167_v61, %v1165_v7  ;;  %1674 = vmatmul.bf16.gmra.mxu3 %v10148_v19  ;;  %2092 = vmatmul.bf16.gmra.mxu1 %v7696_v10  ;;  %v8118_v7 = vperm.slane %v8115_v47, 0 }
 0x3b4   :  { %2261 = vmatmul.bf16.gmra.mxu2 %v7915_v18  ;;  %v8108_v38 = vpack.c.bf16 %v3103_v26, %v3099_v22 }
 0x3b5   :  { %10147 = vst [vmem:[#allocation108_spill] sm:$0xff] %v8103_v59  ;;  %1958 = vmatmul.bf16.gmra.mxu0 %v8103_v59 }
 0x3b6   :  { %10149 = vst [vmem:[#allocation109_spill] sm:$0xff] %v8108_v38  ;;  %v1635_v9 = vpop.f32.mrf.mxu3 }
 0x3b7   :  { %v2222_v61 = vpop.f32.mrf.mxu2  ;;  %v1636_v22 = vadd.f32 %v1635_v9, %v8118_v7 }
 0x3b8   :  { %v2223_v54 = vadd.f32 %v2222_v61, %v2054_v58  ;;  %v2055_v40 = vpop.f32.mrf.mxu1 }
 0x3b9   :  { %v2056_v2 = vadd.f32 %v2055_v40, %v7670_v56  ;;  %v1805_v44 = vadd.f32 %v10152_v49, %v1636_v22  ;;  %v10157_v22 = vld [vmem:[#allocation22_spill] sm:$0xff] }
 0x3ba   :  { %v3107_v10 = vmax.f32 %v2223_v54, 0.0 }
 0x3bb   :  { %v2978_v61 = vmax.f32 %v1805_v44, 0.0 }
 0x3be   :  { %v1637_v0 = vpop.f32.mrf.mxu3 }
 0x3bf   :  { %v1638_v35 = vadd.f32 %v1637_v0, %v8118_v7  ;;  %v2224_v26 = vpop.f32.mrf.mxu2 }
 0x3c0   :  { %v2225_v38 = vadd.f32 %v2224_v26, %v2056_v2  ;;  %v2058_v18 = vpop.f32.mrf.mxu1  ;;  %v10159_v26 = vld [vmem:[#allocation35_spill] sm:$0xff] }
 0x3c1   :  { %v1807_v19 = vadd.f32 %v10153_v15, %v1638_v35  ;;  %v2059_v15 = vadd.f32 %v2058_v18, %v7670_v56 }
 0x3c2   :  { %v3111_v47 = vmax.f32 %v2225_v38, 0.0  ;;  %v8127_v58 = vpop.f32.mrf.mxu0 }
 0x3c3   :  { %10154 = vst [vmem:[#allocation32_spill] sm:$0xff] %v8127_v58  ;;  %v2982_v30 = vmax.f32 %v1807_v19, 0.0  ;;  %1679 = vmatmul.bf16.gmra.mxu3 %v7240_v11  ;;  %2097 = vmatmul.bf16.gmra.mxu1 %v7724_v55 }
 0x3c4   :  { %2266 = vmatmul.bf16.gmra.mxu2 %v7931_v23  ;;  %v8132_v9 = vpack.c.bf16 %v3111_v47, %v3107_v10 }
 0x3c5   :  { %v8134_v40 = vpack.c.bf16 %v2982_v30, %v2978_v61  ;;  %2479 = vmatmul.bf16.vlgmr.msra.gmra.mxu0 %v10157_v22 }
 0x3c6   :  { %10155 = vst [vmem:[#allocation34_spill] sm:$0xff] %v8132_v9  ;;  %v1640_v54 = vpop.f32.mrf.mxu3  ;;  %v10160_v9 = vld [vmem:[#allocation37_spill] sm:$0xff] }
 0x3c7   :  { %10156 = vst [vmem:[#allocation112_spill] sm:$0xff] %v8134_v40  ;;  %v2227_v38 = vpop.f32.mrf.mxu2  ;;  %v1641_v19 = vadd.f32 %v1640_v54, %v8118_v7  ;;  %v5785_v54 = vld [vmem:[%s9943_s5 + $0x88] sm:$0xf] }
 0x3c8   :  { %v2228_v2 = vadd.f32 %v2227_v38, %v2059_v15  ;;  %v2060_v0 = vpop.f32.mrf.mxu1 }
 0x3c9   :  { %v2061_v44 = vadd.f32 %v2060_v0, %v7670_v56  ;;  %v1810_v10 = vadd.f32 %v10159_v26, %v1641_v19  ;;  %v10163_v0 = vld [vmem:[#allocation24_spill] sm:$0xff] }
 0x3ca   :  { %v8138_v49 = vpop.f32.mrf.mxu0  ;;  %v3115_v23 = vmax.f32 %v2228_v2, 0.0 }
 0x3cb   :  { %10158 = vst [vmem:[#allocation22_spill] sm:$0xff] %v8138_v49  ;;  %v2986_v38 = vmax.f32 %v1810_v10, 0.0 }
 0x3ce   :  { %v1642_v35 = vpop.f32.mrf.mxu3 }
 0x3cf   :  { %v1643_v47 = vadd.f32 %v1642_v35, %v8118_v7  ;;  %v2229_v30 = vpop.f32.mrf.mxu2 }
 0x3d0   :  { %v2230_v61 = vadd.f32 %v2229_v30, %v2061_v44  ;;  %v2063_v40 = vpop.f32.mrf.mxu1 }
 0x3d1   :  { %v1812_v18 = vadd.f32 %v10160_v9, %v1643_v47  ;;  %v6198_v9 = vld [vmem:[%s9943_s5 + $0x94] sm:$0xf0]  ;;  %v2064_v35 = vadd.f32 %v2063_v40, %v7670_v56  ;;  %v6196_v40 = vld [vmem:[%s9943_s5 + $0x8c] sm:$0xf] }
 0x3d2   :  { %v3119_v58 = vmax.f32 %v2230_v61, 0.0  ;;  %v8145_v15 = vpop.f32.mrf.mxu0  ;;  %v5786_v19 = vor.u32 %v6198_v9, %v5785_v54 }
 0x3d3   :  { %10161 = vst [vmem:[#allocation35_spill] sm:$0xff] %v8145_v15  ;;  %v2990_v49 = vmax.f32 %v1812_v18, 0.0  ;;  %1684 = vmatmul.bf16.gmra.mxu3 %v7276_v63  ;;  %2102 = vmatmul.bf16.gmra.mxu1 %v7752_v4 }
 0x3d4   :  { %2271 = vmatmul.bf16.gmra.mxu2 %v7971_v16  ;;  %v8156_v2 = vpack.c.bf16 %v3119_v58, %v3115_v23  ;;  %2305 = vmatpush.bf16.msra.mxu3 %v5786_v19  ;;  %v6228_v23 = vld [vmem:[%s9943_s5 + $0x18c] sm:$0xf]  ;;  %v5915_v58 = vld [vmem:[%s9943_s5 + $0x198] sm:$0xf0] }
 0x3d5   :  { %2484 = vmatmul.bf16.gmra.mxu0 %v10163_v0  ;;  %v8159_v44 = vpack.c.bf16 %v2990_v49, %v2986_v38  ;;  %v5918_v49 = vor.u32 %v6228_v23, %v5915_v58  ;;  %v5787_v38 = vld [vmem:[%s9943_s5 + $0x98] sm:$0xf0] }
 0x3d6   :  { %10162 = vst [vmem:[#allocation37_spill] sm:$0xff] %v8156_v2  ;;  %v1645_v26 = vpop.f32.mrf.mxu3  ;;  %v5790_v54 = vor.u32 %v6196_v40, %v5787_v38  ;;  %v10167_v2 = vld [vmem:[#allocation40_spill] sm:$0xff] }
 0x3d7   :  { %10164 = vst [vmem:[#allocation24_spill] sm:$0xff] %v8159_v44  ;;  %v2232_v10 = vpop.f32.mrf.mxu2  ;;  %v1646_v18 = vadd.f32 %v1645_v26, %v8118_v7  ;;  %2812 = vmatpush.bf16.msra.mxu2 %v5918_v49 }
 0x3d8   :  { %v2233_v47 = vadd.f32 %v2232_v10, %v2064_v35  ;;  %v2065_v30 = vpop.f32.mrf.mxu1  ;;  %v10166_v35 = vld [vmem:[#allocation38_spill] sm:$0xff]  ;;  %2643 = vmatpush.bf16.msra.mxu1 %v5790_v54 }
 0x3d9   :  { %v2066_v9 = vadd.f32 %v2065_v30, %v7670_v56  ;;  %v1815_v26 = vadd.f32 %v10166_v35, %v1646_v18  ;;  %v10170_v18 = vld [vmem:[#allocation25_spill] sm:$0xff] }
 0x3da   :  { %v8162_v61 = vpop.f32.mrf.mxu0 }
 0x3db   :  { %10165 = vst [vmem:[#allocation113_spill] sm:$0xff] %v8162_v61  ;;  %v3123_v61 = vmax.f32 %v2233_v47, 0.0  ;;  %v2994_v4 = vmax.f32 %v1815_v26, 0.0  ;;  %v10173_v26 = vld [vmem:[#allocation42_spill] sm:$0xff] }
 0x3de   :  { %v1647_v19 = vpop.f32.mrf.mxu3 }
 0x3df   :  { %v1648_v10 = vadd.f32 %v1647_v19, %v8118_v7  ;;  %v2234_v44 = vpop.f32.mrf.mxu2 }
 0x3e0   :  { %v2235_v23 = vadd.f32 %v2234_v44, %v2066_v9  ;;  %v2068_v58 = vpop.f32.mrf.mxu1 }
 0x3e1   :  { %v1817_v16 = vadd.f32 %v10167_v2, %v1648_v10  ;;  %v2069_v2 = vadd.f32 %v2068_v58, %v7670_v56 }
 0x3e2   :  { %v3127_v15 = vmax.f32 %v2235_v23, 0.0  ;;  %v8181_v63 = vpop.f32.mrf.mxu0 }
 0x3e3   :  { %10168 = vst [vmem:[#allocation38_spill] sm:$0xff] %v8181_v63  ;;  %v2998_v40 = vmax.f32 %v1817_v16, 0.0  ;;  %1689 = vmatmul.bf16.gmra.mxu3 %v7300_v42  ;;  %2107 = vmatmul.bf16.gmra.mxu1 %v7780_v45 }
 0x3e4   :  { %2276 = vmatmul.bf16.gmra.mxu2 %v7987_v36  ;;  %v8186_v30 = vpack.c.bf16 %v3127_v15, %v3123_v61 }
 0x3e5   :  { %2489 = vmatmul.bf16.gmra.mxu0 %v10170_v18  ;;  %v8189_v44 = vpack.c.bf16 %v2998_v40, %v2994_v4  ;;  %v10174_v40 = vld [vmem:[#allocation44_spill] sm:$0xff] }
 0x3e6   :  { %10169 = vst [vmem:[#allocation40_spill] sm:$0xff] %v8186_v30  ;;  %v1650_v47 = vpop.f32.mrf.mxu3 }
 0x3e7   :  { %10171 = vst [vmem:[#allocation25_spill] sm:$0xff] %v8189_v44  ;;  %v2237_v49 = vpop.f32.mrf.mxu2  ;;  %v1651_v16 = vadd.f32 %v1650_v47, %v8118_v7 }
 0x3e8   :  { %v2238_v38 = vadd.f32 %v2237_v49, %v2069_v2  ;;  %v2070_v54 = vpop.f32.mrf.mxu1 }
 0x3e9   :  { %v2071_v19 = vadd.f32 %v2070_v54, %v7670_v56  ;;  %v1820_v15 = vadd.f32 %v10173_v26, %v1651_v16  ;;  %v10177_v54 = vld [vmem:[#allocation27_spill] sm:$0xff] }
 0x3ea   :  { %v8192_v9 = vpop.f32.mrf.mxu0  ;;  %v3131_v44 = vmax.f32 %v2238_v38, 0.0 }
 0x3eb   :  { %10172 = vst [vmem:[#allocation114_spill] sm:$0xff] %v8192_v9  ;;  %v3002_v49 = vmax.f32 %v1820_v15, 0.0 }
 0x3ee   :  { %v1652_v35 = vpop.f32.mrf.mxu3 }
 0x3ef   :  { %v1653_v61 = vadd.f32 %v1652_v35, %v8118_v7  ;;  %v2239_v10 = vpop.f32.mrf.mxu2 }
 0x3f0   :  { %v2240_v4 = vadd.f32 %v2239_v10, %v2071_v19  ;;  %v2073_v23 = vpop.f32.mrf.mxu1 }
 0x3f1   :  { %v1822_v58 = vadd.f32 %v10174_v40, %v1653_v61  ;;  %v2074_v19 = vadd.f32 %v2073_v23, %v7670_v56 }
 0x3f2   :  { %v3135_v30 = vmax.f32 %v2240_v4, 0.0  ;;  %v8199_v2 = vpop.f32.mrf.mxu0 }
 0x3f3   :  { %10175 = vst [vmem:[#allocation42_spill] sm:$0xff] %v8199_v2  ;;  %v3006_v36 = vmax.f32 %v1822_v58, 0.0  ;;  %1694 = vmatmul.bf16.gmra.mxu3 %v7329_v27  ;;  %2112 = vmatmul.bf16.gmra.mxu1 %v7808_v8  ;;  %v10180_v58 = vld [vmem:[#allocation46_spill] sm:$0xff] }
 0x3f4   :  { %2281 = vmatmul.bf16.gmra.mxu2 %v8003_v17  ;;  %v8204_v47 = vpack.c.bf16 %v3135_v30, %v3131_v44 }
 0x3f5   :  { %2494 = vmatmul.bf16.gmra.mxu0 %v10177_v54  ;;  %v8207_v16 = vpack.c.bf16 %v3006_v36, %v3002_v49 }
 0x3f6   :  { %10176 = vst [vmem:[#allocation44_spill] sm:$0xff] %v8204_v47  ;;  %v1655_v38 = vpop.f32.mrf.mxu3 }
 0x3f7   :  { %10178 = vst [vmem:[#allocation27_spill] sm:$0xff] %v8207_v16  ;;  %v2242_v35 = vpop.f32.mrf.mxu2  ;;  %v1656_v10 = vadd.f32 %v1655_v38, %v8118_v7  ;;  %v10181_v16 = vld [vmem:[#allocation48_spill] sm:$0xff] }
 0x3f8   :  { %v2243_v26 = vadd.f32 %v2242_v35, %v2074_v19  ;;  %v2075_v61 = vpop.f32.mrf.mxu1  ;;  %v6192_v38 = vld [vmem:[%s9943_s5 + $0x6c] sm:$0xf]  ;;  %v5771_v35 = vld [vmem:[%s9943_s5 + $0x78] sm:$0xf0] }
 0x3f9   :  { %v2076_v4 = vadd.f32 %v2075_v61, %v7670_v56  ;;  %v1825_v30 = vadd.f32 %v10180_v58, %v1656_v10  ;;  %v10184_v58 = vld [vmem:[#allocation28_spill] sm:$0xff] }
 0x3fa   :  { %v8210_v15 = vpop.f32.mrf.mxu0  ;;  %v3139_v17 = vmax.f32 %v2243_v26, 0.0  ;;  %v5899_v26 = vld [vmem:[%s9943_s5 + $0x178] sm:$0xf0] }
 0x3fb   :  { %10179 = vst [vmem:[#allocation115_spill] sm:$0xff] %v8210_v15  ;;  %v3010_v61 = vmax.f32 %v1825_v30, 0.0 }
 0x3fe   :  { %v1657_v40 = vpop.f32.mrf.mxu3 }
 0x3ff   :  { %v1658_v44 = vadd.f32 %v1657_v40, %v8118_v7  ;;  %v2244_v47 = vpop.f32.mrf.mxu2 }
 0x400   :  { %v2245_v36 = vadd.f32 %v2244_v47, %v2076_v4  ;;  %v2078_v49 = vpop.f32.mrf.mxu1  ;;  %v5774_v47 = vor.u32 %v6192_v38, %v5771_v35  ;;  %v5755_v38 = vld [vmem:[%s9943_s5 + $0x58] sm:$0xf0] }
 0x401   :  { %v1827_v23 = vadd.f32 %v10181_v16, %v1658_v44  ;;  %v6224_v16 = vld [vmem:[%s9943_s5 + $0x16c] sm:$0xf]  ;;  %v2079_v44 = vadd.f32 %v2078_v49, %v7670_v56  ;;  %v5883_v49 = vld [vmem:[%s9943_s5 + $0x158] sm:$0xf0] }
 0x402   :  { %v3143_v2 = vmax.f32 %v2245_v36, 0.0  ;;  %v8217_v19 = vpop.f32.mrf.mxu0  ;;  %v5902_v4 = vor.u32 %v6224_v16, %v5899_v26  ;;  %2644 = vmatpush.bf16.msra.mxu1 %v5774_v47  ;;  %v6184_v26 = vld [vmem:[%s9943_s5 + $0x2c] sm:$0xf] }
 0x403   :  { %10182 = vst [vmem:[#allocation46_spill] sm:$0xff] %v8217_v19  ;;  %v3014_v10 = vmax.f32 %v1827_v23, 0.0  ;;  %1699 = vmatmul.bf16.gmra.mxu3 %v7396_v33  ;;  %2117 = vmatmul.bf16.gmra.mxu1 %v7836_v60  ;;  %v6188_v23 = vld [vmem:[%s9943_s5 + $0x4c] sm:$0xf] }
 0x404   :  { %2286 = vmatmul.bf16.gmra.mxu2 %v8031_v57  ;;  %v8234_v40 = vpack.c.bf16 %v3143_v2, %v3139_v17  ;;  %v6220_v17 = vld [vmem:[%s9943_s5 + $0x14c] sm:$0xf]  ;;  %v5758_v35 = vor.u32 %v6188_v23, %v5755_v38 }
 0x405   :  { %2499 = vmatmul.bf16.gmra.mxu0 %v10184_v58  ;;  %v8237_v30 = vpack.c.bf16 %v3014_v10, %v3010_v61  ;;  %2813 = vmatpush.bf16.msra.mxu2 %v5902_v4  ;;  %v5886_v47 = vor.u32 %v6220_v17, %v5883_v49  ;;  %v5739_v4 = vld [vmem:[%s9943_s5 + $0x38] sm:$0xf0] }
 0x406   :  { %10183 = vst [vmem:[#allocation48_spill] sm:$0xff] %v8234_v40  ;;  %v1660_v36 = vpop.f32.mrf.mxu3  ;;  %2645 = vmatpush.bf16.msra.mxu1 %v5758_v35  ;;  %v5742_v38 = vor.u32 %v6184_v26, %v5739_v4  ;;  %v5867_v17 = vld [vmem:[%s9943_s5 + $0x138] sm:$0xf0]  ;;  %v6212_v26 = vld [vmem:[%s9943_s5 + $0x10c] sm:$0xf] }
 0x407   :  { %10185 = vst [vmem:[#allocation28_spill] sm:$0xff] %v8237_v30  ;;  %v2247_v2 = vpop.f32.mrf.mxu2  ;;  %v1661_v23 = vadd.f32 %v1660_v36, %v8118_v7  ;;  %v5723_v36 = vld [vmem:[%s9943_s5 + $0x18] sm:$0xf0]  ;;  %v10187_v4 = vld [vmem:[#allocation49_spill] sm:$0xff] }
 0x408   :  { %v2248_v61 = vadd.f32 %v2247_v2, %v2079_v44  ;;  %v2080_v10 = vpop.f32.mrf.mxu1  ;;  %v6216_v44 = vld [vmem:[%s9943_s5 + $0x12c] sm:$0xf] }
 0x409   :  { %2814 = vmatpush.bf16.msra.mxu2 %v5886_v47  ;;  %v5870_v2 = vor.u32 %v6216_v44, %v5867_v17  ;;  %v2081_v35 = vadd.f32 %v2080_v10, %v7670_v56  ;;  %v6180_v47 = vld [vmem:[%s9943_s5 + $0xc] sm:$0xf]  ;;  %v1830_v30 = vadd.f32 %v10187_v4, %v1661_v23  ;;  %v5851_v17 = vld [vmem:[%s9943_s5 + $0x118] sm:$0xf0] }
 0x40a   :  { %v8252_v16 = vpop.f32.mrf.mxu0  ;;  %2646 = vmatpush.bf16.msra.mxu1 %v5742_v38  ;;  %v5726_v10 = vor.u32 %v6180_v47, %v5723_v36  ;;  %v5854_v57 = vor.u32 %v6212_v26, %v5851_v17  ;;  %v3147_v15 = vmax.f32 %v2248_v61, 0.0 }
 0x40b   :  { %10186 = vst [vmem:[#allocation116_spill] sm:$0xff] %v8252_v16  ;;  %v10188_v16 = vld [vmem:[#allocation51_spill] sm:$0xff]  ;;  %v3018_v23 = vmax.f32 %v1830_v30, 0.0 }
 0x40d   :  { %2815 = vmatpush.bf16.msra.mxu2 %v5870_v2 }
 0x40e   :  { %v1662_v49 = vpop.f32.mrf.mxu3  ;;  %2647 = vmatpush.bf16.msra.mxu1 %v5726_v10 }
 0x40f   :  { %v1663_v38 = vadd.f32 %v1662_v49, %v8118_v7  ;;  %v2249_v44 = vpop.f32.mrf.mxu2 }
 0x410   :  { %v2250_v2 = vadd.f32 %v2249_v44, %v2081_v35  ;;  %v2083_v40 = vpop.f32.mrf.mxu1  ;;  %v5769_v35 = vld [vmem:[%s9943_s5 + $0x68] sm:$0xf] }
 0x411   :  { %v1832_v19 = vadd.f32 %v10188_v16, %v1663_v38  ;;  %2816 = vmatpush.bf16.msra.mxu2 %v5854_v57  ;;  %v6194_v16 = vld [vmem:[%s9943_s5 + $0x74] sm:$0xf0]  ;;  %v10190_v57 = vld [vmem:[#allocation29_spill] sm:$0xff]  ;;  %v2084_v30 = vadd.f32 %v2083_v40, %v7670_v56 }
 0x412   :  { %v3151_v9 = vmax.f32 %v2250_v2, 0.0  ;;  %v8283_v63 = vpop.f32.mrf.mxu0  ;;  %v5770_v61 = vor.u32 %v6194_v16, %v5769_v35  ;;  %v10193_v40 = vld [vmem:[#allocation54_spill] sm:$0xff] }
 0x413   :  { %v3022_v4 = vmax.f32 %v1832_v19, 0.0  ;;  %1704 = vmatmul.bf16.gmra.mxu3 %v7425_v62  ;;  %2122 = vmatmul.bf16.gmra.mxu1 %v7882_v37 }
 0x414   :  { %2291 = vmatmul.bf16.gmra.mxu2 %v8087_v46  ;;  %v8294_v49 = vpack.c.bf16 %v3151_v9, %v3147_v15  ;;  %2306 = vmatpush.bf16.msra.mxu3 %v5770_v61  ;;  %v10192_v9 = vld [vmem:[#allocation52_spill] sm:$0xff] }
 0x415   :  { %2504 = vmatmul.bf16.gmra.mxu0 %v10190_v57  ;;  %v8297_v19 = vpack.c.bf16 %v3022_v4, %v3018_v23 }
 0x416   :  { %10189 = vst [vmem:[#allocation49_spill] sm:$0xff] %v8294_v49  ;;  %v1665_v47 = vpop.f32.mrf.mxu3 }
 0x417   :  { %10191 = vst [vmem:[#allocation51_spill] sm:$0xff] %v8297_v19  ;;  %v2252_v36 = vpop.f32.mrf.mxu2  ;;  %v1666_v10 = vadd.f32 %v1665_v47, %v8118_v7 }
 0x418   :  { %v2253_v26 = vadd.f32 %v2252_v36, %v2084_v30  ;;  %v2085_v38 = vpop.f32.mrf.mxu1 }
 0x419   :  { %v2086_v17 = vadd.f32 %v2085_v38, %v7670_v56  ;;  %v1835_v15 = vadd.f32 %v10192_v9, %v1666_v10  ;;  %v10196_v38 = vld [vmem:[#allocation30_spill] sm:$0xff] }
 0x41a   :  { %v8300_v44 = vpop.f32.mrf.mxu0  ;;  %v3155_v61 = vmax.f32 %v2253_v26, 0.0 }
 0x41b   :  { %v3026_v36 = vmax.f32 %v1835_v15, 0.0 }
 0x41e   :  { %v1667_v2 = vpop.f32.mrf.mxu3 }
 0x41f   :  { %v1668_v35 = vadd.f32 %v1667_v2, %v8118_v7  ;;  %v2254_v23 = vpop.f32.mrf.mxu2 }
 0x420   :  { %v2255_v4 = vadd.f32 %v2254_v23, %v2086_v17  ;;  %v2088_v16 = vpop.f32.mrf.mxu1 }
 0x421   :  { %v1837_v19 = vadd.f32 %v10193_v40, %v1668_v35  ;;  %v2089_v17 = vadd.f32 %v2088_v16, %v7670_v56  ;;  %v10199_v40 = vld [vmem:[#allocation56_spill] sm:$0xff] }
 0x422   :  { %v3159_v49 = vmax.f32 %v2255_v4, 0.0  ;;  %v8307_v30 = vpop.f32.mrf.mxu0 }
 0x423   :  { %10194 = vst [vmem:[#allocation29_spill] sm:$0xff] %v8307_v30  ;;  %v3030_v46 = vmax.f32 %v1837_v19, 0.0  ;;  %1709 = vmatmul.bf16.gmra.mxu3 %v7442_v52  ;;  %2127 = vmatmul.bf16.gmra.mxu1 %v7900_v13 }
 0x424   :  { %2296 = vmatmul.bf16.gmra.mxu2 %v8103_v59  ;;  %v8312_v47 = vpack.c.bf16 %v3159_v49, %v3155_v61 }
 0x425   :  { %2509 = vmatmul.bf16.gmra.mxu0 %v10196_v38  ;;  %v8315_v10 = vpack.c.bf16 %v3030_v46, %v3026_v36 }
 0x426   :  { %10195 = vst [vmem:[#allocation52_spill] sm:$0xff] %v8312_v47  ;;  %v1670_v26 = vpop.f32.mrf.mxu3 }
 0x427   :  { %10197 = vst [vmem:[#allocation54_spill] sm:$0xff] %v8315_v10  ;;  %v2257_v2 = vpop.f32.mrf.mxu2  ;;  %v1671_v19 = vadd.f32 %v1670_v26, %v8118_v7  ;;  %v10200_v10 = vld [vmem:[#allocation58_spill] sm:$0xff] }
 0x428   :  { %v2258_v9 = vadd.f32 %v2257_v2, %v2089_v17  ;;  %v2090_v35 = vpop.f32.mrf.mxu1 }
 0x429   :  { %v2091_v23 = vadd.f32 %v2090_v35, %v7670_v56  ;;  %v1840_v49 = vadd.f32 %v10199_v40, %v1671_v19  ;;  %v10203_v35 = vld [vmem:[#allocation31_spill] sm:$0xff] }
 0x42a   :  { %v8318_v15 = vpop.f32.mrf.mxu0  ;;  %v3163_v59 = vmax.f32 %v2258_v9, 0.0 }
 0x42b   :  { %10198 = vst [vmem:[#allocation30_spill] sm:$0xff] %v8318_v15  ;;  %v3034_v2 = vmax.f32 %v1840_v49, 0.0 }
 0x42e   :  { %v1672_v4 = vpop.f32.mrf.mxu3 }
 0x42f   :  { %v1673_v61 = vadd.f32 %v1672_v4, %v8118_v7  ;;  %v2259_v47 = vpop.f32.mrf.mxu2 }
 0x430   :  { %v2260_v46 = vadd.f32 %v2259_v47, %v2091_v23  ;;  %v2093_v36 = vpop.f32.mrf.mxu1 }
 0x431   :  { %v1842_v16 = vadd.f32 %v10200_v10, %v1673_v61  ;;  %v2094_v10 = vadd.f32 %v2093_v36, %v7670_v56 }
 0x432   :  { %v3167_v30 = vmax.f32 %v2260_v46, 0.0  ;;  %v8325_v17 = vpop.f32.mrf.mxu0 }
 0x433   :  { %10201 = vst [vmem:[#allocation56_spill] sm:$0xff] %v8325_v17  ;;  %v3038_v15 = vmax.f32 %v1842_v16, 0.0  ;;  %1714 = vmatmul.bf16.gmra.mxu3 %v7469_v39  ;;  %2648 = vmatmul.bf16.vlgmr.msra.gmra.mxu1 %v6979_v6 }
 0x434   :  { %2817 = vmatmul.bf16.vlgmr.msra.gmra.mxu2 %v10157_v22  ;;  %v8330_v26 = vpack.c.bf16 %v3167_v30, %v3163_v59  ;;  %v10206_v22 = vld [vmem:[#allocation60_spill] sm:$0xff] }
 0x435   :  { %2514 = vmatmul.bf16.gmra.mxu0 %v10203_v35  ;;  %v8333_v47 = vpack.c.bf16 %v3038_v15, %v3034_v2 }
 0x436   :  { %10202 = vst [vmem:[#allocation58_spill] sm:$0xff] %v8330_v26  ;;  %v1675_v9 = vpop.f32.mrf.mxu3 }
 0x437   :  { %10204 = vst [vmem:[#allocation31_spill] sm:$0xff] %v8333_v47  ;;  %v2262_v19 = vpop.f32.mrf.mxu2  ;;  %v1676_v49 = vadd.f32 %v1675_v9, %v8118_v7  ;;  %v10207_v47 = vld [vmem:[#allocation62_spill] sm:$0xff] }
 0x438   :  { %v2263_v23 = vadd.f32 %v2262_v19, %v2094_v10  ;;  %v2095_v4 = vpop.f32.mrf.mxu1 }
 0x439   :  { %v2096_v61 = vadd.f32 %v2095_v4, %v7670_v56  ;;  %v1845_v59 = vadd.f32 %v10206_v22, %v1676_v49  ;;  %v10209_v4 = vld [vmem:[#allocation33_spill] sm:$0xff] }
 0x43a   :  { %v8336_v40 = vpop.f32.mrf.mxu0  ;;  %v3171_v26 = vmax.f32 %v2263_v23, 0.0 }
 0x43b   :  { %10205 = vst [vmem:[#allocation117_spill] sm:$0xff] %v8336_v40  ;;  %v3042_v19 = vmax.f32 %v1845_v59, 0.0 }
 0x43e   :  { %v1677_v46 = vpop.f32.mrf.mxu3 }
 0x43f   :  { %v1678_v30 = vadd.f32 %v1677_v46, %v8118_v7  ;;  %v2264_v16 = vpop.f32.mrf.mxu2 }
 0x440   :  { %v2265_v15 = vadd.f32 %v2264_v16, %v2096_v61  ;;  %v2098_v2 = vpop.f32.mrf.mxu1 }
 0x441   :  { %v1847_v36 = vadd.f32 %v10207_v47, %v1678_v30  ;;  %v2099_v47 = vadd.f32 %v2098_v2, %v7670_v56 }
 0x442   :  { %v3175_v17 = vmax.f32 %v2265_v15, 0.0  ;;  %v8343_v10 = vpop.f32.mrf.mxu0 }
 0x443   :  { %v3046_v40 = vmax.f32 %v1847_v36, 0.0  ;;  %1719 = vmatmul.bf16.gmra.mxu3 %v7495_v20  ;;  %2653 = vmatmul.bf16.gmra.mxu1 %v6996_v28 }
 0x444   :  { %2822 = vmatmul.bf16.gmra.mxu2 %v10163_v0  ;;  %v8348_v9 = vpack.c.bf16 %v3175_v17, %v3171_v26 }
 0x445   :  { %2519 = vmatmul.bf16.gmra.mxu0 %v10209_v4  ;;  %v8351_v49 = vpack.c.bf16 %v3046_v40, %v3042_v19 }
 0x446   :  { %10208 = vst [vmem:[#allocation60_spill] sm:$0xff] %v8348_v9  ;;  %v1680_v23 = vpop.f32.mrf.mxu3 }
 0x447   :  { %10210 = vst [vmem:[#allocation62_spill] sm:$0xff] %v8351_v49  ;;  %v2267_v61 = vpop.f32.mrf.mxu2  ;;  %v1681_v30 = vadd.f32 %v1680_v23, %v8118_v7  ;;  %v6190_v23 = vld [vmem:[%s9943_s5 + $0x54] sm:$0xf0] }
 0x448   :  { %v2268_v46 = vadd.f32 %v2267_v61, %v2099_v47  ;;  %v2100_v22 = vpop.f32.mrf.mxu1 }
 0x449   :  { %v2101_v16 = vadd.f32 %v2100_v22, %v7670_v56  ;;  %v1850_v0 = vadd.f32 %v7709_v53, %v1681_v30  ;;  %v5753_v53 = vld [vmem:[%s9943_s5 + $0x48] sm:$0xf] }
 0x44a   :  { %v8354_v59 = vpop.f32.mrf.mxu0  ;;  %v3179_v19 = vmax.f32 %v2268_v46, 0.0  ;;  %v10212_v22 = vld [vmem:[#allocation36_spill] sm:$0xff] }
 0x44b   :  { %v3050_v61 = vmax.f32 %v1850_v0, 0.0 }
 0x44e   :  { %v1682_v15 = vpop.f32.mrf.mxu3 }
 0x44f   :  { %v1683_v17 = vadd.f32 %v1682_v15, %v8118_v7  ;;  %v2269_v26 = vpop.f32.mrf.mxu2 }
 0x450   :  { %v2270_v40 = vadd.f32 %v2269_v26, %v2101_v16  ;;  %v2103_v36 = vpop.f32.mrf.mxu1 }
 0x451   :  { %v1852_v2 = vadd.f32 %v7715_v24, %v1683_v17  ;;  %v5754_v24 = vor.u32 %v6190_v23, %v5753_v53  ;;  %v2104_v16 = vadd.f32 %v2103_v36, %v7670_v56 }
 0x452   :  { %v3183_v49 = vmax.f32 %v2270_v40, 0.0  ;;  %v8361_v47 = vpop.f32.mrf.mxu0 }
 0x453   :  { %v3054_v9 = vmax.f32 %v1852_v2, 0.0  ;;  %1724 = vmatmul.bf16.gmra.mxu3 %v10117_v41  ;;  %2658 = vmatmul.bf16.gmra.mxu1 %v10116_v31 }
 0x454   :  { %2827 = vmatmul.bf16.gmra.mxu2 %v10170_v18  ;;  %v8372_v46 = vpack.c.bf16 %v3183_v49, %v3179_v19  ;;  %2307 = vmatpush.bf16.msra.mxu3 %v5754_v24 }
 0x455   :  { %2524 = vmatmul.bf16.gmra.mxu0 %v10212_v22  ;;  %v8375_v30 = vpack.c.bf16 %v3054_v9, %v3050_v61 }
 0x456   :  { %10211 = vst [vmem:[#allocation33_spill] sm:$0xff] %v8372_v46  ;;  %v1685_v15 = vpop.f32.mrf.mxu3 }
 0x457   :  { %10213 = vst [vmem:[#allocation36_spill] sm:$0xff] %v8375_v30  ;;  %v2272_v0 = vpop.f32.mrf.mxu2  ;;  %v1686_v2 = vadd.f32 %v1685_v15, %v8118_v7  ;;  %v10217_v15 = vld [vmem:[#allocation39_spill] sm:$0xff] }
 0x458   :  { %v2273_v17 = vadd.f32 %v2272_v0, %v2104_v16  ;;  %v2105_v26 = vpop.f32.mrf.mxu1 }
 0x459   :  { %v2106_v18 = vadd.f32 %v2105_v26, %v7670_v56  ;;  %v1855_v49 = vadd.f32 %v7735_v25, %v1686_v2 }
 0x45a   :  { %v8378_v40 = vpop.f32.mrf.mxu0  ;;  %v3187_v24 = vmax.f32 %v2273_v17, 0.0 }
 0x45b   :  { %10214 = vst [vmem:[#allocation118_spill] sm:$0xff] %v8378_v40  ;;  %v3058_v0 = vmax.f32 %v1855_v49, 0.0  ;;  %v10266_v40 = vld [vmem:[#allocation68_spill] sm:$0xff] }
 0x45e   :  { %v1687_v53 = vpop.f32.mrf.mxu3 }
 0x45f   :  { %v1688_v19 = vadd.f32 %v1687_v53, %v8118_v7  ;;  %v2274_v9 = vpop.f32.mrf.mxu2 }
 0x460   :  { %v2275_v61 = vadd.f32 %v2274_v9, %v2106_v18  ;;  %v2108_v23 = vpop.f32.mrf.mxu1 }
 0x461   :  { %v1857_v36 = vadd.f32 %v7743_v50, %v1688_v19  ;;  %v2109_v50 = vadd.f32 %v2108_v23, %v7670_v56 }
 0x462   :  { %v3191_v30 = vmax.f32 %v2275_v61, 0.0  ;;  %v8385_v16 = vpop.f32.mrf.mxu0 }
 0x463   :  { %10215 = vst [vmem:[#allocation119_spill] sm:$0xff] %v8385_v16  ;;  %v3062_v46 = vmax.f32 %v1857_v36, 0.0  ;;  %1729 = vmatmul.bf16.gmra.mxu3 %v10123_v51  ;;  %2663 = vmatmul.bf16.gmra.mxu1 %v10122_v14 }
 0x464   :  { %2832 = vmatmul.bf16.gmra.mxu2 %v10177_v54  ;;  %v8390_v25 = vpack.c.bf16 %v3191_v30, %v3187_v24 }
 0x465   :  { %2529 = vmatmul.bf16.gmra.mxu0 %v10217_v15  ;;  %v8393_v26 = vpack.c.bf16 %v3062_v46, %v3058_v0 }
 0x466   :  { %10216 = vst [vmem:[#allocation120_spill] sm:$0xff] %v8390_v25  ;;  %v1690_v17 = vpop.f32.mrf.mxu3 }
 0x467   :  { %10218 = vst [vmem:[#allocation39_spill] sm:$0xff] %v8393_v26  ;;  %v2277_v2 = vpop.f32.mrf.mxu2  ;;  %v1691_v19 = vadd.f32 %v1690_v17, %v8118_v7  ;;  %v10222_v17 = vld [vmem:[#allocation43_spill] sm:$0xff] }
 0x468   :  { %v2278_v18 = vadd.f32 %v2277_v2, %v2109_v50  ;;  %v2110_v53 = vpop.f32.mrf.mxu1 }
 0x469   :  { %v2111_v9 = vadd.f32 %v2110_v53, %v7670_v56  ;;  %v1860_v54 = vadd.f32 %v7763_v5, %v1691_v19 }
 0x46a   :  { %v8396_v49 = vpop.f32.mrf.mxu0  ;;  %v3195_v0 = vmax.f32 %v2278_v18, 0.0 }
 0x46b   :  { %10219 = vst [vmem:[#allocation121_spill] sm:$0xff] %v8396_v49  ;;  %v3066_v2 = vmax.f32 %v1860_v54, 0.0 }
 0x46e   :  { %v1692_v61 = vpop.f32.mrf.mxu3 }
 0x46f   :  { %v1693_v30 = vadd.f32 %v1692_v61, %v8118_v7  ;;  %v2279_v36 = vpop.f32.mrf.mxu2 }
 0x470   :  { %v2280_v46 = vadd.f32 %v2279_v36, %v2111_v9  ;;  %v2113_v24 = vpop.f32.mrf.mxu1 }
 0x471   :  { %v1862_v23 = vadd.f32 %v7771_v29, %v1693_v30  ;;  %v2114_v29 = vadd.f32 %v2113_v24, %v7670_v56 }
 0x472   :  { %v3199_v26 = vmax.f32 %v2280_v46, 0.0  ;;  %v8403_v50 = vpop.f32.mrf.mxu0 }
 0x473   :  { %10220 = vst [vmem:[#allocation122_spill] sm:$0xff] %v8403_v50  ;;  %v3070_v25 = vmax.f32 %v1862_v23, 0.0  ;;  %1734 = vmatmul.bf16.gmra.mxu3 %v7573_v3  ;;  %2668 = vmatmul.bf16.gmra.mxu1 %v10128_v34 }
 0x474   :  { %2837 = vmatmul.bf16.gmra.mxu2 %v10184_v58  ;;  %v8408_v5 = vpack.c.bf16 %v3199_v26, %v3195_v0 }
 0x475   :  { %2534 = vmatmul.bf16.gmra.mxu0 %v10222_v17  ;;  %v8411_v53 = vpack.c.bf16 %v3070_v25, %v3066_v2 }
 0x476   :  { %10221 = vst [vmem:[#allocation123_spill] sm:$0xff] %v8408_v5  ;;  %v1695_v18 = vpop.f32.mrf.mxu3 }
 0x477   :  { %10223 = vst [vmem:[#allocation43_spill] sm:$0xff] %v8411_v53  ;;  %v2282_v19 = vpop.f32.mrf.mxu2  ;;  %v1696_v30 = vadd.f32 %v1695_v18, %v8118_v7  ;;  %v10227_v18 = vld [vmem:[#allocation47_spill] sm:$0xff] }
 0x478   :  { %v2283_v9 = vadd.f32 %v2282_v19, %v2114_v29  ;;  %v2115_v61 = vpop.f32.mrf.mxu1 }
 0x479   :  { %v2116_v36 = vadd.f32 %v2115_v61, %v7670_v56  ;;  %v1865_v58 = vadd.f32 %v7791_v21, %v1696_v30 }
 0x47a   :  { %v8414_v54 = vpop.f32.mrf.mxu0  ;;  %v3203_v2 = vmax.f32 %v2283_v9, 0.0 }
 0x47b   :  { %10224 = vst [vmem:[#allocation124_spill] sm:$0xff] %v8414_v54  ;;  %v3074_v19 = vmax.f32 %v1865_v58, 0.0  ;;  %v10240_v54 = vld [vmem:[#allocation59_spill] sm:$0xff] }
 0x47e   :  { %v1697_v46 = vpop.f32.mrf.mxu3 }
 0x47f   :  { %v1698_v26 = vadd.f32 %v1697_v46, %v8118_v7  ;;  %v2284_v23 = vpop.f32.mrf.mxu2 }
 0x480   :  { %v2285_v25 = vadd.f32 %v2284_v23, %v2116_v36  ;;  %v2118_v0 = vpop.f32.mrf.mxu1 }
 0x481   :  { %v1867_v24 = vadd.f32 %v7799_v43, %v1698_v26  ;;  %v2119_v43 = vadd.f32 %v2118_v0, %v7670_v56 }
 0x482   :  { %v3207_v53 = vmax.f32 %v2285_v25, 0.0  ;;  %v8421_v29 = vpop.f32.mrf.mxu0 }
 0x483   :  { %10225 = vst [vmem:[#allocation125_spill] sm:$0xff] %v8421_v29  ;;  %v3078_v5 = vmax.f32 %v1867_v24, 0.0  ;;  %1739 = vmatmul.bf16.gmra.mxu3 %v7599_v48  ;;  %2673 = vmatmul.bf16.gmra.mxu1 %v10133_v1 }
 0x484   :  { %2842 = vmatmul.bf16.gmra.mxu2 %v10190_v57  ;;  %v8426_v21 = vpack.c.bf16 %v3207_v53, %v3203_v2 }
 0x485   :  { %2539 = vmatmul.bf16.gmra.mxu0 %v10227_v18  ;;  %v8429_v61 = vpack.c.bf16 %v3078_v5, %v3074_v19 }
 0x486   :  { %10226 = vst [vmem:[#allocation126_spill] sm:$0xff] %v8426_v21  ;;  %v1700_v9 = vpop.f32.mrf.mxu3 }
 0x487   :  { %10228 = vst [vmem:[#allocation47_spill] sm:$0xff] %v8429_v61  ;;  %v2287_v30 = vpop.f32.mrf.mxu2  ;;  %v1701_v26 = vadd.f32 %v1700_v9, %v8118_v7  ;;  %v10232_v9 = vld [vmem:[#allocation20_spill] sm:$0xff] }
 0x488   :  { %v2288_v36 = vadd.f32 %v2287_v30, %v2119_v43  ;;  %v2120_v46 = vpop.f32.mrf.mxu1 }
 0x489   :  { %v2121_v23 = vadd.f32 %v2120_v46, %v7670_v56  ;;  %v1870_v57 = vadd.f32 %v7819_v12, %v1701_v26  ;;  %v5737_v12 = vld [vmem:[%s9943_s5 + $0x28] sm:$0xf]  ;;  %v6186_v46 = vld [vmem:[%s9943_s5 + $0x34] sm:$0xf0] }
 0x48a   :  { %v8432_v58 = vpop.f32.mrf.mxu0  ;;  %v3211_v19 = vmax.f32 %v2288_v36, 0.0  ;;  %v10234_v26 = vld [vmem:[#allocation50_spill] sm:$0xff] }
 0x48b   :  { %10229 = vst [vmem:[#allocation127_spill] sm:$0xff] %v8432_v58  ;;  %v3082_v30 = vmax.f32 %v1870_v57, 0.0  ;;  %v10231_v58 = vld [vmem:[#allocation55_spill] sm:$0xff] }
 0x48e   :  { %v1702_v25 = vpop.f32.mrf.mxu3 }
 0x48f   :  { %v1703_v53 = vadd.f32 %v1702_v25, %v8118_v7  ;;  %v2289_v24 = vpop.f32.mrf.mxu2 }
 0x490   :  { %v2290_v5 = vadd.f32 %v2289_v24, %v2121_v23  ;;  %v2123_v2 = vpop.f32.mrf.mxu1 }
 0x491   :  { %v1872_v0 = vadd.f32 %v7827_v32, %v1703_v53  ;;  %v5738_v32 = vor.u32 %v6186_v46, %v5737_v12  ;;  %v2124_v25 = vadd.f32 %v2123_v2, %v7670_v56  ;;  %v10238_v2 = vld [vmem:[#allocation78_spill] sm:$0xff] }
 0x492   :  { %v3215_v61 = vmax.f32 %v2290_v5, 0.0  ;;  %v8439_v43 = vpop.f32.mrf.mxu0 }
 0x493   :  { %10230 = vst [vmem:[#allocation128_spill] sm:$0xff] %v8439_v43  ;;  %v3086_v21 = vmax.f32 %v1872_v0, 0.0  ;;  %1744 = vmatmul.bf16.gmra.mxu3 %v10231_v58  ;;  %2678 = vmatmul.bf16.gmra.mxu1 %v10232_v9 }
 0x494   :  { %2847 = vmatmul.bf16.gmra.mxu2 %v10196_v38  ;;  %v8450_v36 = vpack.c.bf16 %v3215_v61, %v3211_v19  ;;  %2308 = vmatpush.bf16.msra.mxu3 %v5738_v32  ;;  %v10237_v61 = vld [vmem:[#allocation75_spill] sm:$0xff] }
 0x495   :  { %2544 = vmatmul.bf16.gmra.mxu0 %v10234_v26  ;;  %v8453_v23 = vpack.c.bf16 %v3086_v21, %v3082_v30 }
 0x496   :  { %10233 = vst [vmem:[#allocation55_spill] sm:$0xff] %v8450_v36  ;;  %v1705_v57 = vpop.f32.mrf.mxu3 }
 0x497   :  { %10235 = vst [vmem:[#allocation20_spill] sm:$0xff] %v8453_v23  ;;  %v2292_v53 = vpop.f32.mrf.mxu2  ;;  %v1706_v43 = vadd.f32 %v1705_v57, %v8118_v7  ;;  %v10241_v57 = vld [vmem:[#allocation21_spill] sm:$0xff] }
 0x498   :  { %v2293_v24 = vadd.f32 %v2292_v53, %v2124_v25  ;;  %v2125_v5 = vpop.f32.mrf.mxu1 }
 0x499   :  { %v2126_v38 = vadd.f32 %v2125_v5, %v7670_v56  ;;  %v1875_v19 = vadd.f32 %v10237_v61, %v1706_v43  ;;  %v10243_v5 = vld [vmem:[#allocation53_spill] sm:$0xff] }
 0x49a   :  { %v8456_v0 = vpop.f32.mrf.mxu0  ;;  %v3219_v32 = vmax.f32 %v2293_v24, 0.0 }
 0x49b   :  { %10236 = vst [vmem:[#allocation50_spill] sm:$0xff] %v8456_v0  ;;  %v3090_v53 = vmax.f32 %v1875_v19, 0.0 }
 0x49e   :  { %v1707_v12 = vpop.f32.mrf.mxu3 }
 0x49f   :  { %v1708_v46 = vadd.f32 %v1707_v12, %v8118_v7  ;;  %v2294_v21 = vpop.f32.mrf.mxu2 }
 0x4a0   :  { %v2295_v30 = vadd.f32 %v2294_v21, %v2126_v38  ;;  %v2128_v23 = vpop.f32.mrf.mxu1 }
 0x4a1   :  { %v1877_v36 = vadd.f32 %v10238_v2, %v1708_v46  ;;  %v2129_v12 = vadd.f32 %v2128_v23, %v7670_v56 }
 0x4a2   :  { %v3223_v29 = vmax.f32 %v2295_v30, 0.0  ;;  %v8463_v25 = vpop.f32.mrf.mxu0 }
 0x4a3   :  { %10239 = vst [vmem:[#allocation75_spill] sm:$0xff] %v8463_v25  ;;  %v3094_v0 = vmax.f32 %v1877_v36, 0.0  ;;  %1749 = vmatmul.bf16.gmra.mxu3 %v10240_v54  ;;  %2683 = vmatmul.bf16.gmra.mxu1 %v10241_v57 }
 0x4a4   :  { %2852 = vmatmul.bf16.gmra.mxu2 %v10203_v35  ;;  %v8468_v43 = vpack.c.bf16 %v3223_v29, %v3219_v32  ;;  %v10246_v35 = vld [vmem:[#allocation80_spill] sm:$0xff] }
 0x4a5   :  { %2549 = vmatmul.bf16.gmra.mxu0 %v10243_v5  ;;  %v8471_v38 = vpack.c.bf16 %v3094_v0, %v3090_v53 }
 0x4a6   :  { %10242 = vst [vmem:[#allocation78_spill] sm:$0xff] %v8468_v43  ;;  %v1710_v24 = vpop.f32.mrf.mxu3 }
 0x4a7   :  { %10244 = vst [vmem:[#allocation59_spill] sm:$0xff] %v8471_v38  ;;  %v2297_v61 = vpop.f32.mrf.mxu2  ;;  %v1711_v36 = vadd.f32 %v1710_v24, %v8118_v7  ;;  %v10247_v38 = vld [vmem:[#allocation83_spill] sm:$0xff] }
 0x4a8   :  { %v2298_v46 = vadd.f32 %v2297_v61, %v2129_v12  ;;  %v2130_v21 = vpop.f32.mrf.mxu1  ;;  %v10248_v12 = vld [vmem:[#allocation110_spill] sm:$0xff] }
 0x4a9   :  { %v2131_v30 = vadd.f32 %v2130_v21, %v7670_v56  ;;  %v1880_v29 = vadd.f32 %v10246_v35, %v1711_v36  ;;  %v8482_v61 = vperm.slane %v10248_v12, 3  ;;  %v10250_v56 = vld [vmem:[#allocation63_spill] sm:$0xff] }
 0x4aa   :  { %v8474_v19 = vpop.f32.mrf.mxu0  ;;  %v3227_v25 = vmax.f32 %v2298_v46, 0.0  ;;  %v10251_v21 = vld [vmem:[#allocation23_spill] sm:$0xff] }
 0x4ab   :  { %10245 = vst [vmem:[#allocation21_spill] sm:$0xff] %v8474_v19  ;;  %v3098_v24 = vmax.f32 %v1880_v29, 0.0 }
 0x4ae   :  { %v1712_v2 = vpop.f32.mrf.mxu3 }
 0x4af   :  { %v1713_v32 = vadd.f32 %v1712_v2, %v8118_v7  ;;  %v2299_v43 = vpop.f32.mrf.mxu2 }
 0x4b0   :  { %v2300_v0 = vadd.f32 %v2299_v43, %v2131_v30  ;;  %v2649_v53 = vpop.f32.mrf.mxu1  ;;  %v10253_v43 = vld [vmem:[#allocation57_spill] sm:$0xff] }
 0x4b1   :  { %v1882_v23 = vadd.f32 %v10247_v38, %v1713_v32  ;;  %v2650_v46 = vadd.f32 %v2649_v53, %v8482_v61 }
 0x4b2   :  { %v3231_v50 = vmax.f32 %v2300_v0, 0.0  ;;  %v8484_v19 = vpop.f32.mrf.mxu0 }
 0x4b3   :  { %10249 = vst [vmem:[#allocation53_spill] sm:$0xff] %v8484_v19  ;;  %v3102_v49 = vmax.f32 %v1882_v23, 0.0  ;;  %1754 = vmatmul.bf16.gmra.mxu3 %v10250_v56  ;;  %2688 = vmatmul.bf16.gmra.mxu1 %v10251_v21 }
 0x4b4   :  { %2857 = vmatmul.bf16.gmra.mxu2 %v10209_v4  ;;  %v8489_v36 = vpack.c.bf16 %v3231_v50, %v3227_v25  ;;  %v10256_v4 = vld [vmem:[#allocation84_spill] sm:$0xff] }
 0x4b5   :  { %2554 = vmatmul.bf16.gmra.mxu0 %v10253_v43  ;;  %v8492_v38 = vpack.c.bf16 %v3102_v49, %v3098_v24 }
 0x4b6   :  { %10252 = vst [vmem:[#allocation80_spill] sm:$0xff] %v8489_v36  ;;  %v1715_v30 = vpop.f32.mrf.mxu3 }
 0x4b7   :  { %10254 = vst [vmem:[#allocation83_spill] sm:$0xff] %v8492_v38  ;;  %v2818_v2 = vpop.f32.mrf.mxu2  ;;  %v1716_v0 = vadd.f32 %v1715_v30, %v8118_v7  ;;  %v10257_v38 = vld [vmem:[#allocation86_spill] sm:$0xff] }
 0x4b8   :  { %v2819_v35 = vadd.f32 %v2818_v2, %v2650_v46  ;;  %v2651_v32 = vpop.f32.mrf.mxu1 }
 0x4b9   :  { %v2652_v23 = vadd.f32 %v2651_v32, %v8482_v61  ;;  %v1885_v50 = vadd.f32 %v10256_v4, %v1716_v0  ;;  %v10260_v32 = vld [vmem:[#allocation61_spill] sm:$0xff] }
 0x4ba   :  { %v8495_v29 = vpop.f32.mrf.mxu0  ;;  %v2981_v19 = vmax.f32 %v2819_v35, 0.0 }
 0x4bb   :  { %10255 = vst [vmem:[#allocation110_spill] sm:$0xff] %v8495_v29  ;;  %v3106_v2 = vmax.f32 %v1885_v50, 0.0 }
 0x4be   :  { %v1717_v12 = vpop.f32.mrf.mxu3 }
 0x4bf   :  { %v1718_v25 = vadd.f32 %v1717_v12, %v8118_v7  ;;  %v2820_v36 = vpop.f32.mrf.mxu2 }
 0x4c0   :  { %v2821_v49 = vadd.f32 %v2820_v36, %v2652_v23  ;;  %v2654_v24 = vpop.f32.mrf.mxu1 }
 0x4c1   :  { %v1887_v53 = vadd.f32 %v10257_v38, %v1718_v25  ;;  %v2655_v38 = vadd.f32 %v2654_v24, %v8482_v61 }
 0x4c2   :  { %v2985_v16 = vmax.f32 %v2821_v49, 0.0  ;;  %v8502_v46 = vpop.f32.mrf.mxu0 }
 0x4c3   :  { %10258 = vst [vmem:[#allocation63_spill] sm:$0xff] %v8502_v46  ;;  %v3110_v29 = vmax.f32 %v1887_v53, 0.0  ;;  %1759 = vmatmul.bf16.gmra.mxu3 %v7724_v55  ;;  %2693 = vmatmul.bf16.gmra.mxu1 %v7240_v11 }
 0x4c4   :  { %v8506_v30 = vpack.c.bf16 %v2985_v16, %v2981_v19  ;;  %2862 = vmatmul.bf16.gmra.mxu2 %v10212_v22  ;;  %v10263_v19 = vld [vmem:[#allocation88_spill] sm:$0xff] }
 0x4c5   :  { %2559 = vmatmul.bf16.gmra.mxu0 %v10260_v32  ;;  %v8510_v36 = vpack.c.bf16 %v3110_v29, %v3106_v2 }
 0x4c6   :  { %10259 = vst [vmem:[#allocation23_spill] sm:$0xff] %v8506_v30  ;;  %v1720_v35 = vpop.f32.mrf.mxu3 }
 0x4c7   :  { %10261 = vst [vmem:[#allocation57_spill] sm:$0xff] %v8510_v36  ;;  %v2823_v0 = vpop.f32.mrf.mxu2  ;;  %v1721_v50 = vadd.f32 %v1720_v35, %v8118_v7  ;;  %v10264_v36 = vld [vmem:[#allocation90_spill] sm:$0xff] }
 0x4c8   :  { %v2824_v23 = vadd.f32 %v2823_v0, %v2655_v38  ;;  %v2656_v12 = vpop.f32.mrf.mxu1  ;;  %v10267_v35 = vld [vmem:[#allocation26_spill] sm:$0xff] }
 0x4c9   :  { %v2657_v25 = vadd.f32 %v2656_v12, %v8482_v61  ;;  %v1890_v49 = vadd.f32 %v10263_v19, %v1721_v50  ;;  %v5721_v12 = vld [vmem:[%s9943_s5 + $0x8] sm:$0xf]  ;;  %v6182_v50 = vld [vmem:[%s9943_s5 + $0x14] sm:$0xf0] }
 0x4ca   :  { %v8513_v4 = vpop.f32.mrf.mxu0  ;;  %v2989_v46 = vmax.f32 %v2824_v23, 0.0 }
 0x4cb   :  { %10262 = vst [vmem:[#allocation84_spill] sm:$0xff] %v8513_v4  ;;  %v3114_v0 = vmax.f32 %v1890_v49, 0.0 }
 0x4ce   :  { %v1722_v16 = vpop.f32.mrf.mxu3 }
 0x4cf   :  { %v1723_v22 = vadd.f32 %v1722_v16, %v8118_v7  ;;  %v2825_v53 = vpop.f32.mrf.mxu2 }
 0x4d0   :  { %v2826_v29 = vadd.f32 %v2825_v53, %v2657_v25  ;;  %v2659_v2 = vpop.f32.mrf.mxu1  ;;  %v10269_v25 = vld [vmem:[#allocation65_spill] sm:$0xff] }
 0x4d1   :  { %v1892_v24 = vadd.f32 %v10264_v36, %v1723_v22  ;;  %v5722_v36 = vor.u32 %v6182_v50, %v5721_v12  ;;  %v2660_v19 = vadd.f32 %v2659_v2, %v8482_v61  ;;  %v10273_v2 = vld [vmem:[#allocation92_spill] sm:$0xff] }
 0x4d2   :  { %v2993_v30 = vmax.f32 %v2826_v29, 0.0  ;;  %v8520_v38 = vpop.f32.mrf.mxu0 }
 0x4d3   :  { %10265 = vst [vmem:[#allocation86_spill] sm:$0xff] %v8520_v38  ;;  %v3118_v4 = vmax.f32 %v1892_v24, 0.0  ;;  %1764 = vmatmul.bf16.gmra.mxu3 %v10266_v40  ;;  %2698 = vmatmul.bf16.gmra.mxu1 %v10267_v35 }
 0x4d4   :  { %2867 = vmatmul.bf16.gmra.mxu2 %v10217_v15  ;;  %v8531_v23 = vpack.c.bf16 %v2993_v30, %v2989_v46  ;;  %2309 = vmatpush.bf16.msra.mxu3 %v5722_v36  ;;  %v10272_v46 = vld [vmem:[#allocation16_spill] sm:$0xff] }
 0x4d5   :  { %2564 = vmatmul.bf16.gmra.mxu0 %v10269_v25  ;;  %v8534_v16 = vpack.c.bf16 %v3118_v4, %v3114_v0 }
 0x4d6   :  { %10268 = vst [vmem:[#allocation61_spill] sm:$0xff] %v8531_v23  ;;  %v1725_v49 = vpop.f32.mrf.mxu3 }
 0x4d7   :  { %10270 = vst [vmem:[#allocation88_spill] sm:$0xff] %v8534_v16  ;;  %v2828_v22 = vpop.f32.mrf.mxu2  ;;  %v1726_v38 = vadd.f32 %v1725_v49, %v8118_v7  ;;  %v10276_v49 = vld [vmem:[#allocation67_spill] sm:$0xff] }
 0x4d8   :  { %v2829_v53 = vadd.f32 %v2828_v22, %v2660_v19  ;;  %v2661_v29 = vpop.f32.mrf.mxu1 }
 0x4d9   :  { %v2662_v15 = vadd.f32 %v2661_v29, %v8482_v61  ;;  %v1895_v30 = vadd.f32 %v10272_v46, %v1726_v38 }
 0x4da   :  { %v8537_v24 = vpop.f32.mrf.mxu0  ;;  %v2997_v36 = vmax.f32 %v2829_v53, 0.0 }
 0x4db   :  { %10271 = vst [vmem:[#allocation90_spill] sm:$0xff] %v8537_v24  ;;  %v3122_v22 = vmax.f32 %v1895_v30, 0.0 }
 0x4de   :  { %v1727_v12 = vpop.f32.mrf.mxu3 }
 0x4df   :  { %v1728_v50 = vadd.f32 %v1727_v12, %v8118_v7  ;;  %v2830_v4 = vpop.f32.mrf.mxu2 }
 0x4e0   :  { %v2831_v0 = vadd.f32 %v2830_v4, %v2662_v15  ;;  %v2664_v16 = vpop.f32.mrf.mxu1 }
 0x4e1   :  { %v1897_v23 = vadd.f32 %v10273_v2, %v1728_v50  ;;  %v2665_v15 = vadd.f32 %v2664_v16, %v8482_v61 }
 0x4e2   :  { %v3001_v40 = vmax.f32 %v2831_v0, 0.0  ;;  %v8544_v19 = vpop.f32.mrf.mxu0 }
 0x4e3   :  { %10274 = vst [vmem:[#allocation26_spill] sm:$0xff] %v8544_v19  ;;  %v3126_v24 = vmax.f32 %v1897_v23, 0.0  ;;  %1769 = vmatmul.bf16.gmra.mxu3 %v7780_v45  ;;  %2703 = vmatmul.bf16.gmra.mxu1 %v7300_v42 }
 0x4e4   :  { %2872 = vmatmul.bf16.gmra.mxu2 %v10222_v17  ;;  %v8549_v38 = vpack.c.bf16 %v3001_v40, %v2997_v36  ;;  %v10279_v17 = vld [vmem:[#allocation17_spill] sm:$0xff] }
 0x4e5   :  { %2569 = vmatmul.bf16.gmra.mxu0 %v10276_v49  ;;  %v8552_v29 = vpack.c.bf16 %v3126_v24, %v3122_v22 }
 0x4e6   :  { %10275 = vst [vmem:[#allocation65_spill] sm:$0xff] %v8549_v38  ;;  %v1730_v53 = vpop.f32.mrf.mxu3 }
 0x4e7   :  { %10277 = vst [vmem:[#allocation16_spill] sm:$0xff] %v8552_v29  ;;  %v2833_v12 = vpop.f32.mrf.mxu2  ;;  %v1731_v23 = vadd.f32 %v1730_v53, %v8118_v7  ;;  %v10280_v29 = vld [vmem:[#allocation94_spill] sm:$0xff] }
 0x4e8   :  { %v2834_v46 = vadd.f32 %v2833_v12, %v2665_v15  ;;  %v2666_v50 = vpop.f32.mrf.mxu1 }
 0x4e9   :  { %v2667_v4 = vadd.f32 %v2666_v50, %v8482_v61  ;;  %v1900_v40 = vadd.f32 %v10279_v17, %v1731_v23  ;;  %v10283_v50 = vld [vmem:[#allocation70_spill] sm:$0xff] }
 0x4ea   :  { %v8555_v30 = vpop.f32.mrf.mxu0  ;;  %v3005_v19 = vmax.f32 %v2834_v46, 0.0 }
 0x4eb   :  { %10278 = vst [vmem:[#allocation92_spill] sm:$0xff] %v8555_v30  ;;  %v3130_v12 = vmax.f32 %v1900_v40, 0.0 }
 0x4ee   :  { %v1732_v0 = vpop.f32.mrf.mxu3 }
 0x4ef   :  { %v1733_v2 = vadd.f32 %v1732_v0, %v8118_v7  ;;  %v2835_v36 = vpop.f32.mrf.mxu2 }
 0x4f0   :  { %v2836_v24 = vadd.f32 %v2835_v36, %v2667_v4  ;;  %v2669_v22 = vpop.f32.mrf.mxu1 }
 0x4f1   :  { %v1902_v16 = vadd.f32 %v10280_v29, %v1733_v2  ;;  %v2670_v29 = vadd.f32 %v2669_v22, %v8482_v61 }
 0x4f2   :  { %v3009_v38 = vmax.f32 %v2836_v24, 0.0  ;;  %v8562_v15 = vpop.f32.mrf.mxu0 }
 0x4f3   :  { %10281 = vst [vmem:[#allocation67_spill] sm:$0xff] %v8562_v15  ;;  %v3134_v30 = vmax.f32 %v1902_v16, 0.0  ;;  %1774 = vmatmul.bf16.gmra.mxu3 %v7808_v8  ;;  %2708 = vmatmul.bf16.gmra.mxu1 %v7329_v27 }
 0x4f4   :  { %2877 = vmatmul.bf16.gmra.mxu2 %v10227_v18  ;;  %v8567_v53 = vpack.c.bf16 %v3009_v38, %v3005_v19  ;;  %v10286_v18 = vld [vmem:[#allocation18_spill] sm:$0xff] }
 0x4f5   :  { %2574 = vmatmul.bf16.gmra.mxu0 %v10283_v50  ;;  %v8570_v23 = vpack.c.bf16 %v3134_v30, %v3130_v12 }
 0x4f6   :  { %10282 = vst [vmem:[#allocation17_spill] sm:$0xff] %v8567_v53  ;;  %v1735_v46 = vpop.f32.mrf.mxu3 }
 0x4f7   :  { %10284 = vst [vmem:[#allocation94_spill] sm:$0xff] %v8570_v23  ;;  %v2838_v4 = vpop.f32.mrf.mxu2  ;;  %v1736_v2 = vadd.f32 %v1735_v46, %v8118_v7  ;;  %v10287_v23 = vld [vmem:[#allocation97_spill] sm:$0xff] }
 0x4f8   :  { %v2839_v0 = vadd.f32 %v2838_v4, %v2670_v29  ;;  %v2671_v17 = vpop.f32.mrf.mxu1 }
 0x4f9   :  { %v2672_v36 = vadd.f32 %v2671_v17, %v8482_v61  ;;  %v1905_v19 = vadd.f32 %v10286_v18, %v1736_v2  ;;  %v10290_v17 = vld [vmem:[#allocation72_spill] sm:$0xff] }
 0x4fa   :  { %v8573_v40 = vpop.f32.mrf.mxu0  ;;  %v3013_v15 = vmax.f32 %v2839_v0, 0.0 }
 0x4fb   :  { %10285 = vst [vmem:[#allocation70_spill] sm:$0xff] %v8573_v40  ;;  %v3138_v4 = vmax.f32 %v1905_v19, 0.0 }
 0x4fe   :  { %v1737_v24 = vpop.f32.mrf.mxu3 }
 0x4ff   :  { %v1738_v38 = vadd.f32 %v1737_v24, %v8118_v7  ;;  %v2840_v16 = vpop.f32.mrf.mxu2 }
 0x500   :  { %v2841_v30 = vadd.f32 %v2840_v16, %v2672_v36  ;;  %v2674_v12 = vpop.f32.mrf.mxu1 }
 0x501   :  { %v1907_v22 = vadd.f32 %v10287_v23, %v1738_v38  ;;  %v2675_v23 = vadd.f32 %v2674_v12, %v8482_v61 }
 0x502   :  { %v3017_v53 = vmax.f32 %v2841_v30, 0.0  ;;  %v8580_v29 = vpop.f32.mrf.mxu0 }
 0x503   :  { %10288 = vst [vmem:[#allocation18_spill] sm:$0xff] %v8580_v29  ;;  %v3142_v40 = vmax.f32 %v1907_v22, 0.0  ;;  %1779 = vmatmul.bf16.gmra.mxu3 %v7836_v60  ;;  %2713 = vmatmul.bf16.gmra.mxu1 %v7396_v33 }
 0x504   :  { %2882 = vmatmul.bf16.gmra.mxu2 %v10234_v26  ;;  %v8585_v46 = vpack.c.bf16 %v3017_v53, %v3013_v15  ;;  %v10293_v26 = vld [vmem:[#allocation99_spill] sm:$0xff] }
 0x505   :  { %2579 = vmatmul.bf16.gmra.mxu0 %v10290_v17  ;;  %v8588_v2 = vpack.c.bf16 %v3142_v40, %v3138_v4 }
 0x506   :  { %10289 = vst [vmem:[#allocation97_spill] sm:$0xff] %v8585_v46  ;;  %v1740_v0 = vpop.f32.mrf.mxu3 }
 0x507   :  { %10291 = vst [vmem:[#allocation72_spill] sm:$0xff] %v8588_v2  ;;  %v2843_v36 = vpop.f32.mrf.mxu2  ;;  %v1741_v38 = vadd.f32 %v1740_v0, %v8118_v7  ;;  %v10294_v2 = vld [vmem:[#allocation100_spill] sm:$0xff]  ;;  %v6250_v0 = vld [vmem:[%s9945_s7 + $0x38] sm:$0xff] }
 0x508   :  { %v2844_v24 = vadd.f32 %v2843_v36, %v2675_v23  ;;  %v2676_v18 = vpop.f32.mrf.mxu1  ;;  %3622 = vmatpush.bf16.msrb.mxu3 %v6250_v0 }
 0x509   :  { %v2677_v16 = vadd.f32 %v2676_v18, %v8482_v61  ;;  %v1910_v15 = vadd.f32 %v10293_v26, %v1741_v38  ;;  %v10297_v38 = vld [vmem:[#allocation74_spill] sm:$0xff] }
 0x50a   :  { %v8591_v19 = vpop.f32.mrf.mxu0  ;;  %v3021_v29 = vmax.f32 %v2844_v24, 0.0 }
 0x50b   :  { %10292 = vst [vmem:[#allocation129_spill] sm:$0xff] %v8591_v19  ;;  %v3146_v36 = vmax.f32 %v1910_v15, 0.0 }
 0x50e   :  { %v1742_v30 = vpop.f32.mrf.mxu3 }
 0x50f   :  { %v1743_v53 = vadd.f32 %v1742_v30, %v8118_v7  ;;  %v2845_v22 = vpop.f32.mrf.mxu2 }
 0x510   :  { %v2846_v40 = vadd.f32 %v2845_v22, %v2677_v16  ;;  %v2679_v4 = vpop.f32.mrf.mxu1 }
 0x511   :  { %v1912_v12 = vadd.f32 %v10294_v2, %v1743_v53  ;;  %v2680_v24 = vadd.f32 %v2679_v4, %v8482_v61  ;;  %v10300_v4 = vld [vmem:[#allocation103_spill] sm:$0xff] }
 0x512   :  { %v3025_v46 = vmax.f32 %v2846_v40, 0.0  ;;  %v8598_v23 = vpop.f32.mrf.mxu0 }
 0x513   :  { %10295 = vst [vmem:[#allocation99_spill] sm:$0xff] %v8598_v23  ;;  %v3150_v19 = vmax.f32 %v1912_v12, 0.0  ;;  %1784 = vmatmul.bf16.gmra.mxu3 %v7882_v37  ;;  %2718 = vmatmul.bf16.gmra.mxu1 %v7425_v62 }
 0x514   :  { %2887 = vmatmul.bf16.gmra.mxu2 %v10243_v5  ;;  %v8606_v18 = vpack.c.bf16 %v3025_v46, %v3021_v29  ;;  %v6274_v29 = vld [vmem:[%s9945_s7 + $0xf8] sm:$0xff] }
 0x515   :  { %2584 = vmatmul.bf16.gmra.mxu0 %v10297_v38  ;;  %v8609_v2 = vpack.c.bf16 %v3150_v19, %v3146_v36  ;;  %v6258_v46 = vld [vmem:[%s9945_s7 + $0x78] sm:$0xff]  ;;  %4129 = vmatpush.bf16.msrb.mxu2 %v6274_v29 }
 0x516   :  { %10296 = vst [vmem:[#allocation100_spill] sm:$0xff] %v8606_v18  ;;  %v1745_v16 = vpop.f32.mrf.mxu3  ;;  %v6266_v19 = vld [vmem:[%s9945_s7 + $0xb8] sm:$0xff]  ;;  %3791 = vmatpush.bf16.msrb.mxu0 %v6258_v46 }
 0x517   :  { %10298 = vst [vmem:[#allocation74_spill] sm:$0xff] %v8609_v2  ;;  %v2848_v30 = vpop.f32.mrf.mxu2  ;;  %v1746_v5 = vadd.f32 %v1745_v16, %v8118_v7  ;;  %3960 = vmatpush.bf16.msrb.mxu1 %v6266_v19 }
 0x518   :  { %v2849_v26 = vadd.f32 %v2848_v30, %v2680_v24  ;;  %v2681_v15 = vpop.f32.mrf.mxu1  ;;  %v10301_v30 = vld [vmem:[#allocation106_spill] sm:$0xff] }
 0x519   :  { %v2682_v22 = vadd.f32 %v2681_v15, %v8482_v61  ;;  %v1915_v12 = vadd.f32 %v10300_v4, %v1746_v5  ;;  %v10303_v5 = vld [vmem:[#allocation77_spill] sm:$0xff] }
 0x51a   :  { %v8612_v53 = vpop.f32.mrf.mxu0 }
 0x51b   :  { %10299 = vst [vmem:[#allocation130_spill] sm:$0xff] %v8612_v53  ;;  %v3029_v53 = vmax.f32 %v2849_v26, 0.0  ;;  %v3154_v37 = vmax.f32 %v1915_v12, 0.0 }
 0x51e   :  { %v1747_v40 = vpop.f32.mrf.mxu3 }
 0x51f   :  { %v1748_v36 = vadd.f32 %v1747_v40, %v8118_v7  ;;  %v2850_v0 = vpop.f32.mrf.mxu2 }
 0x520   :  { %v2851_v24 = vadd.f32 %v2850_v0, %v2682_v22  ;;  %v2684_v16 = vpop.f32.mrf.mxu1 }
 0x521   :  { %v1917_v2 = vadd.f32 %v10301_v30, %v1748_v36  ;;  %v2685_v19 = vadd.f32 %v2684_v16, %v8482_v61 }
 0x522   :  { %v3033_v23 = vmax.f32 %v2851_v24, 0.0  ;;  %v8628_v18 = vpop.f32.mrf.mxu0 }
 0x523   :  { %10302 = vst [vmem:[#allocation103_spill] sm:$0xff] %v8628_v18  ;;  %v3158_v29 = vmax.f32 %v1917_v2, 0.0  ;;  %1789 = vmatmul.bf16.gmra.mxu3 %v7900_v13  ;;  %2723 = vmatmul.bf16.gmra.mxu1 %v7442_v52 }
 0x524   :  { %2892 = vmatmul.bf16.gmra.mxu2 %v10253_v43  ;;  %v8633_v15 = vpack.c.bf16 %v3033_v23, %v3029_v53  ;;  %v10306_v43 = vld [vmem:[#allocation107_spill] sm:$0xff] }
 0x525   :  { %2589 = vmatmul.bf16.gmra.mxu0 %v10303_v5  ;;  %v8636_v46 = vpack.c.bf16 %v3158_v29, %v3154_v37  ;;  %v10307_v29 = vld [vmem:[#allocation111_spill] sm:$0xff] }
 0x526   :  { %v1750_v26 = vpop.f32.mrf.mxu3 }
 0x527   :  { %10304 = vst [vmem:[#allocation106_spill] sm:$0xff] %v8636_v46  ;;  %v2853_v22 = vpop.f32.mrf.mxu2  ;;  %v1751_v2 = vadd.f32 %v1750_v26, %v8118_v7 }
 0x528   :  { %v2854_v40 = vadd.f32 %v2853_v22, %v2685_v19  ;;  %v2686_v4 = vpop.f32.mrf.mxu1 }
 0x529   :  { %v2687_v36 = vadd.f32 %v2686_v4, %v8482_v61  ;;  %v1920_v23 = vadd.f32 %v10306_v43, %v1751_v2  ;;  %v10309_v4 = vld [vmem:[#allocation82_spill] sm:$0xff] }
 0x52a   :  { %v8639_v12 = vpop.f32.mrf.mxu0  ;;  %v3037_v46 = vmax.f32 %v2854_v40, 0.0 }
 0x52b   :  { %10305 = vst [vmem:[#allocation77_spill] sm:$0xff] %v8639_v12  ;;  %v3162_v22 = vmax.f32 %v1920_v23, 0.0 }
 0x52e   :  { %v1752_v0 = vpop.f32.mrf.mxu3 }
 0x52f   :  { %v1753_v53 = vadd.f32 %v1752_v0, %v8118_v7  ;;  %v2855_v24 = vpop.f32.mrf.mxu2 }
 0x530   :  { %v2856_v37 = vadd.f32 %v2855_v24, %v2687_v36  ;;  %v2689_v30 = vpop.f32.mrf.mxu1 }
 0x531   :  { %v1922_v16 = vadd.f32 %v10307_v29, %v1753_v53  ;;  %v2690_v36 = vadd.f32 %v2689_v30, %v8482_v61 }
 0x532   :  { %v3041_v18 = vmax.f32 %v2856_v37, 0.0  ;;  %v8646_v19 = vpop.f32.mrf.mxu0 }
 0x533   :  { %10308 = vst [vmem:[#allocation107_spill] sm:$0xff] %v8646_v19  ;;  %v3166_v12 = vmax.f32 %v1922_v16, 0.0  ;;  %2310 = vmatmul.bf16.vlgmr.msra.gmra.mxu3 %v6979_v6  ;;  %2728 = vmatmul.bf16.gmra.mxu1 %v7469_v39 }
 0x534   :  { %2897 = vmatmul.bf16.gmra.mxu2 %v10260_v32  ;;  %v8651_v26 = vpack.c.bf16 %v3041_v18, %v3037_v46  ;;  %v10312_v32 = vld [vmem:[#allocation32_spill] sm:$0xff] }
 0x535   :  { %2594 = vmatmul.bf16.gmra.mxu0 %v10309_v4  ;;  %v8654_v2 = vpack.c.bf16 %v3166_v12, %v3162_v22  ;;  %v10313_v22 = vld [vmem:[#allocation22_spill] sm:$0xff] }
 0x536   :  { %v1755_v40 = vpop.f32.mrf.mxu3 }
 0x537   :  { %10310 = vst [vmem:[#allocation111_spill] sm:$0xff] %v8654_v2  ;;  %v2858_v0 = vpop.f32.mrf.mxu2  ;;  %v1756_v6 = vadd.f32 %v1755_v40, %v8118_v7 }
 0x538   :  { %v2859_v43 = vadd.f32 %v2858_v0, %v2690_v36  ;;  %v2691_v53 = vpop.f32.mrf.mxu1 }
 0x539   :  { %v2692_v24 = vadd.f32 %v2691_v53, %v8482_v61  ;;  %v1925_v18 = vadd.f32 %v10312_v32, %v1756_v6  ;;  %v10315_v53 = vld [vmem:[#allocation87_spill] sm:$0xff] }
 0x53a   :  { %v8657_v23 = vpop.f32.mrf.mxu0  ;;  %v3045_v2 = vmax.f32 %v2859_v43, 0.0 }
 0x53b   :  { %10311 = vst [vmem:[#allocation82_spill] sm:$0xff] %v8657_v23  ;;  %v3170_v0 = vmax.f32 %v1925_v18, 0.0 }
 0x53e   :  { %v1757_v37 = vpop.f32.mrf.mxu3 }
 0x53f   :  { %v1758_v46 = vadd.f32 %v1757_v37, %v8118_v7  ;;  %v2860_v29 = vpop.f32.mrf.mxu2 }
 0x540   :  { %v2861_v12 = vadd.f32 %v2860_v29, %v2692_v24  ;;  %v2694_v16 = vpop.f32.mrf.mxu1 }
 0x541   :  { %v1927_v30 = vadd.f32 %v10313_v22, %v1758_v46  ;;  %v2695_v24 = vadd.f32 %v2694_v16, %v8482_v61 }
 0x542   :  { %v3049_v19 = vmax.f32 %v2861_v12, 0.0  ;;  %v8664_v36 = vpop.f32.mrf.mxu0 }
 0x543   :  { %10314 = vst [vmem:[#allocation32_spill] sm:$0xff] %v8664_v36  ;;  %v3174_v23 = vmax.f32 %v1927_v30, 0.0  ;;  %2315 = vmatmul.bf16.gmra.mxu3 %v6996_v28  ;;  %2733 = vmatmul.bf16.gmra.mxu1 %v7495_v20 }
 0x544   :  { %2902 = vmatmul.bf16.gmra.mxu2 %v10269_v25  ;;  %v8669_v40 = vpack.c.bf16 %v3049_v19, %v3045_v2  ;;  %v10318_v25 = vld [vmem:[#allocation35_spill] sm:$0xff] }
 0x545   :  { %2599 = vmatmul.bf16.gmra.mxu0 %v10315_v53  ;;  %v8672_v6 = vpack.c.bf16 %v3174_v23, %v3170_v0  ;;  %v10319_v0 = vld [vmem:[#allocation113_spill] sm:$0xff] }
 0x546   :  { %v1760_v43 = vpop.f32.mrf.mxu3 }
 0x547   :  { %10316 = vst [vmem:[#allocation22_spill] sm:$0xff] %v8672_v6  ;;  %v2863_v37 = vpop.f32.mrf.mxu2  ;;  %v1761_v28 = vadd.f32 %v1760_v43, %v8118_v7  ;;  %v6249_v43 = vld [vmem:[%s9945_s7 + $0x30] sm:$0xff] }
 0x548   :  { %v2864_v32 = vadd.f32 %v2863_v37, %v2695_v24  ;;  %v2696_v46 = vpop.f32.mrf.mxu1  ;;  %3623 = vmatpush.bf16.msrb.mxu3 %v6249_v43 }
 0x549   :  { %v2697_v29 = vadd.f32 %v2696_v46, %v8482_v61  ;;  %v1930_v19 = vadd.f32 %v10318_v25, %v1761_v28  ;;  %v10322_v28 = vld [vmem:[#allocation91_spill] sm:$0xff] }
 0x54a   :  { %v8675_v18 = vpop.f32.mrf.mxu0  ;;  %v3053_v6 = vmax.f32 %v2864_v32, 0.0 }
 0x54b   :  { %10317 = vst [vmem:[#allocation87_spill] sm:$0xff] %v8675_v18  ;;  %v3178_v37 = vmax.f32 %v1930_v19, 0.0 }
 0x54e   :  { %v1762_v12 = vpop.f32.mrf.mxu3 }
 0x54f   :  { %v1763_v2 = vadd.f32 %v1762_v12, %v8118_v7  ;;  %v2865_v22 = vpop.f32.mrf.mxu2 }
 0x550   :  { %v2866_v23 = vadd.f32 %v2865_v22, %v2697_v29  ;;  %v2699_v30 = vpop.f32.mrf.mxu1 }
 0x551   :  { %v1932_v16 = vadd.f32 %v10319_v0, %v1763_v2  ;;  %v2700_v29 = vadd.f32 %v2699_v30, %v8482_v61  ;;  %v10325_v30 = vld [vmem:[#allocation38_spill] sm:$0xff] }
 0x552   :  { %v3057_v36 = vmax.f32 %v2866_v23, 0.0  ;;  %v8682_v24 = vpop.f32.mrf.mxu0 }
 0x553   :  { %10320 = vst [vmem:[#allocation35_spill] sm:$0xff] %v8682_v24  ;;  %v3182_v18 = vmax.f32 %v1932_v16, 0.0  ;;  %2320 = vmatmul.bf16.gmra.mxu3 %v10116_v31  ;;  %2738 = vmatmul.bf16.gmra.mxu1 %v10117_v41 }
 0x554   :  { %2907 = vmatmul.bf16.gmra.mxu2 %v10276_v49  ;;  %v8690_v46 = vpack.c.bf16 %v3057_v36, %v3053_v6  ;;  %v6273_v36 = vld [vmem:[%s9945_s7 + $0xf0] sm:$0xff] }
 0x555   :  { %2604 = vmatmul.bf16.gmra.mxu0 %v10322_v28  ;;  %v8693_v32 = vpack.c.bf16 %v3182_v18, %v3178_v37  ;;  %v6257_v6 = vld [vmem:[%s9945_s7 + $0x70] sm:$0xff]  ;;  %4130 = vmatpush.bf16.msrb.mxu2 %v6273_v36 }
 0x556   :  { %10321 = vst [vmem:[#allocation113_spill] sm:$0xff] %v8690_v46  ;;  %v1765_v12 = vpop.f32.mrf.mxu3  ;;  %v6265_v18 = vld [vmem:[%s9945_s7 + $0xb0] sm:$0xff]  ;;  %3792 = vmatpush.bf16.msrb.mxu0 %v6257_v6 }
 0x557   :  { %10323 = vst [vmem:[#allocation91_spill] sm:$0xff] %v8693_v32  ;;  %v2868_v25 = vpop.f32.mrf.mxu2  ;;  %v1766_v49 = vadd.f32 %v1765_v12, %v8118_v7  ;;  %3961 = vmatpush.bf16.msrb.mxu1 %v6265_v18  ;;  %v10326_v12 = vld [vmem:[#allocation114_spill] sm:$0xff] }
 0x558   :  { %v2869_v31 = vadd.f32 %v2868_v25, %v2700_v29  ;;  %v2701_v19 = vpop.f32.mrf.mxu1 }
 0x559   :  { %v2702_v22 = vadd.f32 %v2701_v19, %v8482_v61  ;;  %v1935_v0 = vadd.f32 %v10325_v30, %v1766_v49  ;;  %v10327_v49 = vld [vmem:[#allocation93_spill] sm:$0xff] }
 0x55a   :  { %v8696_v2 = vpop.f32.mrf.mxu0  ;;  %v3061_v32 = vmax.f32 %v2869_v31, 0.0 }
 0x55b   :  { %10324 = vst [vmem:[#allocation131_spill] sm:$0xff] %v8696_v2  ;;  %v3186_v46 = vmax.f32 %v1935_v0, 0.0 }
 0x55e   :  { %v1767_v23 = vpop.f32.mrf.mxu3 }
 0x55f   :  { %v1768_v16 = vadd.f32 %v1767_v23, %v8118_v7  ;;  %v2870_v37 = vpop.f32.mrf.mxu2 }
 0x560   :  { %v2871_v43 = vadd.f32 %v2870_v37, %v2702_v22  ;;  %v2704_v29 = vpop.f32.mrf.mxu1 }
 0x561   :  { %v1937_v25 = vadd.f32 %v10326_v12, %v1768_v16  ;;  %v2705_v18 = vadd.f32 %v2704_v29, %v8482_v61 }
 0x562   :  { %v3065_v2 = vmax.f32 %v2871_v43, 0.0  ;;  %v8712_v24 = vpop.f32.mrf.mxu0 }
 0x563   :  { %v3190_v36 = vmax.f32 %v1937_v25, 0.0  ;;  %2325 = vmatmul.bf16.gmra.mxu3 %v10122_v14  ;;  %2743 = vmatmul.bf16.gmra.mxu1 %v10123_v51  ;;  %v10331_v25 = vld [vmem:[#allocation115_spill] sm:$0xff] }
 0x564   :  { %2912 = vmatmul.bf16.gmra.mxu2 %v10283_v50  ;;  %v8717_v19 = vpack.c.bf16 %v3065_v2, %v3061_v32  ;;  %v10330_v50 = vld [vmem:[#allocation42_spill] sm:$0xff] }
 0x565   :  { %2609 = vmatmul.bf16.gmra.mxu0 %v10327_v49  ;;  %v8720_v6 = vpack.c.bf16 %v3190_v36, %v3186_v46 }
 0x566   :  { %v1770_v31 = vpop.f32.mrf.mxu3 }
 0x567   :  { %10328 = vst [vmem:[#allocation38_spill] sm:$0xff] %v8720_v6  ;;  %v2873_v22 = vpop.f32.mrf.mxu2  ;;  %v1771_v14 = vadd.f32 %v1770_v31, %v8118_v7 }
 0x568   :  { %v2874_v23 = vadd.f32 %v2873_v22, %v2705_v18  ;;  %v2706_v30 = vpop.f32.mrf.mxu1 }
 0x569   :  { %v2707_v16 = vadd.f32 %v2706_v30, %v8482_v61  ;;  %v1940_v32 = vadd.f32 %v10330_v50, %v1771_v14  ;;  %v10333_v30 = vld [vmem:[#allocation95_spill] sm:$0xff] }
 0x56a   :  { %v8723_v0 = vpop.f32.mrf.mxu0  ;;  %v3069_v36 = vmax.f32 %v2874_v23, 0.0 }
 0x56b   :  { %10329 = vst [vmem:[#allocation114_spill] sm:$0xff] %v8723_v0  ;;  %v3194_v22 = vmax.f32 %v1940_v32, 0.0 }
 0x56e   :  { %v1772_v37 = vpop.f32.mrf.mxu3 }
 0x56f   :  { %v1773_v2 = vadd.f32 %v1772_v37, %v8118_v7  ;;  %v2875_v43 = vpop.f32.mrf.mxu2 }
 0x570   :  { %v2876_v46 = vadd.f32 %v2875_v43, %v2707_v16  ;;  %v2709_v12 = vpop.f32.mrf.mxu1 }
 0x571   :  { %v1942_v29 = vadd.f32 %v10331_v25, %v1773_v2  ;;  %v2710_v16 = vadd.f32 %v2709_v12, %v8482_v61 }
 0x572   :  { %v3073_v6 = vmax.f32 %v2876_v46, 0.0  ;;  %v8730_v18 = vpop.f32.mrf.mxu0 }
 0x573   :  { %10332 = vst [vmem:[#allocation93_spill] sm:$0xff] %v8730_v18  ;;  %v3198_v0 = vmax.f32 %v1942_v29, 0.0  ;;  %2330 = vmatmul.bf16.gmra.mxu3 %v10128_v34  ;;  %2748 = vmatmul.bf16.gmra.mxu1 %v7573_v3 }
 0x574   :  { %2917 = vmatmul.bf16.gmra.mxu2 %v10290_v17  ;;  %v8735_v31 = vpack.c.bf16 %v3073_v6, %v3069_v36  ;;  %v10336_v17 = vld [vmem:[#allocation46_spill] sm:$0xff] }
 0x575   :  { %2614 = vmatmul.bf16.gmra.mxu0 %v10333_v30  ;;  %v8738_v14 = vpack.c.bf16 %v3198_v0, %v3194_v22  ;;  %v10337_v22 = vld [vmem:[#allocation116_spill] sm:$0xff] }
 0x576   :  { %v1775_v23 = vpop.f32.mrf.mxu3 }
 0x577   :  { %10334 = vst [vmem:[#allocation42_spill] sm:$0xff] %v8738_v14  ;;  %v2878_v37 = vpop.f32.mrf.mxu2  ;;  %v1776_v34 = vadd.f32 %v1775_v23, %v8118_v7 }
 0x578   :  { %v2879_v50 = vadd.f32 %v2878_v37, %v2710_v16  ;;  %v2711_v2 = vpop.f32.mrf.mxu1 }
 0x579   :  { %v2712_v43 = vadd.f32 %v2711_v2, %v8482_v61  ;;  %v1945_v6 = vadd.f32 %v10336_v17, %v1776_v34  ;;  %v10338_v2 = vld [vmem:[#allocation98_spill] sm:$0xff] }
 0x57a   :  { %v8741_v32 = vpop.f32.mrf.mxu0  ;;  %v3077_v14 = vmax.f32 %v2879_v50, 0.0 }
 0x57b   :  { %10335 = vst [vmem:[#allocation115_spill] sm:$0xff] %v8741_v32  ;;  %v3202_v37 = vmax.f32 %v1945_v6, 0.0 }
 0x57e   :  { %v1777_v46 = vpop.f32.mrf.mxu3 }
 0x57f   :  { %v1778_v25 = vadd.f32 %v1777_v46, %v8118_v7  ;;  %v2880_v29 = vpop.f32.mrf.mxu2 }
 0x580   :  { %v2881_v0 = vadd.f32 %v2880_v29, %v2712_v43  ;;  %v2714_v36 = vpop.f32.mrf.mxu1 }
 0x581   :  { %v1947_v12 = vadd.f32 %v10337_v22, %v1778_v25  ;;  %v2715_v43 = vadd.f32 %v2714_v36, %v8482_v61 }
 0x582   :  { %v3081_v18 = vmax.f32 %v2881_v0, 0.0  ;;  %v8748_v16 = vpop.f32.mrf.mxu0 }
 0x583   :  { %v3206_v32 = vmax.f32 %v1947_v12, 0.0  ;;  %2335 = vmatmul.bf16.gmra.mxu3 %v10133_v1  ;;  %2753 = vmatmul.bf16.gmra.mxu1 %v7599_v48 }
 0x584   :  { %2922 = vmatmul.bf16.gmra.mxu2 %v10297_v38  ;;  %v8753_v23 = vpack.c.bf16 %v3081_v18, %v3077_v14  ;;  %v6256_v38 = vld [vmem:[%s9945_s7 + $0x68] sm:$0xff] }
 0x585   :  { %2619 = vmatmul.bf16.gmra.mxu0 %v10338_v2  ;;  %v8756_v34 = vpack.c.bf16 %v3206_v32, %v3202_v37  ;;  %v6255_v37 = vld [vmem:[%s9945_s7 + $0x60] sm:$0xff] }
 0x586   :  { %v1780_v50 = vpop.f32.mrf.mxu3  ;;  %3793 = vmatpush.bf16.msrb.mxu0 %v6256_v38 }
 0x587   :  { %10339 = vst [vmem:[#allocation95_spill] sm:$0xff] %v8756_v34  ;;  %v2883_v46 = vpop.f32.mrf.mxu2  ;;  %v1781_v1 = vadd.f32 %v1780_v50, %v8118_v7 }
 0x588   :  { %v2884_v17 = vadd.f32 %v2883_v46, %v2715_v43  ;;  %v2716_v25 = vpop.f32.mrf.mxu1 }
 0x589   :  { %v2717_v18 = vadd.f32 %v2716_v25, %v8482_v61  ;;  %v1950_v32 = vadd.f32 %v8283_v63, %v1781_v1  ;;  %v6248_v63 = vld [vmem:[%s9945_s7 + $0x28] sm:$0xff] }
 0x58a   :  { %v8759_v6 = vpop.f32.mrf.mxu0  ;;  %v3085_v43 = vmax.f32 %v2884_v17, 0.0  ;;  %3794 = vmatpush.bf16.msrb.mxu0 %v6255_v37  ;;  %v10341_v1 = vld [vmem:[#allocation101_spill] sm:$0xff]  ;;  %v6254_v17 = vld [vmem:[%s9945_s7 + $0x58] sm:$0xff]  ;;  %3624 = vmatpush.bf16.msrb.mxu3 %v6248_v63 }
 0x58b   :  { %v3210_v25 = vmax.f32 %v1950_v32, 0.0 }
 0x58e   :  { %v1782_v14 = vpop.f32.mrf.mxu3  ;;  %3795 = vmatpush.bf16.msrb.mxu0 %v6254_v17 }
 0x58f   :  { %v1783_v29 = vadd.f32 %v1782_v14, %v8118_v7  ;;  %v2885_v0 = vpop.f32.mrf.mxu2 }
 0x590   :  { %v2886_v36 = vadd.f32 %v2885_v0, %v2717_v18  ;;  %v2719_v22 = vpop.f32.mrf.mxu1 }
 0x591   :  { %v1952_v12 = vadd.f32 %v8300_v44, %v1783_v29  ;;  %v6253_v29 = vld [vmem:[%s9945_s7 + $0x50] sm:$0xff] }
 0x592   :  { %v3089_v50 = vmax.f32 %v2886_v36, 0.0  ;;  %v8772_v46 = vpop.f32.mrf.mxu0  ;;  %3796 = vmatpush.bf16.msrb.mxu0 %v6253_v29  ;;  %v6251_v29 = vld [vmem:[%s9945_s7 + $0x40] sm:$0xff] }
 0x593   :  { %10340 = vst [vmem:[#allocation46_spill] sm:$0xff] %v8772_v46  ;;  %v3214_v34 = vmax.f32 %v1952_v12, 0.0  ;;  %2340 = vmatmul.bf16.gmra.mxu3 %v10232_v9  ;;  %2758 = vmatmul.bf16.gmra.mxu1 %v10231_v58  ;;  %v2720_v9 = vadd.f32 %v2719_v22, %v8482_v61  ;;  %v6264_v22 = vld [vmem:[%s9945_s7 + $0xa8] sm:$0xff] }
 0x594   :  { %2927 = vmatmul.bf16.gmra.mxu2 %v10303_v5  ;;  %v8780_v44 = vpack.c.bf16 %v3089_v50, %v3085_v43  ;;  %3962 = vmatpush.bf16.msrb.mxu1 %v6264_v22  ;;  %v6252_v12 = vld [vmem:[%s9945_s7 + $0x48] sm:$0xff] }
 0x595   :  { %2624 = vmatmul.bf16.gmra.mxu0 %v10341_v1  ;;  %v8786_v38 = vpack.c.bf16 %v3214_v34, %v3210_v25  ;;  %v6272_v34 = vld [vmem:[%s9945_s7 + $0xe8] sm:$0xff] }
 0x596   :  { %v1785_v18 = vpop.f32.mrf.mxu3  ;;  %4131 = vmatpush.bf16.msrb.mxu2 %v6272_v34  ;;  %v10344_v50 = vld [vmem:[#allocation29_spill] sm:$0xff]  ;;  %3797 = vmatpush.bf16.msrb.mxu0 %v6252_v12  ;;  %v10347_v12 = vld [vmem:[#allocation104_spill] sm:$0xff] }
 0x597   :  { %10342 = vst [vmem:[#allocation116_spill] sm:$0xff] %v8786_v38  ;;  %v2888_v5 = vpop.f32.mrf.mxu2  ;;  %v1786_v36 = vadd.f32 %v1785_v18, %v8118_v7 }
 0x598   :  { %v2889_v14 = vadd.f32 %v2888_v5, %v2720_v9  ;;  %v2721_v32 = vpop.f32.mrf.mxu1  ;;  %v10345_v5 = vld [vmem:[#allocation30_spill] sm:$0xff] }
 0x599   :  { %v2722_v37 = vadd.f32 %v2721_v32, %v8482_v61  ;;  %v1955_v25 = vadd.f32 %v10344_v50, %v1786_v36 }
 0x59a   :  { %v8792_v0 = vpop.f32.mrf.mxu0  ;;  %v3093_v34 = vmax.f32 %v2889_v14, 0.0  ;;  %3798 = vmatpush.bf16.msrb.mxu0 %v6251_v29 }
 0x59b   :  { %10343 = vst [vmem:[#allocation98_spill] sm:$0xff] %v8792_v0  ;;  %v3218_v32 = vmax.f32 %v1955_v25, 0.0 }
 0x59e   :  { %v1787_v43 = vpop.f32.mrf.mxu3 }
 0x59f   :  { %v1788_v63 = vadd.f32 %v1787_v43, %v8118_v7  ;;  %v2890_v17 = vpop.f32.mrf.mxu2 }
 0x5a0   :  { %v2891_v9 = vadd.f32 %v2890_v17, %v2722_v37  ;;  %v2724_v18 = vpop.f32.mrf.mxu1 }
 0x5a1   :  { %v1957_v38 = vadd.f32 %v10345_v5, %v1788_v63  ;;  %v2725_v14 = vadd.f32 %v2724_v18, %v8482_v61 }
 0x5a2   :  { %v3097_v22 = vmax.f32 %v2891_v9, 0.0  ;;  %v8811_v0 = vpop.f32.mrf.mxu0  ;;  %v10350_v9 = vld [vmem:[#allocation56_spill] sm:$0xff] }
 0x5a3   :  { %10346 = vst [vmem:[#allocation101_spill] sm:$0xff] %v8811_v0  ;;  %v3222_v46 = vmax.f32 %v1957_v38, 0.0  ;;  %2345 = vmatmul.bf16.gmra.mxu3 %v10241_v57  ;;  %2763 = vmatmul.bf16.gmra.mxu1 %v10240_v54 }
 0x5a4   :  { %2932 = vmatmul.bf16.gmra.mxu2 %v10309_v4  ;;  %v8816_v36 = vpack.c.bf16 %v3097_v22, %v3093_v34 }
 0x5a5   :  { %2629 = vmatmul.bf16.gmra.mxu0 %v10347_v12  ;;  %v8819_v37 = vpack.c.bf16 %v3222_v46, %v3218_v32  ;;  %v10351_v32 = vld [vmem:[#allocation117_spill] sm:$0xff] }
 0x5a6   :  { %v1790_v43 = vpop.f32.mrf.mxu3 }
 0x5a7   :  { %10348 = vst [vmem:[#allocation29_spill] sm:$0xff] %v8819_v37  ;;  %v2893_v50 = vpop.f32.mrf.mxu2  ;;  %v1791_v57 = vadd.f32 %v1790_v43, %v8118_v7 }
 0x5a8   :  { %v2894_v63 = vadd.f32 %v2893_v50, %v2725_v14  ;;  %v2726_v25 = vpop.f32.mrf.mxu1 }
 0x5a9   :  { %v2727_v17 = vadd.f32 %v2726_v25, %v8482_v61  ;;  %v1960_v5 = vadd.f32 %v10350_v9, %v1791_v57 }
 0x5aa   :  { %v8822_v38 = vpop.f32.mrf.mxu0  ;;  %v3101_v37 = vmax.f32 %v2894_v63, 0.0 }
 0x5ab   :  { %10349 = vst [vmem:[#allocation30_spill] sm:$0xff] %v8822_v38  ;;  %v3226_v50 = vmax.f32 %v1960_v5, 0.0 }
 0x5ae   :  { %v1792_v4 = vpop.f32.mrf.mxu3 }
 0x5af   :  { %v1793_v29 = vadd.f32 %v1792_v4, %v8118_v7  ;;  %v2895_v34 = vpop.f32.mrf.mxu2  ;;  %v10352_v7 = vld [vmem:[#allocation108_spill] sm:$0xff] }
 0x5b0   :  { %v2896_v46 = vadd.f32 %v2895_v34, %v2727_v17  ;;  %v2729_v22 = vpop.f32.mrf.mxu1  ;;  %v6565_v17 = vld [vmem:[%s9944_s6] sm:$0xf] }
 0x5b1   :  { %v1962_v18 = vadd.f32 %v10351_v32, %v1793_v29  ;;  %v2730_v57 = vadd.f32 %v2729_v22, %v8482_v61  ;;  %v8843_v4 = vperm.slane %v6565_v17, 2 }
 0x5b2   :  { %v3105_v0 = vmax.f32 %v2896_v46, 0.0  ;;  %v8829_v14 = vpop.f32.mrf.mxu0 }
 0x5b3   :  { %v3230_v38 = vmax.f32 %v1962_v18, 0.0  ;;  %2350 = vmatmul.bf16.gmra.mxu3 %v10251_v21  ;;  %2768 = vmatmul.bf16.gmra.mxu1 %v10250_v56 }
 0x5b4   :  { %2937 = vmatmul.bf16.gmra.mxu2 %v10315_v53  ;;  %v8834_v43 = vpack.c.bf16 %v3105_v0, %v3101_v37 }
 0x5b5   :  { %2634 = vmatmul.bf16.gmra.mxu0 %v10352_v7  ;;  %v8837_v25 = vpack.c.bf16 %v3230_v38, %v3226_v50 }
 0x5b6   :  { %v2311_v63 = vpop.f32.mrf.mxu3 }
 0x5b7   :  { %10353 = vst [vmem:[#allocation104_spill] sm:$0xff] %v8837_v25  ;;  %v2898_v21 = vpop.f32.mrf.mxu2  ;;  %v2312_v53 = vadd.f32 %v2311_v63, %v8843_v4 }
 0x5b8   :  { %v2899_v9 = vadd.f32 %v2898_v21, %v2730_v57  ;;  %v2731_v5 = vpop.f32.mrf.mxu1 }
 0x5b9   :  { %v2732_v0 = vadd.f32 %v2731_v5, %v8482_v61  ;;  %v2481_v38 = vadd.f32 %v8343_v10, %v2312_v53  ;;  %v10355_v5 = vld [vmem:[#allocation64_spill] sm:$0xff] }
 0x5ba   :  { %v8845_v29 = vpop.f32.mrf.mxu0  ;;  %v3109_v50 = vmax.f32 %v2899_v9, 0.0 }
 0x5bb   :  { %v2980_v21 = vmax.f32 %v2481_v38, 0.0 }
 0x5be   :  { %v2313_v37 = vpop.f32.mrf.mxu3 }
 0x5bf   :  { %v2314_v34 = vadd.f32 %v2313_v37, %v8843_v4  ;;  %v2900_v46 = vpop.f32.mrf.mxu2 }
 0x5c0   :  { %v2901_v22 = vadd.f32 %v2900_v46, %v2732_v0  ;;  %v2734_v32 = vpop.f32.mrf.mxu1 }
 0x5c1   :  { %v2483_v18 = vadd.f32 %v8354_v59, %v2314_v34  ;;  %v2735_v59 = vadd.f32 %v2734_v32, %v8482_v61 }
 0x5c2   :  { %v3113_v17 = vmax.f32 %v2901_v22, 0.0  ;;  %v8852_v57 = vpop.f32.mrf.mxu0 }
 0x5c3   :  { %10354 = vst [vmem:[#allocation56_spill] sm:$0xff] %v8852_v57  ;;  %v2984_v25 = vmax.f32 %v2483_v18, 0.0  ;;  %2355 = vmatmul.bf16.gmra.mxu3 %v7240_v11  ;;  %2773 = vmatmul.bf16.gmra.mxu1 %v7724_v55 }
 0x5c4   :  { %2942 = vmatmul.bf16.gmra.mxu2 %v10322_v28  ;;  %v8857_v10 = vpack.c.bf16 %v3113_v17, %v3109_v50  ;;  %v10357_v17 = vld [vmem:[#allocation118_spill] sm:$0xff] }
 0x5c5   :  { %v8859_v63 = vpack.c.bf16 %v2984_v25, %v2980_v21  ;;  %3799 = vmatmul.bf16.vlgmr.msrb.gmra.mxu0 %v10355_v5 }
 0x5c6   :  { %v2316_v9 = vpop.f32.mrf.mxu3 }
 0x5c7   :  { %v2903_v53 = vpop.f32.mrf.mxu2  ;;  %v2317_v11 = vadd.f32 %v2316_v9, %v8843_v4  ;;  %v10359_v9 = vld [vmem:[#allocation68_spill] sm:$0xff] }
 0x5c8   :  { %v2904_v0 = vadd.f32 %v2903_v53, %v2735_v59  ;;  %v2736_v37 = vpop.f32.mrf.mxu1 }
 0x5c9   :  { %v2737_v34 = vadd.f32 %v2736_v37, %v8482_v61  ;;  %v2486_v28 = vadd.f32 %v8361_v47, %v2317_v11  ;;  %v6247_v47 = vld [vmem:[%s9945_s7 + $0x20] sm:$0xff]  ;;  %v10361_v11 = vld [vmem:[#allocation66_spill] sm:$0xff] }
 0x5ca   :  { %v8863_v38 = vpop.f32.mrf.mxu0  ;;  %v3117_v21 = vmax.f32 %v2904_v0, 0.0  ;;  %3625 = vmatpush.bf16.msrb.mxu3 %v6247_v47 }
 0x5cb   :  { %10356 = vst [vmem:[#allocation117_spill] sm:$0xff] %v8863_v38  ;;  %v2988_v53 = vmax.f32 %v2486_v28, 0.0 }
 0x5ce   :  { %v2318_v46 = vpop.f32.mrf.mxu3 }
 0x5cf   :  { %v2319_v25 = vadd.f32 %v2318_v46, %v8843_v4  ;;  %v2905_v22 = vpop.f32.mrf.mxu2 }
 0x5d0   :  { %v2906_v18 = vadd.f32 %v2905_v22, %v2737_v34  ;;  %v2739_v50 = vpop.f32.mrf.mxu1 }
 0x5d1   :  { %v2488_v32 = vadd.f32 %v10357_v17, %v2319_v25  ;;  %v2740_v34 = vadd.f32 %v2739_v50, %v8482_v61 }
 0x5d2   :  { %v3121_v5 = vmax.f32 %v2906_v18, 0.0  ;;  %v8870_v59 = vpop.f32.mrf.mxu0  ;;  %v6271_v18 = vld [vmem:[%s9945_s7 + $0xe0] sm:$0xff] }
 0x5d3   :  { %10358 = vst [vmem:[#allocation108_spill] sm:$0xff] %v8870_v59  ;;  %v2992_v38 = vmax.f32 %v2488_v32, 0.0  ;;  %2360 = vmatmul.bf16.gmra.mxu3 %v10267_v35  ;;  %2778 = vmatmul.bf16.gmra.mxu1 %v10359_v9  ;;  %v10363_v32 = vld [vmem:[#allocation119_spill] sm:$0xff] }
 0x5d4   :  { %2947 = vmatmul.bf16.gmra.mxu2 %v10327_v49  ;;  %v8878_v37 = vpack.c.bf16 %v3121_v5, %v3117_v21 }
 0x5d5   :  { %3804 = vmatmul.bf16.gmra.mxu0 %v10361_v11  ;;  %v8881_v0 = vpack.c.bf16 %v2992_v38, %v2988_v53  ;;  %v6263_v38 = vld [vmem:[%s9945_s7 + $0xa0] sm:$0xff]  ;;  %4132 = vmatpush.bf16.msrb.mxu2 %v6271_v18 }
 0x5d6   :  { %10360 = vst [vmem:[#allocation64_spill] sm:$0xff] %v8878_v37  ;;  %v2321_v46 = vpop.f32.mrf.mxu3  ;;  %3963 = vmatpush.bf16.msrb.mxu1 %v6263_v38 }
 0x5d7   :  { %v2908_v28 = vpop.f32.mrf.mxu2  ;;  %v2322_v49 = vadd.f32 %v2321_v46, %v8843_v4 }
 0x5d8   :  { %v2909_v35 = vadd.f32 %v2908_v28, %v2740_v34  ;;  %v2741_v25 = vpop.f32.mrf.mxu1  ;;  %v10364_v34 = vld [vmem:[#allocation121_spill] sm:$0xff] }
 0x5d9   :  { %v2742_v50 = vadd.f32 %v2741_v25, %v8482_v61  ;;  %v2491_v21 = vadd.f32 %v10363_v32, %v2322_v49  ;;  %v10365_v49 = vld [vmem:[#allocation69_spill] sm:$0xff] }
 0x5da   :  { %v8884_v22 = vpop.f32.mrf.mxu0  ;;  %v3125_v28 = vmax.f32 %v2909_v35, 0.0 }
 0x5db   :  { %10362 = vst [vmem:[#allocation118_spill] sm:$0xff] %v8884_v22  ;;  %v2996_v37 = vmax.f32 %v2491_v21, 0.0 }
 0x5de   :  { %v2323_v17 = vpop.f32.mrf.mxu3 }
 0x5df   :  { %v2324_v5 = vadd.f32 %v2323_v17, %v8843_v4  ;;  %v2910_v53 = vpop.f32.mrf.mxu2 }
 0x5e0   :  { %v2911_v47 = vadd.f32 %v2910_v53, %v2742_v50  ;;  %v2744_v11 = vpop.f32.mrf.mxu1 }
 0x5e1   :  { %v2493_v46 = vadd.f32 %v10364_v34, %v2324_v5  ;;  %v2745_v38 = vadd.f32 %v2744_v11, %v8482_v61 }
 0x5e2   :  { %v3129_v22 = vmax.f32 %v2911_v47, 0.0  ;;  %v8897_v59 = vpop.f32.mrf.mxu0 }
 0x5e3   :  { %v3000_v57 = vmax.f32 %v2493_v46, 0.0  ;;  %2365 = vmatmul.bf16.gmra.mxu3 %v7300_v42  ;;  %2783 = vmatmul.bf16.gmra.mxu1 %v7780_v45  ;;  %v10368_v46 = vld [vmem:[#allocation124_spill] sm:$0xff] }
 0x5e4   :  { %2952 = vmatmul.bf16.gmra.mxu2 %v10333_v30  ;;  %v8902_v25 = vpack.c.bf16 %v3129_v22, %v3125_v28  ;;  %v10367_v30 = vld [vmem:[#allocation122_spill] sm:$0xff] }
 0x5e5   :  { %3809 = vmatmul.bf16.gmra.mxu0 %v10365_v49  ;;  %v8905_v18 = vpack.c.bf16 %v3000_v57, %v2996_v37 }
 0x5e6   :  { %v2326_v35 = vpop.f32.mrf.mxu3 }
 0x5e7   :  { %v2913_v50 = vpop.f32.mrf.mxu2  ;;  %v2327_v42 = vadd.f32 %v2326_v35, %v8843_v4 }
 0x5e8   :  { %v2914_v17 = vadd.f32 %v2913_v50, %v2745_v38  ;;  %v2746_v32 = vpop.f32.mrf.mxu1 }
 0x5e9   :  { %v2747_v5 = vadd.f32 %v2746_v32, %v8482_v61  ;;  %v2496_v22 = vadd.f32 %v10367_v30, %v2327_v42  ;;  %v10370_v32 = vld [vmem:[#allocation71_spill] sm:$0xff] }
 0x5ea   :  { %v8908_v21 = vpop.f32.mrf.mxu0  ;;  %v3133_v28 = vmax.f32 %v2914_v17, 0.0 }
 0x5eb   :  { %10366 = vst [vmem:[#allocation68_spill] sm:$0xff] %v8908_v21  ;;  %v3004_v50 = vmax.f32 %v2496_v22, 0.0 }
 0x5ee   :  { %v2328_v53 = vpop.f32.mrf.mxu3 }
 0x5ef   :  { %v2329_v47 = vadd.f32 %v2328_v53, %v8843_v4  ;;  %v2915_v34 = vpop.f32.mrf.mxu2 }
 0x5f0   :  { %v2916_v57 = vadd.f32 %v2915_v34, %v2747_v5  ;;  %v2749_v37 = vpop.f32.mrf.mxu1 }
 0x5f1   :  { %v2498_v11 = vadd.f32 %v10368_v46, %v2329_v47  ;;  %v2750_v5 = vadd.f32 %v2749_v37, %v8482_v61 }
 0x5f2   :  { %v3137_v49 = vmax.f32 %v2916_v57, 0.0  ;;  %v8915_v38 = vpop.f32.mrf.mxu0 }
 0x5f3   :  { %10369 = vst [vmem:[#allocation66_spill] sm:$0xff] %v8915_v38  ;;  %v3008_v21 = vmax.f32 %v2498_v11, 0.0  ;;  %2370 = vmatmul.bf16.gmra.mxu3 %v7329_v27  ;;  %2788 = vmatmul.bf16.gmra.mxu1 %v7808_v8 }
 0x5f4   :  { %2957 = vmatmul.bf16.gmra.mxu2 %v10338_v2  ;;  %v8920_v35 = vpack.c.bf16 %v3137_v49, %v3133_v28  ;;  %v10372_v2 = vld [vmem:[#allocation125_spill] sm:$0xff] }
 0x5f5   :  { %3814 = vmatmul.bf16.gmra.mxu0 %v10370_v32  ;;  %v8923_v42 = vpack.c.bf16 %v3008_v21, %v3004_v50  ;;  %v10373_v50 = vld [vmem:[#allocation127_spill] sm:$0xff] }
 0x5f6   :  { %v2331_v17 = vpop.f32.mrf.mxu3 }
 0x5f7   :  { %v2918_v53 = vpop.f32.mrf.mxu2  ;;  %v2332_v27 = vadd.f32 %v2331_v17, %v8843_v4  ;;  %v6262_v17 = vld [vmem:[%s9945_s7 + $0x98] sm:$0xff] }
 0x5f8   :  { %v2919_v30 = vadd.f32 %v2918_v53, %v2750_v5  ;;  %v2751_v47 = vpop.f32.mrf.mxu1  ;;  %3964 = vmatpush.bf16.msrb.mxu1 %v6262_v17 }
 0x5f9   :  { %v2752_v34 = vadd.f32 %v2751_v47, %v8482_v61  ;;  %v2501_v46 = vadd.f32 %v10372_v2, %v2332_v27  ;;  %v6270_v47 = vld [vmem:[%s9945_s7 + $0xd8] sm:$0xff]  ;;  %v10375_v27 = vld [vmem:[#allocation73_spill] sm:$0xff] }
 0x5fa   :  { %v8926_v22 = vpop.f32.mrf.mxu0  ;;  %v3141_v32 = vmax.f32 %v2919_v30, 0.0  ;;  %4133 = vmatpush.bf16.msrb.mxu2 %v6270_v47 }
 0x5fb   :  { %10371 = vst [vmem:[#allocation119_spill] sm:$0xff] %v8926_v22  ;;  %v3012_v53 = vmax.f32 %v2501_v46, 0.0  ;;  %v6261_v46 = vld [vmem:[%s9945_s7 + $0x90] sm:$0xff] }
 0x5fc   :  { %3965 = vmatpush.bf16.msrb.mxu1 %v6261_v46  ;;  %v10378_v46 = vld [vmem:[#allocation50_spill] sm:$0xff] }
 0x5fe   :  { %v2333_v57 = vpop.f32.mrf.mxu3 }
 0x5ff   :  { %v2334_v11 = vadd.f32 %v2333_v57, %v8843_v4  ;;  %v2920_v28 = vpop.f32.mrf.mxu2 }
 0x600   :  { %v2921_v21 = vadd.f32 %v2920_v28, %v2752_v34  ;;  %v2754_v49 = vpop.f32.mrf.mxu1 }
 0x601   :  { %v2503_v37 = vadd.f32 %v10373_v50, %v2334_v11 }
 0x602   :  { %v3145_v38 = vmax.f32 %v2921_v21, 0.0  ;;  %v8933_v5 = vpop.f32.mrf.mxu0  ;;  %v6260_v21 = vld [vmem:[%s9945_s7 + $0x88] sm:$0xff] }
 0x603   :  { %10374 = vst [vmem:[#allocation121_spill] sm:$0xff] %v8933_v5  ;;  %v3016_v22 = vmax.f32 %v2503_v37, 0.0  ;;  %2375 = vmatmul.bf16.gmra.mxu3 %v7396_v33  ;;  %2793 = vmatmul.bf16.gmra.mxu1 %v7836_v60  ;;  %v2755_v33 = vadd.f32 %v2754_v49, %v8482_v61  ;;  %v6268_v49 = vld [vmem:[%s9945_s7 + $0xc8] sm:$0xff] }
 0x604   :  { %2962 = vmatmul.bf16.gmra.mxu2 %v10341_v1  ;;  %v8944_v30 = vpack.c.bf16 %v3145_v38, %v3141_v32  ;;  %v6269_v1 = vld [vmem:[%s9945_s7 + $0xd0] sm:$0xff]  ;;  %3966 = vmatpush.bf16.msrb.mxu1 %v6260_v21  ;;  %v10377_v32 = vld [vmem:[#allocation128_spill] sm:$0xff] }
 0x605   :  { %3819 = vmatmul.bf16.gmra.mxu0 %v10375_v27  ;;  %v8947_v34 = vpack.c.bf16 %v3016_v22, %v3012_v53  ;;  %4134 = vmatpush.bf16.msrb.mxu2 %v6269_v1  ;;  %v6259_v27 = vld [vmem:[%s9945_s7 + $0x80] sm:$0xff] }
 0x606   :  { %v2336_v57 = vpop.f32.mrf.mxu3 }
 0x607   :  { %v2923_v2 = vpop.f32.mrf.mxu2  ;;  %v2337_v22 = vadd.f32 %v2336_v57, %v8843_v4 }
 0x608   :  { %v2924_v38 = vadd.f32 %v2923_v2, %v2755_v33  ;;  %v2756_v11 = vpop.f32.mrf.mxu1  ;;  %v6267_v33 = vld [vmem:[%s9945_s7 + $0xc0] sm:$0xff]  ;;  %3967 = vmatpush.bf16.msrb.mxu1 %v6259_v27 }
 0x609   :  { %v2757_v50 = vadd.f32 %v2756_v11, %v8482_v61  ;;  %4135 = vmatpush.bf16.msrb.mxu2 %v6268_v49  ;;  %v2506_v53 = vadd.f32 %v10377_v32, %v2337_v22  ;;  %v10380_v32 = vld [vmem:[#allocation79_spill] sm:$0xff] }
 0x60a   :  { %v8956_v28 = vpop.f32.mrf.mxu0  ;;  %v3149_v11 = vmax.f32 %v2924_v38, 0.0 }
 0x60b   :  { %10376 = vst [vmem:[#allocation69_spill] sm:$0xff] %v8956_v28  ;;  %v3020_v22 = vmax.f32 %v2506_v53, 0.0  ;;  %v6246_v28 = vld [vmem:[%s9945_s7 + $0x18] sm:$0xff] }
 0x60c   :  { %3626 = vmatpush.bf16.msrb.mxu3 %v6246_v28 }
 0x60d   :  { %4136 = vmatpush.bf16.msrb.mxu2 %v6267_v33 }
 0x60e   :  { %v2338_v37 = vpop.f32.mrf.mxu3 }
 0x60f   :  { %v2339_v17 = vadd.f32 %v2338_v37, %v8843_v4  ;;  %v2925_v47 = vpop.f32.mrf.mxu2 }
 0x610   :  { %v2926_v57 = vadd.f32 %v2925_v47, %v2757_v50  ;;  %v2759_v2 = vpop.f32.mrf.mxu1 }
 0x611   :  { %v2508_v1 = vadd.f32 %v10378_v46, %v2339_v17  ;;  %v10382_v17 = vld [vmem:[#allocation76_spill] sm:$0xff]  ;;  %v2760_v53 = vadd.f32 %v2759_v2, %v8482_v61 }
 0x612   :  { %v3153_v21 = vmax.f32 %v2926_v57, 0.0  ;;  %v8975_v49 = vpop.f32.mrf.mxu0 }
 0x613   :  { %10379 = vst [vmem:[#allocation122_spill] sm:$0xff] %v8975_v49  ;;  %v3024_v37 = vmax.f32 %v2508_v1, 0.0  ;;  %2380 = vmatmul.bf16.gmra.mxu3 %v7425_v62  ;;  %2798 = vmatmul.bf16.gmra.mxu1 %v10380_v32  ;;  %v10385_v49 = vld [vmem:[#allocation21_spill] sm:$0xff] }
 0x614   :  { %2967 = vmatmul.bf16.gmra.mxu2 %v10347_v12  ;;  %v8983_v50 = vpack.c.bf16 %v3153_v21, %v3149_v11  ;;  %v10384_v11 = vld [vmem:[#allocation75_spill] sm:$0xff] }
 0x615   :  { %3824 = vmatmul.bf16.gmra.mxu0 %v10382_v17  ;;  %v8986_v38 = vpack.c.bf16 %v3024_v37, %v3020_v22 }
 0x616   :  { %10381 = vst [vmem:[#allocation124_spill] sm:$0xff] %v8983_v50  ;;  %v2341_v47 = vpop.f32.mrf.mxu3 }
 0x617   :  { %v2928_v27 = vpop.f32.mrf.mxu2  ;;  %v2342_v46 = vadd.f32 %v2341_v47, %v8843_v4 }
 0x618   :  { %v2929_v62 = vadd.f32 %v2928_v27, %v2760_v53  ;;  %v2761_v33 = vpop.f32.mrf.mxu1 }
 0x619   :  { %v2762_v1 = vadd.f32 %v2761_v33, %v8482_v61  ;;  %v2511_v21 = vadd.f32 %v10384_v11, %v2342_v46  ;;  %v10387_v33 = vld [vmem:[#allocation81_spill] sm:$0xff] }
 0x61a   :  { %v8989_v57 = vpop.f32.mrf.mxu0  ;;  %v3157_v50 = vmax.f32 %v2929_v62, 0.0 }
 0x61b   :  { %10383 = vst [vmem:[#allocation71_spill] sm:$0xff] %v8989_v57  ;;  %v3028_v27 = vmax.f32 %v2511_v21, 0.0 }
 0x61e   :  { %v2343_v12 = vpop.f32.mrf.mxu3 }
 0x61f   :  { %v2344_v17 = vadd.f32 %v2343_v12, %v8843_v4  ;;  %v2930_v28 = vpop.f32.mrf.mxu2 }
 0x620   :  { %v2931_v22 = vadd.f32 %v2930_v28, %v2762_v1  ;;  %v2764_v37 = vpop.f32.mrf.mxu1 }
 0x621   :  { %v2513_v2 = vadd.f32 %v10385_v49, %v2344_v17  ;;  %v2765_v49 = vadd.f32 %v2764_v37, %v8482_v61 }
 0x622   :  { %v3161_v5 = vmax.f32 %v2931_v22, 0.0  ;;  %v8996_v53 = vpop.f32.mrf.mxu0 }
 0x623   :  { %10386 = vst [vmem:[#allocation125_spill] sm:$0xff] %v8996_v53  ;;  %v3032_v57 = vmax.f32 %v2513_v2, 0.0  ;;  %2385 = vmatmul.bf16.gmra.mxu3 %v7442_v52  ;;  %2803 = vmatmul.bf16.gmra.mxu1 %v7900_v13 }
 0x624   :  { %2972 = vmatmul.bf16.gmra.mxu2 %v10352_v7  ;;  %v9001_v47 = vpack.c.bf16 %v3161_v5, %v3157_v50  ;;  %v10389_v7 = vld [vmem:[#allocation53_spill] sm:$0xff] }
 0x625   :  { %3829 = vmatmul.bf16.gmra.mxu0 %v10387_v33  ;;  %v9004_v46 = vpack.c.bf16 %v3032_v57, %v3028_v27  ;;  %v10390_v27 = vld [vmem:[#allocation110_spill] sm:$0xff] }
 0x626   :  { %v2346_v62 = vpop.f32.mrf.mxu3 }
 0x627   :  { %v2933_v1 = vpop.f32.mrf.mxu2  ;;  %v2347_v52 = vadd.f32 %v2346_v62, %v8843_v4  ;;  %v10392_v62 = vld [vmem:[#allocation23_spill] sm:$0xff] }
 0x628   :  { %v2934_v12 = vadd.f32 %v2933_v1, %v2765_v49  ;;  %v2766_v11 = vpop.f32.mrf.mxu1 }
 0x629   :  { %v2767_v17 = vadd.f32 %v2766_v11, %v8482_v61  ;;  %v2516_v5 = vadd.f32 %v10389_v7, %v2347_v52  ;;  %v10393_v52 = vld [vmem:[#allocation85_spill] sm:$0xff] }
 0x62a   :  { %v9007_v21 = vpop.f32.mrf.mxu0  ;;  %v3165_v33 = vmax.f32 %v2934_v12, 0.0 }
 0x62b   :  { %10388 = vst [vmem:[#allocation127_spill] sm:$0xff] %v9007_v21  ;;  %v3036_v1 = vmax.f32 %v2516_v5, 0.0 }
 0x62e   :  { %v2348_v28 = vpop.f32.mrf.mxu3 }
 0x62f   :  { %v2349_v50 = vadd.f32 %v2348_v28, %v8843_v4  ;;  %v2935_v22 = vpop.f32.mrf.mxu2 }
 0x630   :  { %v2936_v57 = vadd.f32 %v2935_v22, %v2767_v17  ;;  %v2769_v2 = vpop.f32.mrf.mxu1 }
 0x631   :  { %v2518_v37 = vadd.f32 %v10390_v27, %v2349_v50  ;;  %v2770_v28 = vadd.f32 %v2769_v2, %v8482_v61  ;;  %v10395_v27 = vld [vmem:[#allocation63_spill] sm:$0xff] }
 0x632   :  { %v3169_v53 = vmax.f32 %v2936_v57, 0.0  ;;  %v9014_v49 = vpop.f32.mrf.mxu0 }
 0x633   :  { %10391 = vst [vmem:[#allocation73_spill] sm:$0xff] %v9014_v49  ;;  %v3040_v21 = vmax.f32 %v2518_v37, 0.0  ;;  %2390 = vmatmul.bf16.gmra.mxu3 %v7469_v39  ;;  %3968 = vmatmul.bf16.vlgmr.msrb.gmra.mxu1 %v8859_v63 }
 0x634   :  { %4137 = vmatmul.bf16.vlgmr.msrb.gmra.mxu2 %v10392_v62  ;;  %v9019_v11 = vpack.c.bf16 %v3169_v53, %v3165_v33  ;;  %v10396_v62 = vld [vmem:[#allocation84_spill] sm:$0xff] }
 0x635   :  { %3834 = vmatmul.bf16.gmra.mxu0 %v10393_v52  ;;  %v9022_v17 = vpack.c.bf16 %v3040_v21, %v3036_v1 }
 0x636   :  { %v2351_v12 = vpop.f32.mrf.mxu3 }
 0x637   :  { %v2938_v7 = vpop.f32.mrf.mxu2  ;;  %v2352_v39 = vadd.f32 %v2351_v12, %v8843_v4  ;;  %v10398_v12 = vld [vmem:[#allocation61_spill] sm:$0xff] }
 0x638   :  { %v2939_v50 = vadd.f32 %v2938_v7, %v2770_v28  ;;  %v2771_v22 = vpop.f32.mrf.mxu1 }
 0x639   :  { %v2772_v63 = vadd.f32 %v2771_v22, %v8482_v61  ;;  %v2521_v53 = vadd.f32 %v10395_v27, %v2352_v39  ;;  %v10399_v39 = vld [vmem:[#allocation89_spill] sm:$0xff] }
 0x63a   :  { %v9025_v5 = vpop.f32.mrf.mxu0  ;;  %v3173_v52 = vmax.f32 %v2939_v50, 0.0 }
 0x63b   :  { %10394 = vst [vmem:[#allocation128_spill] sm:$0xff] %v9025_v5  ;;  %v3044_v7 = vmax.f32 %v2521_v53, 0.0 }
 0x63e   :  { %v2353_v57 = vpop.f32.mrf.mxu3 }
 0x63f   :  { %v2354_v37 = vadd.f32 %v2353_v57, %v8843_v4  ;;  %v2940_v33 = vpop.f32.mrf.mxu2 }
 0x640   :  { %v2941_v21 = vadd.f32 %v2940_v33, %v2772_v63  ;;  %v2774_v1 = vpop.f32.mrf.mxu1 }
 0x641   :  { %v2523_v2 = vadd.f32 %v10396_v62, %v2354_v37  ;;  %v2775_v57 = vadd.f32 %v2774_v1, %v8482_v61  ;;  %v10401_v62 = vld [vmem:[#allocation86_spill] sm:$0xff] }
 0x642   :  { %v3177_v49 = vmax.f32 %v2941_v21, 0.0  ;;  %v9032_v28 = vpop.f32.mrf.mxu0 }
 0x643   :  { %10397 = vst [vmem:[#allocation50_spill] sm:$0xff] %v9032_v28  ;;  %v3048_v5 = vmax.f32 %v2523_v2, 0.0  ;;  %2395 = vmatmul.bf16.gmra.mxu3 %v7495_v20  ;;  %3973 = vmatmul.bf16.gmra.mxu1 %v8881_v0 }
 0x644   :  { %4142 = vmatmul.bf16.gmra.mxu2 %v10398_v12  ;;  %v9037_v22 = vpack.c.bf16 %v3177_v49, %v3173_v52  ;;  %v10402_v12 = vld [vmem:[#allocation90_spill] sm:$0xff] }
 0x645   :  { %3839 = vmatmul.bf16.gmra.mxu0 %v10399_v39  ;;  %v9040_v63 = vpack.c.bf16 %v3048_v5, %v3044_v7 }
 0x646   :  { %v2356_v50 = vpop.f32.mrf.mxu3 }
 0x647   :  { %v2943_v27 = vpop.f32.mrf.mxu2  ;;  %v2357_v20 = vadd.f32 %v2356_v50, %v8843_v4  ;;  %v6245_v50 = vld [vmem:[%s9945_s7 + $0x10] sm:$0xff] }
 0x648   :  { %v2944_v37 = vadd.f32 %v2943_v27, %v2775_v57  ;;  %v2776_v33 = vpop.f32.mrf.mxu1  ;;  %3627 = vmatpush.bf16.msrb.mxu3 %v6245_v50 }
 0x649   :  { %v2777_v0 = vadd.f32 %v2776_v33, %v8482_v61  ;;  %v2526_v49 = vadd.f32 %v10401_v62, %v2357_v20  ;;  %v10404_v33 = vld [vmem:[#allocation65_spill] sm:$0xff] }
 0x64a   :  { %v9043_v53 = vpop.f32.mrf.mxu0  ;;  %v3181_v39 = vmax.f32 %v2944_v37, 0.0 }
 0x64b   :  { %10400 = vst [vmem:[#allocation79_spill] sm:$0xff] %v9043_v53  ;;  %v3052_v27 = vmax.f32 %v2526_v49, 0.0 }
 0x64e   :  { %v2358_v21 = vpop.f32.mrf.mxu3 }
 0x64f   :  { %v2359_v2 = vadd.f32 %v2358_v21, %v8843_v4  ;;  %v2945_v52 = vpop.f32.mrf.mxu2 }
 0x650   :  { %v2946_v5 = vadd.f32 %v2945_v52, %v2777_v0  ;;  %v2779_v7 = vpop.f32.mrf.mxu1  ;;  %v10405_v0 = vld [vmem:[#allocation41_spill] sm:$0xff] }
 0x651   :  { %v2528_v1 = vadd.f32 %v10402_v12, %v2359_v2  ;;  %v2780_v21 = vadd.f32 %v2779_v7, %v8482_v61 }
 0x652   :  { %v3185_v28 = vmax.f32 %v2946_v5, 0.0  ;;  %v9050_v57 = vpop.f32.mrf.mxu0 }
 0x653   :  { %10403 = vst [vmem:[#allocation76_spill] sm:$0xff] %v9050_v57  ;;  %v3056_v53 = vmax.f32 %v2528_v1, 0.0  ;;  %2400 = vmatmul.bf16.gmra.mxu3 %v10117_v41  ;;  %3978 = vmatmul.bf16.gmra.mxu1 %v8905_v18 }
 0x654   :  { %4147 = vmatmul.bf16.gmra.mxu2 %v10404_v33  ;;  %v9058_v20 = vpack.c.bf16 %v3185_v28, %v3181_v39  ;;  %v10407_v28 = vld [vmem:[#allocation26_spill] sm:$0xff]  ;;  %v10408_v33 = vld [vmem:[#allocation92_spill] sm:$0xff] }
 0x655   :  { %3844 = vmatmul.bf16.gmra.mxu0 %v10405_v0  ;;  %v9061_v37 = vpack.c.bf16 %v3056_v53, %v3052_v27 }
 0x656   :  { %v2361_v62 = vpop.f32.mrf.mxu3 }
 0x657   :  { %v2948_v49 = vpop.f32.mrf.mxu2  ;;  %v2362_v52 = vadd.f32 %v2361_v62, %v8843_v4  ;;  %v10410_v62 = vld [vmem:[#allocation17_spill] sm:$0xff] }
 0x658   :  { %v2949_v41 = vadd.f32 %v2948_v49, %v2780_v21  ;;  %v2781_v2 = vpop.f32.mrf.mxu1 }
 0x659   :  { %v2782_v5 = vadd.f32 %v2781_v2, %v8482_v61  ;;  %v2531_v1 = vadd.f32 %v10407_v28, %v2362_v52  ;;  %v10411_v52 = vld [vmem:[#allocation45_spill] sm:$0xff] }
 0x65a   :  { %v9064_v18 = vpop.f32.mrf.mxu0  ;;  %v3189_v0 = vmax.f32 %v2949_v41, 0.0 }
 0x65b   :  { %10406 = vst [vmem:[#allocation75_spill] sm:$0xff] %v9064_v18  ;;  %v3060_v49 = vmax.f32 %v2531_v1, 0.0 }
 0x65e   :  { %v2363_v12 = vpop.f32.mrf.mxu3 }
 0x65f   :  { %v2364_v39 = vadd.f32 %v2363_v12, %v8843_v4  ;;  %v2950_v50 = vpop.f32.mrf.mxu2 }
 0x660   :  { %v2951_v53 = vadd.f32 %v2950_v50, %v2782_v5  ;;  %v2784_v27 = vpop.f32.mrf.mxu1 }
 0x661   :  { %v2533_v7 = vadd.f32 %v10408_v33, %v2364_v39  ;;  %v2785_v12 = vadd.f32 %v2784_v27, %v8482_v61  ;;  %v10413_v33 = vld [vmem:[#allocation67_spill] sm:$0xff] }
 0x662   :  { %v3193_v57 = vmax.f32 %v2951_v53, 0.0  ;;  %v9071_v21 = vpop.f32.mrf.mxu0 }
 0x663   :  { %10409 = vst [vmem:[#allocation21_spill] sm:$0xff] %v9071_v21  ;;  %v3064_v18 = vmax.f32 %v2533_v7, 0.0  ;;  %2405 = vmatmul.bf16.gmra.mxu3 %v10123_v51  ;;  %3983 = vmatmul.bf16.gmra.mxu1 %v8923_v42 }
 0x664   :  { %4152 = vmatmul.bf16.gmra.mxu2 %v10410_v62  ;;  %v9076_v2 = vpack.c.bf16 %v3193_v57, %v3189_v0  ;;  %v10414_v62 = vld [vmem:[#allocation70_spill] sm:$0xff] }
 0x665   :  { %3849 = vmatmul.bf16.gmra.mxu0 %v10411_v52  ;;  %v9079_v5 = vpack.c.bf16 %v3064_v18, %v3060_v49 }
 0x666   :  { %v2366_v41 = vpop.f32.mrf.mxu3 }
 0x667   :  { %v2953_v28 = vpop.f32.mrf.mxu2  ;;  %v2367_v51 = vadd.f32 %v2366_v41, %v8843_v4  ;;  %v10416_v41 = vld [vmem:[#allocation97_spill] sm:$0xff] }
 0x668   :  { %v2954_v39 = vadd.f32 %v2953_v28, %v2785_v12  ;;  %v2786_v50 = vpop.f32.mrf.mxu1 }
 0x669   :  { %v2787_v42 = vadd.f32 %v2786_v50, %v8482_v61  ;;  %v2536_v57 = vadd.f32 %v10413_v33, %v2367_v51  ;;  %v10417_v51 = vld [vmem:[#allocation96_spill] sm:$0xff] }
 0x66a   :  { %v9082_v1 = vpop.f32.mrf.mxu0  ;;  %v3197_v52 = vmax.f32 %v2954_v39, 0.0 }
 0x66b   :  { %10412 = vst [vmem:[#allocation81_spill] sm:$0xff] %v9082_v1  ;;  %v3068_v28 = vmax.f32 %v2536_v57, 0.0 }
 0x66e   :  { %v2368_v53 = vpop.f32.mrf.mxu3 }
 0x66f   :  { %v2369_v7 = vadd.f32 %v2368_v53, %v8843_v4  ;;  %v2955_v0 = vpop.f32.mrf.mxu2 }
 0x670   :  { %v2956_v18 = vadd.f32 %v2955_v0, %v2787_v42  ;;  %v2789_v49 = vpop.f32.mrf.mxu1 }
 0x671   :  { %v2538_v27 = vadd.f32 %v10414_v62, %v2369_v7  ;;  %v2790_v53 = vadd.f32 %v2789_v49, %v8482_v61  ;;  %v10419_v62 = vld [vmem:[#allocation18_spill] sm:$0xff] }
 0x672   :  { %v3201_v21 = vmax.f32 %v2956_v18, 0.0  ;;  %v9089_v12 = vpop.f32.mrf.mxu0 }
 0x673   :  { %10415 = vst [vmem:[#allocation53_spill] sm:$0xff] %v9089_v12  ;;  %v3072_v1 = vmax.f32 %v2538_v27, 0.0  ;;  %2410 = vmatmul.bf16.gmra.mxu3 %v7573_v3  ;;  %3988 = vmatmul.bf16.gmra.mxu1 %v8947_v34 }
 0x674   :  { %4157 = vmatmul.bf16.gmra.mxu2 %v10416_v41  ;;  %v9094_v50 = vpack.c.bf16 %v3201_v21, %v3197_v52  ;;  %v10420_v41 = vld [vmem:[#allocation129_spill] sm:$0xff] }
 0x675   :  { %3854 = vmatmul.bf16.gmra.mxu0 %v10417_v51  ;;  %v9097_v42 = vpack.c.bf16 %v3072_v1, %v3068_v28 }
 0x676   :  { %v2371_v39 = vpop.f32.mrf.mxu3 }
 0x677   :  { %v2958_v33 = vpop.f32.mrf.mxu2  ;;  %v2372_v3 = vadd.f32 %v2371_v39, %v8843_v4  ;;  %v10422_v39 = vld [vmem:[#allocation100_spill] sm:$0xff] }
 0x678   :  { %v2959_v7 = vadd.f32 %v2958_v33, %v2790_v53  ;;  %v2791_v0 = vpop.f32.mrf.mxu1 }
 0x679   :  { %v2792_v34 = vadd.f32 %v2791_v0, %v8482_v61  ;;  %v2541_v21 = vadd.f32 %v10419_v62, %v2372_v3  ;;  %v10424_v3 = vld [vmem:[#allocation19_spill] sm:$0xff] }
 0x67a   :  { %v9100_v57 = vpop.f32.mrf.mxu0  ;;  %v3205_v51 = vmax.f32 %v2959_v7, 0.0 }
 0x67b   :  { %10418 = vst [vmem:[#allocation110_spill] sm:$0xff] %v9100_v57  ;;  %v3076_v33 = vmax.f32 %v2541_v21, 0.0 }
 0x67e   :  { %v2373_v18 = vpop.f32.mrf.mxu3 }
 0x67f   :  { %v2374_v27 = vadd.f32 %v2373_v18, %v8843_v4  ;;  %v2960_v52 = vpop.f32.mrf.mxu2 }
 0x680   :  { %v2961_v1 = vadd.f32 %v2960_v52, %v2792_v34  ;;  %v2794_v28 = vpop.f32.mrf.mxu1 }
 0x681   :  { %v2543_v49 = vadd.f32 %v10420_v41, %v2374_v27  ;;  %v2795_v18 = vadd.f32 %v2794_v28, %v8482_v61  ;;  %v10425_v41 = vld [vmem:[#allocation99_spill] sm:$0xff] }
 0x682   :  { %v3209_v12 = vmax.f32 %v2961_v1, 0.0  ;;  %v9107_v53 = vpop.f32.mrf.mxu0 }
 0x683   :  { %10421 = vst [vmem:[#allocation23_spill] sm:$0xff] %v9107_v53  ;;  %v3080_v57 = vmax.f32 %v2543_v49, 0.0  ;;  %2415 = vmatmul.bf16.gmra.mxu3 %v7599_v48  ;;  %3993 = vmatmul.bf16.gmra.mxu1 %v8986_v38 }
 0x684   :  { %4162 = vmatmul.bf16.gmra.mxu2 %v10422_v39  ;;  %v9112_v0 = vpack.c.bf16 %v3209_v12, %v3205_v51  ;;  %v10426_v39 = vld [vmem:[#allocation130_spill] sm:$0xff] }
 0x685   :  { %3859 = vmatmul.bf16.gmra.mxu0 %v10424_v3  ;;  %v9115_v34 = vpack.c.bf16 %v3080_v57, %v3076_v33 }
 0x686   :  { %10423 = vst [vmem:[#allocation85_spill] sm:$0xff] %v9112_v0  ;;  %v2376_v7 = vpop.f32.mrf.mxu3 }
 0x687   :  { %v2963_v62 = vpop.f32.mrf.mxu2  ;;  %v2377_v48 = vadd.f32 %v2376_v7, %v8843_v4  ;;  %v6244_v7 = vld [vmem:[%s9945_s7 + $0x8] sm:$0xff] }
 0x688   :  { %v2964_v27 = vadd.f32 %v2963_v62, %v2795_v18  ;;  %v2796_v52 = vpop.f32.mrf.mxu1  ;;  %3628 = vmatpush.bf16.msrb.mxu3 %v6244_v7 }
 0x689   :  { %v2797_v38 = vadd.f32 %v2796_v52, %v8482_v61  ;;  %v2546_v12 = vadd.f32 %v10425_v41, %v2377_v48  ;;  %v10427_v48 = vld [vmem:[#allocation102_spill] sm:$0xff] }
 0x68a   :  { %v9118_v21 = vpop.f32.mrf.mxu0  ;;  %v3213_v3 = vmax.f32 %v2964_v27, 0.0 }
 0x68b   :  { %v3084_v18 = vmax.f32 %v2546_v12, 0.0 }
 0x68e   :  { %v2378_v1 = vpop.f32.mrf.mxu3 }
 0x68f   :  { %v2379_v49 = vadd.f32 %v2378_v1, %v8843_v4  ;;  %v2965_v51 = vpop.f32.mrf.mxu2 }
 0x690   :  { %v2966_v57 = vadd.f32 %v2965_v51, %v2797_v38  ;;  %v2799_v33 = vpop.f32.mrf.mxu1 }
 0x691   :  { %v2548_v28 = vadd.f32 %v10426_v39, %v2379_v49  ;;  %v2800_v38 = vadd.f32 %v2799_v33, %v8482_v61 }
 0x692   :  { %v3217_v53 = vmax.f32 %v2966_v57, 0.0  ;;  %v9125_v0 = vpop.f32.mrf.mxu0 }
 0x693   :  { %v3088_v62 = vmax.f32 %v2548_v28, 0.0  ;;  %2420 = vmatmul.bf16.gmra.mxu3 %v10231_v58  ;;  %3998 = vmatmul.bf16.gmra.mxu1 %v9004_v46 }
 0x694   :  { %4167 = vmatmul.bf16.gmra.mxu2 %v8633_v15  ;;  %v9133_v52 = vpack.c.bf16 %v3217_v53, %v3213_v3  ;;  %v10428_v53 = vld [vmem:[#allocation103_spill] sm:$0xff] }
 0x695   :  { %3864 = vmatmul.bf16.gmra.mxu0 %v10427_v48  ;;  %v9136_v27 = vpack.c.bf16 %v3088_v62, %v3084_v18  ;;  %v10429_v62 = vld [vmem:[#allocation77_spill] sm:$0xff] }
 0x696   :  { %v2381_v1 = vpop.f32.mrf.mxu3 }
 0x697   :  { %v2968_v41 = vpop.f32.mrf.mxu2  ;;  %v2382_v46 = vadd.f32 %v2381_v1, %v8843_v4 }
 0x698   :  { %v2969_v58 = vadd.f32 %v2968_v41, %v2800_v38  ;;  %v2801_v12 = vpop.f32.mrf.mxu1 }
 0x699   :  { %v2802_v51 = vadd.f32 %v2801_v12, %v8482_v61  ;;  %v2551_v57 = vadd.f32 %v10428_v53, %v2382_v46  ;;  %v10431_v12 = vld [vmem:[#allocation105_spill] sm:$0xff] }
 0x69a   :  { %v9140_v49 = vpop.f32.mrf.mxu0  ;;  %v3221_v7 = vmax.f32 %v2969_v58, 0.0 }
 0x69b   :  { %v3092_v38 = vmax.f32 %v2551_v57, 0.0 }
 0x69e   :  { %v2383_v15 = vpop.f32.mrf.mxu3 }
 0x69f   :  { %v2384_v39 = vadd.f32 %v2383_v15, %v8843_v4  ;;  %v2970_v28 = vpop.f32.mrf.mxu2 }
 0x6a0   :  { %v2971_v3 = vadd.f32 %v2970_v28, %v2802_v51  ;;  %v2804_v18 = vpop.f32.mrf.mxu1 }
 0x6a1   :  { %v2553_v33 = vadd.f32 %v10429_v62, %v2384_v39  ;;  %v2805_v51 = vadd.f32 %v2804_v18, %v8482_v61 }
 0x6a2   :  { %v3225_v48 = vmax.f32 %v2971_v3, 0.0  ;;  %v9155_v53 = vpop.f32.mrf.mxu0 }
 0x6a3   :  { %v3096_v41 = vmax.f32 %v2553_v33, 0.0  ;;  %2425 = vmatmul.bf16.gmra.mxu3 %v10240_v54  ;;  %4003 = vmatmul.bf16.gmra.mxu1 %v9022_v17  ;;  %10432 = vst [vmem:[#allocation84_spill] sm:$0xff] %v9155_v53 }
 0x6a4   :  { %4172 = vmatmul.bf16.gmra.mxu2 %v8651_v26  ;;  %v9149_v1 = vpack.c.bf16 %v3225_v48, %v3221_v7  ;;  %v10433_v26 = vld [vmem:[#allocation107_spill] sm:$0xff] }
 0x6a5   :  { %3869 = vmatmul.bf16.gmra.mxu0 %v10431_v12  ;;  %v9152_v46 = vpack.c.bf16 %v3096_v41, %v3092_v38  ;;  %v10435_v38 = vld [vmem:[#allocation82_spill] sm:$0xff] }
 0x6a6   :  { %10430 = vst [vmem:[#allocation63_spill] sm:$0xff] %v9149_v1  ;;  %v2386_v15 = vpop.f32.mrf.mxu3 }
 0x6a7   :  { %v2973_v58 = vpop.f32.mrf.mxu2  ;;  %v2387_v54 = vadd.f32 %v2386_v15, %v8843_v4  ;;  %v10437_v15 = vld [vmem:[#allocation109_spill] sm:$0xff] }
 0x6a8   :  { %v2974_v57 = vadd.f32 %v2973_v58, %v2805_v51  ;;  %v2806_v39 = vpop.f32.mrf.mxu1 }
 0x6a9   :  { %v2807_v17 = vadd.f32 %v2806_v39, %v8482_v61  ;;  %v2556_v3 = vadd.f32 %v10433_v26, %v2387_v54 }
 0x6aa   :  { %v9163_v18 = vpop.f32.mrf.mxu0  ;;  %v3229_v12 = vmax.f32 %v2974_v57, 0.0 }
 0x6ab   :  { %10434 = vst [vmem:[#allocation61_spill] sm:$0xff] %v9163_v18  ;;  %v3100_v58 = vmax.f32 %v2556_v3, 0.0  ;;  %v10439_v3 = vld [vmem:[#allocation32_spill] sm:$0xff] }
 0x6ae   :  { %v2388_v28 = vpop.f32.mrf.mxu3 }
 0x6af   :  { %v2389_v62 = vadd.f32 %v2388_v28, %v8843_v4  ;;  %v2975_v33 = vpop.f32.mrf.mxu2 }
 0x6b0   :  { %v2976_v7 = vadd.f32 %v2975_v33, %v2807_v17  ;;  %v9161_v48 = vpop.f32.mrf.mxu1 }
 0x6b1   :  { %v2558_v41 = vadd.f32 %v10435_v38, %v2389_v62 }
 0x6b2   :  { %v3233_v51 = vmax.f32 %v2976_v7, 0.0  ;;  %v9178_v57 = vpop.f32.mrf.mxu0 }
 0x6b3   :  { %v3104_v53 = vmax.f32 %v2558_v41, 0.0  ;;  %2430 = vmatmul.bf16.gmra.mxu3 %v10250_v56  ;;  %4008 = vmatmul.bf16.gmra.mxu1 %v9040_v63  ;;  %10438 = vst [vmem:[#allocation86_spill] sm:$0xff] %v9178_v57 }
 0x6b4   :  { %4177 = vmatmul.bf16.gmra.mxu2 %v8669_v40  ;;  %v9169_v61 = vpack.c.bf16 %v3233_v51, %v3229_v12  ;;  %v10441_v12 = vld [vmem:[#allocation113_spill] sm:$0xff] }
 0x6b5   :  { %3874 = vmatmul.bf16.gmra.mxu0 %v10437_v15  ;;  %v9172_v39 = vpack.c.bf16 %v3104_v53, %v3100_v58  ;;  %v10440_v53 = vld [vmem:[#allocation87_spill] sm:$0xff]  ;;  %v10443_v58 = vld [vmem:[#allocation34_spill] sm:$0xff] }
 0x6b6   :  { %10436 = vst [vmem:[#allocation89_spill] sm:$0xff] %v9169_v61  ;;  %v2391_v54 = vpop.f32.mrf.mxu3 }
 0x6b7   :  { %v9174_v17 = vpop.f32.mrf.mxu2  ;;  %v2392_v26 = vadd.f32 %v2391_v54, %v8843_v4 }
 0x6b8   :  { %v9176_v28 = vpop.f32.mrf.mxu1 }
 0x6b9   :  { %v2561_v63 = vadd.f32 %v10439_v3, %v2392_v26 }
 0x6ba   :  { %v9191_v51 = vpop.f32.mrf.mxu0 }
 0x6bb   :  { %v3108_v38 = vmax.f32 %v2561_v63, 0.0  ;;  %10442 = vst [vmem:[#allocation90_spill] sm:$0xff] %v9191_v51 }
 0x6be   :  { %v2393_v56 = vpop.f32.mrf.mxu3 }
 0x6bf   :  { %v2394_v40 = vadd.f32 %v2393_v56, %v8843_v4  ;;  %v9183_v62 = vpop.f32.mrf.mxu2 }
 0x6c0   :  { %v9185_v33 = vpop.f32.mrf.mxu1 }
 0x6c1   :  { %v2563_v7 = vadd.f32 %v10440_v53, %v2394_v40 }
 0x6c2   :  { %v9201_v40 = vpop.f32.mrf.mxu0 }
 0x6c3   :  { %v3112_v41 = vmax.f32 %v2563_v7, 0.0  ;;  %2435 = vmatmul.bf16.gmra.mxu3 %v7724_v55  ;;  %4013 = vmatmul.bf16.gmra.mxu1 %v9061_v37  ;;  %10444 = vst [vmem:[#allocation65_spill] sm:$0xff] %v9201_v40  ;;  %v10445_v55 = vld [vmem:[#allocation35_spill] sm:$0xff] }
 0x6c4   :  { %4182 = vmatmul.bf16.gmra.mxu2 %v10441_v12 }
 0x6c5   :  { %3879 = vmatmul.bf16.gmra.mxu0 %v10443_v58  ;;  %v9194_v15 = vpack.c.bf16 %v3112_v41, %v3108_v38  ;;  %v10446_v38 = vld [vmem:[#allocation131_spill] sm:$0xff] }
 0x6c6   :  { %v2396_v54 = vpop.f32.mrf.mxu3 }
 0x6c7   :  { %v9196_v26 = vpop.f32.mrf.mxu2  ;;  %v2397_v3 = vadd.f32 %v2396_v54, %v8843_v4  ;;  %v6243_v54 = vld [vmem:[%s9945_s7] sm:$0xff]  ;;  %s6730_s7 = smov [#allocation11]  }
 0x6c8   :  { %v9198_v56 = vpop.f32.mrf.mxu1  ;;  %3629 = vmatpush.bf16.msrb.mxu3 %v6243_v54  ;;  %s5582_s18 = sshll.u32 %s6730_s7, 4  ;;  %s5583_s18 = int_to_ptr.vmem [resolvable:$true] %s5582_s18 }
 0x6c9   :  { %v2566_v37 = vadd.f32 %v10445_v55, %v2397_v3  ;;  %v10447_v3 = vld [vmem:[#allocation37_spill] sm:$0xff] }
 0x6cb   :  { %v3116_v58 = vmax.f32 %v2566_v37, 0.0 }
 0x6ce   :  { %v2398_v63 = vpop.f32.mrf.mxu3 }
 0x6cf   :  { %v2399_v53 = vadd.f32 %v2398_v63, %v8843_v4  ;;  %v9205_v7 = vpop.f32.mrf.mxu2 }
 0x6d0   :  { %v9207_v12 = vpop.f32.mrf.mxu1 }
 0x6d1   :  { %v2568_v41 = vadd.f32 %v10446_v38, %v2399_v53  ;;  %v9223_v53 = vpop.f32.mrf.mxu0 }
 0x6d2   :  { %10448 = vst [vmem:[#allocation41_spill] sm:$0xff] %v9223_v53 }
 0x6d3   :  { %v3120_v51 = vmax.f32 %v2568_v41, 0.0  ;;  %2440 = vmatmul.bf16.gmra.mxu3 %v10359_v9  ;;  %4018 = vmatmul.bf16.gmra.mxu1 %v9079_v5 }
 0x6d4   :  { %4187 = vmatmul.bf16.gmra.mxu2 %v8717_v19 }
 0x6d5   :  { %3884 = vmatmul.bf16.gmra.mxu0 %v10447_v3  ;;  %v9217_v63 = vpack.c.bf16 %v3120_v51, %v3116_v58  ;;  %v10449_v51 = vld [vmem:[#allocation114_spill] sm:$0xff] }
 0x6d6   :  { %v2401_v55 = vpop.f32.mrf.mxu3 }
 0x6d7   :  { %v9219_v40 = vpop.f32.mrf.mxu2  ;;  %v2402_v9 = vadd.f32 %v2401_v55, %v8843_v4  ;;  %v10451_v55 = vld [vmem:[#allocation40_spill] sm:$0xff] }
 0x6d8   :  { %v9221_v37 = vpop.f32.mrf.mxu1 }
 0x6d9   :  { %v2571_v38 = vadd.f32 %v8712_v24, %v2402_v9  ;;  %v9233_v54 = vpop.f32.mrf.mxu0 }
 0x6da   :  { %10450 = vst [vmem:[#allocation26_spill] sm:$0xff] %v9233_v54 }
 0x6db   :  { %v3124_v57 = vmax.f32 %v2571_v38, 0.0 }
 0x6de   :  { %v2403_v5 = vpop.f32.mrf.mxu3 }
 0x6df   :  { %v2404_v41 = vadd.f32 %v2403_v5, %v8843_v4  ;;  %v9228_v19 = vpop.f32.mrf.mxu2 }
 0x6e0   :  { %v9230_v3 = vpop.f32.mrf.mxu1 }
 0x6e1   :  { %v2573_v58 = vadd.f32 %v10449_v51, %v2404_v41  ;;  %v9246_v51 = vpop.f32.mrf.mxu0 }
 0x6e2   :  { %10452 = vst [vmem:[#allocation92_spill] sm:$0xff] %v9246_v51 }
 0x6e3   :  { %v3128_v61 = vmax.f32 %v2573_v58, 0.0  ;;  %2445 = vmatmul.bf16.gmra.mxu3 %v7780_v45  ;;  %4023 = vmatmul.bf16.gmra.mxu1 %v9097_v42  ;;  %v10453_v58 = vld [vmem:[#allocation93_spill] sm:$0xff] }
 0x6e4   :  { %4192 = vmatmul.bf16.gmra.mxu2 %v8735_v31 }
 0x6e5   :  { %3889 = vmatmul.bf16.gmra.mxu0 %v10451_v55  ;;  %v9239_v24 = vpack.c.bf16 %v3128_v61, %v3124_v57  ;;  %v10454_v61 = vld [vmem:[#allocation115_spill] sm:$0xff] }
 0x6e6   :  { %v2406_v9 = vpop.f32.mrf.mxu3 }
 0x6e7   :  { %v9241_v5 = vpop.f32.mrf.mxu2  ;;  %v2407_v41 = vadd.f32 %v2406_v9, %v8843_v4  ;;  %v10455_v9 = vld [vmem:[#allocation44_spill] sm:$0xff] }
 0x6e8   :  { %v9243_v53 = vpop.f32.mrf.mxu1 }
 0x6e9   :  { %v2576_v45 = vadd.f32 %v10453_v58, %v2407_v41 }
 0x6eb   :  { %v3132_v55 = vmax.f32 %v2576_v45, 0.0 }
 0x6ee   :  { %v2408_v38 = vpop.f32.mrf.mxu3 }
 0x6ef   :  { %v2409_v42 = vadd.f32 %v2408_v38, %v8843_v4  ;;  %v9250_v54 = vpop.f32.mrf.mxu2  ;;  %v9261_v38 = vpop.f32.mrf.mxu0 }
 0x6f0   :  { %v9252_v31 = vpop.f32.mrf.mxu1  ;;  %10456 = vst [vmem:[#allocation17_spill] sm:$0xff] %v9261_v38 }
 0x6f1   :  { %v2578_v57 = vadd.f32 %v10454_v61, %v2409_v42 }
 0x6f3   :  { %v3136_v18 = vmax.f32 %v2578_v57, 0.0  ;;  %2450 = vmatmul.bf16.gmra.mxu3 %v7808_v8  ;;  %4028 = vmatmul.bf16.gmra.mxu1 %v9115_v34 }
 0x6f4   :  { %4197 = vmatmul.bf16.gmra.mxu2 %v8753_v23 }
 0x6f5   :  { %3894 = vmatmul.bf16.gmra.mxu0 %v10455_v9  ;;  %v9259_v51 = vpack.c.bf16 %v3136_v18, %v3132_v55 }
 0x6f6   :  { %v2411_v41 = vpop.f32.mrf.mxu3 }
 0x6f7   :  { %v9263_v58 = vpop.f32.mrf.mxu2  ;;  %v2412_v45 = vadd.f32 %v2411_v41, %v8843_v4  ;;  %v9272_v23 = vpop.f32.mrf.mxu0  ;;  %v10458_v41 = vld [vmem:[#allocation48_spill] sm:$0xff] }
 0x6f8   :  { %v9265_v1 = vpop.f32.mrf.mxu1  ;;  %10457 = vst [vmem:[#allocation45_spill] sm:$0xff] %v9272_v23 }
 0x6f9   :  { %v2581_v8 = vadd.f32 %v8748_v16, %v2412_v45 }
 0x6fb   :  { %v3140_v55 = vmax.f32 %v2581_v8, 0.0 }
 0x6fe   :  { %v2413_v42 = vpop.f32.mrf.mxu3 }
 0x6ff   :  { %v2414_v34 = vadd.f32 %v2413_v42, %v8843_v4  ;;  %v9270_v61 = vpop.f32.mrf.mxu2  ;;  %v9285_v23 = vpop.f32.mrf.mxu0 }
 0x700   :  { %v9275_v57 = vpop.f32.mrf.mxu1  ;;  %10459 = vst [vmem:[#allocation67_spill] sm:$0xff] %v9285_v23 }
 0x701   :  { %v2583_v18 = vadd.f32 %v8759_v6, %v2414_v34 }
 0x703   :  { %v3144_v9 = vmax.f32 %v2583_v18, 0.0  ;;  %2455 = vmatmul.bf16.gmra.mxu3 %v7836_v60  ;;  %4033 = vmatmul.bf16.gmra.mxu1 %v9136_v27  ;;  %v10461_v18 = vld [vmem:[#allocation46_spill] sm:$0xff] }
 0x704   :  { %4202 = vmatmul.bf16.gmra.mxu2 %v8780_v44  ;;  %v10462_v44 = vld [vmem:[#allocation98_spill] sm:$0xff] }
 0x705   :  { %3899 = vmatmul.bf16.gmra.mxu0 %v10458_v41  ;;  %v9281_v16 = vpack.c.bf16 %v3144_v9, %v3140_v55 }
 0x706   :  { %v2416_v45 = vpop.f32.mrf.mxu3 }
 0x707   :  { %v9283_v42 = vpop.f32.mrf.mxu2  ;;  %v2417_v6 = vadd.f32 %v2416_v45, %v8843_v4  ;;  %v9298_v45 = vpop.f32.mrf.mxu0 }
 0x708   :  { %v9288_v34 = vpop.f32.mrf.mxu1  ;;  %10463 = vst [vmem:[#allocation97_spill] sm:$0xff] %v9298_v45 }
 0x709   :  { %10460 = vst [vmem:[#allocation70_spill] sm:$0xff] %v9288_v34  ;;  %v2586_v60 = vadd.f32 %v10461_v18, %v2417_v6  ;;  %v10465_v34 = vld [vmem:[#allocation49_spill] sm:$0xff] }
 0x70b   :  { %v3148_v55 = vmax.f32 %v2586_v60, 0.0 }
 0x70e   :  { %v2418_v8 = vpop.f32.mrf.mxu3 }
 0x70f   :  { %v2419_v27 = vadd.f32 %v2418_v8, %v8843_v4  ;;  %v9292_v38 = vpop.f32.mrf.mxu2 }
 0x710   :  { %v9300_v23 = vpop.f32.mrf.mxu1 }
 0x711   :  { %v2588_v41 = vadd.f32 %v10462_v44, %v2419_v27  ;;  %10464 = vst [vmem:[#allocation96_spill] sm:$0xff] %v9300_v23  ;;  %v9308_v44 = vpop.f32.mrf.mxu0  ;;  %v10469_v23 = vld [vmem:[#allocation30_spill] sm:$0xff] }
 0x712   :  { %10466 = vst [vmem:[#allocation18_spill] sm:$0xff] %v9308_v44 }
 0x713   :  { %v3152_v9 = vmax.f32 %v2588_v41, 0.0  ;;  %2460 = vmatmul.bf16.gmra.mxu3 %v10380_v32  ;;  %4038 = vmatmul.bf16.gmra.mxu1 %v9152_v46  ;;  %v10467_v32 = vld [vmem:[#allocation101_spill] sm:$0xff] }
 0x714   :  { %4207 = vmatmul.bf16.gmra.mxu2 %v8816_v36 }
 0x715   :  { %3904 = vmatmul.bf16.gmra.mxu0 %v10465_v34  ;;  %v9303_v6 = vpack.c.bf16 %v3152_v9, %v3148_v55 }
 0x716   :  { %v2421_v8 = vpop.f32.mrf.mxu3 }
 0x717   :  { %v9305_v18 = vpop.f32.mrf.mxu2  ;;  %v2422_v60 = vadd.f32 %v2421_v8, %v8843_v4  ;;  %v10470_v8 = vld [vmem:[#allocation52_spill] sm:$0xff] }
 0x718   :  { %v9311_v41 = vpop.f32.mrf.mxu1 }
 0x719   :  { %v2591_v46 = vadd.f32 %v10467_v32, %v2422_v60  ;;  %v9323_v32 = vpop.f32.mrf.mxu0 }
 0x71a   :  { %10471 = vst [vmem:[#allocation100_spill] sm:$0xff] %v9323_v32 }
 0x71b   :  { %v3156_v55 = vmax.f32 %v2591_v46, 0.0 }
 0x71e   :  { %v2423_v27 = vpop.f32.mrf.mxu3 }
 0x71f   :  { %v2424_v36 = vadd.f32 %v2423_v27, %v8843_v4  ;;  %v9314_v45 = vpop.f32.mrf.mxu2 }
 0x720   :  { %10468 = vst [vmem:[#allocation129_spill] sm:$0xff] %v9314_v45  ;;  %v9325_v27 = vpop.f32.mrf.mxu1 }
 0x721   :  { %v2593_v34 = vadd.f32 %v10469_v23, %v2424_v36  ;;  %v9333_v36 = vpop.f32.mrf.mxu0 }
 0x722   :  { %10472 = vst [vmem:[#allocation19_spill] sm:$0xff] %v9333_v36 }
 0x723   :  { %v3160_v9 = vmax.f32 %v2593_v34, 0.0  ;;  %2465 = vmatmul.bf16.gmra.mxu3 %v7900_v13  ;;  %4043 = vmatmul.bf16.gmra.mxu1 %v9172_v39 }
 0x724   :  { %4212 = vmatmul.bf16.gmra.mxu2 %v8834_v43 }
 0x725   :  { %3909 = vmatmul.bf16.gmra.mxu0 %v10470_v8  ;;  %v9321_v44 = vpack.c.bf16 %v3160_v9, %v3156_v55  ;;  %v10474_v8 = vld [vmem:[#allocation112_spill] sm:$0xff] }
 0x726   :  { %v2426_v60 = vpop.f32.mrf.mxu3 }
 0x727   :  { %v9327_v45 = vpop.f32.mrf.mxu2  ;;  %v2427_v23 = vadd.f32 %v2426_v60, %v8843_v4  ;;  %v10476_v60 = vld [vmem:[#allocation58_spill] sm:$0xff] }
 0x728   :  { %v9335_v55 = vpop.f32.mrf.mxu1 }
 0x729   :  { %v2596_v13 = vadd.f32 %v8829_v14, %v2427_v23  ;;  %10473 = vst [vmem:[#allocation99_spill] sm:$0xff] %v9335_v55 }
 0x72b   :  { %v3164_v34 = vmax.f32 %v2596_v13, 0.0 }
 0x72e   :  { %v2428_v46 = vpop.f32.mrf.mxu3 }
 0x72f   :  { %v2429_v39 = vadd.f32 %v2428_v46, %v8843_v4  ;;  %v9339_v32 = vpop.f32.mrf.mxu2  ;;  %v9346_v46 = vpop.f32.mrf.mxu0 }
 0x730   :  { %10475 = vst [vmem:[#allocation130_spill] sm:$0xff] %v9339_v32  ;;  %v9348_v13 = vpop.f32.mrf.mxu1  ;;  %v10481_v32 = vld [vmem:[#allocation117_spill] sm:$0xff] }
 0x731   :  { %v2598_v43 = vadd.f32 %v8845_v29, %v2429_v39  ;;  %10477 = vst [vmem:[#allocation102_spill] sm:$0xff] %v9346_v46 }
 0x732   :  { %10478 = vst [vmem:[#allocation103_spill] sm:$0xff] %v9348_v13 }
 0x733   :  { %v3168_v9 = vmax.f32 %v2598_v43, 0.0  ;;  %3630 = vmatmul.bf16.vlgmr.msrb.gmra.mxu3 %v10474_v8  ;;  %4048 = vmatmul.bf16.gmra.mxu1 %v9194_v15  ;;  %v10480_v8 = vld [vmem:[#allocation56_spill] sm:$0xff] }
 0x734   :  { %4217 = vmatmul.bf16.gmra.mxu2 %v8857_v10 }
 0x735   :  { %3914 = vmatmul.bf16.gmra.mxu0 %v10476_v60  ;;  %v9343_v14 = vpack.c.bf16 %v3168_v9, %v3164_v34  ;;  %v10482_v34 = vld [vmem:[#allocation24_spill] sm:$0xff] }
 0x736   :  { %v2431_v23 = vpop.f32.mrf.mxu3  ;;  %v10483_v9 = vld [vmem:[#allocation64_spill] sm:$0xff] }
 0x737   :  { %v2432_v29 = vadd.f32 %v2431_v23, %v8843_v4  ;;  %v9350_v39 = vpop.f32.mrf.mxu2  ;;  %v10484_v23 = vld [vmem:[#allocation60_spill] sm:$0xff]  ;;  %v9361_v13 = vpop.f32.mrf.mxu0 }
 0x738   :  { %10479 = vst [vmem:[#allocation77_spill] sm:$0xff] %v9350_v39 }
 0x739   :  { %v2601_v15 = vadd.f32 %v10480_v8, %v2432_v29  ;;  %10485 = vst [vmem:[#allocation105_spill] sm:$0xff] %v9361_v13  ;;  %v9363_v29 = vpop.f32.mrf.mxu1  ;;  %v10487_v8 = vld [vmem:[#allocation108_spill] sm:$0xff] }
 0x73a   :  { %10486 = vst [vmem:[#allocation107_spill] sm:$0xff] %v9363_v29  ;;  %v10491_v29 = vld [vmem:[#allocation25_spill] sm:$0xff] }
 0x73b   :  { %v3172_v55 = vmax.f32 %v2601_v15, 0.0 }
 0x73e   :  { %v2433_v43 = vpop.f32.mrf.mxu3 }
 0x73f   :  { %v2434_v36 = vadd.f32 %v2433_v43, %v8843_v4  ;;  %v9365_v43 = vpop.f32.mrf.mxu2 }
 0x741   :  { %v2603_v10 = vadd.f32 %v10481_v32, %v2434_v36 }
 0x743   :  { %v3176_v60 = vmax.f32 %v2603_v10, 0.0  ;;  %3635 = vmatmul.bf16.gmra.mxu3 %v10482_v34  ;;  %4053 = vmatmul.bf16.gmra.mxu1 %v9217_v63  ;;  %v9370_v10 = vpop.f32.mrf.mxu0  ;;  %v9372_v34 = vpop.f32.mrf.mxu1 }
 0x744   :  { %4222 = vmatmul.bf16.gmra.mxu2 %v10483_v9  ;;  %10488 = vst [vmem:[#allocation82_spill] sm:$0xff] %v9370_v10 }
 0x745   :  { %3919 = vmatmul.bf16.gmra.mxu0 %v10484_v23  ;;  %v9359_v46 = vpack.c.bf16 %v3176_v60, %v3172_v55  ;;  %v10489_v55 = vld [vmem:[#allocation118_spill] sm:$0xff] }
 0x746   :  { %v2436_v39 = vpop.f32.mrf.mxu3 }
 0x747   :  { %v2437_v32 = vadd.f32 %v2436_v39, %v8843_v4  ;;  %v9375_v9 = vpop.f32.mrf.mxu2  ;;  %v10492_v39 = vld [vmem:[#allocation33_spill] sm:$0xff] }
 0x748   :  { %10490 = vst [vmem:[#allocation109_spill] sm:$0xff] %v9375_v9 }
 0x749   :  { %v2606_v15 = vadd.f32 %v10487_v8, %v2437_v32 }
 0x74b   :  { %v3180_v23 = vmax.f32 %v2606_v15, 0.0  ;;  %v9383_v8 = vpop.f32.mrf.mxu0  ;;  %v9385_v10 = vpop.f32.mrf.mxu1 }
 0x74c   :  { %10493 = vst [vmem:[#allocation32_spill] sm:$0xff] %v9383_v8  ;;  %v10499_v8 = vld [vmem:[#allocation120_spill] sm:$0xff] }
 0x74e   :  { %v2438_v36 = vpop.f32.mrf.mxu3 }
 0x74f   :  { %v2439_v63 = vadd.f32 %v2438_v36, %v8843_v4 }
 0x751   :  { %v2608_v60 = vadd.f32 %v10489_v55, %v2439_v63  ;;  %v9388_v55 = vpop.f32.mrf.mxu2 }
 0x752   :  { %10494 = vst [vmem:[#allocation87_spill] sm:$0xff] %v9388_v55 }
 0x753   :  { %v3184_v13 = vmax.f32 %v2608_v60, 0.0  ;;  %3640 = vmatmul.bf16.gmra.mxu3 %v10491_v29  ;;  %4058 = vmatmul.bf16.gmra.mxu1 %v9239_v24  ;;  %v10495_v60 = vld [vmem:[#allocation68_spill] sm:$0xff] }
 0x754   :  { %4227 = vmatmul.bf16.gmra.mxu2 %v8902_v25 }
 0x755   :  { %3924 = vmatmul.bf16.gmra.mxu0 %v10492_v39  ;;  %v9381_v32 = vpack.c.bf16 %v3184_v13, %v3180_v23  ;;  %v10496_v13 = vld [vmem:[#allocation27_spill] sm:$0xff]  ;;  %v9396_v23 = vpop.f32.mrf.mxu0 }
 0x756   :  { %v2441_v36 = vpop.f32.mrf.mxu3  ;;  %10497 = vst [vmem:[#allocation113_spill] sm:$0xff] %v9396_v23  ;;  %v10504_v23 = vld [vmem:[#allocation119_spill] sm:$0xff] }
 0x757   :  { %v2442_v63 = vadd.f32 %v2441_v36, %v8843_v4  ;;  %v9398_v36 = vpop.f32.mrf.mxu1 }
 0x758   :  { %10498 = vst [vmem:[#allocation34_spill] sm:$0xff] %v9398_v36  ;;  %v10505_v36 = vld [vmem:[#allocation28_spill] sm:$0xff] }
 0x759   :  { %v2611_v29 = vadd.f32 %v8897_v59, %v2442_v63  ;;  %v9403_v59 = vpop.f32.mrf.mxu2 }
 0x75b   :  { %v3188_v9 = vmax.f32 %v2611_v29, 0.0 }
 0x75e   :  { %v2443_v15 = vpop.f32.mrf.mxu3 }
 0x75f   :  { %v2444_v24 = vadd.f32 %v2443_v15, %v8843_v4 }
 0x761   :  { %v2613_v25 = vadd.f32 %v10495_v60, %v2444_v24  ;;  %v9406_v24 = vpop.f32.mrf.mxu0  ;;  %v9408_v60 = vpop.f32.mrf.mxu1 }
 0x762   :  { %10500 = vst [vmem:[#allocation35_spill] sm:$0xff] %v9406_v24 }
 0x763   :  { %v3192_v39 = vmax.f32 %v2613_v25, 0.0  ;;  %3645 = vmatmul.bf16.gmra.mxu3 %v10496_v13  ;;  %4063 = vmatmul.bf16.gmra.mxu1 %v9259_v51  ;;  %10501 = vst [vmem:[#allocation131_spill] sm:$0xff] %v9408_v60  ;;  %v10502_v51 = vld [vmem:[#allocation66_spill] sm:$0xff]  ;;  %v9412_v13 = vpop.f32.mrf.mxu2 }
 0x764   :  { %4232 = vmatmul.bf16.gmra.mxu2 %v8920_v35  ;;  %10503 = vst [vmem:[#allocation37_spill] sm:$0xff] %v9412_v13 }
 0x765   :  { %3929 = vmatmul.bf16.gmra.mxu0 %v10499_v8  ;;  %v9401_v55 = vpack.c.bf16 %v3192_v39, %v3188_v9 }
 0x766   :  { %v2446_v63 = vpop.f32.mrf.mxu3 }
 0x767   :  { %v2447_v15 = vadd.f32 %v2446_v63, %v8843_v4  ;;  %v10506_v63 = vld [vmem:[#allocation123_spill] sm:$0xff] }
 0x769   :  { %v2616_v35 = vadd.f32 %v10502_v51, %v2447_v15  ;;  %v9421_v15 = vpop.f32.mrf.mxu0 }
 0x76a   :  { %10507 = vst [vmem:[#allocation114_spill] sm:$0xff] %v9421_v15  ;;  %v10514_v15 = vld [vmem:[#allocation51_spill] sm:$0xff] }
 0x76b   :  { %v3196_v9 = vmax.f32 %v2616_v35, 0.0  ;;  %v9425_v51 = vpop.f32.mrf.mxu2 }
 0x76c   :  { %10509 = vst [vmem:[#allocation93_spill] sm:$0xff] %v9425_v51 }
 0x76e   :  { %v2448_v29 = vpop.f32.mrf.mxu3 }
 0x76f   :  { %v2449_v25 = vadd.f32 %v2448_v29, %v8843_v4  ;;  %v9423_v29 = vpop.f32.mrf.mxu1 }
 0x770   :  { %10508 = vst [vmem:[#allocation40_spill] sm:$0xff] %v9423_v29  ;;  %v10517_v29 = vld [vmem:[#allocation126_spill] sm:$0xff] }
 0x771   :  { %v2618_v8 = vadd.f32 %v10504_v23, %v2449_v25  ;;  %v10510_v25 = vld [vmem:[#allocation121_spill] sm:$0xff]  ;;  %v9431_v13 = vpop.f32.mrf.mxu0 }
 0x772   :  { %10512 = vst [vmem:[#allocation115_spill] sm:$0xff] %v9431_v13 }
 0x773   :  { %v3200_v39 = vmax.f32 %v2618_v8, 0.0  ;;  %3650 = vmatmul.bf16.gmra.mxu3 %v10505_v36  ;;  %4068 = vmatmul.bf16.gmra.mxu1 %v9281_v16  ;;  %v10511_v8 = vld [vmem:[#allocation69_spill] sm:$0xff]  ;;  %v9437_v51 = vpop.f32.mrf.mxu2 }
 0x774   :  { %4237 = vmatmul.bf16.gmra.mxu2 %v8944_v30  ;;  %10515 = vst [vmem:[#allocation48_spill] sm:$0xff] %v9437_v51  ;;  %v10521_v51 = vld [vmem:[#allocation71_spill] sm:$0xff] }
 0x775   :  { %3934 = vmatmul.bf16.gmra.mxu0 %v10506_v63  ;;  %v9419_v24 = vpack.c.bf16 %v3200_v39, %v3196_v9 }
 0x776   :  { %v2451_v60 = vpop.f32.mrf.mxu3 }
 0x777   :  { %v2452_v23 = vadd.f32 %v2451_v60, %v8843_v4  ;;  %v9433_v9 = vpop.f32.mrf.mxu1  ;;  %v10516_v60 = vld [vmem:[#allocation124_spill] sm:$0xff] }
 0x778   :  { %10513 = vst [vmem:[#allocation44_spill] sm:$0xff] %v9433_v9 }
 0x779   :  { %v2621_v36 = vadd.f32 %v10510_v25, %v2452_v23 }
 0x77b   :  { %v3204_v39 = vmax.f32 %v2621_v36, 0.0  ;;  %v9448_v36 = vpop.f32.mrf.mxu2 }
 0x77c   :  { %10519 = vst [vmem:[#allocation98_spill] sm:$0xff] %v9448_v36 }
 0x77e   :  { %v2453_v35 = vpop.f32.mrf.mxu3 }
 0x77f   :  { %v2454_v16 = vadd.f32 %v2453_v35, %v8843_v4 }
 0x781   :  { %v2623_v30 = vadd.f32 %v10511_v8, %v2454_v16  ;;  %v9444_v16 = vpop.f32.mrf.mxu0  ;;  %v9446_v8 = vpop.f32.mrf.mxu1 }
 0x782   :  { %10518 = vst [vmem:[#allocation46_spill] sm:$0xff] %v9444_v16 }
 0x783   :  { %v3208_v63 = vmax.f32 %v2623_v30, 0.0  ;;  %3655 = vmatmul.bf16.gmra.mxu3 %v10514_v15  ;;  %4073 = vmatmul.bf16.gmra.mxu1 %v9303_v6  ;;  %v10520_v30 = vld [vmem:[#allocation122_spill] sm:$0xff] }
 0x784   :  { %4242 = vmatmul.bf16.gmra.mxu2 %v10516_v60 }
 0x785   :  { %3939 = vmatmul.bf16.gmra.mxu0 %v10517_v29  ;;  %v9441_v23 = vpack.c.bf16 %v3208_v63, %v3204_v39  ;;  %v10522_v39 = vld [vmem:[#allocation54_spill] sm:$0xff]  ;;  %v10523_v63 = vld [vmem:[#allocation55_spill] sm:$0xff] }
 0x786   :  { %v2456_v35 = vpop.f32.mrf.mxu3 }
 0x787   :  { %v2457_v25 = vadd.f32 %v2456_v35, %v8843_v4 }
 0x789   :  { %v2626_v6 = vadd.f32 %v10520_v30, %v2457_v25  ;;  %v9459_v36 = vpop.f32.mrf.mxu0  ;;  %v9461_v25 = vpop.f32.mrf.mxu1  ;;  %v10526_v30 = vld [vmem:[#allocation125_spill] sm:$0xff] }
 0x78a   :  { %10524 = vst [vmem:[#allocation49_spill] sm:$0xff] %v9459_v36 }
 0x78b   :  { %v3212_v9 = vmax.f32 %v2626_v6, 0.0  ;;  %10525 = vst [vmem:[#allocation101_spill] sm:$0xff] %v9461_v25  ;;  %v10531_v25 = vld [vmem:[#allocation31_spill] sm:$0xff] }
 0x78e   :  { %v2458_v15 = vpop.f32.mrf.mxu3 }
 0x78f   :  { %v2459_v13 = vadd.f32 %v2458_v15, %v8843_v4  ;;  %v9463_v15 = vpop.f32.mrf.mxu2 }
 0x791   :  { %v2628_v60 = vadd.f32 %v10521_v51, %v2459_v13 }
 0x793   :  { %v3216_v29 = vmax.f32 %v2628_v60, 0.0  ;;  %3660 = vmatmul.bf16.gmra.mxu3 %v10522_v39  ;;  %4078 = vmatmul.bf16.gmra.mxu1 %v9321_v44  ;;  %v9468_v60 = vpop.f32.mrf.mxu0 }
 0x794   :  { %4247 = vmatmul.bf16.gmra.mxu2 %v9001_v47  ;;  %10527 = vst [vmem:[#allocation30_spill] sm:$0xff] %v9468_v60  ;;  %v9470_v47 = vpop.f32.mrf.mxu1 }
 0x795   :  { %3944 = vmatmul.bf16.gmra.mxu0 %v10523_v63  ;;  %v9457_v35 = vpack.c.bf16 %v3216_v29, %v3212_v9  ;;  %10528 = vst [vmem:[#allocation52_spill] sm:$0xff] %v9470_v47  ;;  %v10529_v9 = vld [vmem:[#allocation127_spill] sm:$0xff] }
 0x796   :  { %v2461_v16 = vpop.f32.mrf.mxu3 }
 0x797   :  { %v2462_v13 = vadd.f32 %v2461_v16, %v8843_v4  ;;  %v9473_v39 = vpop.f32.mrf.mxu2  ;;  %v10532_v16 = vld [vmem:[#allocation78_spill] sm:$0xff] }
 0x798   :  { %10530 = vst [vmem:[#allocation112_spill] sm:$0xff] %v9473_v39  ;;  %v10536_v39 = vld [vmem:[#allocation128_spill] sm:$0xff] }
 0x799   :  { %v2631_v6 = vadd.f32 %v10526_v30, %v2462_v13 }
 0x79b   :  { %v3220_v63 = vmax.f32 %v2631_v6, 0.0  ;;  %v9481_v30 = vpop.f32.mrf.mxu0 }
 0x79c   :  { %10533 = vst [vmem:[#allocation58_spill] sm:$0xff] %v9481_v30  ;;  %v9483_v60 = vpop.f32.mrf.mxu1 }
 0x79e   :  { %v2463_v51 = vpop.f32.mrf.mxu3 }
 0x79f   :  { %v2464_v44 = vadd.f32 %v2463_v51, %v8843_v4 }
 0x7a1   :  { %v2633_v29 = vadd.f32 %v10529_v9, %v2464_v44  ;;  %v9486_v9 = vpop.f32.mrf.mxu2 }
 0x7a2   :  { %10534 = vst [vmem:[#allocation56_spill] sm:$0xff] %v9486_v9  ;;  %v10539_v9 = vld [vmem:[#allocation80_spill] sm:$0xff] }
 0x7a3   :  { %v3224_v36 = vmax.f32 %v2633_v29, 0.0  ;;  %3665 = vmatmul.bf16.gmra.mxu3 %v10531_v25  ;;  %4083 = vmatmul.bf16.gmra.mxu1 %v9343_v14  ;;  %v10535_v29 = vld [vmem:[#allocation73_spill] sm:$0xff] }
 0x7a4   :  { %4252 = vmatmul.bf16.gmra.mxu2 %v9019_v11  ;;  %v9498_v30 = vpop.f32.mrf.mxu1 }
 0x7a5   :  { %3949 = vmatmul.bf16.gmra.mxu0 %v10532_v16  ;;  %v9479_v13 = vpack.c.bf16 %v3224_v36, %v3220_v63  ;;  %v10537_v36 = vld [vmem:[#allocation62_spill] sm:$0xff]  ;;  %v9493_v63 = vld [vmem:[#allocation10] ss:$0 sm:$0xff] }
 0x7a6   :  { %v2466_v51 = vpop.f32.mrf.mxu3 }
 0x7a7   :  { %v2467_v44 = vadd.f32 %v2466_v51, %v8843_v4  ;;  %v9496_v51 = vpop.f32.mrf.mxu0 }
 0x7a8   :  { %10538 = vst [vmem:[#allocation117_spill] sm:$0xff] %v9496_v51 }
 0x7a9   :  { %v2636_v25 = vadd.f32 %v10535_v29, %v2467_v44  ;;  %v10541_v29 = vld [vmem:[#allocation50_spill] sm:$0xff] }
 0x7ab   :  { %v3228_v47 = vmax.f32 %v2636_v25, 0.0 }
 0x7ae   :  { %v2468_v6 = vpop.f32.mrf.mxu3 }
 0x7af   :  { %v2469_v14 = vadd.f32 %v2468_v6, %v8843_v4  ;;  %v9503_v4 = vpop.f32.mrf.mxu2 }
 0x7b0   :  { %10540 = vst [vmem:[#allocation24_spill] sm:$0xff] %v9503_v4 }
 0x7b1   :  { %v2638_v11 = vadd.f32 %v10536_v39, %v2469_v14 }
 0x7b3   :  { %v3232_v16 = vmax.f32 %v2638_v11, 0.0  ;;  %3670 = vmatmul.bf16.gmra.mxu3 %v10537_v36  ;;  %4088 = vmatmul.bf16.gmra.mxu1 %v9359_v46  ;;  %v9509_v11 = vpop.f32.mrf.mxu1 }
 0x7b4   :  { %4257 = vmatmul.bf16.gmra.mxu2 %v9037_v22 }
 0x7b5   :  { %3954 = vmatmul.bf16.gmra.mxu0 %v10539_v9  ;;  %v9501_v44 = vpack.c.bf16 %v3232_v16, %v3228_v47  ;;  %v10542_v47 = vld [vmem:[#allocation79_spill] sm:$0xff] }
 0x7b6   :  { %v3631_v39 = vpop.f32.mrf.mxu3 }
 0x7b7   :  { %v3632_v6 = vadd.f32 %v9493_v63, %v3631_v39  ;;  %v9512_v9 = vpop.f32.mrf.mxu2  ;;  %v10543_v39 = vld [vmem:[#allocation36_spill] sm:$0xff] }
 0x7b9   :  { %v3801_v25 = vadd.f32 %v10541_v29, %v3632_v6 }
 0x7bb   :  { %v3970_v46 = vadd.f32 %v9161_v48, %v3801_v25 }
 0x7bd   :  { %v4139_v14 = vadd.f32 %v9174_v17, %v3970_v46 }
 0x7be   :  { %v3633_v22 = vpop.f32.mrf.mxu3 }
 0x7bf   :  { %v6095_v36 = vmul.f32 -1.442695, %v4139_v14  ;;  %v3634_v51 = vadd.f32 %v9493_v63, %v3633_v22  ;;  %v9521_v14 = vpop.f32.mrf.mxu1 }
 0x7c1   :  { %6307 = vpow2.f32 %v6095_v36  ;;  %v3803_v16 = vadd.f32 %v10542_v47, %v3634_v51  ;;  %v10544_v51 = vld [vmem:[#allocation76_spill] sm:$0xff] }
 0x7c3   :  { %v3972_v4 = vadd.f32 %v9176_v28, %v3803_v16  ;;  %3675 = vmatmul.bf16.gmra.mxu3 %v10543_v39  ;;  %4093 = vmatmul.bf16.gmra.mxu1 %v9381_v32  ;;  %v9524_v28 = vpop.f32.mrf.mxu2 }
 0x7c4   :  { %4262 = vmatmul.bf16.gmra.mxu2 %v9058_v20 }
 0x7c5   :  { %v4141_v48 = vadd.f32 %v9183_v62, %v3972_v4 }
 0x7c6   :  { %v3636_v17 = vpop.f32.mrf.mxu3 }
 0x7c7   :  { %v6308_v6 = vpop.eup %6307  ;;  %v6096_v29 = vmul.f32 -1.442695, %v4141_v48  ;;  %v3637_v25 = vadd.f32 %v9493_v63, %v3636_v17  ;;  %v10545_v17 = vld [vmem:[#allocation75_spill] sm:$0xff] }
 0x7c8   :  { %v4490_v46 = vadd.f32 1.0, %v6308_v6 }
 0x7c9   :  { %6309 = vpow2.f32 %v6096_v29  ;;  %v3806_v22 = vadd.f32 %v10544_v51, %v3637_v25  ;;  %v9530_v29 = vpop.f32.mrf.mxu1 }
 0x7ca   :  { %6311 = vrcp.f32 %v4490_v46  ;;  %10546 = vst [vmem:[#allocation64_spill] sm:$0xff] %v9530_v29  ;;  %vm4559_vm2 = vweird.f32 %v4490_v46 }
 0x7cb   :  { %v3975_v32 = vadd.f32 %v9185_v33, %v3806_v22  ;;  %v10547_v33 = vld [vmem:[#allocation39_spill] sm:$0xff]  ;;  %v4565_v22 = vand.u32 2147483648, %v4490_v46 }
 0x7cd   :  { %v4144_v20 = vadd.f32 %v9196_v26, %v3975_v32  ;;  %v9535_v26 = vpop.f32.mrf.mxu2 }
 0x7ce   :  { %v3638_v36 = vpop.f32.mrf.mxu3  ;;  %10548 = vst [vmem:[#allocation60_spill] sm:$0xff] %v9535_v26 }
 0x7cf   :  { %v6310_v62 = vpop.eup %6309  ;;  %v6097_v4 = vmul.f32 -1.442695, %v4144_v20  ;;  %v3639_v47 = vadd.f32 %v9493_v63, %v3638_v36  ;;  %v4563_v20 = vand.u32 2147483647, %v4490_v46 }
 0x7d0   :  { %v6312_v16 = vpop.eup %6311  ;;  %v4491_v39 = vadd.f32 1.0, %v6310_v62 }
 0x7d1   :  { %v4555_v48 = vmul.f32 %v6312_v16, %v4490_v46  ;;  %6313 = vpow2.f32 %v6097_v4  ;;  %v3808_v6 = vadd.f32 %v10545_v17, %v3639_v47  ;;  %vm4560_vm1 = vweird.f32 %v6312_v16 }
 0x7d2   :  { %6315 = vrcp.f32 %v4491_v39  ;;  %vm4561_vm3 = vmor %vm4559_vm2, %vm4560_vm1  ;;  %vm4564_vm4 = vcmp.eq.f32.partialorder %v4563_v20, 8.507059e+37  ;;  %v4580_v29 = vand.u32 2147483648, %v4491_v39  ;;  %vm4574_vm6 = vweird.f32 %v4491_v39 }
 0x7d3   :  { %v4556_v25 = vsub.f32 1.0, %v4555_v48  ;;  %v3977_v51 = vadd.f32 %v9198_v56, %v3808_v6  ;;  %3680 = vmatmul.bf16.gmra.mxu3 %v10547_v33  ;;  %4098 = vmatmul.bf16.gmra.mxu1 %v9401_v55  ;;  %v4566_v55 = vor.u32 1.1754944e-38, %v4565_v22 }
 0x7d4   :  { %4267 = vmatmul.bf16.gmra.mxu2 %v9076_v2 }
 0x7d5   :  { %v4557_v32 = vmul.f32 %v6312_v16, %v4556_v25  ;;  %v4146_v36 = vadd.f32 %v9205_v7, %v3977_v51  ;;  %v10549_v7 = vld [vmem:[#allocation21_spill] sm:$0xff]  ;;  %v9544_v22 = vpop.f32.mrf.mxu2 }
 0x7d6   :  { %v3641_v62 = vpop.f32.mrf.mxu3 }
 0x7d7   :  { %v6314_v4 = vpop.eup %6313  ;;  %v4558_v47 = vadd.f32 %v6312_v16, %v4557_v32  ;;  %v6098_v48 = vmul.f32 -1.442695, %v4146_v36  ;;  %v3642_v56 = vadd.f32 %v9493_v63, %v3641_v62  ;;  %v9541_v32 = vpop.f32.mrf.mxu1  ;;  %v4578_v36 = vand.u32 2147483647, %v4491_v39 }
 0x7d8   :  { %v6316_v17 = vpop.eup %6315  ;;  %v4492_v6 = vadd.f32 1.0, %v6314_v4 }
 0x7d9   :  { %v4562_v33 = vsel %vm4561_vm3, %v6312_v16, %v4558_v47  ;;  %v4570_v26 = vmul.f32 %v6316_v17, %v4491_v39  ;;  %6317 = vpow2.f32 %v6098_v48  ;;  %v3811_v51 = vadd.f32 %v10549_v7, %v3642_v56  ;;  %v10551_v39 = vld [vmem:[#allocation43_spill] sm:$0xff] }
 0x7da   :  { %v4567_v2 = vsel %vm4564_vm4, %v4566_v55, %v4562_v33  ;;  %6319 = vrcp.f32 %v4492_v6  ;;  %vm4575_vm5 = vweird.f32 %v6316_v17  ;;  %v4581_v56 = vor.u32 1.1754944e-38, %v4580_v29 }
 0x7db   :  { %5514 = vst [vmem:[#allocation11] sm:$0xff] %v4567_v2  ;;  %v4571_v25 = vsub.f32 1.0, %v4570_v26  ;;  %v3980_v62 = vadd.f32 %v9207_v12, %v3811_v51  ;;  %vm4576_vm7 = vmor %vm4574_vm6, %vm4575_vm5  ;;  %vm4579_vm8 = vcmp.eq.f32.partialorder %v4578_v36, 8.507059e+37  ;;  %v10550_v51 = vld [vmem:[#allocation81_spill] sm:$0xff]  ;;  %vm4589_vm10 = vweird.f32 %v4492_v6 }
 0x7dd   :  { %v4572_v46 = vmul.f32 %v6316_v17, %v4571_v25  ;;  %v4149_v47 = vadd.f32 %v9219_v40, %v3980_v62  ;;  %v4595_v40 = vand.u32 2147483648, %v4492_v6 }
 0x7de   :  { %v3643_v16 = vpop.f32.mrf.mxu3 }
 0x7df   :  { %v6318_v20 = vpop.eup %6317  ;;  %v4573_v4 = vadd.f32 %v6316_v17, %v4572_v46  ;;  %v3644_v26 = vadd.f32 %v9493_v63, %v3643_v16  ;;  %v6099_v25 = vmul.f32 -1.442695, %v4149_v47  ;;  %v9553_v16 = vpop.f32.mrf.mxu1 }
 0x7e0   :  { %v6320_v48 = vpop.eup %6319  ;;  %v4493_v55 = vadd.f32 1.0, %v6318_v20 }
 0x7e1   :  { %v4577_v33 = vsel %vm4576_vm7, %v6316_v17, %v4573_v4  ;;  %v4585_v2 = vmul.f32 %v6320_v48, %v4492_v6  ;;  %v3813_v46 = vadd.f32 %v10550_v51, %v3644_v26  ;;  %vm4590_vm9 = vweird.f32 %v6320_v48 }
 0x7e2   :  { %v4582_v7 = vsel %vm4579_vm8, %v4581_v56, %v4577_v33  ;;  %6321 = vrcp.f32 %v4493_v55  ;;  %v4593_v17 = vand.u32 2147483647, %v4492_v6  ;;  %v9557_v56 = vpop.f32.mrf.mxu2  ;;  %vm4591_vm11 = vmor %vm4589_vm10, %vm4590_vm9  ;;  %vm4604_vm14 = vweird.f32 %v4493_v55 }
 0x7e3   :  { %5515 = vst [vmem:[#allocation11 + $0x8] sm:$0xff] %v4582_v7  ;;  %v4586_v12 = vsub.f32 1.0, %v4585_v2  ;;  %6323 = vpow2.f32 %v6099_v25  ;;  %3685 = vmatmul.bf16.gmra.mxu3 %v10551_v39  ;;  %4103 = vmatmul.bf16.gmra.mxu1 %v9419_v24  ;;  %v3982_v36 = vadd.f32 %v9221_v37, %v3813_v46  ;;  %v4596_v24 = vor.u32 1.1754944e-38, %v4595_v40 }
 0x7e4   :  { %4272 = vmatmul.bf16.gmra.mxu2 %v9094_v50  ;;  %vm4594_vm12 = vcmp.eq.f32.partialorder %v4593_v17, 8.507059e+37  ;;  %v4608_v39 = vand.u32 2147483647, %v4493_v55 }
 0x7e5   :  { %v4587_v29 = vmul.f32 %v6320_v48, %v4586_v12  ;;  %v4151_v4 = vadd.f32 %v9228_v19, %v3982_v36  ;;  %v10552_v12 = vld [vmem:[#allocation53_spill] sm:$0xff]  ;;  %v4610_v19 = vand.u32 2147483648, %v4493_v55 }
 0x7e6   :  { %v3646_v62 = vpop.f32.mrf.mxu3  ;;  %vm4609_vm0 = vcmp.eq.f32.partialorder %v4608_v39, 8.507059e+37 }
 0x7e7   :  { %v4588_v20 = vadd.f32 %v6320_v48, %v4587_v29  ;;  %v3647_v47 = vadd.f32 %v9493_v63, %v3646_v62  ;;  %v6100_v25 = vmul.f32 -1.442695, %v4151_v4  ;;  %v4611_v62 = vor.u32 1.1754944e-38, %v4610_v19  ;;  %v9563_v4 = vpop.f32.mrf.mxu1 }
 0x7e8   :  { %v6322_v26 = vpop.eup %6321 }
 0x7e9   :  { %v6324_v50 = vpop.eup %6323  ;;  %v4592_v33 = vsel %vm4591_vm11, %v6320_v48, %v4588_v20  ;;  %v4600_v2 = vmul.f32 %v6322_v26, %v4493_v55  ;;  %v3816_v51 = vadd.f32 %v10552_v12, %v3647_v47  ;;  %6325 = vpow2.f32 %v6100_v25  ;;  %v10554_v12 = vld [vmem:[#allocation47_spill] sm:$0xff] }
 0x7ea   :  { %v4597_v37 = vsel %vm4594_vm12, %v4596_v24, %v4592_v33  ;;  %v4494_v7 = vadd.f32 1.0, %v6324_v50  ;;  %vm4605_vm13 = vweird.f32 %v6322_v26  ;;  %v10553_v50 = vld [vmem:[#allocation110_spill] sm:$0xff]  ;;  %v9566_v25 = vpop.f32.mrf.mxu2 }
 0x7eb   :  { %5516 = vst [vmem:[#allocation11 + $0x10] sm:$0xff] %v4597_v37  ;;  %v4601_v6 = vsub.f32 1.0, %v4600_v2  ;;  %v3985_v29 = vadd.f32 %v9230_v3, %v3816_v51  ;;  %vm4606_vm15 = vmor %vm4604_vm14, %vm4605_vm13 }
 0x7ec   :  { %6327 = vrcp.f32 %v4494_v7  ;;  %v4623_v19 = vand.u32 2147483647, %v4494_v7  ;;  %vm4619_vm2 = vweird.f32 %v4494_v7 }
 0x7ed   :  { %v4602_v46 = vmul.f32 %v6322_v26, %v4601_v6  ;;  %v4154_v48 = vadd.f32 %v9241_v5, %v3985_v29 }
 0x7ee   :  { %v3648_v40 = vpop.f32.mrf.mxu3  ;;  %vm4624_vm4 = vcmp.eq.f32.partialorder %v4623_v19, 8.507059e+37 }
 0x7ef   :  { %v4603_v36 = vadd.f32 %v6322_v26, %v4602_v46  ;;  %v3649_v17 = vadd.f32 %v9493_v63, %v3648_v40  ;;  %v6326_v20 = vpop.eup %6325  ;;  %v6101_v24 = vmul.f32 -1.442695, %v4154_v48  ;;  %v4625_v46 = vand.u32 2147483648, %v4494_v7 }
 0x7f0   :  { %v4495_v37 = vadd.f32 1.0, %v6326_v20 }
 0x7f1   :  { %v4607_v47 = vsel %vm4606_vm15, %v6322_v26, %v4603_v36  ;;  %v3818_v33 = vadd.f32 %v10553_v50, %v3649_v17  ;;  %6329 = vpow2.f32 %v6101_v24  ;;  %v10555_v26 = vld [vmem:[#allocation85_spill] sm:$0xff]  ;;  %v10556_v17 = vld [vmem:[#allocation23_spill] sm:$0xff]  ;;  %v4626_v20 = vor.u32 1.1754944e-38, %v4625_v46  ;;  %v9575_v24 = vpop.f32.mrf.mxu1 }
 0x7f2   :  { %v6328_v2 = vpop.eup %6327  ;;  %v4612_v3 = vsel %vm4609_vm0, %v4611_v62, %v4607_v47  ;;  %6331 = vrcp.f32 %v4495_v37  ;;  %vm4634_vm6 = vweird.f32 %v4495_v37 }
 0x7f3   :  { %5517 = vst [vmem:[#allocation11 + $0x18] sm:$0xff] %v4612_v3  ;;  %v4615_v55 = vmul.f32 %v6328_v2, %v4494_v7  ;;  %v3987_v5 = vadd.f32 %v9243_v53, %v3818_v33  ;;  %3690 = vmatmul.bf16.gmra.mxu3 %v10554_v12  ;;  %4108 = vmatmul.bf16.gmra.mxu1 %v9441_v23  ;;  %vm4620_vm1 = vweird.f32 %v6328_v2  ;;  %v9578_v3 = vpop.f32.mrf.mxu2  ;;  %v4638_v12 = vand.u32 2147483647, %v4495_v37 }
 0x7f4   :  { %4277 = vmatmul.bf16.gmra.mxu2 %v10555_v26  ;;  %vm4621_vm3 = vmor %vm4619_vm2, %vm4620_vm1  ;;  %v4640_v26 = vand.u32 2147483648, %v4495_v37 }
 0x7f5   :  { %v4616_v51 = vsub.f32 1.0, %v4615_v55  ;;  %v4156_v6 = vadd.f32 %v9250_v54, %v3987_v5  ;;  %vm4639_vm8 = vcmp.eq.f32.partialorder %v4638_v12, 8.507059e+37 }
 0x7f6   :  { %v3651_v39 = vpop.f32.mrf.mxu3 }
 0x7f7   :  { %v4617_v29 = vmul.f32 %v6328_v2, %v4616_v51  ;;  %v6102_v40 = vmul.f32 -1.442695, %v4156_v6  ;;  %v3652_v36 = vadd.f32 %v9493_v63, %v3651_v39  ;;  %v6330_v48 = vpop.eup %6329 }
 0x7f8   :  { %v6332_v62 = vpop.eup %6331  ;;  %v4496_v47 = vadd.f32 1.0, %v6330_v48 }
 0x7f9   :  { %v4618_v53 = vadd.f32 %v6328_v2, %v4617_v29  ;;  %6333 = vpow2.f32 %v6102_v40  ;;  %v3821_v23 = vadd.f32 %v10556_v17, %v3652_v36  ;;  %v4630_v50 = vmul.f32 %v6332_v62, %v4495_v37  ;;  %v10557_v17 = vld [vmem:[#allocation20_spill] sm:$0xff]  ;;  %v9590_v37 = vpop.f32.mrf.mxu1 }
 0x7fa   :  { %6335 = vrcp.f32 %v4496_v47  ;;  %vm4635_vm5 = vweird.f32 %v6332_v62  ;;  %v4641_v36 = vor.u32 1.1754944e-38, %v4640_v26  ;;  %vm4649_vm10 = vweird.f32 %v4496_v47 }
 0x7fb   :  { %v4622_v54 = vsel %vm4621_vm3, %v6328_v2, %v4618_v53  ;;  %v3990_v33 = vadd.f32 %v9252_v31, %v3821_v23  ;;  %v4631_v7 = vsub.f32 1.0, %v4630_v50  ;;  %vm4636_vm7 = vmor %vm4634_vm6, %vm4635_vm5  ;;  %v4655_v50 = vand.u32 2147483648, %v4496_v47 }
 0x7fc   :  { %v4627_v55 = vsel %vm4624_vm4, %v4626_v20, %v4622_v54  ;;  %v9593_v54 = vpop.f32.mrf.mxu2 }
 0x7fd   :  { %5518 = vst [vmem:[#allocation11 + $0x20] sm:$0xff] %v4627_v55  ;;  %v4159_v5 = vadd.f32 %v9263_v58, %v3990_v33  ;;  %v4632_v46 = vmul.f32 %v6332_v62, %v4631_v7 }
 0x7fe   :  { %v3653_v51 = vpop.f32.mrf.mxu3 }
 0x7ff   :  { %v6334_v6 = vpop.eup %6333  ;;  %v6103_v39 = vmul.f32 -1.442695, %v4159_v5  ;;  %v3654_v2 = vadd.f32 %v9493_v63, %v3653_v51  ;;  %v4633_v31 = vadd.f32 %v6332_v62, %v4632_v46 }
 0x800   :  { %v9582_v19 = vadd.f32 1.0, %v6334_v6  ;;  %v6336_v40 = vpop.eup %6335 }
 0x801   :  { %6337 = vpow2.f32 %v6103_v39  ;;  %v3823_v29 = vadd.f32 %v9118_v21, %v3654_v2  ;;  %v4637_v58 = vsel %vm4636_vm7, %v6332_v62, %v4633_v31  ;;  %v4645_v48 = vmul.f32 %v6336_v40, %v4496_v47 }
 0x802   :  { %6339 = vrcp.f32 %v9582_v19  ;;  %v4642_v23 = vsel %vm4639_vm8, %v4641_v36, %v4637_v58  ;;  %v4653_v62 = vand.u32 2147483647, %v4496_v47  ;;  %vm4650_vm9 = vweird.f32 %v6336_v40 }
 0x803   :  { %v3992_v53 = vadd.f32 %v9265_v1, %v3823_v29  ;;  %3695 = vmatmul.bf16.gmra.mxu3 %v10557_v17  ;;  %4113 = vmatmul.bf16.gmra.mxu1 %v9457_v35  ;;  %5519 = vst [vmem:[#allocation11 + $0x28] sm:$0xff] %v4642_v23  ;;  %v4646_v21 = vsub.f32 1.0, %v4645_v48  ;;  %vm4651_vm11 = vmor %vm4649_vm10, %vm4650_vm9  ;;  %v4670_v2 = vand.u32 2147483648, %v9582_v19  ;;  %v4668_v29 = vand.u32 2147483647, %v9582_v19  ;;  %v9601_v48 = vpop.f32.mrf.mxu1 }
 0x804   :  { %4282 = vmatmul.bf16.gmra.mxu2 %v9133_v52  ;;  %vm4654_vm12 = vcmp.eq.f32.partialorder %v4653_v62, 8.507059e+37  ;;  %vm4664_vm14 = vweird.f32 %v9582_v19  ;;  %v9606_v23 = vpop.f32.mrf.mxu2 }
 0x805   :  { %v4161_v20 = vadd.f32 %v9270_v61, %v3992_v53  ;;  %v4647_v1 = vmul.f32 %v6336_v40, %v4646_v21  ;;  %v4656_v61 = vor.u32 1.1754944e-38, %v4655_v50  ;;  %v4671_v21 = vor.u32 1.1754944e-38, %v4670_v2 }
 0x806   :  { %v3656_v33 = vpop.f32.mrf.mxu3  ;;  %vm4669_vm0 = vcmp.eq.f32.partialorder %v4668_v29, 8.507059e+37 }
 0x807   :  { %v6338_v55 = vpop.eup %6337  ;;  %v6104_v7 = vmul.f32 -1.442695, %v4161_v20  ;;  %v3657_v35 = vadd.f32 %v9493_v63, %v3656_v33  ;;  %v4648_v52 = vadd.f32 %v6336_v40, %v4647_v1 }
 0x808   :  { %v6340_v5 = vpop.eup %6339  ;;  %v4498_v12 = vadd.f32 1.0, %v6338_v55 }
 0x809   :  { %v4660_v26 = vmul.f32 %v6340_v5, %v9582_v19  ;;  %6341 = vpow2.f32 %v6104_v7  ;;  %v4652_v51 = vsel %vm4651_vm11, %v6336_v40, %v4648_v52  ;;  %v3826_v46 = vadd.f32 %v9125_v0, %v3657_v35  ;;  %v10559_v7 = vld [vmem:[#allocation63_spill] sm:$0xff]  ;;  %v10560_v52 = vld [vmem:[#allocation70_spill] sm:$0xff] }
 0x80a   :  { %6343 = vrcp.f32 %v4498_v12  ;;  %v4657_v39 = vsel %vm4654_vm12, %v4656_v61, %v4652_v51  ;;  %vm4665_vm13 = vweird.f32 %v6340_v5  ;;  %v4685_v1 = vand.u32 2147483648, %v4498_v12 }
 0x80b   :  { %v4661_v6 = vsub.f32 1.0, %v4660_v26  ;;  %5520 = vst [vmem:[#allocation11 + $0x30] sm:$0xff] %v4657_v39  ;;  %v3995_v47 = vadd.f32 %v9275_v57, %v3826_v46  ;;  %vm4666_vm15 = vmor %vm4664_vm14, %vm4665_vm13  ;;  %vm4679_vm2 = vweird.f32 %v4498_v12 }
 0x80c   :  { %v4686_v39 = vor.u32 1.1754944e-38, %v4685_v1 }
 0x80d   :  { %v4662_v31 = vmul.f32 %v6340_v5, %v4661_v6  ;;  %v4164_v40 = vadd.f32 %v9283_v42, %v3995_v47  ;;  %v10558_v42 = vld [vmem:[#allocation59_spill] sm:$0xff] }
 0x80e   :  { %v3658_v36 = vpop.f32.mrf.mxu3 }
 0x80f   :  { %v6342_v58 = vpop.eup %6341  ;;  %v4663_v53 = vadd.f32 %v6340_v5, %v4662_v31  ;;  %v3659_v0 = vadd.f32 %v9493_v63, %v3658_v36  ;;  %v6105_v50 = vmul.f32 -1.442695, %v4164_v40  ;;  %v9617_v36 = vpop.f32.mrf.mxu2  ;;  %v10561_v40 = vld [vmem:[#allocation84_spill] sm:$0xff] }
 0x810   :  { %v6344_v17 = vpop.eup %6343  ;;  %v4499_v20 = vadd.f32 1.0, %v6342_v58 }
 0x811   :  { %v4667_v62 = vsel %vm4666_vm15, %v6340_v5, %v4663_v53  ;;  %v4675_v57 = vmul.f32 %v6344_v17, %v4498_v12  ;;  %v3828_v19 = vadd.f32 %v9140_v49, %v3659_v0  ;;  %vm4680_vm1 = vweird.f32 %v6344_v17 }
 0x812   :  { %v4672_v33 = vsel %vm4669_vm0, %v4671_v21, %v4667_v62  ;;  %6345 = vrcp.f32 %v4499_v20  ;;  %v4683_v5 = vand.u32 2147483647, %v4498_v12  ;;  %vm4681_vm3 = vmor %vm4679_vm2, %vm4680_vm1  ;;  %v4700_v0 = vand.u32 2147483648, %v4499_v20 }
 0x813   :  { %5521 = vst [vmem:[#allocation11 + $0x38] sm:$0xff] %v4672_v33  ;;  %v4676_v55 = vsub.f32 1.0, %v4675_v57  ;;  %6347 = vpow2.f32 %v6105_v50  ;;  %3700 = vmatmul.bf16.gmra.mxu3 %v10558_v42  ;;  %4118 = vmatmul.bf16.gmra.mxu1 %v9479_v13  ;;  %v3997_v26 = vadd.f32 %v10560_v52, %v3828_v19  ;;  %v9615_v13 = vpop.f32.mrf.mxu1  ;;  %v4698_v62 = vand.u32 2147483647, %v4499_v20  ;;  %v10562_v57 = vld [vmem:[#allocation96_spill] sm:$0xff] }
 0x814   :  { %4287 = vmatmul.bf16.gmra.mxu2 %v10559_v7  ;;  %vm4684_vm4 = vcmp.eq.f32.partialorder %v4683_v5, 8.507059e+37  ;;  %vm4694_vm6 = vweird.f32 %v4499_v20  ;;  %v4701_v42 = vor.u32 1.1754944e-38, %v4700_v0  ;;  %v10563_v5 = vld [vmem:[#allocation61_spill] sm:$0xff] }
 0x815   :  { %v4677_v35 = vmul.f32 %v6344_v17, %v4676_v55  ;;  %v4166_v6 = vadd.f32 %v9292_v38, %v3997_v26  ;;  %vm4699_vm8 = vcmp.eq.f32.partialorder %v4698_v62, 8.507059e+37 }
 0x816   :  { %v3661_v61 = vpop.f32.mrf.mxu3 }
 0x817   :  { %v4678_v51 = vadd.f32 %v6344_v17, %v4677_v35  ;;  %v3662_v46 = vadd.f32 %v9493_v63, %v3661_v61  ;;  %v6106_v47 = vmul.f32 -1.442695, %v4166_v6 }
 0x818   :  { %v6346_v49 = vpop.eup %6345 }
 0x819   :  { %v6348_v2 = vpop.eup %6347  ;;  %v4682_v31 = vsel %vm4681_vm3, %v6344_v17, %v4678_v51  ;;  %v4690_v29 = vmul.f32 %v6346_v49, %v4499_v20  ;;  %v3831_v12 = vadd.f32 %v10561_v40, %v3662_v46  ;;  %6349 = vpow2.f32 %v6106_v47  ;;  %v10564_v20 = vld [vmem:[#allocation83_spill] sm:$0xff] }
 0x81a   :  { %v4687_v58 = vsel %vm4684_vm4, %v4686_v39, %v4682_v31  ;;  %v4500_v53 = vadd.f32 1.0, %v6348_v2  ;;  %vm4695_vm5 = vweird.f32 %v6346_v49  ;;  %v9629_v39 = vpop.f32.mrf.mxu2  ;;  %v10566_v31 = vld [vmem:[#allocation129_spill] sm:$0xff] }
 0x81b   :  { %5522 = vst [vmem:[#allocation11 + $0x40] sm:$0xff] %v4687_v58  ;;  %v4691_v38 = vsub.f32 1.0, %v4690_v29  ;;  %v4000_v50 = vadd.f32 %v10562_v57, %v3831_v12  ;;  %vm4696_vm7 = vmor %vm4694_vm6, %vm4695_vm5  ;;  %v9624_v6 = vpop.f32.mrf.mxu1 }
 0x81c   :  { %6351 = vrcp.f32 %v4500_v53  ;;  %v4713_v47 = vand.u32 2147483647, %v4500_v53  ;;  %v4715_v58 = vand.u32 2147483648, %v4500_v53  ;;  %vm4709_vm10 = vweird.f32 %v4500_v53 }
 0x81d   :  { %v4692_v21 = vmul.f32 %v6346_v49, %v4691_v38  ;;  %v4169_v55 = vadd.f32 %v9305_v18, %v4000_v50 }
 0x81e   :  { %v3663_v17 = vpop.f32.mrf.mxu3  ;;  %v4716_v50 = vor.u32 1.1754944e-38, %v4715_v58  ;;  %vm4714_vm12 = vcmp.eq.f32.partialorder %v4713_v47, 8.507059e+37  ;;  %v10569_v47 = vld [vmem:[#allocation99_spill] sm:$0xff] }
 0x81f   :  { %v4693_v33 = vadd.f32 %v6346_v49, %v4692_v21  ;;  %v3664_v19 = vadd.f32 %v9493_v63, %v3663_v17  ;;  %v6350_v1 = vpop.eup %6349  ;;  %v6107_v35 = vmul.f32 -1.442695, %v4169_v55 }
 0x820   :  { %v4501_v51 = vadd.f32 1.0, %v6350_v1 }
 0x821   :  { %v4697_v7 = vsel %vm4696_vm7, %v6346_v49, %v4693_v33  ;;  %v3833_v52 = vadd.f32 %v10563_v5, %v3664_v19  ;;  %6353 = vpow2.f32 %v6107_v35  ;;  %v10565_v49 = vld [vmem:[#allocation89_spill] sm:$0xff] }
 0x822   :  { %v6352_v26 = vpop.eup %6351  ;;  %v4702_v61 = vsel %vm4699_vm8, %v4701_v42, %v4697_v7  ;;  %6355 = vrcp.f32 %v4501_v51  ;;  %v4728_v35 = vand.u32 2147483647, %v4501_v51  ;;  %vm4724_vm14 = vweird.f32 %v4501_v51 }
 0x823   :  { %5523 = vst [vmem:[#allocation11 + $0x48] sm:$0xff] %v4702_v61  ;;  %v4705_v46 = vmul.f32 %v6352_v26, %v4500_v53  ;;  %v4002_v18 = vadd.f32 %v9311_v41, %v3833_v52  ;;  %3705 = vmatmul.bf16.gmra.mxu3 %v10564_v20  ;;  %4123 = vmatmul.bf16.gmra.mxu1 %v9501_v44  ;;  %vm4710_vm9 = vweird.f32 %v6352_v26  ;;  %v10567_v44 = vld [vmem:[#allocation86_spill] sm:$0xff]  ;;  %v4730_v53 = vand.u32 2147483648, %v4501_v51 }
 0x824   :  { %4292 = vmatmul.bf16.gmra.mxu2 %v10565_v49  ;;  %vm4711_vm11 = vmor %vm4709_vm10, %vm4710_vm9  ;;  %vm4729_vm0 = vcmp.eq.f32.partialorder %v4728_v35, 8.507059e+37 }
 0x825   :  { %v4706_v2 = vsub.f32 1.0, %v4705_v46  ;;  %v4171_v29 = vadd.f32 %v10566_v31, %v4002_v18  ;;  %v4731_v31 = vor.u32 1.1754944e-38, %v4730_v53 }
 0x826   :  { %v3666_v40 = vpop.f32.mrf.mxu3 }
 0x827   :  { %v4707_v12 = vmul.f32 %v6352_v26, %v4706_v2  ;;  %v6108_v38 = vmul.f32 -1.442695, %v4171_v29  ;;  %v3667_v41 = vadd.f32 %v9493_v63, %v3666_v40  ;;  %v6354_v0 = vpop.eup %6353  ;;  %v10570_v40 = vld [vmem:[#allocation57_spill] sm:$0xff] }
 0x828   :  { %v6356_v57 = vpop.eup %6355  ;;  %v4502_v17 = vadd.f32 1.0, %v6354_v0 }
 0x829   :  { %v4708_v21 = vadd.f32 %v6352_v26, %v4707_v12  ;;  %6357 = vpow2.f32 %v6108_v38  ;;  %v3836_v62 = vadd.f32 %v10567_v44, %v3667_v41  ;;  %v4720_v55 = vmul.f32 %v6356_v57, %v4501_v51  ;;  %v10571_v41 = vld [vmem:[#allocation130_spill] sm:$0xff] }
 0x82a   :  { %6359 = vrcp.f32 %v4502_v17  ;;  %vm4725_vm13 = vweird.f32 %v6356_v57  ;;  %v4743_v51 = vand.u32 2147483647, %v4502_v17  ;;  %vm4739_vm2 = vweird.f32 %v4502_v17 }
 0x82b   :  { %v4712_v33 = vsel %vm4711_vm11, %v6352_v26, %v4708_v21  ;;  %v4005_v19 = vadd.f32 %v9325_v27, %v3836_v62  ;;  %v4721_v1 = vsub.f32 1.0, %v4720_v55  ;;  %v10568_v27 = vld [vmem:[#allocation90_spill] sm:$0xff]  ;;  %vm4726_vm15 = vmor %vm4724_vm14, %vm4725_vm13  ;;  %v4745_v21 = vand.u32 2147483648, %v4502_v17 }
 0x82c   :  { %v4717_v42 = vsel %vm4714_vm12, %v4716_v50, %v4712_v33  ;;  %vm4744_vm4 = vcmp.eq.f32.partialorder %v4743_v51, 8.507059e+37 }
 0x82d   :  { %5524 = vst [vmem:[#allocation11 + $0x50] sm:$0xff] %v4717_v42  ;;  %v4174_v7 = vadd.f32 %v9327_v45, %v4005_v19  ;;  %v4722_v61 = vmul.f32 %v6356_v57, %v4721_v1 }
 0x82e   :  { %v3668_v5 = vpop.f32.mrf.mxu3 }
 0x82f   :  { %v6358_v52 = vpop.eup %6357  ;;  %v6109_v46 = vmul.f32 -1.442695, %v4174_v7  ;;  %v3669_v18 = vadd.f32 %v9493_v63, %v3668_v5  ;;  %v4723_v20 = vadd.f32 %v6356_v57, %v4722_v61  ;;  %v4746_v7 = vor.u32 1.1754944e-38, %v4745_v21  ;;  %v10572_v5 = vld [vmem:[#allocation65_spill] sm:$0xff] }
 0x830   :  { %v4503_v26 = vadd.f32 1.0, %v6358_v52  ;;  %v6360_v2 = vpop.eup %6359 }
 0x831   :  { %6361 = vpow2.f32 %v6109_v46  ;;  %v3838_v49 = vadd.f32 %v10568_v27, %v3669_v18  ;;  %v4727_v45 = vsel %vm4726_vm15, %v6356_v57, %v4723_v20  ;;  %v4735_v29 = vmul.f32 %v6360_v2, %v4502_v17  ;;  %v10573_v27 = vld [vmem:[#allocation103_spill] sm:$0xff] }
 0x832   :  { %6363 = vrcp.f32 %v4503_v26  ;;  %v4732_v12 = vsel %vm4729_vm0, %v4731_v31, %v4727_v45  ;;  %vm4740_vm1 = vweird.f32 %v6360_v2  ;;  %v4760_v46 = vand.u32 2147483648, %v4503_v26 }
 0x833   :  { %v4007_v58 = vadd.f32 %v10569_v47, %v3838_v49  ;;  %3710 = vmatmul.bf16.gmra.mxu3 %v10570_v40  ;;  %5525 = vst [vmem:[#allocation11 + $0x58] sm:$0xff] %v4732_v12  ;;  %v4736_v38 = vsub.f32 1.0, %v4735_v29  ;;  %vm4741_vm3 = vmor %vm4739_vm2, %vm4740_vm1  ;;  %v4758_v20 = vand.u32 2147483647, %v4503_v26  ;;  %vm4754_vm6 = vweird.f32 %v4503_v26  ;;  %v10574_v29 = vld [vmem:[#allocation77_spill] sm:$0xff] }
 0x834   :  { %v4761_v40 = vor.u32 1.1754944e-38, %v4760_v46 }
 0x835   :  { %v4176_v0 = vadd.f32 %v10571_v41, %v4007_v58  ;;  %v4737_v50 = vmul.f32 %v6360_v2, %v4736_v38  ;;  %vm4759_vm8 = vcmp.eq.f32.partialorder %v4758_v20, 8.507059e+37 }
 0x836   :  { %v3671_v44 = vpop.f32.mrf.mxu3 }
 0x837   :  { %v6362_v62 = vpop.eup %6361  ;;  %v6110_v33 = vmul.f32 -1.442695, %v4176_v0  ;;  %v3672_v57 = vadd.f32 %v9493_v63, %v3671_v44  ;;  %v4738_v42 = vadd.f32 %v6360_v2, %v4737_v50  ;;  %v10575_v44 = vld [vmem:[#allocation41_spill] sm:$0xff] }
 0x838   :  { %v6364_v55 = vpop.eup %6363  ;;  %v4504_v19 = vadd.f32 1.0, %v6362_v62 }
 0x839   :  { %v4750_v1 = vmul.f32 %v6364_v55, %v4503_v26  ;;  %6365 = vpow2.f32 %v6110_v33  ;;  %v4742_v35 = vsel %vm4741_vm3, %v6360_v2, %v4738_v42  ;;  %v3841_v52 = vadd.f32 %v10572_v5, %v3672_v57  ;;  %v10576_v26 = vld [vmem:[#allocation88_spill] sm:$0xff]  ;;  %v10577_v42 = vld [vmem:[#allocation107_spill] sm:$0xff] }
 0x83a   :  { %6367 = vrcp.f32 %v4504_v19  ;;  %v4747_v61 = vsel %vm4744_vm4, %v4746_v7, %v4742_v35  ;;  %vm4755_vm5 = vweird.f32 %v6364_v55  ;;  %v4775_v50 = vand.u32 2147483648, %v4504_v19 }
 0x83b   :  { %v4751_v53 = vsub.f32 1.0, %v4750_v1  ;;  %5526 = vst [vmem:[#allocation11 + $0x60] sm:$0xff] %v4747_v61  ;;  %v4010_v49 = vadd.f32 %v10573_v27, %v3841_v52  ;;  %vm4756_vm7 = vmor %vm4754_vm6, %vm4755_vm5  ;;  %v4773_v57 = vand.u32 2147483647, %v4504_v19  ;;  %vm4769_vm10 = vweird.f32 %v4504_v19 }
 0x83c   :  { %v4776_v52 = vor.u32 1.1754944e-38, %v4775_v50 }
 0x83d   :  { %v4752_v18 = vmul.f32 %v6364_v55, %v4751_v53  ;;  %v4179_v47 = vadd.f32 %v10574_v29, %v4010_v49  ;;  %vm4774_vm12 = vcmp.eq.f32.partialorder %v4773_v57, 8.507059e+37 }
 0x83e   :  { %v3673_v31 = vpop.f32.mrf.mxu3 }
 0x83f   :  { %v6366_v17 = vpop.eup %6365  ;;  %v4753_v45 = vadd.f32 %v6364_v55, %v4752_v18  ;;  %v3674_v2 = vadd.f32 %v9493_v63, %v3673_v31  ;;  %v6111_v0 = vmul.f32 -1.442695, %v4179_v47  ;;  %v10578_v31 = vld [vmem:[#allocation26_spill] sm:$0xff] }
 0x840   :  { %v6368_v58 = vpop.eup %6367  ;;  %v4505_v12 = vadd.f32 1.0, %v6366_v17 }
 0x841   :  { %v4757_v38 = vsel %vm4756_vm7, %v6364_v55, %v4753_v45  ;;  %v4765_v41 = vmul.f32 %v6368_v58, %v4504_v19  ;;  %v3843_v62 = vadd.f32 %v10575_v44, %v3674_v2  ;;  %vm4770_vm9 = vweird.f32 %v6368_v58 }
 0x842   :  { %v4762_v51 = vsel %vm4759_vm8, %v4761_v40, %v4757_v38  ;;  %6369 = vrcp.f32 %v4505_v12  ;;  %vm4771_vm11 = vmor %vm4769_vm10, %vm4770_vm9  ;;  %v4790_v19 = vand.u32 2147483648, %v4505_v12  ;;  %v4788_v29 = vand.u32 2147483647, %v4505_v12 }
 0x843   :  { %5527 = vst [vmem:[#allocation11 + $0x68] sm:$0xff] %v4762_v51  ;;  %v4766_v21 = vsub.f32 1.0, %v4765_v41  ;;  %6371 = vpow2.f32 %v6111_v0  ;;  %3715 = vmatmul.bf16.gmra.mxu3 %v10576_v26  ;;  %v4012_v1 = vadd.f32 %v10577_v42, %v3843_v62  ;;  %vm4784_vm14 = vweird.f32 %v4505_v12  ;;  %v10580_v62 = vld [vmem:[#allocation92_spill] sm:$0xff] }
 0x844   :  { %v4791_v0 = vor.u32 1.1754944e-38, %v4790_v19  ;;  %vm4789_vm0 = vcmp.eq.f32.partialorder %v4788_v29, 8.507059e+37  ;;  %v10581_v42 = vld [vmem:[#allocation16_spill] sm:$0xff]  ;;  %v10584_v29 = vld [vmem:[#allocation34_spill] sm:$0xff] }
 0x845   :  { %v4767_v33 = vmul.f32 %v6368_v58, %v4766_v21  ;;  %v4181_v35 = vadd.f32 %v9365_v43, %v4012_v1 }
 0x846   :  { %v3676_v7 = vpop.f32.mrf.mxu3 }
 0x847   :  { %v4768_v55 = vadd.f32 %v6368_v58, %v4767_v33  ;;  %v3677_v53 = vadd.f32 %v9493_v63, %v3676_v7  ;;  %v6112_v20 = vmul.f32 -1.442695, %v4181_v35  ;;  %v10582_v7 = vld [vmem:[#allocation87_spill] sm:$0xff] }
 0x848   :  { %v6370_v5 = vpop.eup %6369 }
 0x849   :  { %v6372_v61 = vpop.eup %6371  ;;  %v4772_v46 = vsel %vm4771_vm11, %v6368_v58, %v4768_v55  ;;  %v4780_v18 = vmul.f32 %v6370_v5, %v4505_v12  ;;  %v3846_v17 = vadd.f32 %v10578_v31, %v3677_v53  ;;  %6373 = vpow2.f32 %v6112_v20  ;;  %v10579_v58 = vld [vmem:[#allocation109_spill] sm:$0xff] }
 0x84a   :  { %v4777_v27 = vsel %vm4774_vm12, %v4776_v52, %v4772_v46  ;;  %v4506_v49 = vadd.f32 1.0, %v6372_v61  ;;  %vm4785_vm13 = vweird.f32 %v6370_v5 }
 0x84b   :  { %5528 = vst [vmem:[#allocation11 + $0x70] sm:$0xff] %v4777_v27  ;;  %v4781_v45 = vsub.f32 1.0, %v4780_v18  ;;  %v4015_v47 = vadd.f32 %v9372_v34, %v3846_v17  ;;  %vm4786_vm15 = vmor %vm4784_vm14, %vm4785_vm13  ;;  %v10583_v27 = vld [vmem:[#allocation17_spill] sm:$0xff] }
 0x84c   :  { %6375 = vrcp.f32 %v4506_v49  ;;  %v4803_v35 = vand.u32 2147483647, %v4506_v49  ;;  %v4805_v53 = vand.u32 2147483648, %v4506_v49  ;;  %vm4799_vm2 = vweird.f32 %v4506_v49 }
 0x84d   :  { %v4782_v43 = vmul.f32 %v6370_v5, %v4781_v45  ;;  %v4184_v38 = vadd.f32 %v10579_v58, %v4015_v47 }
 0x84e   :  { %v3678_v2 = vpop.f32.mrf.mxu3  ;;  %v4806_v17 = vor.u32 1.1754944e-38, %v4805_v53  ;;  %vm4804_vm4 = vcmp.eq.f32.partialorder %v4803_v35, 8.507059e+37 }
 0x84f   :  { %v4783_v40 = vadd.f32 %v6370_v5, %v4782_v43  ;;  %v3679_v41 = vadd.f32 %v9493_v63, %v3678_v2  ;;  %v6374_v51 = vpop.eup %6373  ;;  %v6113_v44 = vmul.f32 -1.442695, %v4184_v38 }
 0x850   :  { %v4507_v57 = vadd.f32 1.0, %v6374_v51 }
 0x851   :  { %v4787_v21 = vsel %vm4786_vm15, %v6370_v5, %v4783_v40  ;;  %v3848_v26 = vadd.f32 %v10580_v62, %v3679_v41  ;;  %6377 = vpow2.f32 %v6113_v44 }
 0x852   :  { %v6376_v50 = vpop.eup %6375  ;;  %v4792_v33 = vsel %vm4789_vm0, %v4791_v0, %v4787_v21  ;;  %6379 = vrcp.f32 %v4507_v57  ;;  %v4818_v58 = vand.u32 2147483647, %v4507_v57  ;;  %v9664_v21 = vld [vmem:[#allocation10] ss:$0 sm:$0xff]  ;;  %vm4814_vm6 = vweird.f32 %v4507_v57 }
 0x853   :  { %5529 = vst [vmem:[#allocation11 + $0x78] sm:$0xff] %v4792_v33  ;;  %v4795_v34 = vmul.f32 %v6376_v50, %v4506_v49  ;;  %v4017_v12 = vadd.f32 %v9385_v10, %v3848_v26  ;;  %3720 = vmatmul.bf16.gmra.mxu3 %v10581_v42  ;;  %vm4800_vm1 = vweird.f32 %v6376_v50  ;;  %v4820_v49 = vand.u32 2147483648, %v4507_v57 }
 0x854   :  { %vm4801_vm3 = vmor %vm4799_vm2, %vm4800_vm1  ;;  %vm4819_vm8 = vcmp.eq.f32.partialorder %v4818_v58, 8.507059e+37 }
 0x855   :  { %v4796_v1 = vsub.f32 1.0, %v4795_v34  ;;  %v4186_v55 = vadd.f32 %v10582_v7, %v4017_v12 }
 0x856   :  { %v3681_v5 = vpop.f32.mrf.mxu3 }
 0x857   :  { %v4797_v52 = vmul.f32 %v6376_v50, %v4796_v1  ;;  %v6114_v61 = vmul.f32 -1.442695, %v4186_v55  ;;  %v3682_v46 = vadd.f32 %v9493_v63, %v3681_v5  ;;  %v6378_v18 = vpop.eup %6377  ;;  %v10586_v1 = vld [vmem:[#allocation131_spill] sm:$0xff]  ;;  %v10587_v55 = vld [vmem:[#allocation94_spill] sm:$0xff]  ;;  %v10588_v5 = vld [vmem:[#allocation37_spill] sm:$0xff] }
 0x858   :  { %v6380_v31 = vpop.eup %6379  ;;  %v4508_v45 = vadd.f32 1.0, %v6378_v18 }
 0x859   :  { %v4798_v20 = vadd.f32 %v6376_v50, %v4797_v52  ;;  %6381 = vpow2.f32 %v6114_v61  ;;  %v3851_v10 = vadd.f32 %v10583_v27, %v3682_v46  ;;  %v4810_v43 = vmul.f32 %v6380_v31, %v4507_v57 }
 0x85a   :  { %6383 = vrcp.f32 %v4508_v45  ;;  %vm4815_vm5 = vweird.f32 %v6380_v31  ;;  %v4833_v57 = vand.u32 2147483647, %v4508_v45  ;;  %v4835_v61 = vand.u32 2147483648, %v4508_v45 }
 0x85b   :  { %v4802_v19 = vsel %vm4801_vm3, %v6376_v50, %v4798_v20  ;;  %v4020_v47 = vadd.f32 %v10584_v29, %v3851_v10  ;;  %v4811_v40 = vsub.f32 1.0, %v4810_v43  ;;  %v10585_v50 = vld [vmem:[#allocation45_spill] sm:$0xff]  ;;  %vm4816_vm7 = vmor %vm4814_vm6, %vm4815_vm5  ;;  %vm4829_vm10 = vweird.f32 %v4508_v45 }
 0x85c   :  { %v4807_v2 = vsel %vm4804_vm4, %v4806_v17, %v4802_v19  ;;  %v4836_v29 = vor.u32 1.1754944e-38, %v4835_v61  ;;  %vm4834_vm12 = vcmp.eq.f32.partialorder %v4833_v57, 8.507059e+37 }
 0x85d   :  { %5530 = vst [vmem:[#allocation11 + $0x80] sm:$0xff] %v4807_v2  ;;  %v4189_v63 = vadd.f32 %v9403_v59, %v4020_v47  ;;  %v4812_v0 = vmul.f32 %v6380_v31, %v4811_v40  ;;  %v4821_v59 = vor.u32 1.1754944e-38, %v4820_v49  ;;  %v10589_v40 = vld [vmem:[#allocation67_spill] sm:$0xff] }
 0x85e   :  { %v3683_v38 = vpop.f32.mrf.mxu3 }
 0x85f   :  { %v6382_v41 = vpop.eup %6381  ;;  %v6115_v51 = vmul.f32 -1.442695, %v4189_v63  ;;  %v3684_v44 = vadd.f32 %v9664_v21, %v3683_v38  ;;  %v4813_v26 = vadd.f32 %v6380_v31, %v4812_v0  ;;  %v10590_v0 = vld [vmem:[#allocation40_spill] sm:$0xff] }
 0x860   :  { %v4509_v62 = vadd.f32 1.0, %v6382_v41  ;;  %v6384_v34 = vpop.eup %6383 }
 0x861   :  { %6385 = vpow2.f32 %v6115_v51  ;;  %v3853_v33 = vadd.f32 %v10585_v50, %v3684_v44  ;;  %v4817_v12 = vsel %vm4816_vm7, %v6380_v31, %v4813_v26  ;;  %v4825_v42 = vmul.f32 %v6384_v34, %v4508_v45  ;;  %v10591_v50 = vld [vmem:[#allocation93_spill] sm:$0xff] }
 0x862   :  { %6387 = vrcp.f32 %v4509_v62  ;;  %v4822_v35 = vsel %vm4819_vm8, %v4821_v59, %v4817_v12  ;;  %vm4830_vm9 = vweird.f32 %v6384_v34  ;;  %v4850_v49 = vand.u32 2147483648, %v4509_v62 }
 0x863   :  { %v4022_v7 = vadd.f32 %v10586_v1, %v3853_v33  ;;  %3725 = vmatmul.bf16.gmra.mxu3 %v10587_v55  ;;  %5531 = vst [vmem:[#allocation11 + $0x88] sm:$0xff] %v4822_v35  ;;  %v4826_v53 = vsub.f32 1.0, %v4825_v42  ;;  %vm4831_vm11 = vmor %vm4829_vm10, %vm4830_vm9  ;;  %v4848_v41 = vand.u32 2147483647, %v4509_v62  ;;  %vm4844_vm14 = vweird.f32 %v4509_v62 }
 0x864   :  { %v4851_v12 = vor.u32 1.1754944e-38, %v4850_v49 }
 0x865   :  { %v4191_v52 = vadd.f32 %v10588_v5, %v4022_v7  ;;  %v4827_v20 = vmul.f32 %v6384_v34, %v4826_v53  ;;  %vm4849_vm0 = vcmp.eq.f32.partialorder %v4848_v41, 8.507059e+37  ;;  %v10592_v5 = vld [vmem:[#allocation97_spill] sm:$0xff]  ;;  %v10596_v41 = vld [vmem:[#allocation18_spill] sm:$0xff] }
 0x866   :  { %v3686_v46 = vpop.f32.mrf.mxu3 }
 0x867   :  { %v6386_v18 = vpop.eup %6385  ;;  %v6116_v27 = vmul.f32 -1.442695, %v4191_v52  ;;  %v3687_v10 = vadd.f32 %v9664_v21, %v3686_v46  ;;  %v4828_v19 = vadd.f32 %v6384_v34, %v4827_v20 }
 0x868   :  { %v6388_v31 = vpop.eup %6387  ;;  %v4510_v17 = vadd.f32 1.0, %v6386_v18  ;;  %v10594_v18 = vld [vmem:[#allocation44_spill] sm:$0xff] }
 0x869   :  { %v4840_v43 = vmul.f32 %v6388_v31, %v4509_v62  ;;  %6389 = vpow2.f32 %v6116_v27  ;;  %v4832_v47 = vsel %vm4831_vm11, %v6384_v34, %v4828_v19  ;;  %v3856_v63 = vadd.f32 %v10589_v40, %v3687_v10  ;;  %v10593_v62 = vld [vmem:[#allocation72_spill] sm:$0xff] }
 0x86a   :  { %6391 = vrcp.f32 %v4510_v17  ;;  %v4837_v58 = vsel %vm4834_vm12, %v4836_v29, %v4832_v47  ;;  %vm4845_vm13 = vweird.f32 %v6388_v31  ;;  %v4865_v57 = vand.u32 2147483648, %v4510_v17 }
 0x86b   :  { %v4841_v2 = vsub.f32 1.0, %v4840_v43  ;;  %5532 = vst [vmem:[#allocation11 + $0x90] sm:$0xff] %v4837_v58  ;;  %v4025_v51 = vadd.f32 %v10590_v0, %v3856_v63  ;;  %vm4846_vm15 = vmor %vm4844_vm14, %vm4845_vm13  ;;  %v4863_v46 = vand.u32 2147483647, %v4510_v17  ;;  %vm4859_vm2 = vweird.f32 %v4510_v17 }
 0x86c   :  { %v4866_v47 = vor.u32 1.1754944e-38, %v4865_v57 }
 0x86d   :  { %v4842_v38 = vmul.f32 %v6388_v31, %v4841_v2  ;;  %v4194_v33 = vadd.f32 %v10591_v50, %v4025_v51  ;;  %vm4864_vm4 = vcmp.eq.f32.partialorder %v4863_v46, 8.507059e+37  ;;  %v10600_v46 = vld [vmem:[#allocation74_spill] sm:$0xff] }
 0x86e   :  { %v3688_v44 = vpop.f32.mrf.mxu3 }
 0x86f   :  { %v6390_v45 = vpop.eup %6389  ;;  %v4843_v26 = vadd.f32 %v6388_v31, %v4842_v38  ;;  %v3689_v34 = vadd.f32 %v9664_v21, %v3688_v44  ;;  %v6117_v55 = vmul.f32 -1.442695, %v4194_v33 }
 0x870   :  { %v6392_v59 = vpop.eup %6391  ;;  %v4511_v42 = vadd.f32 1.0, %v6390_v45 }
 0x871   :  { %v4847_v1 = vsel %vm4846_vm15, %v6388_v31, %v4843_v26  ;;  %v4855_v7 = vmul.f32 %v6392_v59, %v4510_v17  ;;  %v3858_v52 = vadd.f32 %v10592_v5, %v3689_v34  ;;  %vm4860_vm1 = vweird.f32 %v6392_v59  ;;  %v10595_v31 = vld [vmem:[#allocation48_spill] sm:$0xff]  ;;  %v10597_v34 = vld [vmem:[#allocation98_spill] sm:$0xff] }
 0x872   :  { %v4852_v35 = vsel %vm4849_vm0, %v4851_v12, %v4847_v1  ;;  %6393 = vrcp.f32 %v4511_v42  ;;  %vm4861_vm3 = vmor %vm4859_vm2, %vm4860_vm1  ;;  %v4880_v17 = vand.u32 2147483648, %v4511_v42  ;;  %v4878_v45 = vand.u32 2147483647, %v4511_v42 }
 0x873   :  { %5533 = vst [vmem:[#allocation11 + $0x98] sm:$0xff] %v4852_v35  ;;  %v4856_v53 = vsub.f32 1.0, %v4855_v7  ;;  %6395 = vpow2.f32 %v6117_v55  ;;  %3730 = vmatmul.bf16.gmra.mxu3 %v10593_v62  ;;  %v4027_v20 = vadd.f32 %v10594_v18, %v3858_v52  ;;  %vm4874_vm6 = vweird.f32 %v4511_v42 }
 0x874   :  { %v4881_v1 = vor.u32 1.1754944e-38, %v4880_v17  ;;  %vm4879_vm8 = vcmp.eq.f32.partialorder %v4878_v45, 8.507059e+37 }
 0x875   :  { %v4857_v61 = vmul.f32 %v6392_v59, %v4856_v53  ;;  %v4196_v19 = vadd.f32 %v10595_v31, %v4027_v20  ;;  %v10598_v53 = vld [vmem:[#allocation100_spill] sm:$0xff] }
 0x876   :  { %v3691_v27 = vpop.f32.mrf.mxu3 }
 0x877   :  { %v4858_v10 = vadd.f32 %v6392_v59, %v4857_v61  ;;  %v3692_v43 = vadd.f32 %v9664_v21, %v3691_v27  ;;  %v6118_v58 = vmul.f32 -1.442695, %v4196_v19  ;;  %v10599_v61 = vld [vmem:[#allocation101_spill] sm:$0xff] }
 0x878   :  { %v6394_v29 = vpop.eup %6393 }
 0x879   :  { %v6396_v2 = vpop.eup %6395  ;;  %v4862_v40 = vsel %vm4861_vm3, %v6392_v59, %v4858_v10  ;;  %v4870_v63 = vmul.f32 %v6394_v29, %v4511_v42  ;;  %v3861_v0 = vadd.f32 %v10596_v41, %v3692_v43  ;;  %6397 = vpow2.f32 %v6118_v58 }
 0x87a   :  { %v4867_v49 = vsel %vm4864_vm4, %v4866_v47, %v4862_v40  ;;  %v4512_v38 = vadd.f32 1.0, %v6396_v2  ;;  %vm4875_vm5 = vweird.f32 %v6394_v29  ;;  %v10601_v40 = vld [vmem:[#allocation19_spill] sm:$0xff] }
 0x87b   :  { %5534 = vst [vmem:[#allocation11 + $0xa0] sm:$0xff] %v4867_v49  ;;  %v4871_v51 = vsub.f32 1.0, %v4870_v63  ;;  %v4030_v26 = vadd.f32 %v9446_v8, %v3861_v0  ;;  %vm4876_vm7 = vmor %vm4874_vm6, %vm4875_vm5 }
 0x87c   :  { %6399 = vrcp.f32 %v4512_v38  ;;  %v4893_v27 = vand.u32 2147483647, %v4512_v38  ;;  %v4895_v10 = vand.u32 2147483648, %v4512_v38  ;;  %vm4889_vm10 = vweird.f32 %v4512_v38 }
 0x87d   :  { %v4872_v44 = vmul.f32 %v6394_v29, %v4871_v51  ;;  %v4199_v59 = vadd.f32 %v10597_v34, %v4030_v26  ;;  %v10602_v51 = vld [vmem:[#allocation52_spill] sm:$0xff] }
 0x87e   :  { %v3693_v50 = vpop.f32.mrf.mxu3  ;;  %v4896_v49 = vor.u32 1.1754944e-38, %v4895_v10  ;;  %vm4894_vm12 = vcmp.eq.f32.partialorder %v4893_v27, 8.507059e+37  ;;  %v10603_v26 = vld [vmem:[#allocation112_spill] sm:$0xff] }
 0x87f   :  { %v4873_v33 = vadd.f32 %v6394_v29, %v4872_v44  ;;  %v3694_v12 = vadd.f32 %v9664_v21, %v3693_v50  ;;  %v6398_v7 = vpop.eup %6397  ;;  %v6119_v35 = vmul.f32 -1.442695, %v4199_v59  ;;  %v10606_v27 = vld [vmem:[#allocation56_spill] sm:$0xff] }
 0x880   :  { %v4513_v57 = vadd.f32 1.0, %v6398_v7 }
 0x881   :  { %v4877_v55 = vsel %vm4876_vm7, %v6394_v29, %v4873_v33  ;;  %v3863_v5 = vadd.f32 %v10598_v53, %v3694_v12  ;;  %6401 = vpow2.f32 %v6119_v35  ;;  %v10604_v53 = vld [vmem:[#allocation102_spill] sm:$0xff] }
 0x882   :  { %v6400_v52 = vpop.eup %6399  ;;  %v4882_v62 = vsel %vm4879_vm8, %v4881_v1, %v4877_v55  ;;  %6403 = vrcp.f32 %v4513_v57  ;;  %v4908_v33 = vand.u32 2147483647, %v4513_v57  ;;  %vm4904_vm14 = vweird.f32 %v4513_v57 }
 0x883   :  { %5535 = vst [vmem:[#allocation11 + $0xa8] sm:$0xff] %v4882_v62  ;;  %v4885_v8 = vmul.f32 %v6400_v52, %v4512_v38  ;;  %v4032_v42 = vadd.f32 %v10599_v61, %v3863_v5  ;;  %3735 = vmatmul.bf16.gmra.mxu3 %v10600_v46  ;;  %vm4890_vm9 = vweird.f32 %v6400_v52  ;;  %v4910_v38 = vand.u32 2147483648, %v4513_v57  ;;  %v10605_v46 = vld [vmem:[#allocation106_spill] sm:$0xff] }
 0x884   :  { %vm4891_vm11 = vmor %vm4889_vm10, %vm4890_vm9  ;;  %vm4909_vm0 = vcmp.eq.f32.partialorder %v4908_v33, 8.507059e+37 }
 0x885   :  { %v4886_v18 = vsub.f32 1.0, %v4885_v8  ;;  %v4201_v20 = vadd.f32 %v9463_v15, %v4032_v42  ;;  %v4911_v62 = vor.u32 1.1754944e-38, %v4910_v38 }
 0x886   :  { %v3696_v31 = vpop.f32.mrf.mxu3 }
 0x887   :  { %v4887_v19 = vmul.f32 %v6400_v52, %v4886_v18  ;;  %v6120_v43 = vmul.f32 -1.442695, %v4201_v20  ;;  %v3697_v29 = vadd.f32 %v9664_v21, %v3696_v31  ;;  %v6402_v47 = vpop.eup %6401 }
 0x888   :  { %v6404_v58 = vpop.eup %6403  ;;  %v4514_v41 = vadd.f32 1.0, %v6402_v47 }
 0x889   :  { %v4888_v2 = vadd.f32 %v6400_v52, %v4887_v19  ;;  %6405 = vpow2.f32 %v6120_v43  ;;  %v3866_v63 = vadd.f32 %v10601_v40, %v3697_v29  ;;  %v4900_v15 = vmul.f32 %v6404_v58, %v4513_v57 }
 0x88a   :  { %6407 = vrcp.f32 %v4514_v41  ;;  %vm4905_vm13 = vweird.f32 %v6404_v58  ;;  %v4923_v57 = vand.u32 2147483647, %v4514_v41  ;;  %v4925_v31 = vand.u32 2147483648, %v4514_v41 }
 0x88b   :  { %v4892_v0 = vsel %vm4891_vm11, %v6400_v52, %v4888_v2  ;;  %v4035_v17 = vadd.f32 %v10602_v51, %v3866_v63  ;;  %v4901_v45 = vsub.f32 1.0, %v4900_v15  ;;  %vm4906_vm15 = vmor %vm4904_vm14, %vm4905_vm13  ;;  %vm4919_vm2 = vweird.f32 %v4514_v41  ;;  %v10607_v51 = vld [vmem:[#allocation105_spill] sm:$0xff] }
 0x88c   :  { %v4897_v44 = vsel %vm4894_vm12, %v4896_v49, %v4892_v0  ;;  %v4926_v49 = vor.u32 1.1754944e-38, %v4925_v31  ;;  %vm4924_vm4 = vcmp.eq.f32.partialorder %v4923_v57, 8.507059e+37 }
 0x88d   :  { %5536 = vst [vmem:[#allocation11 + $0xb0] sm:$0xff] %v4897_v44  ;;  %v4204_v50 = vadd.f32 %v10603_v26, %v4035_v17  ;;  %v4902_v12 = vmul.f32 %v6404_v58, %v4901_v45 }
 0x88e   :  { %v3698_v34 = vpop.f32.mrf.mxu3 }
 0x88f   :  { %v6406_v59 = vpop.eup %6405  ;;  %v6121_v1 = vmul.f32 -1.442695, %v4204_v50  ;;  %v3699_v7 = vadd.f32 %v9664_v21, %v3698_v34  ;;  %v4903_v35 = vadd.f32 %v6404_v58, %v4902_v12 }
 0x890   :  { %v4515_v55 = vadd.f32 1.0, %v6406_v59  ;;  %v6408_v52 = vpop.eup %6407  ;;  %v10608_v59 = vld [vmem:[#allocation24_spill] sm:$0xff] }
 0x891   :  { %6409 = vpow2.f32 %v6121_v1  ;;  %v3868_v5 = vadd.f32 %v10604_v53, %v3699_v7  ;;  %v4907_v8 = vsel %vm4906_vm15, %v6404_v58, %v4903_v35  ;;  %v4915_v61 = vmul.f32 %v6408_v52, %v4514_v41 }
 0x892   :  { %6411 = vrcp.f32 %v4515_v55  ;;  %v4912_v18 = vsel %vm4909_vm0, %v4911_v62, %v4907_v8  ;;  %vm4920_vm1 = vweird.f32 %v6408_v52  ;;  %v4940_v45 = vand.u32 2147483648, %v4515_v55 }
 0x893   :  { %v4037_v42 = vadd.f32 %v9483_v60, %v3868_v5  ;;  %3740 = vmatmul.bf16.gmra.mxu3 %v10605_v46  ;;  %5537 = vst [vmem:[#allocation11 + $0xb8] sm:$0xff] %v4912_v18  ;;  %v4916_v20 = vsub.f32 1.0, %v4915_v61  ;;  %vm4921_vm3 = vmor %vm4919_vm2, %vm4920_vm1  ;;  %v4938_v50 = vand.u32 2147483647, %v4515_v55  ;;  %vm4934_vm6 = vweird.f32 %v4515_v55  ;;  %v10609_v61 = vld [vmem:[#allocation82_spill] sm:$0xff] }
 0x894   :  { %v4941_v35 = vor.u32 1.1754944e-38, %v4940_v45 }
 0x895   :  { %v4206_v10 = vadd.f32 %v10606_v27, %v4037_v42  ;;  %v4917_v29 = vmul.f32 %v6408_v52, %v4916_v20  ;;  %vm4939_vm8 = vcmp.eq.f32.partialorder %v4938_v50, 8.507059e+37 }
 0x896   :  { %v3701_v19 = vpop.f32.mrf.mxu3 }
 0x897   :  { %v6410_v43 = vpop.eup %6409  ;;  %v6122_v47 = vmul.f32 -1.442695, %v4206_v10  ;;  %v3702_v2 = vadd.f32 %v9664_v21, %v3701_v19  ;;  %v4918_v58 = vadd.f32 %v6408_v52, %v4917_v29 }
 0x898   :  { %v6412_v40 = vpop.eup %6411  ;;  %v4516_v63 = vadd.f32 1.0, %v6410_v43 }
 0x899   :  { %v4930_v60 = vmul.f32 %v6412_v40, %v4515_v55  ;;  %6413 = vpow2.f32 %v6122_v47  ;;  %v4922_v0 = vsel %vm4921_vm3, %v6408_v52, %v4918_v58  ;;  %v3871_v17 = vadd.f32 %v10607_v51, %v3702_v2  ;;  %v10610_v55 = vld [vmem:[#allocation111_spill] sm:$0xff] }
 0x89a   :  { %6415 = vrcp.f32 %v4516_v63  ;;  %v4927_v44 = vsel %vm4924_vm4, %v4926_v49, %v4922_v0  ;;  %vm4935_vm5 = vweird.f32 %v6412_v40  ;;  %v4955_v46 = vand.u32 2147483648, %v4516_v63  ;;  %v10611_v0 = vld [vmem:[#allocation32_spill] sm:$0xff] }
 0x89b   :  { %v4931_v15 = vsub.f32 1.0, %v4930_v60  ;;  %5538 = vst [vmem:[#allocation11 + $0xc0] sm:$0xff] %v4927_v44  ;;  %v4040_v33 = vadd.f32 %v9498_v30, %v3871_v17  ;;  %vm4936_vm7 = vmor %vm4934_vm6, %vm4935_vm5  ;;  %v4953_v20 = vand.u32 2147483647, %v4516_v63  ;;  %vm4949_vm10 = vweird.f32 %v4516_v63 }
 0x89c   :  { %v4956_v29 = vor.u32 1.1754944e-38, %v4955_v46 }
 0x89d   :  { %v4932_v26 = vmul.f32 %v6412_v40, %v4931_v15  ;;  %v4209_v12 = vadd.f32 %v10608_v59, %v4040_v33  ;;  %vm4954_vm12 = vcmp.eq.f32.partialorder %v4953_v20, 8.507059e+37  ;;  %v10612_v59 = vld [vmem:[#allocation113_spill] sm:$0xff] }
 0x89e   :  { %v3703_v38 = vpop.f32.mrf.mxu3 }
 0x89f   :  { %v6414_v41 = vpop.eup %6413  ;;  %v4933_v34 = vadd.f32 %v6412_v40, %v4932_v26  ;;  %v3704_v1 = vadd.f32 %v9664_v21, %v3703_v38  ;;  %v6123_v62 = vmul.f32 -1.442695, %v4209_v12 }
 0x8a0   :  { %v6416_v7 = vpop.eup %6415  ;;  %v4517_v53 = vadd.f32 1.0, %v6414_v41 }
 0x8a1   :  { %v4937_v5 = vsel %vm4936_vm7, %v6412_v40, %v4933_v34  ;;  %v4945_v52 = vmul.f32 %v6416_v7, %v4516_v63  ;;  %v3873_v42 = vadd.f32 %v10609_v61, %v3704_v1  ;;  %vm4950_vm9 = vweird.f32 %v6416_v7 }
 0x8a2   :  { %v4942_v8 = vsel %vm4939_vm8, %v4941_v35, %v4937_v5  ;;  %6417 = vrcp.f32 %v4517_v53  ;;  %vm4951_vm11 = vmor %vm4949_vm10, %vm4950_vm9  ;;  %v4970_v63 = vand.u32 2147483648, %v4517_v53  ;;  %v4968_v51 = vand.u32 2147483647, %v4517_v53  ;;  %v10613_v5 = vld [vmem:[#allocation64_spill] sm:$0xff] }
 0x8a3   :  { %5539 = vst [vmem:[#allocation11 + $0xc8] sm:$0xff] %v4942_v8  ;;  %v4946_v30 = vsub.f32 1.0, %v4945_v52  ;;  %6419 = vpow2.f32 %v6123_v62  ;;  %3745 = vmatmul.bf16.gmra.mxu3 %v10610_v55  ;;  %v4042_v27 = vadd.f32 %v9509_v11, %v3873_v42  ;;  %vm4964_vm14 = vweird.f32 %v4517_v53  ;;  %v10614_v52 = vld [vmem:[#allocation22_spill] sm:$0xff]  ;;  %v10615_v62 = vld [vmem:[#allocation60_spill] sm:$0xff] }
 0x8a4   :  { %v4971_v33 = vor.u32 1.1754944e-38, %v4970_v63  ;;  %vm4969_vm0 = vcmp.eq.f32.partialorder %v4968_v51, 8.507059e+37 }
 0x8a5   :  { %v4947_v18 = vmul.f32 %v6416_v7, %v4946_v30  ;;  %v4211_v31 = vadd.f32 %v9512_v9, %v4042_v27 }
 0x8a6   :  { %v3706_v10 = vpop.f32.mrf.mxu3 }
 0x8a7   :  { %v4948_v57 = vadd.f32 %v6416_v7, %v4947_v18  ;;  %v3707_v19 = vadd.f32 %v9664_v21, %v3706_v10  ;;  %v6124_v58 = vmul.f32 -1.442695, %v4211_v31  ;;  %v10616_v10 = vld [vmem:[#allocation35_spill] sm:$0xff] }
 0x8a8   :  { %v6418_v43 = vpop.eup %6417 }
 0x8a9   :  { %v6420_v47 = vpop.eup %6419  ;;  %v4952_v2 = vsel %vm4951_vm11, %v6416_v7, %v4948_v57  ;;  %v4960_v40 = vmul.f32 %v6418_v43, %v4517_v53  ;;  %v3876_v15 = vadd.f32 %v10611_v0, %v3707_v19  ;;  %6421 = vpow2.f32 %v6124_v58 }
 0x8aa   :  { %v4957_v60 = vsel %vm4954_vm12, %v4956_v29, %v4952_v2  ;;  %v4518_v49 = vadd.f32 1.0, %v6420_v47  ;;  %vm4965_vm13 = vweird.f32 %v6418_v43 }
 0x8ab   :  { %5540 = vst [vmem:[#allocation11 + $0xd0] sm:$0xff] %v4957_v60  ;;  %v4961_v11 = vsub.f32 1.0, %v4960_v40  ;;  %v4045_v17 = vadd.f32 %v9521_v14, %v3876_v15  ;;  %vm4966_vm15 = vmor %vm4964_vm14, %vm4965_vm13 }
 0x8ac   :  { %6423 = vrcp.f32 %v4518_v49  ;;  %v4983_v30 = vand.u32 2147483647, %v4518_v49  ;;  %v4985_v61 = vand.u32 2147483648, %v4518_v49  ;;  %vm4979_vm2 = vweird.f32 %v4518_v49 }
 0x8ad   :  { %v4962_v9 = vmul.f32 %v6418_v43, %v4961_v11  ;;  %v4214_v26 = vadd.f32 %v9524_v28, %v4045_v17 }
 0x8ae   :  { %v3708_v44 = vpop.f32.mrf.mxu3  ;;  %v4986_v19 = vor.u32 1.1754944e-38, %v4985_v61  ;;  %vm4984_vm4 = vcmp.eq.f32.partialorder %v4983_v30, 8.507059e+37  ;;  %v9726_v30 = vpop.f32.mrf.mxu0 }
 0x8af   :  { %v4963_v45 = vadd.f32 %v6418_v43, %v4962_v9  ;;  %v3709_v50 = vadd.f32 %v9664_v21, %v3708_v44  ;;  %v6422_v38 = vpop.eup %6421  ;;  %v6125_v34 = vmul.f32 -1.442695, %v4214_v26 }
 0x8b0   :  { %v4519_v35 = vadd.f32 1.0, %v6422_v38 }
 0x8b1   :  { %v4967_v41 = vsel %vm4966_vm15, %v6418_v43, %v4963_v45  ;;  %v3878_v12 = vadd.f32 %v10612_v59, %v3709_v50  ;;  %6425 = vpow2.f32 %v6125_v34 }
 0x8b2   :  { %v6424_v1 = vpop.eup %6423  ;;  %v4972_v7 = vsel %vm4969_vm0, %v4971_v33, %v4967_v41  ;;  %6427 = vrcp.f32 %v4519_v35  ;;  %v4998_v0 = vand.u32 2147483647, %v4519_v35  ;;  %vm4994_vm6 = vweird.f32 %v4519_v35  ;;  %v10618_v41 = vld [vmem:[#allocation91_spill] sm:$0xff] }
 0x8b3   :  { %5541 = vst [vmem:[#allocation11 + $0xd8] sm:$0xff] %v4972_v7  ;;  %v4975_v14 = vmul.f32 %v6424_v1, %v4518_v49  ;;  %v4047_v53 = vadd.f32 %v10613_v5, %v3878_v12  ;;  %3750 = vmatmul.bf16.gmra.mxu3 %v10614_v52  ;;  %vm4980_vm1 = vweird.f32 %v6424_v1  ;;  %v5000_v49 = vand.u32 2147483648, %v4519_v35 }
 0x8b4   :  { %vm4981_vm3 = vmor %vm4979_vm2, %vm4980_vm1  ;;  %vm4999_vm8 = vcmp.eq.f32.partialorder %v4998_v0, 8.507059e+37 }
 0x8b5   :  { %v4976_v28 = vsub.f32 1.0, %v4975_v14  ;;  %v4216_v8 = vadd.f32 %v10615_v62, %v4047_v53  ;;  %v5001_v50 = vor.u32 1.1754944e-38, %v5000_v49 }
 0x8b6   :  { %v3711_v42 = vpop.f32.mrf.mxu3 }
 0x8b7   :  { %v4977_v55 = vmul.f32 %v6424_v1, %v4976_v28  ;;  %v6126_v46 = vmul.f32 -1.442695, %v4216_v8  ;;  %v3712_v18 = vadd.f32 %v9664_v21, %v3711_v42  ;;  %v6426_v20 = vpop.eup %6425 }
 0x8b8   :  { %v6428_v31 = vpop.eup %6427  ;;  %v4520_v43 = vadd.f32 1.0, %v6426_v20 }
 0x8b9   :  { %v4978_v27 = vadd.f32 %v6424_v1, %v4977_v55  ;;  %6429 = vpow2.f32 %v6126_v46  ;;  %v3881_v57 = vadd.f32 %v10616_v10, %v3712_v18  ;;  %v4990_v47 = vmul.f32 %v6428_v31, %v4519_v35  ;;  %v10619_v55 = vld [vmem:[#allocation115_spill] sm:$0xff]  ;;  %v9729_v18 = vpop.f32.mrf.mxu1 }
 0x8ba   :  { %6431 = vrcp.f32 %v4520_v43  ;;  %vm4995_vm5 = vweird.f32 %v6428_v31  ;;  %v5015_v7 = vand.u32 2147483648, %v4520_v43  ;;  %vm5009_vm10 = vweird.f32 %v4520_v43 }
 0x8bb   :  { %v4982_v29 = vsel %vm4981_vm3, %v6424_v1, %v4978_v27  ;;  %v4050_v2 = vadd.f32 %v9541_v32, %v3881_v57  ;;  %v4991_v58 = vsub.f32 1.0, %v4990_v47  ;;  %v10617_v32 = vld [vmem:[#allocation114_spill] sm:$0xff]  ;;  %vm4996_vm7 = vmor %vm4994_vm6, %vm4995_vm5  ;;  %v5013_v1 = vand.u32 2147483647, %v4520_v43 }
 0x8bc   :  { %v4987_v40 = vsel %vm4984_vm4, %v4986_v19, %v4982_v29  ;;  %v5016_v61 = vor.u32 1.1754944e-38, %v5015_v7  ;;  %v9732_v19 = vpop.f32.mrf.mxu2 }
 0x8bd   :  { %5542 = vst [vmem:[#allocation11 + $0xe0] sm:$0xff] %v4987_v40  ;;  %v4219_v60 = vadd.f32 %v9544_v22, %v4050_v2  ;;  %v4992_v63 = vmul.f32 %v6428_v31, %v4991_v58  ;;  %vm5014_vm12 = vcmp.eq.f32.partialorder %v5013_v1, 8.507059e+37 }
 0x8be   :  { %v3713_v15 = vpop.f32.mrf.mxu3 }
 0x8bf   :  { %v6430_v11 = vpop.eup %6429  ;;  %v6127_v9 = vmul.f32 -1.442695, %v4219_v60  ;;  %v3714_v51 = vadd.f32 %v9664_v21, %v3713_v15  ;;  %v4993_v44 = vadd.f32 %v6428_v31, %v4992_v63 }
 0x8c0   :  { %v4521_v17 = vadd.f32 1.0, %v6430_v11  ;;  %v6432_v26 = vpop.eup %6431 }
 0x8c1   :  { %6433 = vpow2.f32 %v6127_v9  ;;  %v3883_v45 = vadd.f32 %v10617_v32, %v3714_v51  ;;  %v4997_v22 = vsel %vm4996_vm7, %v6428_v31, %v4993_v44  ;;  %v5005_v33 = vmul.f32 %v6432_v26, %v4520_v43  ;;  %v10620_v9 = vld [vmem:[#allocation46_spill] sm:$0xff] }
 0x8c2   :  { %6435 = vrcp.f32 %v4521_v17  ;;  %v5002_v34 = vsel %vm4999_vm8, %v5001_v50, %v4997_v22  ;;  %vm5010_vm9 = vweird.f32 %v6432_v26  ;;  %v5030_v27 = vand.u32 2147483648, %v4521_v17  ;;  %v9741_v50 = vpop.f32.mrf.mxu1 }
 0x8c3   :  { %v4052_v38 = vadd.f32 %v9553_v16, %v3883_v45  ;;  %3755 = vmatmul.bf16.gmra.mxu3 %v10618_v41  ;;  %5543 = vst [vmem:[#allocation11 + $0xe8] sm:$0xff] %v5002_v34  ;;  %v5006_v59 = vsub.f32 1.0, %v5005_v33  ;;  %vm5011_vm11 = vmor %vm5009_vm10, %vm5010_vm9  ;;  %v5028_v57 = vand.u32 2147483647, %v4521_v17  ;;  %vm5024_vm14 = vweird.f32 %v4521_v17 }
 0x8c4   :  { %v5031_v60 = vor.u32 1.1754944e-38, %v5030_v27 }
 0x8c5   :  { %v4221_v12 = vadd.f32 %v9557_v56, %v4052_v38  ;;  %v5007_v5 = vmul.f32 %v6432_v26, %v5006_v59  ;;  %vm5029_vm0 = vcmp.eq.f32.partialorder %v5028_v57, 8.507059e+37  ;;  %v9745_v59 = vpop.f32.mrf.mxu2 }
 0x8c6   :  { %v3716_v35 = vpop.f32.mrf.mxu3 }
 0x8c7   :  { %v6434_v14 = vpop.eup %6433  ;;  %v6128_v53 = vmul.f32 -1.442695, %v4221_v12  ;;  %v3717_v52 = vadd.f32 %v9664_v21, %v3716_v35  ;;  %v5008_v8 = vadd.f32 %v6432_v26, %v5007_v5 }
 0x8c8   :  { %v6436_v28 = vpop.eup %6435  ;;  %v4522_v62 = vadd.f32 1.0, %v6434_v14 }
 0x8c9   :  { %v5020_v16 = vmul.f32 %v6436_v28, %v4521_v17  ;;  %6437 = vpow2.f32 %v6128_v53  ;;  %v5012_v56 = vsel %vm5011_vm11, %v6432_v26, %v5008_v8  ;;  %v3886_v46 = vadd.f32 %v10619_v55, %v3717_v52  ;;  %v10621_v17 = vld [vmem:[#allocation38_spill] sm:$0xff]  ;;  %v10622_v53 = vld [vmem:[#allocation49_spill] sm:$0xff] }
 0x8ca   :  { %6439 = vrcp.f32 %v4522_v62  ;;  %v5017_v20 = vsel %vm5014_vm12, %v5016_v61, %v5012_v56  ;;  %vm5025_vm13 = vweird.f32 %v6436_v28  ;;  %v5045_v44 = vand.u32 2147483648, %v4522_v62 }
 0x8cb   :  { %v5021_v42 = vsub.f32 1.0, %v5020_v16  ;;  %5544 = vst [vmem:[#allocation11 + $0xf0] sm:$0xff] %v5017_v20  ;;  %v4055_v31 = vadd.f32 %v9563_v4, %v3886_v46  ;;  %vm5026_vm15 = vmor %vm5024_vm14, %vm5025_vm13  ;;  %v5043_v45 = vand.u32 2147483647, %v4522_v62  ;;  %vm5039_vm2 = vweird.f32 %v4522_v62  ;;  %v9753_v20 = vpop.f32.mrf.mxu1 }
 0x8cc   :  { %v5046_v12 = vor.u32 1.1754944e-38, %v5045_v44 }
 0x8cd   :  { %v5022_v10 = vmul.f32 %v6436_v28, %v5021_v42  ;;  %v4224_v2 = vadd.f32 %v9566_v25, %v4055_v31  ;;  %v9738_v25 = vpop.f32.mrf.mxu0  ;;  %vm5044_vm4 = vcmp.eq.f32.partialorder %v5043_v45, 8.507059e+37 }
 0x8ce   :  { %v3718_v43 = vpop.f32.mrf.mxu3 }
 0x8cf   :  { %v6438_v29 = vpop.eup %6437  ;;  %v5023_v47 = vadd.f32 %v6436_v28, %v5022_v10  ;;  %v3719_v40 = vadd.f32 %v9664_v21, %v3718_v43  ;;  %v6129_v11 = vmul.f32 -1.442695, %v4224_v2  ;;  %v10623_v43 = vld [vmem:[#allocation30_spill] sm:$0xff] }
 0x8d0   :  { %v6440_v58 = vpop.eup %6439  ;;  %v4523_v0 = vadd.f32 1.0, %v6438_v29 }
 0x8d1   :  { %v5027_v49 = vsel %vm5026_vm15, %v6436_v28, %v5023_v47  ;;  %v5035_v15 = vmul.f32 %v6440_v58, %v4522_v62  ;;  %v3888_v51 = vadd.f32 %v10620_v9, %v3719_v40  ;;  %vm5040_vm1 = vweird.f32 %v6440_v58  ;;  %v9756_v47 = vpop.f32.mrf.mxu2 }
 0x8d2   :  { %v5032_v63 = vsel %vm5029_vm0, %v5031_v60, %v5027_v49  ;;  %6441 = vrcp.f32 %v4523_v0  ;;  %vm5041_vm3 = vmor %vm5039_vm2, %vm5040_vm1  ;;  %v5058_v8 = vand.u32 2147483647, %v4523_v0  ;;  %vm5054_vm6 = vweird.f32 %v4523_v0  ;;  %v10624_v60 = vld [vmem:[#allocation42_spill] sm:$0xff] }
 0x8d3   :  { %5545 = vst [vmem:[#allocation11 + $0xf8] sm:$0xff] %v5032_v63  ;;  %v5036_v4 = vsub.f32 1.0, %v5035_v15  ;;  %6443 = vpow2.f32 %v6129_v11  ;;  %3760 = vmatmul.bf16.gmra.mxu3 %v10621_v17  ;;  %v4057_v26 = vadd.f32 %v9575_v24, %v3888_v51 }
 0x8d4   :  { %vm5059_vm8 = vcmp.eq.f32.partialorder %v5058_v8, 8.507059e+37  ;;  %v10626_v8 = vld [vmem:[#allocation117_spill] sm:$0xff] }
 0x8d5   :  { %v5037_v32 = vmul.f32 %v6440_v58, %v5036_v4  ;;  %v4226_v38 = vadd.f32 %v9578_v3, %v4057_v26  ;;  %v5060_v3 = vand.u32 2147483648, %v4523_v0  ;;  %v9749_v61 = vpop.f32.mrf.mxu0 }
 0x8d6   :  { %v3721_v22 = vpop.f32.mrf.mxu3 }
 0x8d7   :  { %v5038_v33 = vadd.f32 %v6440_v58, %v5037_v32  ;;  %v3722_v41 = vadd.f32 %v9664_v21, %v3721_v22  ;;  %v6130_v14 = vmul.f32 -1.442695, %v4226_v38  ;;  %v5061_v27 = vor.u32 1.1754944e-38, %v5060_v3  ;;  %v9765_v22 = vpop.f32.mrf.mxu1 }
 0x8d8   :  { %v6442_v34 = vpop.eup %6441 }
 0x8d9   :  { %v6444_v1 = vpop.eup %6443  ;;  %v5042_v7 = vsel %vm5041_vm3, %v6440_v58, %v5038_v33  ;;  %v5050_v35 = vmul.f32 %v6442_v34, %v4523_v0  ;;  %v3891_v52 = vadd.f32 %v10622_v53, %v3722_v41  ;;  %6445 = vpow2.f32 %v6130_v14 }
 0x8da   :  { %v5047_v24 = vsel %vm5044_vm4, %v5046_v12, %v5042_v7  ;;  %v4524_v5 = vadd.f32 1.0, %v6444_v1  ;;  %vm5055_vm5 = vweird.f32 %v6442_v34  ;;  %v9768_v12 = vpop.f32.mrf.mxu2 }
 0x8db   :  { %5546 = vst [vmem:[#allocation11 + $0x100] sm:$0xff] %v5047_v24  ;;  %v5051_v28 = vsub.f32 1.0, %v5050_v35  ;;  %v4060_v16 = vadd.f32 %v9590_v37, %v3891_v52  ;;  %vm5056_vm7 = vmor %vm5054_vm6, %vm5055_vm5 }
 0x8dc   :  { %6447 = vrcp.f32 %v4524_v5  ;;  %v5073_v15 = vand.u32 2147483647, %v4524_v5  ;;  %v5075_v11 = vand.u32 2147483648, %v4524_v5  ;;  %vm5069_vm10 = vweird.f32 %v4524_v5 }
 0x8dd   :  { %v5052_v62 = vmul.f32 %v6442_v34, %v5051_v28  ;;  %v4229_v55 = vadd.f32 %v9593_v54, %v4060_v16  ;;  %v9762_v17 = vpop.f32.mrf.mxu0 }
 0x8de   :  { %v3723_v56 = vpop.f32.mrf.mxu3  ;;  %vm5074_vm12 = vcmp.eq.f32.partialorder %v5073_v15, 8.507059e+37 }
 0x8df   :  { %v5053_v42 = vadd.f32 %v6442_v34, %v5052_v62  ;;  %v3724_v46 = vadd.f32 %v9664_v21, %v3723_v56  ;;  %v6446_v10 = vpop.eup %6445  ;;  %v6131_v31 = vmul.f32 -1.442695, %v4229_v55 }
 0x8e0   :  { %v4525_v40 = vadd.f32 1.0, %v6446_v10  ;;  %v10627_v10 = vld [vmem:[#allocation95_spill] sm:$0xff] }
 0x8e1   :  { %v5057_v57 = vsel %vm5056_vm7, %v6442_v34, %v5053_v42  ;;  %v3893_v29 = vadd.f32 %v10623_v43, %v3724_v46  ;;  %6449 = vpow2.f32 %v6131_v31 }
 0x8e2   :  { %v6448_v37 = vpop.eup %6447  ;;  %v5062_v2 = vsel %vm5059_vm8, %v5061_v27, %v5057_v57  ;;  %6451 = vrcp.f32 %v4525_v40  ;;  %v5088_v14 = vand.u32 2147483647, %v4525_v40  ;;  %v5090_v24 = vand.u32 2147483648, %v4525_v40  ;;  %v9780_v57 = vpop.f32.mrf.mxu1 }
 0x8e3   :  { %5547 = vst [vmem:[#allocation11 + $0x108] sm:$0xff] %v5062_v2  ;;  %v5065_v58 = vmul.f32 %v6448_v37, %v4524_v5  ;;  %v4062_v54 = vadd.f32 %v9601_v48, %v3893_v29  ;;  %3765 = vmatmul.bf16.gmra.mxu3 %v10624_v60  ;;  %vm5070_vm9 = vweird.f32 %v6448_v37  ;;  %v10625_v48 = vld [vmem:[#allocation58_spill] sm:$0xff]  ;;  %vm5084_vm14 = vweird.f32 %v4525_v40 }
 0x8e4   :  { %vm5071_vm11 = vmor %vm5069_vm10, %vm5070_vm9  ;;  %vm5089_vm0 = vcmp.eq.f32.partialorder %v5088_v14, 8.507059e+37 }
 0x8e5   :  { %v5066_v0 = vsub.f32 1.0, %v5065_v58  ;;  %v4231_v49 = vadd.f32 %v9606_v23, %v4062_v54  ;;  %v5076_v23 = vor.u32 1.1754944e-38, %v5075_v11  ;;  %v9775_v42 = vpop.f32.mrf.mxu0 }
 0x8e6   :  { %v3726_v63 = vpop.f32.mrf.mxu3 }
 0x8e7   :  { %v5067_v4 = vmul.f32 %v6448_v37, %v5066_v0  ;;  %v6132_v9 = vmul.f32 -1.442695, %v4231_v49  ;;  %v3727_v51 = vadd.f32 %v9664_v21, %v3726_v63  ;;  %v6450_v44 = vpop.eup %6449 }
 0x8e8   :  { %v6452_v26 = vpop.eup %6451  ;;  %v4526_v33 = vadd.f32 1.0, %v6450_v44 }
 0x8e9   :  { %v5068_v32 = vadd.f32 %v6448_v37, %v5067_v4  ;;  %6453 = vpow2.f32 %v6132_v9  ;;  %v3896_v45 = vadd.f32 %v10625_v48, %v3727_v51  ;;  %v5080_v41 = vmul.f32 %v6452_v26, %v4525_v40 }
 0x8ea   :  { %6455 = vrcp.f32 %v4526_v33  ;;  %vm5085_vm13 = vweird.f32 %v6452_v26  ;;  %v5103_v2 = vand.u32 2147483647, %v4526_v33  ;;  %v5105_v40 = vand.u32 2147483648, %v4526_v33 }
 0x8eb   :  { %v5072_v38 = vsel %vm5071_vm11, %v6448_v37, %v5068_v32  ;;  %v4065_v34 = vadd.f32 %v9615_v13, %v3896_v45  ;;  %v5081_v7 = vsub.f32 1.0, %v5080_v41  ;;  %vm5086_vm15 = vmor %vm5084_vm14, %vm5085_vm13  ;;  %v9783_v37 = vpop.f32.mrf.mxu2  ;;  %vm5099_vm2 = vweird.f32 %v4526_v33 }
 0x8ec   :  { %v5077_v1 = vsel %vm5074_vm12, %v5076_v23, %v5072_v38  ;;  %vm5104_vm4 = vcmp.eq.f32.partialorder %v5103_v2, 8.507059e+37  ;;  %v9793_v23 = vpop.f32.mrf.mxu1 }
 0x8ed   :  { %5548 = vst [vmem:[#allocation11 + $0x110] sm:$0xff] %v5077_v1  ;;  %v4234_v35 = vadd.f32 %v9617_v36, %v4065_v34  ;;  %v5082_v52 = vmul.f32 %v6452_v26, %v5081_v7  ;;  %v5091_v36 = vor.u32 1.1754944e-38, %v5090_v24  ;;  %v9788_v44 = vpop.f32.mrf.mxu0  ;;  %v9797_v34 = vld [vmem:[#allocation10] ss:$0 sm:$0xff] }
 0x8ee   :  { %v3728_v5 = vpop.f32.mrf.mxu3 }
 0x8ef   :  { %v6454_v53 = vpop.eup %6453  ;;  %v6133_v28 = vmul.f32 -1.442695, %v4234_v35  ;;  %v3729_v3 = vadd.f32 %v9664_v21, %v3728_v5  ;;  %v5083_v13 = vadd.f32 %v6452_v26, %v5082_v52 }
 0x8f0   :  { %v9772_v62 = vadd.f32 1.0, %v6454_v53  ;;  %v6456_v56 = vpop.eup %6455 }
 0x8f1   :  { %6457 = vpow2.f32 %v6133_v28  ;;  %v3898_v16 = vadd.f32 %v10626_v8, %v3729_v3  ;;  %v5087_v55 = vsel %vm5086_vm15, %v6452_v26, %v5083_v13  ;;  %v5095_v46 = vmul.f32 %v6456_v56, %v4526_v33  ;;  %v10628_v3 = vld [vmem:[#allocation116_spill] sm:$0xff] }
 0x8f2   :  { %6459 = vrcp.f32 %v9772_v62  ;;  %v5092_v31 = vsel %vm5089_vm0, %v5091_v36, %v5087_v55  ;;  %vm5100_vm1 = vweird.f32 %v6456_v56  ;;  %v5118_v45 = vand.u32 2147483647, %v9772_v62 }
 0x8f3   :  { %v4067_v27 = vadd.f32 %v9624_v6, %v3898_v16  ;;  %3770 = vmatmul.bf16.gmra.mxu3 %v10627_v10  ;;  %5549 = vst [vmem:[#allocation11 + $0x118] sm:$0xff] %v5092_v31  ;;  %v5096_v43 = vsub.f32 1.0, %v5095_v46  ;;  %vm5101_vm3 = vmor %vm5099_vm2, %vm5100_vm1  ;;  %vm5114_vm6 = vweird.f32 %v9772_v62  ;;  %v9800_v35 = vpop.f32.mrf.mxu2 }
 0x8f4   :  { %vm5119_vm8 = vcmp.eq.f32.partialorder %v5118_v45, 8.507059e+37  ;;  %v9809_v31 = vpop.f32.mrf.mxu1 }
 0x8f5   :  { %v4236_v29 = vadd.f32 %v9629_v39, %v4067_v27  ;;  %v5097_v60 = vmul.f32 %v6456_v56, %v5096_v43  ;;  %v5106_v39 = vor.u32 1.1754944e-38, %v5105_v40 }
 0x8f6   :  { %v3731_v58 = vpop.f32.mrf.mxu3 }
 0x8f7   :  { %v6458_v54 = vpop.eup %6457  ;;  %v6134_v0 = vmul.f32 -1.442695, %v4236_v29  ;;  %v3732_v6 = vadd.f32 %v9664_v21, %v3731_v58  ;;  %v5098_v11 = vadd.f32 %v6456_v56, %v5097_v60  ;;  %v5120_v21 = vand.u32 2147483648, %v9772_v62 }
 0x8f8   :  { %v6460_v49 = vpop.eup %6459  ;;  %v4528_v15 = vadd.f32 1.0, %v6458_v54 }
 0x8f9   :  { %v5110_v63 = vmul.f32 %v6460_v49, %v9772_v62  ;;  %6461 = vpow2.f32 %v6134_v0  ;;  %v5102_v4 = vsel %vm5101_vm3, %v6456_v56, %v5098_v11  ;;  %v3901_v51 = vadd.f32 %v9726_v30, %v3732_v6  ;;  %v9805_v56 = vpop.f32.mrf.mxu0 }
 0x8fa   :  { %6463 = vrcp.f32 %v4528_v15  ;;  %v5107_v32 = vsel %vm5104_vm4, %v5106_v39, %v5102_v4  ;;  %vm5115_vm5 = vweird.f32 %v6460_v49  ;;  %v5121_v14 = vor.u32 1.1754944e-38, %v5120_v21 }
 0x8fb   :  { %v5111_v9 = vsub.f32 1.0, %v5110_v63  ;;  %5550 = vst [vmem:[#allocation11 + $0x120] sm:$0xff] %v5107_v32  ;;  %v4070_v26 = vadd.f32 %v9729_v18, %v3901_v51  ;;  %vm5116_vm7 = vmor %vm5114_vm6, %vm5115_vm5  ;;  %v5135_v62 = vand.u32 2147483648, %v4528_v15  ;;  %v5133_v8 = vand.u32 2147483647, %v4528_v15 }
 0x8fc   :  { %vm5129_vm10 = vweird.f32 %v4528_v15 }
 0x8fd   :  { %v5112_v48 = vmul.f32 %v6460_v49, %v5111_v9  ;;  %v4239_v30 = vadd.f32 %v9732_v19, %v4070_v26  ;;  %vm5134_vm12 = vcmp.eq.f32.partialorder %v5133_v8, 8.507059e+37  ;;  %v9820_v26 = vpop.f32.mrf.mxu1 }
 0x8fe   :  { %v3733_v33 = vpop.f32.mrf.mxu3 }
 0x8ff   :  { %v6462_v38 = vpop.eup %6461  ;;  %v5113_v41 = vadd.f32 %v6460_v49, %v5112_v48  ;;  %v3734_v1 = vadd.f32 %v9797_v34, %v3733_v33  ;;  %v6135_v53 = vmul.f32 -1.442695, %v4239_v30 }
 0x900   :  { %v6464_v7 = vpop.eup %6463  ;;  %v4529_v24 = vadd.f32 1.0, %v6462_v38 }
 0x901   :  { %v5117_v18 = vsel %vm5116_vm7, %v6460_v49, %v5113_v41  ;;  %v5125_v5 = vmul.f32 %v6464_v7, %v4528_v15  ;;  %v3903_v19 = vadd.f32 %v9738_v25, %v3734_v1  ;;  %vm5130_vm9 = vweird.f32 %v6464_v7  ;;  %v9817_v9 = vpop.f32.mrf.mxu0  ;;  %v10629_v41 = vld [vmem:[#allocation29_spill] sm:$0xff] }
 0x902   :  { %v5122_v52 = vsel %vm5119_vm8, %v5121_v14, %v5117_v18  ;;  %6465 = vrcp.f32 %v4529_v24  ;;  %vm5131_vm11 = vmor %vm5129_vm10, %vm5130_vm9  ;;  %v5136_v25 = vor.u32 1.1754944e-38, %v5135_v62  ;;  %v5150_v0 = vand.u32 2147483648, %v4529_v24 }
 0x903   :  { %5551 = vst [vmem:[#allocation11 + $0x128] sm:$0xff] %v5122_v52  ;;  %v5126_v28 = vsub.f32 1.0, %v5125_v5  ;;  %6467 = vpow2.f32 %v6135_v53  ;;  %3775 = vmatmul.bf16.gmra.mxu3 %v10628_v3  ;;  %v4072_v16 = vadd.f32 %v9741_v50, %v3903_v19  ;;  %v9811_v50 = vpop.f32.mrf.mxu2  ;;  %v5148_v49 = vand.u32 2147483647, %v4529_v24 }
 0x904   :  { %vm5144_vm14 = vweird.f32 %v4529_v24 }
 0x905   :  { %v5127_v13 = vmul.f32 %v6464_v7, %v5126_v28  ;;  %v4241_v46 = vadd.f32 %v9745_v59, %v4072_v16  ;;  %vm5149_vm0 = vcmp.eq.f32.partialorder %v5148_v49, 8.507059e+37 }
 0x906   :  { %v3736_v36 = vpop.f32.mrf.mxu3 }
 0x907   :  { %v5128_v55 = vadd.f32 %v6464_v7, %v5127_v13  ;;  %v3737_v27 = vadd.f32 %v9797_v34, %v3736_v36  ;;  %v6136_v40 = vmul.f32 -1.442695, %v4241_v46  ;;  %v9832_v36 = vpop.f32.mrf.mxu1 }
 0x908   :  { %v6466_v10 = vpop.eup %6465 }
 0x909   :  { %v6468_v43 = vpop.eup %6467  ;;  %v5132_v29 = vsel %vm5131_vm11, %v6464_v7, %v5128_v55  ;;  %v5140_v2 = vmul.f32 %v6466_v10, %v4529_v24  ;;  %v3906_v60 = vadd.f32 %v9749_v61, %v3737_v27  ;;  %6469 = vpow2.f32 %v6136_v40  ;;  %v9829_v3 = vpop.f32.mrf.mxu0 }
 0x90a   :  { %v5137_v58 = vsel %vm5134_vm12, %v5136_v25, %v5132_v29  ;;  %v4530_v54 = vadd.f32 1.0, %v6468_v43  ;;  %vm5145_vm13 = vweird.f32 %v6466_v10  ;;  %v5151_v61 = vor.u32 1.1754944e-38, %v5150_v0 }
 0x90b   :  { %5552 = vst [vmem:[#allocation11 + $0x130] sm:$0xff] %v5137_v58  ;;  %v5141_v59 = vsub.f32 1.0, %v5140_v2  ;;  %v4075_v15 = vadd.f32 %v9753_v20, %v3906_v60  ;;  %vm5146_vm15 = vmor %vm5144_vm14, %vm5145_vm13  ;;  %v9824_v30 = vpop.f32.mrf.mxu2 }
 0x90c   :  { %6471 = vrcp.f32 %v4530_v54  ;;  %v5163_v14 = vand.u32 2147483647, %v4530_v54  ;;  %vm5159_vm2 = vweird.f32 %v4530_v54 }
 0x90d   :  { %v5142_v6 = vmul.f32 %v6466_v10, %v5141_v59  ;;  %v4244_v39 = vadd.f32 %v9756_v47, %v4075_v15  ;;  %v10630_v15 = vld [vmem:[#allocation104_spill] sm:$0xff] }
 0x90e   :  { %v3738_v11 = vpop.f32.mrf.mxu3  ;;  %vm5164_vm4 = vcmp.eq.f32.partialorder %v5163_v14, 8.507059e+37 }
 0x90f   :  { %v5143_v63 = vadd.f32 %v6466_v10, %v5142_v6  ;;  %v3739_v4 = vadd.f32 %v9797_v34, %v3738_v11  ;;  %v6470_v51 = vpop.eup %6469  ;;  %v6137_v21 = vmul.f32 -1.442695, %v4244_v39 }
 0x910   :  { %v4531_v33 = vadd.f32 1.0, %v6470_v51 }
 0x911   :  { %v5147_v32 = vsel %vm5146_vm15, %v6466_v10, %v5143_v63  ;;  %v3908_v48 = vadd.f32 %v9762_v17, %v3739_v4  ;;  %6473 = vpow2.f32 %v6137_v21  ;;  %v5165_v17 = vand.u32 2147483648, %v4530_v54  ;;  %v9844_v11 = vpop.f32.mrf.mxu0 }
 0x912   :  { %v6472_v45 = vpop.eup %6471  ;;  %v5152_v20 = vsel %vm5149_vm0, %v5151_v61, %v5147_v32  ;;  %6475 = vrcp.f32 %v4531_v33  ;;  %v5178_v10 = vand.u32 2147483647, %v4531_v33  ;;  %v5180_v25 = vand.u32 2147483648, %v4531_v33 }
 0x913   :  { %5553 = vst [vmem:[#allocation11 + $0x138] sm:$0xff] %v5152_v20  ;;  %v5155_v38 = vmul.f32 %v6472_v45, %v4530_v54  ;;  %v4077_v47 = vadd.f32 %v9765_v22, %v3908_v48  ;;  %3780 = vmatmul.bf16.gmra.mxu3 %v10629_v41  ;;  %vm5160_vm1 = vweird.f32 %v6472_v45  ;;  %v5166_v62 = vor.u32 1.1754944e-38, %v5165_v17 }
 0x914   :  { %vm5161_vm3 = vmor %vm5159_vm2, %vm5160_vm1  ;;  %vm5174_vm6 = vweird.f32 %v4531_v33  ;;  %vm5179_vm8 = vcmp.eq.f32.partialorder %v5178_v10, 8.507059e+37 }
 0x915   :  { %v5156_v1 = vsub.f32 1.0, %v5155_v38  ;;  %v4246_v7 = vadd.f32 %v9768_v12, %v4077_v47 }
 0x916   :  { %v3741_v24 = vpop.f32.mrf.mxu3 }
 0x917   :  { %v5157_v18 = vmul.f32 %v6472_v45, %v5156_v1  ;;  %v6138_v5 = vmul.f32 -1.442695, %v4246_v7  ;;  %v3742_v53 = vadd.f32 %v9797_v34, %v3741_v24  ;;  %v6474_v52 = vpop.eup %6473 }
 0x918   :  { %v6476_v19 = vpop.eup %6475  ;;  %v4532_v12 = vadd.f32 1.0, %v6474_v52 }
 0x919   :  { %v5158_v28 = vadd.f32 %v6472_v45, %v5157_v18  ;;  %6477 = vpow2.f32 %v6138_v5  ;;  %v3911_v22 = vadd.f32 %v9775_v42, %v3742_v53  ;;  %v5170_v8 = vmul.f32 %v6476_v19, %v4531_v33  ;;  %v9835_v42 = vpop.f32.mrf.mxu2  ;;  %v9857_v52 = vpop.f32.mrf.mxu0 }
 0x91a   :  { %6479 = vrcp.f32 %v4532_v12  ;;  %vm5175_vm5 = vweird.f32 %v6476_v19  ;;  %v5193_v61 = vand.u32 2147483647, %v4532_v12  ;;  %v5195_v51 = vand.u32 2147483648, %v4532_v12 }
 0x91b   :  { %v5162_v13 = vsel %vm5161_vm3, %v6472_v45, %v5158_v28  ;;  %v4080_v16 = vadd.f32 %v9780_v57, %v3911_v22  ;;  %v5171_v46 = vsub.f32 1.0, %v5170_v8  ;;  %vm5176_vm7 = vmor %vm5174_vm6, %vm5175_vm5  ;;  %vm5189_vm10 = vweird.f32 %v4532_v12 }
 0x91c   :  { %v5167_v55 = vsel %vm5164_vm4, %v5166_v62, %v5162_v13  ;;  %vm5194_vm12 = vcmp.eq.f32.partialorder %v5193_v61, 8.507059e+37 }
 0x91d   :  { %5554 = vst [vmem:[#allocation11 + $0x140] sm:$0xff] %v5167_v55  ;;  %v4249_v27 = vadd.f32 %v9783_v37, %v4080_v16  ;;  %v5172_v2 = vmul.f32 %v6476_v19, %v5171_v46  ;;  %v5181_v37 = vor.u32 1.1754944e-38, %v5180_v25 }
 0x91e   :  { %v3743_v43 = vpop.f32.mrf.mxu3 }
 0x91f   :  { %v6478_v29 = vpop.eup %6477  ;;  %v6139_v40 = vmul.f32 -1.442695, %v4249_v27  ;;  %v3744_v58 = vadd.f32 %v9797_v34, %v3743_v43  ;;  %v5173_v54 = vadd.f32 %v6476_v19, %v5172_v2 }
 0x920   :  { %v9838_v57 = vadd.f32 1.0, %v6478_v29  ;;  %v6480_v59 = vpop.eup %6479 }
 0x921   :  { %6481 = vpow2.f32 %v6139_v40  ;;  %v3913_v60 = vadd.f32 %v9788_v44, %v3744_v58  ;;  %v5177_v0 = vsel %vm5176_vm7, %v6476_v19, %v5173_v54  ;;  %v5185_v6 = vmul.f32 %v6480_v59, %v4532_v12  ;;  %v9847_v44 = vpop.f32.mrf.mxu1  ;;  %v9850_v33 = vpop.f32.mrf.mxu2 }
 0x922   :  { %6483 = vrcp.f32 %v9838_v57  ;;  %v5182_v63 = vsel %vm5179_vm8, %v5181_v37, %v5177_v0  ;;  %vm5190_vm9 = vweird.f32 %v6480_v59  ;;  %v5210_v24 = vand.u32 2147483648, %v9838_v57  ;;  %v9870_v37 = vpop.f32.mrf.mxu0 }
 0x923   :  { %v4082_v49 = vadd.f32 %v9793_v23, %v3913_v60  ;;  %3785 = vmatmul.bf16.gmra.mxu3 %v10630_v15  ;;  %5555 = vst [vmem:[#allocation11 + $0x148] sm:$0xff] %v5182_v63  ;;  %v5186_v39 = vsub.f32 1.0, %v5185_v6  ;;  %vm5191_vm11 = vmor %vm5189_vm10, %vm5190_vm9  ;;  %v5208_v5 = vand.u32 2147483647, %v9838_v57  ;;  %vm5204_vm14 = vweird.f32 %v9838_v57 }
 0x924   :  { %v5211_v8 = vor.u32 1.1754944e-38, %v5210_v24 }
 0x925   :  { %v4251_v4 = vadd.f32 %v9800_v35, %v4082_v49  ;;  %v5187_v48 = vmul.f32 %v6480_v59, %v5186_v39  ;;  %v5196_v35 = vor.u32 1.1754944e-38, %v5195_v51  ;;  %vm5209_vm0 = vcmp.eq.f32.partialorder %v5208_v5, 8.507059e+37 }
 0x926   :  { %v3746_v32 = vpop.f32.mrf.mxu3 }
 0x927   :  { %v6482_v21 = vpop.eup %6481  ;;  %v6140_v45 = vmul.f32 -1.442695, %v4251_v4  ;;  %v3747_v23 = vadd.f32 %v9797_v34, %v3746_v32  ;;  %v5188_v47 = vadd.f32 %v6480_v59, %v5187_v48 }
 0x928   :  { %v6484_v20 = vpop.eup %6483  ;;  %v4534_v38 = vadd.f32 1.0, %v6482_v21 }
 0x929   :  { %v5200_v41 = vmul.f32 %v6484_v20, %v9838_v57  ;;  %6485 = vpow2.f32 %v6140_v45  ;;  %v5192_v1 = vsel %vm5191_vm11, %v6480_v59, %v5188_v47  ;;  %v3916_v14 = vadd.f32 %v9805_v56, %v3747_v23  ;;  %v9862_v13 = vpop.f32.mrf.mxu1  ;;  %v9864_v27 = vpop.f32.mrf.mxu2 }
 0x92a   :  { %6487 = vrcp.f32 %v4534_v38  ;;  %v5197_v17 = vsel %vm5194_vm12, %v5196_v35, %v5192_v1  ;;  %vm5205_vm13 = vweird.f32 %v6484_v20  ;;  %v5225_v43 = vand.u32 2147483648, %v4534_v38 }
 0x92b   :  { %v5201_v7 = vsub.f32 1.0, %v5200_v41  ;;  %5556 = vst [vmem:[#allocation11 + $0x150] sm:$0xff] %v5197_v17  ;;  %v4085_v53 = vadd.f32 %v9809_v31, %v3916_v14  ;;  %vm5206_vm15 = vmor %vm5204_vm14, %vm5205_vm13  ;;  %v5223_v2 = vand.u32 2147483647, %v4534_v38  ;;  %vm5219_vm2 = vweird.f32 %v4534_v38  ;;  %v9881_v14 = vpop.f32.mrf.mxu0 }
 0x92c   :  { %v5226_v0 = vor.u32 1.1754944e-38, %v5225_v43 }
 0x92d   :  { %v5202_v18 = vmul.f32 %v6484_v20, %v5201_v7  ;;  %v4254_v62 = vadd.f32 %v9811_v50, %v4085_v53  ;;  %vm5224_vm4 = vcmp.eq.f32.partialorder %v5223_v2, 8.507059e+37 }
 0x92e   :  { %v3748_v28 = vpop.f32.mrf.mxu3 }
 0x92f   :  { %v6486_v22 = vpop.eup %6485  ;;  %v5203_v19 = vadd.f32 %v6484_v20, %v5202_v18  ;;  %v3749_v56 = vadd.f32 %v9797_v34, %v3748_v28  ;;  %v6141_v46 = vmul.f32 -1.442695, %v4254_v62 }
 0x930   :  { %v6488_v12 = vpop.eup %6487  ;;  %v4535_v16 = vadd.f32 1.0, %v6486_v22 }
 0x931   :  { %v5207_v55 = vsel %vm5206_vm15, %v6484_v20, %v5203_v19  ;;  %v5215_v31 = vmul.f32 %v6488_v12, %v4534_v38  ;;  %v3918_v50 = vadd.f32 %v9817_v9, %v3749_v56  ;;  %vm5220_vm1 = vweird.f32 %v6488_v12  ;;  %v9872_v63 = vpop.f32.mrf.mxu1  ;;  %v9875_v61 = vpop.f32.mrf.mxu2 }
 0x932   :  { %v5212_v10 = vsel %vm5209_vm0, %v5211_v8, %v5207_v55  ;;  %6489 = vrcp.f32 %v4535_v16  ;;  %vm5221_vm3 = vmor %vm5219_vm2, %vm5220_vm1  ;;  %v5240_v51 = vand.u32 2147483648, %v4535_v16  ;;  %v5238_v21 = vand.u32 2147483647, %v4535_v16 }
 0x933   :  { %5557 = vst [vmem:[#allocation11 + $0x158] sm:$0xff] %v5212_v10  ;;  %v5216_v25 = vsub.f32 1.0, %v5215_v31  ;;  %6491 = vpow2.f32 %v6141_v46  ;;  %v4087_v40 = vadd.f32 %v9820_v26, %v3918_v50  ;;  %vm5234_vm6 = vweird.f32 %v4535_v16  ;;  %v9892_v50 = vpop.f32.mrf.mxu0 }
 0x934   :  { %vm5239_vm8 = vcmp.eq.f32.partialorder %v5238_v21, 8.507059e+37 }
 0x935   :  { %v5217_v29 = vmul.f32 %v6488_v12, %v5216_v25  ;;  %v4256_v54 = vadd.f32 %v9824_v30, %v4087_v40 }
 0x936   :  { %v3751_v58 = vpop.f32.mrf.mxu3 }
 0x937   :  { %v5218_v57 = vadd.f32 %v6488_v12, %v5217_v29  ;;  %v3752_v60 = vadd.f32 %v9797_v34, %v3751_v58  ;;  %v6142_v15 = vmul.f32 -1.442695, %v4256_v54 }
 0x938   :  { %v6490_v59 = vpop.eup %6489 }
 0x939   :  { %v6492_v6 = vpop.eup %6491  ;;  %v5222_v9 = vsel %vm5221_vm3, %v6488_v12, %v5218_v57  ;;  %v5230_v49 = vmul.f32 %v6490_v59, %v4535_v16  ;;  %v3921_v4 = vadd.f32 %v9829_v3, %v3752_v60  ;;  %6493 = vpow2.f32 %v6142_v15  ;;  %v9884_v18 = vpop.f32.mrf.mxu1 }
 0x93a   :  { %v5227_v26 = vsel %vm5224_vm4, %v5226_v0, %v5222_v9  ;;  %v4536_v39 = vadd.f32 1.0, %v6492_v6  ;;  %vm5235_vm5 = vweird.f32 %v6490_v59  ;;  %v5241_v3 = vor.u32 1.1754944e-38, %v5240_v51  ;;  %v9887_v28 = vpop.f32.mrf.mxu2 }
 0x93b   :  { %5558 = vst [vmem:[#allocation11 + $0x160] sm:$0xff] %v5227_v26  ;;  %v5231_v30 = vsub.f32 1.0, %v5230_v49  ;;  %v4090_v48 = vadd.f32 %v9832_v36, %v3921_v4  ;;  %vm5236_vm7 = vmor %vm5234_vm6, %vm5235_vm5  ;;  %v9903_v21 = vpop.f32.mrf.mxu0 }
 0x93c   :  { %6495 = vrcp.f32 %v4536_v39  ;;  %v5253_v22 = vand.u32 2147483647, %v4536_v39  ;;  %vm5249_vm10 = vweird.f32 %v4536_v39 }
 0x93d   :  { %v5232_v32 = vmul.f32 %v6490_v59, %v5231_v30  ;;  %v4259_v20 = vadd.f32 %v9835_v42, %v4090_v48 }
 0x93e   :  { %v3753_v45 = vpop.f32.mrf.mxu3  ;;  %vm5254_vm12 = vcmp.eq.f32.partialorder %v5253_v22, 8.507059e+37 }
 0x93f   :  { %v5233_v23 = vadd.f32 %v6490_v59, %v5232_v32  ;;  %v3754_v38 = vadd.f32 %v9797_v34, %v3753_v45  ;;  %v6494_v47 = vpop.eup %6493  ;;  %v6143_v35 = vmul.f32 -1.442695, %v4259_v20 }
 0x940   :  { %v4537_v36 = vadd.f32 1.0, %v6494_v47 }
 0x941   :  { %v5237_v41 = vsel %vm5236_vm7, %v6490_v59, %v5233_v23  ;;  %v3923_v1 = vadd.f32 %v9844_v11, %v3754_v38  ;;  %6497 = vpow2.f32 %v6143_v35  ;;  %v5255_v11 = vand.u32 2147483648, %v4536_v39  ;;  %v9895_v40 = vpop.f32.mrf.mxu1 }
 0x942   :  { %v6496_v7 = vpop.eup %6495  ;;  %v5242_v17 = vsel %vm5239_vm8, %v5241_v3, %v5237_v41  ;;  %6499 = vrcp.f32 %v4537_v36  ;;  %v5270_v58 = vand.u32 2147483648, %v4537_v36  ;;  %vm5264_vm14 = vweird.f32 %v4537_v36 }
 0x943   :  { %5559 = vst [vmem:[#allocation11 + $0x168] sm:$0xff] %v5242_v17  ;;  %v5245_v24 = vmul.f32 %v6496_v7, %v4536_v39  ;;  %v4092_v42 = vadd.f32 %v9847_v44, %v3923_v1  ;;  %vm5250_vm9 = vweird.f32 %v6496_v7  ;;  %v5256_v31 = vor.u32 1.1754944e-38, %v5255_v11 }
 0x944   :  { %vm5251_vm11 = vmor %vm5249_vm10, %vm5250_vm9  ;;  %v5271_v15 = vor.u32 1.1754944e-38, %v5270_v58 }
 0x945   :  { %v5246_v5 = vsub.f32 1.0, %v5245_v24  ;;  %v4261_v53 = vadd.f32 %v9850_v33, %v4092_v42 }
 0x946   :  { %v3756_v19 = vpop.f32.mrf.mxu3 }
 0x947   :  { %v5247_v62 = vmul.f32 %v6496_v7, %v5246_v5  ;;  %v6144_v56 = vmul.f32 -1.442695, %v4261_v53  ;;  %v3757_v12 = vadd.f32 %v9797_v34, %v3756_v19  ;;  %v6498_v8 = vpop.eup %6497 }
 0x948   :  { %v6500_v55 = vpop.eup %6499  ;;  %v4538_v33 = vadd.f32 1.0, %v6498_v8 }
 0x949   :  { %v5248_v16 = vadd.f32 %v6496_v7, %v5247_v62  ;;  %6501 = vpow2.f32 %v6144_v56  ;;  %v3926_v44 = vadd.f32 %v9857_v52, %v3757_v12  ;;  %v5260_v10 = vmul.f32 %v6500_v55, %v4537_v36  ;;  %v9906_v41 = vpop.f32.mrf.mxu1 }
 0x94a   :  { %6503 = vrcp.f32 %v4538_v33  ;;  %v5268_v52 = vand.u32 2147483647, %v4537_v36  ;;  %vm5265_vm13 = vweird.f32 %v6500_v55  ;;  %v5283_v48 = vand.u32 2147483647, %v4538_v33 }
 0x94b   :  { %v5252_v46 = vsel %vm5251_vm11, %v6496_v7, %v5248_v16  ;;  %v4095_v25 = vadd.f32 %v9862_v13, %v3926_v44  ;;  %v5261_v29 = vsub.f32 1.0, %v5260_v10  ;;  %v9898_v13 = vpop.f32.mrf.mxu2  ;;  %vm5266_vm15 = vmor %vm5264_vm14, %vm5265_vm13  ;;  %v5285_v45 = vand.u32 2147483648, %v4538_v33  ;;  %v3937_v44 = vpop.f32.mrf.mxu0 }
 0x94c   :  { %v5257_v43 = vsel %vm5254_vm12, %v5256_v31, %v5252_v46  ;;  %vm5269_vm0 = vcmp.eq.f32.partialorder %v5268_v52, 8.507059e+37  ;;  %vm5279_vm2 = vweird.f32 %v4538_v33  ;;  %vm5284_vm4 = vcmp.eq.f32.partialorder %v5283_v48, 8.507059e+37 }
 0x94d   :  { %5560 = vst [vmem:[#allocation11 + $0x170] sm:$0xff] %v5257_v43  ;;  %v4264_v2 = vadd.f32 %v9864_v27, %v4095_v25  ;;  %v5262_v60 = vmul.f32 %v6500_v55, %v5261_v29  ;;  %v5286_v7 = vor.u32 1.1754944e-38, %v5285_v45 }
 0x94e   :  { %v3758_v57 = vpop.f32.mrf.mxu3 }
 0x94f   :  { %v6502_v54 = vpop.eup %6501  ;;  %v6145_v59 = vmul.f32 -1.442695, %v4264_v2  ;;  %v3759_v0 = vadd.f32 %v9797_v34, %v3758_v57  ;;  %v5263_v9 = vadd.f32 %v6500_v55, %v5262_v60 }
 0x950   :  { %v4539_v6 = vadd.f32 1.0, %v6502_v54  ;;  %v6504_v27 = vpop.eup %6503 }
 0x951   :  { %6505 = vpow2.f32 %v6145_v59  ;;  %v3928_v49 = vadd.f32 %v9870_v37, %v3759_v0  ;;  %v5267_v26 = vsel %vm5266_vm15, %v6500_v55, %v5263_v9  ;;  %v5275_v39 = vmul.f32 %v6504_v27, %v4538_v33  ;;  %v4106_v10 = vpop.f32.mrf.mxu1 }
 0x952   :  { %6507 = vrcp.f32 %v4539_v6  ;;  %v5272_v30 = vsel %vm5269_vm0, %v5271_v15, %v5267_v26  ;;  %vm5280_vm1 = vweird.f32 %v6504_v27  ;;  %v5300_v5 = vand.u32 2147483648, %v4539_v6 }
 0x953   :  { %v4097_v4 = vadd.f32 %v9872_v63, %v3928_v49  ;;  %5561 = vst [vmem:[#allocation11 + $0x178] sm:$0xff] %v5272_v30  ;;  %v5276_v51 = vsub.f32 1.0, %v5275_v39  ;;  %vm5281_vm3 = vmor %vm5279_vm2, %vm5280_vm1  ;;  %v5298_v22 = vand.u32 2147483647, %v4539_v6  ;;  %vm5294_vm6 = vweird.f32 %v4539_v6  ;;  %v3940_v15 = vpop.f32.mrf.mxu0 }
 0x955   :  { %v4266_v32 = vadd.f32 %v9875_v61, %v4097_v4  ;;  %v5277_v20 = vmul.f32 %v6504_v27, %v5276_v51  ;;  %v9908_v61 = vpop.f32.mrf.mxu2  ;;  %vm5299_vm8 = vcmp.eq.f32.partialorder %v5298_v22, 8.507059e+37 }
 0x956   :  { %v3761_v23 = vpop.f32.mrf.mxu3 }
 0x957   :  { %v6506_v37 = vpop.eup %6505  ;;  %v6146_v38 = vmul.f32 -1.442695, %v4266_v32  ;;  %v3762_v3 = vadd.f32 %v9797_v34, %v3761_v23  ;;  %v5278_v35 = vadd.f32 %v6504_v27, %v5277_v20 }
 0x958   :  { %v6508_v47 = vpop.eup %6507  ;;  %v4540_v63 = vadd.f32 1.0, %v6506_v37 }
 0x959   :  { %v5290_v1 = vmul.f32 %v6508_v47, %v4539_v6  ;;  %6509 = vpow2.f32 %v6146_v38  ;;  %v5282_v17 = vsel %vm5281_vm3, %v6504_v27, %v5278_v35  ;;  %v3931_v24 = vadd.f32 %v9881_v14, %v3762_v3  ;;  %v4109_v30 = vpop.f32.mrf.mxu1 }
 0x95a   :  { %6511 = vrcp.f32 %v4540_v63  ;;  %v5287_v42 = vsel %vm5284_vm4, %v5286_v7, %v5282_v17  ;;  %vm5295_vm5 = vweird.f32 %v6508_v47  ;;  %v5301_v14 = vor.u32 1.1754944e-38, %v5300_v5 }
 0x95b   :  { %v5291_v36 = vsub.f32 1.0, %v5290_v1  ;;  %5562 = vst [vmem:[#allocation11 + $0x180] sm:$0xff] %v5287_v42  ;;  %v4100_v11 = vadd.f32 %v9884_v18, %v3931_v24  ;;  %vm5296_vm7 = vmor %vm5294_vm6, %vm5295_vm5  ;;  %v5315_v29 = vand.u32 2147483648, %v4540_v63  ;;  %v5313_v52 = vand.u32 2147483647, %v4540_v63  ;;  %v3942_v24 = vpop.f32.mrf.mxu0 }
 0x95c   :  { %vm5309_vm10 = vweird.f32 %v4540_v63 }
 0x95d   :  { %v5292_v53 = vmul.f32 %v6508_v47, %v5291_v36  ;;  %v4269_v12 = vadd.f32 %v9887_v28, %v4100_v11  ;;  %v4275_v28 = vpop.f32.mrf.mxu2  ;;  %v5316_v6 = vor.u32 1.1754944e-38, %v5315_v29  ;;  %vm5314_vm12 = vcmp.eq.f32.partialorder %v5313_v52, 8.507059e+37 }
 0x95e   :  { %v3763_v19 = vpop.f32.mrf.mxu3 }
 0x95f   :  { %v6510_v62 = vpop.eup %6509  ;;  %v5293_v56 = vadd.f32 %v6508_v47, %v5292_v53  ;;  %v3764_v8 = vadd.f32 %v9797_v34, %v3763_v19  ;;  %v6147_v46 = vmul.f32 -1.442695, %v4269_v12 }
 0x960   :  { %v6512_v16 = vpop.eup %6511  ;;  %v4541_v55 = vadd.f32 1.0, %v6510_v62 }
 0x961   :  { %v5297_v31 = vsel %vm5296_vm7, %v6508_v47, %v5293_v56  ;;  %v5305_v33 = vmul.f32 %v6512_v16, %v4540_v63  ;;  %v3933_v43 = vadd.f32 %v9892_v50, %v3764_v8  ;;  %vm5310_vm9 = vweird.f32 %v6512_v16  ;;  %v4111_v5 = vpop.f32.mrf.mxu1 }
 0x962   :  { %v5302_v25 = vsel %vm5299_vm8, %v5301_v14, %v5297_v31  ;;  %6513 = vrcp.f32 %v4541_v55  ;;  %vm5311_vm11 = vmor %vm5309_vm10, %vm5310_vm9  ;;  %v5328_v32 = vand.u32 2147483647, %v4541_v55  ;;  %vm5324_vm14 = vweird.f32 %v4541_v55 }
 0x963   :  { %5563 = vst [vmem:[#allocation11 + $0x188] sm:$0xff] %v5302_v25  ;;  %v5306_v18 = vsub.f32 1.0, %v5305_v33  ;;  %6515 = vpow2.f32 %v6147_v46  ;;  %v4102_v58 = vadd.f32 %v9895_v40, %v3933_v43 }
 0x964   :  { %vm5329_vm0 = vcmp.eq.f32.partialorder %v5328_v32, 8.507059e+37 }
 0x965   :  { %v5307_v2 = vmul.f32 %v6512_v16, %v5306_v18  ;;  %v4271_v60 = vadd.f32 %v9898_v13, %v4102_v58  ;;  %v5330_v13 = vand.u32 2147483648, %v4541_v55  ;;  %v4278_v45 = vpop.f32.mrf.mxu2 }
 0x966   :  { %v3766_v57 = vpop.f32.mrf.mxu3 }
 0x967   :  { %v5308_v54 = vadd.f32 %v6512_v16, %v5307_v2  ;;  %v3767_v59 = vadd.f32 %v9797_v34, %v3766_v57  ;;  %v6148_v27 = vmul.f32 -1.442695, %v4271_v60 }
 0x968   :  { %v6514_v0 = vpop.eup %6513 }
 0x969   :  { %v6516_v9 = vpop.eup %6515  ;;  %v5312_v49 = vsel %vm5311_vm11, %v6512_v16, %v5308_v54  ;;  %v5320_v50 = vmul.f32 %v6514_v0, %v4541_v55  ;;  %v3936_v40 = vadd.f32 %v9903_v21, %v3767_v59  ;;  %6517 = vpow2.f32 %v6148_v27  ;;  %v4114_v59 = vpop.f32.mrf.mxu1 }
 0x96a   :  { %v5317_v26 = vsel %vm5314_vm12, %v5316_v6, %v5312_v49  ;;  %v4542_v39 = vadd.f32 1.0, %v6516_v9  ;;  %vm5325_vm13 = vweird.f32 %v6514_v0  ;;  %v5331_v21 = vor.u32 1.1754944e-38, %v5330_v13 }
 0x96b   :  { %5564 = vst [vmem:[#allocation11 + $0x190] sm:$0xff] %v5317_v26  ;;  %v5321_v4 = vsub.f32 1.0, %v5320_v50  ;;  %v4105_v48 = vadd.f32 %v9906_v41, %v3936_v40  ;;  %vm5326_vm15 = vmor %vm5324_vm14, %vm5325_vm13 }
 0x96c   :  { %6519 = vrcp.f32 %v4542_v39  ;;  %v5343_v53 = vand.u32 2147483647, %v4542_v39  ;;  %v5345_v22 = vand.u32 2147483648, %v4542_v39  ;;  %vm5339_vm2 = vweird.f32 %v4542_v39 }
 0x96d   :  { %v5322_v51 = vmul.f32 %v6514_v0, %v5321_v4  ;;  %v4274_v20 = vadd.f32 %v9908_v61, %v4105_v48  ;;  %v4280_v12 = vpop.f32.mrf.mxu2 }
 0x96e   :  { %v3768_v23 = vpop.f32.mrf.mxu3  ;;  %v5346_v55 = vor.u32 1.1754944e-38, %v5345_v22  ;;  %vm5344_vm4 = vcmp.eq.f32.partialorder %v5343_v53, 8.507059e+37 }
 0x96f   :  { %v5323_v37 = vadd.f32 %v6514_v0, %v5322_v51  ;;  %v3769_v38 = vadd.f32 %v9797_v34, %v3768_v23  ;;  %v6518_v3 = vpop.eup %6517  ;;  %v6149_v63 = vmul.f32 -1.442695, %v4274_v20 }
 0x970   :  { %v4543_v17 = vadd.f32 1.0, %v6518_v3 }
 0x971   :  { %v5327_v47 = vsel %vm5326_vm15, %v6514_v0, %v5323_v37  ;;  %v3938_v35 = vadd.f32 %v3937_v44, %v3769_v38  ;;  %6521 = vpow2.f32 %v6149_v63  ;;  %v4116_v63 = vpop.f32.mrf.mxu1 }
 0x972   :  { %v6520_v1 = vpop.eup %6519  ;;  %v5332_v7 = vsel %vm5329_vm0, %v5331_v21, %v5327_v47  ;;  %6523 = vrcp.f32 %v4543_v17  ;;  %v5358_v29 = vand.u32 2147483647, %v4543_v17  ;;  %v5360_v2 = vand.u32 2147483648, %v4543_v17 }
 0x973   :  { %5565 = vst [vmem:[#allocation11 + $0x198] sm:$0xff] %v5332_v7  ;;  %v5335_v41 = vmul.f32 %v6520_v1, %v4542_v39  ;;  %v4107_v36 = vadd.f32 %v4106_v10, %v3938_v35  ;;  %vm5340_vm1 = vweird.f32 %v6520_v1  ;;  %vm5354_vm6 = vweird.f32 %v4543_v17 }
 0x974   :  { %vm5341_vm3 = vmor %vm5339_vm2, %vm5340_vm1  ;;  %v5361_v27 = vor.u32 1.1754944e-38, %v5360_v2  ;;  %vm5359_vm8 = vcmp.eq.f32.partialorder %v5358_v29, 8.507059e+37 }
 0x975   :  { %v5336_v42 = vsub.f32 1.0, %v5335_v41  ;;  %v4276_v61 = vadd.f32 %v4275_v28, %v4107_v36  ;;  %v3945_v28 = vpop.f32.mrf.mxu0  ;;  %v4283_v50 = vpop.f32.mrf.mxu2 }
 0x976   :  { %v3771_v11 = vpop.f32.mrf.mxu3 }
 0x977   :  { %v5337_v19 = vmul.f32 %v6520_v1, %v5336_v42  ;;  %v6150_v62 = vmul.f32 -1.442695, %v4276_v61  ;;  %v3772_v56 = vadd.f32 %v9797_v34, %v3771_v11  ;;  %v6522_v8 = vpop.eup %6521 }
 0x978   :  { %v6524_v14 = vpop.eup %6523  ;;  %v4544_v31 = vadd.f32 1.0, %v6522_v8 }
 0x979   :  { %v5338_v16 = vadd.f32 %v6520_v1, %v5337_v19  ;;  %6525 = vpow2.f32 %v6150_v62  ;;  %v3941_v44 = vadd.f32 %v3940_v15, %v3772_v56  ;;  %v5350_v46 = vmul.f32 %v6524_v14, %v4543_v17 }
 0x97a   :  { %6527 = vrcp.f32 %v4544_v31  ;;  %vm5355_vm5 = vweird.f32 %v6524_v14  ;;  %v5373_v13 = vand.u32 2147483647, %v4544_v31  ;;  %v5375_v51 = vand.u32 2147483648, %v4544_v31 }
 0x97b   :  { %v5342_v33 = vsel %vm5341_vm3, %v6520_v1, %v5338_v16  ;;  %v4110_v10 = vadd.f32 %v4109_v30, %v3941_v44  ;;  %v5351_v18 = vsub.f32 1.0, %v5350_v46  ;;  %vm5356_vm7 = vmor %vm5354_vm6, %vm5355_vm5  ;;  %vm5369_vm10 = vweird.f32 %v4544_v31 }
 0x97c   :  { %v5347_v25 = vsel %vm5344_vm4, %v5346_v55, %v5342_v33  ;;  %v5376_v35 = vor.u32 1.1754944e-38, %v5375_v51  ;;  %vm5374_vm12 = vcmp.eq.f32.partialorder %v5373_v13, 8.507059e+37 }
 0x97d   :  { %5566 = vst [vmem:[#allocation11 + $0x1a0] sm:$0xff] %v5347_v25  ;;  %v4279_v43 = vadd.f32 %v4278_v45, %v4110_v10  ;;  %v5352_v57 = vmul.f32 %v6524_v14, %v5351_v18  ;;  %v3947_v38 = vpop.f32.mrf.mxu0  ;;  %v4285_v41 = vpop.f32.mrf.mxu2 }
 0x97e   :  { %v3773_v52 = vpop.f32.mrf.mxu3  ;;  %v4119_v10 = vpop.f32.mrf.mxu1 }
 0x97f   :  { %v6526_v58 = vpop.eup %6525  ;;  %v6151_v54 = vmul.f32 -1.442695, %v4279_v43  ;;  %v3774_v60 = vadd.f32 %v9797_v34, %v3773_v52  ;;  %v5353_v6 = vadd.f32 %v6524_v14, %v5352_v57 }
 0x980   :  { %v4545_v0 = vadd.f32 1.0, %v6526_v58  ;;  %v6528_v49 = vpop.eup %6527  ;;  %v9926_v58 = vld [vmem:[#allocation10] ss:$0 sm:$0xff] }
 0x981   :  { %6529 = vpow2.f32 %v6151_v54  ;;  %v3943_v9 = vadd.f32 %v3942_v24, %v3774_v60  ;;  %v5357_v15 = vsel %vm5356_vm7, %v6524_v14, %v5353_v6  ;;  %v5365_v26 = vmul.f32 %v6528_v49, %v4544_v31 }
 0x982   :  { %6531 = vrcp.f32 %v4545_v0  ;;  %v5362_v40 = vsel %vm5359_vm8, %v5361_v27, %v5357_v15  ;;  %vm5370_vm9 = vweird.f32 %v6528_v49  ;;  %v5390_v24 = vand.u32 2147483648, %v4545_v0 }
 0x983   :  { %v4112_v39 = vadd.f32 %v4111_v5, %v3943_v9  ;;  %5567 = vst [vmem:[#allocation11 + $0x1a8] sm:$0xff] %v5362_v40  ;;  %v5366_v4 = vsub.f32 1.0, %v5365_v26  ;;  %vm5371_vm11 = vmor %vm5369_vm10, %vm5370_vm9  ;;  %v5388_v61 = vand.u32 2147483647, %v4545_v0  ;;  %vm5384_vm14 = vweird.f32 %v4545_v0 }
 0x985   :  { %v4281_v30 = vadd.f32 %v4280_v12, %v4112_v39  ;;  %v5367_v45 = vmul.f32 %v6528_v49, %v5366_v4  ;;  %v5391_v12 = vor.u32 1.1754944e-38, %v5390_v24  ;;  %vm5389_vm0 = vcmp.eq.f32.partialorder %v5388_v61, 8.507059e+37  ;;  %v3950_v55 = vpop.f32.mrf.mxu0 }
 0x986   :  { %v3776_v32 = vpop.f32.mrf.mxu3  ;;  %v4121_v13 = vpop.f32.mrf.mxu1 }
 0x987   :  { %v6530_v48 = vpop.eup %6529  ;;  %v6152_v23 = vmul.f32 -1.442695, %v4281_v30  ;;  %v3777_v37 = vadd.f32 %v9797_v34, %v3776_v32  ;;  %v5368_v3 = vadd.f32 %v6528_v49, %v5367_v45 }
 0x988   :  { %v6532_v20 = vpop.eup %6531  ;;  %v4546_v21 = vadd.f32 1.0, %v6530_v48 }
 0x989   :  { %v5380_v47 = vmul.f32 %v6532_v20, %v4545_v0  ;;  %6533 = vpow2.f32 %v6152_v23  ;;  %v5372_v1 = vsel %vm5371_vm11, %v6528_v49, %v5368_v3  ;;  %v3946_v17 = vadd.f32 %v3945_v28, %v3777_v37  ;;  %v4288_v28 = vpop.f32.mrf.mxu2 }
 0x98a   :  { %6535 = vrcp.f32 %v4546_v21  ;;  %v5377_v36 = vsel %vm5374_vm12, %v5376_v35, %v5372_v1  ;;  %vm5385_vm13 = vweird.f32 %v6532_v20  ;;  %v5405_v25 = vand.u32 2147483648, %v4546_v21 }
 0x98b   :  { %v5381_v7 = vsub.f32 1.0, %v5380_v47  ;;  %5568 = vst [vmem:[#allocation11 + $0x1b0] sm:$0xff] %v5377_v36  ;;  %v4115_v5 = vadd.f32 %v4114_v59, %v3946_v17  ;;  %vm5386_vm15 = vmor %vm5384_vm14, %vm5385_vm13  ;;  %vm5399_vm2 = vweird.f32 %v4546_v21 }
 0x98c   :  { %v5406_v60 = vor.u32 1.1754944e-38, %v5405_v25 }
 0x98d   :  { %v5382_v42 = vmul.f32 %v6532_v20, %v5381_v7  ;;  %v4284_v19 = vadd.f32 %v4283_v50, %v4115_v5  ;;  %v3952_v26 = vpop.f32.mrf.mxu0 }
 0x98e   :  { %v3778_v53 = vpop.f32.mrf.mxu3 }
 0x98f   :  { %v6534_v22 = vpop.eup %6533  ;;  %v5383_v11 = vadd.f32 %v6532_v20, %v5382_v42  ;;  %v3779_v62 = vadd.f32 %v9797_v34, %v3778_v53  ;;  %v6153_v14 = vmul.f32 -1.442695, %v4284_v19  ;;  %v5403_v34 = vand.u32 2147483647, %v4546_v21 }
 0x990   :  { %v6536_v56 = vpop.eup %6535  ;;  %v4547_v8 = vadd.f32 1.0, %v6534_v22 }
 0x991   :  { %v5387_v16 = vsel %vm5386_vm15, %v6532_v20, %v5383_v11  ;;  %v5395_v44 = vmul.f32 %v6536_v56, %v4546_v21  ;;  %v3948_v46 = vadd.f32 %v3947_v38, %v3779_v62  ;;  %vm5400_vm1 = vweird.f32 %v6536_v56  ;;  %v4290_v23 = vpop.f32.mrf.mxu2  ;;  %v4124_v11 = vpop.f32.mrf.mxu1 }
 0x992   :  { %v5392_v31 = vsel %vm5389_vm0, %v5391_v12, %v5387_v16  ;;  %6537 = vrcp.f32 %v4547_v8  ;;  %vm5401_vm3 = vmor %vm5399_vm2, %vm5400_vm1  ;;  %vm5404_vm4 = vcmp.eq.f32.partialorder %v5403_v34, 8.507059e+37  ;;  %v5420_v39 = vand.u32 2147483648, %v4547_v8 }
 0x993   :  { %5569 = vst [vmem:[#allocation11 + $0x1b8] sm:$0xff] %v5392_v31  ;;  %v5396_v33 = vsub.f32 1.0, %v5395_v44  ;;  %6539 = vpow2.f32 %v6153_v14  ;;  %v4117_v43 = vadd.f32 %v4116_v63, %v3948_v46  ;;  %v5418_v4 = vand.u32 2147483647, %v4547_v8 }
 0x994   :  { %vm5414_vm6 = vweird.f32 %v4547_v8  ;;  %v5421_v37 = vor.u32 1.1754944e-38, %v5420_v39 }
 0x995   :  { %v5397_v18 = vmul.f32 %v6536_v56, %v5396_v33  ;;  %v4286_v52 = vadd.f32 %v4285_v41, %v4117_v43  ;;  %vm5419_vm8 = vcmp.eq.f32.partialorder %v5418_v4, 8.507059e+37  ;;  %v3955_v36 = vpop.f32.mrf.mxu0 }
 0x996   :  { %v3781_v29 = vpop.f32.mrf.mxu3 }
 0x997   :  { %v5398_v2 = vadd.f32 %v6536_v56, %v5397_v18  ;;  %v3782_v57 = vadd.f32 %v9926_v58, %v3781_v29  ;;  %v6154_v9 = vmul.f32 -1.442695, %v4286_v52 }
 0x998   :  { %v6538_v54 = vpop.eup %6537 }
 0x999   :  { %v6540_v59 = vpop.eup %6539  ;;  %v5402_v0 = vsel %vm5401_vm3, %v6536_v56, %v5398_v2  ;;  %v5410_v6 = vmul.f32 %v6538_v54, %v4547_v8  ;;  %v3951_v27 = vadd.f32 %v3950_v55, %v3782_v57  ;;  %6541 = vpow2.f32 %v6154_v9  ;;  %v4293_v8 = vpop.f32.mrf.mxu2 }
 0x99a   :  { %v5407_v49 = vsel %vm5404_vm4, %v5406_v60, %v5402_v0  ;;  %v4548_v50 = vadd.f32 1.0, %v6540_v59  ;;  %vm5415_vm5 = vweird.f32 %v6538_v54  ;;  %v4126_v0 = vpop.f32.mrf.mxu1 }
 0x99b   :  { %5570 = vst [vmem:[#allocation11 + $0x1c0] sm:$0xff] %v5407_v49  ;;  %v5411_v15 = vsub.f32 1.0, %v5410_v6  ;;  %v4120_v30 = vadd.f32 %v4119_v10, %v3951_v27  ;;  %vm5416_vm7 = vmor %vm5414_vm6, %vm5415_vm5 }
 0x99c   :  { %6543 = vrcp.f32 %v4548_v50  ;;  %v5433_v24 = vand.u32 2147483647, %v4548_v50  ;;  %v5435_v42 = vand.u32 2147483648, %v4548_v50  ;;  %vm5429_vm10 = vweird.f32 %v4548_v50 }
 0x99d   :  { %v5412_v40 = vmul.f32 %v6538_v54, %v5411_v15  ;;  %v4289_v48 = vadd.f32 %v4288_v28, %v4120_v30  ;;  %v3957_v52 = vpop.f32.mrf.mxu0 }
 0x99e   :  { %v3783_v51 = vpop.f32.mrf.mxu3  ;;  %v5436_v16 = vor.u32 1.1754944e-38, %v5435_v42  ;;  %vm5434_vm12 = vcmp.eq.f32.partialorder %v5433_v24, 8.507059e+37 }
 0x99f   :  { %v5413_v32 = vadd.f32 %v6538_v54, %v5412_v40  ;;  %v3784_v45 = vadd.f32 %v9926_v58, %v3783_v51  ;;  %v6542_v20 = vpop.eup %6541  ;;  %v6155_v21 = vmul.f32 -1.442695, %v4289_v48 }
 0x9a0   :  { %v4549_v35 = vadd.f32 1.0, %v6542_v20 }
 0x9a1   :  { %v5417_v38 = vsel %vm5416_vm7, %v6538_v54, %v5413_v32  ;;  %v3953_v3 = vadd.f32 %v3952_v26, %v3784_v45  ;;  %6545 = vpow2.f32 %v6155_v21  ;;  %v4295_v27 = vpop.f32.mrf.mxu2 }
 0x9a2   :  { %v6544_v47 = vpop.eup %6543  ;;  %v5422_v63 = vsel %vm5419_vm8, %v5421_v37, %v5417_v38  ;;  %6547 = vrcp.f32 %v4549_v35  ;;  %v5448_v25 = vand.u32 2147483647, %v4549_v35  ;;  %v5450_v18 = vand.u32 2147483648, %v4549_v35 }
 0x9a3   :  { %5571 = vst [vmem:[#allocation11 + $0x1c8] sm:$0xff] %v5422_v63  ;;  %v5425_v1 = vmul.f32 %v6544_v47, %v4548_v50  ;;  %v4122_v7 = vadd.f32 %v4121_v13, %v3953_v3  ;;  %vm5430_vm9 = vweird.f32 %v6544_v47  ;;  %vm5444_vm14 = vweird.f32 %v4549_v35 }
 0x9a4   :  { %vm5431_vm11 = vmor %vm5429_vm10, %vm5430_vm9  ;;  %v5451_v6 = vor.u32 1.1754944e-38, %v5450_v18  ;;  %vm5449_vm0 = vcmp.eq.f32.partialorder %v5448_v25, 8.507059e+37 }
 0x9a5   :  { %v5426_v17 = vsub.f32 1.0, %v5425_v1  ;;  %v4291_v41 = vadd.f32 %v4290_v23, %v4122_v7 }
 0x9a6   :  { %v3786_v61 = vpop.f32.mrf.mxu3 }
 0x9a7   :  { %v5427_v5 = vmul.f32 %v6544_v47, %v5426_v17  ;;  %v6156_v53 = vmul.f32 -1.442695, %v4291_v41  ;;  %v3787_v22 = vadd.f32 %v9926_v58, %v3786_v61  ;;  %v6546_v19 = vpop.eup %6545 }
 0x9a8   :  { %v6548_v12 = vpop.eup %6547  ;;  %v4550_v44 = vadd.f32 1.0, %v6546_v19 }
 0x9a9   :  { %v5428_v62 = vadd.f32 %v6544_v47, %v5427_v5  ;;  %6549 = vpow2.f32 %v6156_v53  ;;  %v3956_v56 = vadd.f32 %v3955_v36, %v3787_v22  ;;  %v5440_v55 = vmul.f32 %v6548_v12, %v4549_v35 }
 0x9aa   :  { %6551 = vrcp.f32 %v4550_v44  ;;  %vm5445_vm13 = vweird.f32 %v6548_v12  ;;  %v5465_v39 = vand.u32 2147483648, %v4550_v44  ;;  %v5463_v30 = vand.u32 2147483647, %v4550_v44 }
 0x9ab   :  { %v5432_v14 = vsel %vm5431_vm11, %v6544_v47, %v5428_v62  ;;  %v4125_v31 = vadd.f32 %v4124_v11, %v3956_v56  ;;  %v5441_v46 = vsub.f32 1.0, %v5440_v55  ;;  %vm5446_vm15 = vmor %vm5444_vm14, %vm5445_vm13  ;;  %vm5459_vm2 = vweird.f32 %v4550_v44 }
 0x9ac   :  { %v5437_v33 = vsel %vm5434_vm12, %v5436_v16, %v5432_v14  ;;  %v5466_v23 = vor.u32 1.1754944e-38, %v5465_v39  ;;  %vm5464_vm4 = vcmp.eq.f32.partialorder %v5463_v30, 8.507059e+37 }
 0x9ad   :  { %5572 = vst [vmem:[#allocation11 + $0x1d0] sm:$0xff] %v5437_v33  ;;  %v4294_v10 = vadd.f32 %v4293_v8, %v4125_v31  ;;  %v5442_v28 = vmul.f32 %v6548_v12, %v5441_v46 }
 0x9ae   :  { %v3788_v34 = vpop.f32.mrf.mxu3 }
 0x9af   :  { %v6550_v43 = vpop.eup %6549  ;;  %v6157_v29 = vmul.f32 -1.442695, %v4294_v10  ;;  %v3789_v2 = vadd.f32 %v9926_v58, %v3788_v34  ;;  %v5443_v54 = vadd.f32 %v6548_v12, %v5442_v28 }
 0x9b0   :  { %v4551_v57 = vadd.f32 1.0, %v6550_v43  ;;  %v6552_v59 = vpop.eup %6551 }
 0x9b1   :  { %6553 = vpow2.f32 %v6157_v29  ;;  %v3958_v60 = vadd.f32 %v3957_v52, %v3789_v2  ;;  %v5447_v9 = vsel %vm5446_vm15, %v6548_v12, %v5443_v54  ;;  %v5455_v49 = vmul.f32 %v6552_v59, %v4550_v44 }
 0x9b2   :  { %6555 = vrcp.f32 %v4551_v57  ;;  %v5452_v15 = vsel %vm5449_vm0, %v5451_v6, %v5447_v9  ;;  %vm5460_vm1 = vweird.f32 %v6552_v59  ;;  %v5480_v21 = vand.u32 2147483648, %v4551_v57 }
 0x9b3   :  { %v4127_v50 = vadd.f32 %v4126_v0, %v3958_v60  ;;  %5573 = vst [vmem:[#allocation11 + $0x1d8] sm:$0xff] %v5452_v15  ;;  %v5456_v26 = vsub.f32 1.0, %v5455_v49  ;;  %vm5461_vm3 = vmor %vm5459_vm2, %vm5460_vm1  ;;  %v5478_v47 = vand.u32 2147483647, %v4551_v57  ;;  %vm5474_vm6 = vweird.f32 %v4551_v57 }
 0x9b4   :  { %v5481_v7 = vor.u32 1.1754944e-38, %v5480_v21 }
 0x9b5   :  { %v4296_v58 = vadd.f32 %v4295_v27, %v4127_v50  ;;  %v5457_v4 = vmul.f32 %v6552_v59, %v5456_v26  ;;  %vm5479_vm8 = vcmp.eq.f32.partialorder %v5478_v47, 8.507059e+37 }
 0x9b7   :  { %v6554_v40 = vpop.eup %6553  ;;  %v6158_v13 = vmul.f32 -1.442695, %v4296_v58  ;;  %v5458_v48 = vadd.f32 %v6552_v59, %v5457_v4 }
 0x9b8   :  { %v6556_v51 = vpop.eup %6555  ;;  %v4552_v32 = vadd.f32 1.0, %v6554_v40 }
 0x9b9   :  { %v5470_v45 = vmul.f32 %v6556_v51, %v4551_v57  ;;  %6557 = vpow2.f32 %v6158_v13  ;;  %v5462_v37 = vsel %vm5461_vm3, %v6552_v59, %v5458_v48  ;;  %vm5475_vm5 = vweird.f32 %v6556_v51 }
 0x9ba   :  { %6559 = vrcp.f32 %v4552_v32  ;;  %v5467_v38 = vsel %vm5464_vm4, %v5466_v23, %v5462_v37  ;;  %vm5476_vm7 = vmor %vm5474_vm6, %vm5475_vm5  ;;  %v5495_v61 = vand.u32 2147483648, %v4552_v32  ;;  %v5493_v53 = vand.u32 2147483647, %v4552_v32 }
 0x9bb   :  { %v5471_v20 = vsub.f32 1.0, %v5470_v45  ;;  %5574 = vst [vmem:[#allocation11 + $0x1e0] sm:$0xff] %v5467_v38  ;;  %vm5489_vm10 = vweird.f32 %v4552_v32 }
 0x9bc   :  { %v5496_v19 = vor.u32 1.1754944e-38, %v5495_v61  ;;  %vm5494_vm12 = vcmp.eq.f32.partialorder %v5493_v53, 8.507059e+37 }
 0x9bd   :  { %v5472_v3 = vmul.f32 %v6556_v51, %v5471_v20 }
 0x9bf   :  { %v6558_v63 = vpop.eup %6557  ;;  %v5473_v35 = vadd.f32 %v6556_v51, %v5472_v3 }
 0x9c0   :  { %v6560_v1 = vpop.eup %6559  ;;  %v4553_v17 = vadd.f32 1.0, %v6558_v63 }
 0x9c1   :  { %v5477_v41 = vsel %vm5476_vm7, %v6556_v51, %v5473_v35  ;;  %v5485_v36 = vmul.f32 %v6560_v1, %v4552_v32  ;;  %vm5490_vm9 = vweird.f32 %v6560_v1 }
 0x9c2   :  { %v5482_v24 = vsel %vm5479_vm8, %v5481_v7, %v5477_v41  ;;  %6561 = vrcp.f32 %v4553_v17  ;;  %vm5491_vm11 = vmor %vm5489_vm10, %vm5490_vm9  ;;  %v5510_v16 = vand.u32 2147483648, %v4553_v17  ;;  %v5508_v14 = vand.u32 2147483647, %v4553_v17 }
 0x9c3   :  { %5575 = vst [vmem:[#allocation11 + $0x1e8] sm:$0xff] %v5482_v24  ;;  %v5486_v42 = vsub.f32 1.0, %v5485_v36  ;;  %vm5504_vm14 = vweird.f32 %v4553_v17 }
 0x9c4   :  { %v5511_v31 = vor.u32 1.1754944e-38, %v5510_v16  ;;  %vm5509_vm0 = vcmp.eq.f32.partialorder %v5508_v14, 8.507059e+37 }
 0x9c5   :  { %v5487_v5 = vmul.f32 %v6560_v1, %v5486_v42 }
 0x9c7   :  { %v5488_v22 = vadd.f32 %v6560_v1, %v5487_v5 }
 0x9c8   :  { %v6562_v11 = vpop.eup %6561 }
 0x9c9   :  { %v5492_v62 = vsel %vm5491_vm11, %v6560_v1, %v5488_v22  ;;  %v5500_v56 = vmul.f32 %v6562_v11, %v4553_v17  ;;  %vm5505_vm13 = vweird.f32 %v6562_v11 }
 0x9ca   :  { %v5497_v12 = vsel %vm5494_vm12, %v5496_v19, %v5492_v62  ;;  %vm5506_vm15 = vmor %vm5504_vm14, %vm5505_vm13 }
 0x9cb   :  { %5576 = vst [vmem:[#allocation11 + $0x1f0] sm:$0xff] %v5497_v12  ;;  %v5501_v8 = vsub.f32 1.0, %v5500_v56 }
 0x9cd   :  { %v5502_v44 = vmul.f32 %v6562_v11, %v5501_v8 }
 0x9cf   :  { %v5503_v55 = vadd.f32 %v6562_v11, %v5502_v44 }
 0x9d1   :  { %v5507_v33 = vsel %vm5506_vm15, %v6562_v11, %v5503_v55 }
 0x9d2   :  { %v5512_v46 = vsel %vm5509_vm0, %v5511_v31, %v5507_v33 }
 0x9d3   :  { %5577 = vst [vmem:[#allocation11 + $0x1f8] sm:$0xff] %v5512_v46 }
 0x9d4   :  { %5590 = dma.vmem_to_hbm [thread:$0]  %s5583_s18, 8192, %s5585_s20, [#allocation4], %s6727_s29, %s6727_s29, %s6728_s30  }
 0x9d5   :  { %6719 = dma.done.wait [#allocation4], 8192  }
 0x9d6   :  { %6720 = vsyncadd [#allocation4], 4294959104 }
 0x9d7   :  { %5595 = vsyncpa [#allocation3], 1 }
 0x9d8   :  { %5596 = vsyncpa [#allocation6], 1 }
 0x9d9   :  { %5597 = vsyncpa [#allocation9], 1 }
 0x9da   :  { %5598 = vsyncpa [#allocation4], 1 }

</bundles_post_ra>
